<compile_context>
chip_gen: v6e
topology: v6e:2x2x1
jax: 0.10.0
libtpu: 0.0.40
codegen_flags: <defaults>
</compile_context>

<pallas_src>
import functools

import jax
import jax.numpy as jnp
from jax.experimental import pallas as pl
from jax.experimental.pallas import tpu as pltpu

D_IN = 768
D_H1 = 2048
D_H2 = 1024
D_OUT = 768


def _mlp_kernel(x_ref, w1_ref, b1_ref, w2_ref, b2_ref, w3_ref, b3_ref, o_ref):
    # x tile: (tm, 768) f32; weights bf16 and resident (single-buffered).
    x = x_ref[...].astype(jnp.bfloat16)

    h1 = jnp.dot(x, w1_ref[...], preferred_element_type=jnp.float32) + b1_ref[...]
    h1 = jnp.maximum(h1, 0.0).astype(jnp.bfloat16)  # ReLU in f32, cast for MXU

    h2 = jnp.dot(h1, w2_ref[...], preferred_element_type=jnp.float32) + b2_ref[...]
    h2 = jnp.maximum(h2, 0.0).astype(jnp.bfloat16)

    y = jnp.dot(h2, w3_ref[...], preferred_element_type=jnp.float32) + b3_ref[...]
    o_ref[...] = y.astype(o_ref.dtype)


def _resident_spec(shape):
    # Grid-invariant operand: constant index_map + single buffering so the
    # block is fetched once and kept resident for every grid step.
    return pl.BlockSpec(shape, lambda i: (0, 0),
                        pipeline_mode=pl.Buffered(buffer_count=1))


@functools.partial(jax.jit, static_argnames=("tm",))
def projection_forward(x, params, *, tm=512):
    """x: (..., 768) float32 -> (..., 768) float32."""
    w1, b1, w2, b2, w3, b3 = params
    lead_shape = x.shape[:-1]
    d = x.shape[-1]
    assert d == D_IN
    m = 1
    for s in lead_shape:
        m *= s
    x2d = x.reshape(m, d)

    # Weights to bf16 (kernel accumulates in f32); biases stay f32.
    w1b = w1.astype(jnp.bfloat16)
    w2b = w2.astype(jnp.bfloat16)
    w3b = w3.astype(jnp.bfloat16)

    # Row-tile selection: multiple of 8 sublanes; prefer >= 2 grid steps so
    # both v7x TensorCores get a share of the M axis.
    m8 = ((m + 7) // 8) * 8
    tm_eff = max(8, min(tm, m8))
    tm_eff = (tm_eff // 8) * 8
    if m8 // tm_eff < 2 and m8 >= 16:
        tm_eff = max(8, ((m8 // 2) // 8) * 8)
    m_pad = ((m8 + tm_eff - 1) // tm_eff) * tm_eff
    if m_pad != m:
        x2d = jnp.pad(x2d, ((0, m_pad - m), (0, 0)))

    grid = (m_pad // tm_eff,)

    flops = 2 * m_pad * (D_IN * D_H1 + D_H1 * D_H2 + D_H2 * D_OUT)
    bytes_accessed = (
        m_pad * D_IN * 4 + m_pad * D_OUT * 4                      # x in, y out (f32)
        + (D_IN * D_H1 + D_H1 * D_H2 + D_H2 * D_OUT) * 2          # bf16 weights
        + (D_H1 + D_H2 + D_OUT) * 4                               # f32 biases
    )

    out = pl.pallas_call(
        _mlp_kernel,
        out_shape=jax.ShapeDtypeStruct((m_pad, D_OUT), x.dtype),
        grid_spec=pltpu.PrefetchScalarGridSpec(
            num_scalar_prefetch=0,
            grid=grid,
            in_specs=[
                pl.BlockSpec((tm_eff, D_IN), lambda i: (i, 0)),   # x tile (pipelined)
                _resident_spec((D_IN, D_H1)),                     # w1 (bf16, resident)
                _resident_spec((1, D_H1)),                        # b1
                _resident_spec((D_H1, D_H2)),                     # w2 (bf16, resident)
                _resident_spec((1, D_H2)),                        # b2
                _resident_spec((D_H2, D_OUT)),                    # w3 (bf16, resident)
                _resident_spec((1, D_OUT)),                       # b3
            ],
            out_specs=pl.BlockSpec((tm_eff, D_OUT), lambda i: (i, 0)),
        ),
        compiler_params=pltpu.CompilerParams(
            dimension_semantics=("parallel",),
            vmem_limit_bytes=48 << 20,    # fits v7x's 64 MiB physical VMEM
        ),
        cost_estimate=pl.CostEstimate(
            flops=flops, transcendentals=0, bytes_accessed=bytes_accessed),
    )(x2d, w1b, b1, w2b, b2, w3b, b3)

    return out[:m].reshape(*lead_shape, D_OUT)


def init_params(key):
    """Deterministic synthetic init matching nn.Linear shapes.

    PyTorch stores Linear weight as (out, in); we keep the math-layout
    (in, out) so the kernel does x @ W + b (identical result)."""
    ks = jax.random.split(key, 6)

    def linear(kw, kb, fan_in, fan_out):
        bound = 1.0 / jnp.sqrt(fan_in)
        w = jax.random.uniform(kw, (fan_in, fan_out), jnp.float32, -bound, bound)
        b = jax.random.uniform(kb, (1, fan_out), jnp.float32, -bound, bound)
        return w, b

    w1, b1 = linear(ks[0], ks[1], D_IN, D_H1)
    w2, b2 = linear(ks[2], ks[3], D_H1, D_H2)
    w3, b3 = linear(ks[4], ks[5], D_H2, D_OUT)
    return (w1, b1, w2, b2, w3, b3)


def _reference_bf16(x, params):
    """Pure-JAX reference mirroring the kernel's bf16-operand / f32-accum math."""
    w1, b1, w2, b2, w3, b3 = params
    xb = x.astype(jnp.bfloat16)
    h1 = jnp.dot(xb, w1.astype(jnp.bfloat16),
                 preferred_element_type=jnp.float32) + b1[0]
    h1 = jnp.maximum(h1, 0.0).astype(jnp.bfloat16)
    h2 = jnp.dot(h1, w2.astype(jnp.bfloat16),
                 preferred_element_type=jnp.float32) + b2[0]
    h2 = jnp.maximum(h2, 0.0).astype(jnp.bfloat16)
    return jnp.dot(h2, w3.astype(jnp.bfloat16),
                   preferred_element_type=jnp.float32) + b3[0]


if __name__ == "__main__":
    key = jax.random.PRNGKey(0)
    kx, kp = jax.random.split(key)

    batch, seq = 2, 8
    x = jax.random.normal(kx, (batch, seq, D_IN), jnp.float32)
    params = init_params(kp)

    y = projection_forward(x, params)
    y = jax.block_until_ready(y)

    y_ref = _reference_bf16(x, params)
    assert y.shape == (batch, seq, D_OUT)
    assert jnp.allclose(y, y_ref, atol=1e-2, rtol=1e-2), "mismatch vs JAX reference"

    print("KERNEL_OK")
</pallas_src>

<mosaic_0001>
module attributes {stable_mosaic.version = 11 : i64} {
  func.func @_mlp_kernel(%arg0: i32, %arg1: memref<8x768xf32, #tpu.memory_space<vmem>>, %arg2: memref<768x2048xbf16, #tpu.memory_space<vmem>>, %arg3: memref<1x2048xf32, #tpu.memory_space<vmem>>, %arg4: memref<2048x1024xbf16, #tpu.memory_space<vmem>>, %arg5: memref<1x1024xf32, #tpu.memory_space<vmem>>, %arg6: memref<1024x768xbf16, #tpu.memory_space<vmem>>, %arg7: memref<1x768xf32, #tpu.memory_space<vmem>>, %arg8: memref<8x768xf32, #tpu.memory_space<vmem>>) attributes {dimension_semantics = [#tpu.dimension_semantics<parallel>], iteration_bounds = array<i64: 2>, scalar_prefetch = 0 : i64, scratch_operands = 0 : i64, tpu.core_type = #tpu.core_type<tc>, window_params = [{transform_indices = @transform_0, window_bounds = array<i64: 8, 768>}, {pipeline_mode = #tpu.pipeline_mode<synchronous>, transform_indices = @transform_1, window_bounds = array<i64: 768, 2048>}, {pipeline_mode = #tpu.pipeline_mode<synchronous>, transform_indices = @transform_2, window_bounds = array<i64: 1, 2048>}, {pipeline_mode = #tpu.pipeline_mode<synchronous>, transform_indices = @transform_3, window_bounds = array<i64: 2048, 1024>}, {pipeline_mode = #tpu.pipeline_mode<synchronous>, transform_indices = @transform_4, window_bounds = array<i64: 1, 1024>}, {pipeline_mode = #tpu.pipeline_mode<synchronous>, transform_indices = @transform_5, window_bounds = array<i64: 1024, 768>}, {pipeline_mode = #tpu.pipeline_mode<synchronous>, transform_indices = @transform_6, window_bounds = array<i64: 1, 768>}, {transform_indices = @transform_7, window_bounds = array<i64: 8, 768>}]} {
    %c0 = arith.constant 0 : index
    %c0_0 = arith.constant 0 : index
    %0 = vector.load %arg1[%c0, %c0_0] : memref<8x768xf32, #tpu.memory_space<vmem>>, vector<8x768xf32>
    %1 = arith.truncf %0 : vector<8x768xf32> to vector<8x768xbf16>
    %c0_1 = arith.constant 0 : index
    %c0_2 = arith.constant 0 : index
    %2 = vector.load %arg2[%c0_1, %c0_2] : memref<768x2048xbf16, #tpu.memory_space<vmem>>, vector<768x2048xbf16>
    %cst = arith.constant dense<0.000000e+00> : vector<8x2048xf32>
    %3 = tpu.matmul %1, %2, %cst {dimension_numbers = #tpu.dot_dimension_numbers<[1], [0], [0], [1], [0, 0, 1, 1], [], []>} : vector<8x768xbf16>, vector<768x2048xbf16>, vector<8x2048xf32> -> vector<8x2048xf32>
    %c0_3 = arith.constant 0 : index
    %c0_4 = arith.constant 0 : index
    %4 = vector.load %arg3[%c0_3, %c0_4] : memref<1x2048xf32, #tpu.memory_space<vmem>>, vector<1x2048xf32>
    %5 = vector.broadcast %4 : vector<1x2048xf32> to vector<8x2048xf32>
    %6 = arith.addf %3, %5 : vector<8x2048xf32>
    %cst_5 = arith.constant 0.000000e+00 : f32
    %7 = vector.broadcast %cst_5 : f32 to vector<8x2048xf32>
    %8 = arith.maximumf %6, %7 : vector<8x2048xf32>
    %9 = arith.truncf %8 : vector<8x2048xf32> to vector<8x2048xbf16>
    %c0_6 = arith.constant 0 : index
    %c0_7 = arith.constant 0 : index
    %10 = vector.load %arg4[%c0_6, %c0_7] : memref<2048x1024xbf16, #tpu.memory_space<vmem>>, vector<2048x1024xbf16>
    %cst_8 = arith.constant dense<0.000000e+00> : vector<8x1024xf32>
    %11 = tpu.matmul %9, %10, %cst_8 {dimension_numbers = #tpu.dot_dimension_numbers<[1], [0], [0], [1], [0, 0, 1, 1], [], []>} : vector<8x2048xbf16>, vector<2048x1024xbf16>, vector<8x1024xf32> -> vector<8x1024xf32>
    %c0_9 = arith.constant 0 : index
    %c0_10 = arith.constant 0 : index
    %12 = vector.load %arg5[%c0_9, %c0_10] : memref<1x1024xf32, #tpu.memory_space<vmem>>, vector<1x1024xf32>
    %13 = vector.broadcast %12 : vector<1x1024xf32> to vector<8x1024xf32>
    %14 = arith.addf %11, %13 : vector<8x1024xf32>
    %cst_11 = arith.constant 0.000000e+00 : f32
    %15 = vector.broadcast %cst_11 : f32 to vector<8x1024xf32>
    %16 = arith.maximumf %14, %15 : vector<8x1024xf32>
    %17 = arith.truncf %16 : vector<8x1024xf32> to vector<8x1024xbf16>
    %c0_12 = arith.constant 0 : index
    %c0_13 = arith.constant 0 : index
    %18 = vector.load %arg6[%c0_12, %c0_13] : memref<1024x768xbf16, #tpu.memory_space<vmem>>, vector<1024x768xbf16>
    %cst_14 = arith.constant dense<0.000000e+00> : vector<8x768xf32>
    %19 = tpu.matmul %17, %18, %cst_14 {dimension_numbers = #tpu.dot_dimension_numbers<[1], [0], [0], [1], [0, 0, 1, 1], [], []>} : vector<8x1024xbf16>, vector<1024x768xbf16>, vector<8x768xf32> -> vector<8x768xf32>
    %c0_15 = arith.constant 0 : index
    %c0_16 = arith.constant 0 : index
    %20 = vector.load %arg7[%c0_15, %c0_16] : memref<1x768xf32, #tpu.memory_space<vmem>>, vector<1x768xf32>
    %21 = vector.broadcast %20 : vector<1x768xf32> to vector<8x768xf32>
    %22 = arith.addf %19, %21 : vector<8x768xf32>
    %c0_17 = arith.constant 0 : index
    %c0_18 = arith.constant 0 : index
    %23 = vector.load %arg8[%c0_17, %c0_18] : memref<8x768xf32, #tpu.memory_space<vmem>>, vector<8x768xf32>
    tpu.vector_store %arg8[%c0_17, %c0_18], %22 {strides = array<i32>} : memref<8x768xf32, #tpu.memory_space<vmem>>, vector<8x768xf32>,
    return
  }
  func.func @transform_0(%arg0: i32) -> (i32, i32) {
    %c0_i32 = arith.constant 0 : i32
    %c0_i32_0 = arith.constant 0 : i32
    return %arg0, %c0_i32 : i32, i32
  }
  func.func @transform_1(%arg0: i32) -> (i32, i32) {
    %c0_i32 = arith.constant 0 : i32
    %c0_i32_0 = arith.constant 0 : i32
    %c0_i32_1 = arith.constant 0 : i32
    return %c0_i32, %c0_i32_0 : i32, i32
  }
  func.func @transform_2(%arg0: i32) -> (i32, i32) {
    %c0_i32 = arith.constant 0 : i32
    %c0_i32_0 = arith.constant 0 : i32
    %c0_i32_1 = arith.constant 0 : i32
    return %c0_i32, %c0_i32_0 : i32, i32
  }
  func.func @transform_3(%arg0: i32) -> (i32, i32) {
    %c0_i32 = arith.constant 0 : i32
    %c0_i32_0 = arith.constant 0 : i32
    %c0_i32_1 = arith.constant 0 : i32
    return %c0_i32, %c0_i32_0 : i32, i32
  }
  func.func @transform_4(%arg0: i32) -> (i32, i32) {
    %c0_i32 = arith.constant 0 : i32
    %c0_i32_0 = arith.constant 0 : i32
    %c0_i32_1 = arith.constant 0 : i32
    return %c0_i32, %c0_i32_0 : i32, i32
  }
  func.func @transform_5(%arg0: i32) -> (i32, i32) {
    %c0_i32 = arith.constant 0 : i32
    %c0_i32_0 = arith.constant 0 : i32
    %c0_i32_1 = arith.constant 0 : i32
    return %c0_i32, %c0_i32_0 : i32, i32
  }
  func.func @transform_6(%arg0: i32) -> (i32, i32) {
    %c0_i32 = arith.constant 0 : i32
    %c0_i32_0 = arith.constant 0 : i32
    %c0_i32_1 = arith.constant 0 : i32
    return %c0_i32, %c0_i32_0 : i32, i32
  }
  func.func @transform_7(%arg0: i32) -> (i32, i32) {
    %c0_i32 = arith.constant 0 : i32
    %c0_i32_0 = arith.constant 0 : i32
    return %arg0, %c0_i32 : i32, i32
  }
}

</mosaic_0001>

<bundles_post_ra>
// kernel: projection_forward.1
= control target key start
LH: loop header
LB: loop body
LE: loop exit
PB: predicated region body
PF: predicated region fallthrough
CT: control target
= control target key end

     0   :  { %12 = vsyncpa [#allocation3], 0  ;;  %s26498_s0 = inlined_call_operand.vmem [shape: f32[16,768], index: 0, kind: input, shape index: {}]   ;;  %s26499_s1 = inlined_call_operand.vmem [shape: bf16[768,2048], index: 1, kind: input, shape index: {}]   ;;  %s26500_s2 = inlined_call_operand.vmem [shape: f32[1,2048], index: 2, kind: input, shape index: {}]   ;;  %s26501_s3 = inlined_call_operand.vmem [shape: bf16[2048,1024], index: 3, kind: input, shape index: {}]   ;;  %s26502_s4 = inlined_call_operand.vmem [shape: f32[1,1024], index: 4, kind: input, shape index: {}]   ;;  %s26503_s5 = inlined_call_operand.vmem [shape: bf16[1024,768], index: 5, kind: input, shape index: {}]   ;;  %s26504_s6 = inlined_call_operand.vmem [shape: f32[1,768], index: 6, kind: input, shape index: {}]   ;;  %s26505_s7 = inlined_call_operand.hbm [shape: f32[16,768], index: 7, kind: output, shape index: {}]  }
   0x1   :  { %14 = vsyncpa [#allocation3 + $0x1], 0  ;;  %s19330_s24 = smov 0   ;;  %s19332_s25 = smov 0  }
   0x2   :  { %s19334_s26 = smov 0   ;;  %s19336_s27 = smov 0  }
   0x3 LB: > { %s19351_s28 = sadd.s32 4294967295, %s19287_s27   ;;  %s16419_s29 = sadd.s32 4294967294, %s19287_s27   ;;  %s19287_s27 = sphi %s19336_s27, %s26511_s27   ;;  %s19283_s26 = sphi %s19334_s26, %s26510_s26   ;;  %s19279_s25 = sphi %s19332_s25, %s26509_s25   ;;  %s19275_s24 = sphi %s19330_s24, %s26508_s24  }
   0x4   : > { %s19355_s30 = sadd.s32 1, %s19287_s27   ;;  %s179_s8 = sadd.s32 1, %s19283_s26 }
   0x5   : > { %s176_s9 = ssub.s32 %s19287_s27, %s19355_s30  ;;  %p189_p0 = scmp.ne.s32.totalorder %s19283_s26, %s19279_s25 }
   0x6   : > { %p177_p1 = scmp.eq.s32.totalorder %s176_s9, 0  ;;  %p190_p2 = scmp.eq.s32.totalorder %s19351_s28, 1 }
   0x7   : > { %p195_p3 = scmp.ne.s32.totalorder %s19279_s25, %s19275_s24  ;;  %p196_p4 = scmp.eq.s32.totalorder %s16419_s29, 1 }
   0x8   : > { %s19366_s10 = scalar_select %p177_p1, %s19283_s26, %s179_s8  }
   0x9   : > { %p19368_p5 = por %p190_p2, %p189_p0  ;;  %p19372_p6 = por %p196_p4, %p195_p3 }
   0xa   : > { %p16422_p7 = scmp.ge.s32.totalorder %s19287_s27, 1  ;;  %p240_p8 = scmp.lt.s32.totalorder %s19287_s27, 3 }
   0xc   : > { %p241_p9 = pnand %p16422_p7, %p240_p8 }
   0xd   : > { %p272_p10 = scmp.lt.s32.totalorder (!%p241_p9), %s19351_s28, 1  ;;  %s269_s17 = sand.u32 (!%p241_p9), 1, %s19279_s25  }
   0xe   : > { %244 = sbr.rel (%p241_p9) target bundleno = 2487 (0x9b7), region = 48  ;;  %s19289_s15 = smov (!%p241_p9), [#allocation2]  }
   0xf   : > { %s18603_s19 = smul.u32 (!%p241_p9), 48, %s269_s17  ;;  %s19231_s18 = sshll.u32 (!%p241_p9), %s19289_s15, 4  ;;  %s19232_s18 = int_to_ptr.vmem [resolvable:$false] %s19231_s18 }
  0x10   : > { %s18605_s23 = smul.u32 (!%p241_p9), 768, %s19351_s28 }
  0x11   : > { %s26349_s14 = scalar_lea.vmem (!%p241_p9), [#allocation2], %s18603_s19 }
  0x12   : > { %s26454_s8 = scalar_lea.hbm (!%p241_p9), %s26505_s7, %s18605_s23 }
  0x13   : > { %v401_v0 = vld [vmem:[%s26499_s1 + $0x380] sm:$0xff]  ;;  %s273_s21 = scalar_select %p272_p10, %s19351_s28, 1 }
  0x14   : > { %v409_v1 = vld [vmem:[%s26499_s1 + $0x3c0] sm:$0xff]  ;;  %s16346_s28 = scalar_lea.sflag [#allocation3], %s269_s17 }
  0x15   : > { %v657_v2 = vld [vmem:[%s26499_s1 + $0xb80] sm:$0xff]  ;;  %v16537_v3 = vcombine.high %v401_v0, %v409_v1  ;;  %v16536_v5 = vcombine.low %v401_v0, %v409_v1  ;;  %s18604_s16 = smul.u32 48, %s273_s21 }
  0x16   : > { %v665_v4 = vld [vmem:[%s26499_s1 + $0xbc0] sm:$0xff] }
  0x17   : > { %v385_v6 = vld [vmem:[%s26499_s1 + $0x300] sm:$0xff]  ;;  %v16793_v8 = vcombine.high %v657_v2, %v665_v4  ;;  %v16792_v9 = vcombine.low %v657_v2, %v665_v4  ;;  %4981 = vmatprep.subr.bf16.mxu0 %v16537_v3  ;;  %s19461_s13 = scalar_lea.vmem %s26498_s0, %s18604_s16  ;;  %s19233_s16 = scalar_lea.vmem %s19232_s18, 1536 }
  0x18   : > { %v393_v7 = vld [vmem:[%s26499_s1 + $0x340] sm:$0xff]  ;;  %4982 = vmatpush1.bf16.msra.mxu0 %v16536_v5  ;;  %v278_v53 = vld [vmem:[%s19461_s13 + $0x8] sm:$0xff]  ;;  %v280_v54 = vld [vmem:[%s19461_s13 + $0x18] sm:$0xff] }
  0x19   : > { %v16521_v10 = vcombine.high %v385_v6, %v393_v7  ;;  %v641_v11 = vld [vmem:[%s26499_s1 + $0xb00] sm:$0xff]  ;;  %5022 = vmatprep.subr.bf16.mxu1 %v16793_v8  ;;  %v16520_v18 = vcombine.low %v385_v6, %v393_v7  ;;  %v19477_v58 = vpack.c.bf16 %v278_v53, %v278_v53  ;;  %v19479_v59 = vpack.c.bf16 %v280_v54, %v280_v54 }
  0x1a   : > { %v649_v12 = vld [vmem:[%s26499_s1 + $0xb40] sm:$0xff]  ;;  %5023 = vmatpush1.bf16.msra.mxu1 %v16792_v9 }
  0x1b   : > { %v369_v13 = vld [vmem:[%s26499_s1 + $0x280] sm:$0xff]  ;;  %v16777_v14 = vcombine.high %v641_v11, %v649_v12  ;;  %4983 = vmatprep.subr.bf16.mxu0 %v16521_v10  ;;  %v16776_v19 = vcombine.low %v641_v11, %v649_v12  ;;  %5013 = vmatprep.mubr.bf16.mxu0 %v19477_v58 }
  0x1c   : > { %v377_v15 = vld [vmem:[%s26499_s1 + $0x2c0] sm:$0xff]  ;;  %4984 = vmatpush1.bf16.msra.mxu0 %v16520_v18  ;;  %5054 = vmatprep.mubr.bf16.mxu1 %v19479_v59 }
  0x1d   : > { %v625_v16 = vld [vmem:[%s26499_s1 + $0xa80] sm:$0xff]  ;;  %v16505_v20 = vcombine.high %v369_v13, %v377_v15  ;;  %5024 = vmatprep.subr.bf16.mxu1 %v16777_v14  ;;  %v16504_v26 = vcombine.low %v369_v13, %v377_v15 }
  0x1e   : > { %v633_v17 = vld [vmem:[%s26499_s1 + $0xac0] sm:$0xff]  ;;  %5025 = vmatpush1.bf16.msra.mxu1 %v16776_v19 }
  0x1f   : > { %v16761_v21 = vcombine.high %v625_v16, %v633_v17  ;;  %v353_v22 = vld [vmem:[%s26499_s1 + $0x200] sm:$0xff]  ;;  %4985 = vmatprep.subr.bf16.mxu0 %v16505_v20  ;;  %v16760_v27 = vcombine.low %v625_v16, %v633_v17 }
  0x20   : > { %v361_v23 = vld [vmem:[%s26499_s1 + $0x240] sm:$0xff]  ;;  %4986 = vmatpush1.bf16.msra.mxu0 %v16504_v26 }
  0x21   : > { %v609_v24 = vld [vmem:[%s26499_s1 + $0xa00] sm:$0xff]  ;;  %v16489_v28 = vcombine.high %v353_v22, %v361_v23  ;;  %5026 = vmatprep.subr.bf16.mxu1 %v16761_v21  ;;  %v16488_v34 = vcombine.low %v353_v22, %v361_v23 }
  0x22   : > { %v617_v25 = vld [vmem:[%s26499_s1 + $0xa40] sm:$0xff]  ;;  %5027 = vmatpush1.bf16.msra.mxu1 %v16760_v27 }
  0x23   : > { %v16745_v29 = vcombine.high %v609_v24, %v617_v25  ;;  %v337_v30 = vld [vmem:[%s26499_s1 + $0x180] sm:$0xff]  ;;  %4987 = vmatprep.subr.bf16.mxu0 %v16489_v28  ;;  %v16744_v35 = vcombine.low %v609_v24, %v617_v25 }
  0x24   : > { %v345_v31 = vld [vmem:[%s26499_s1 + $0x1c0] sm:$0xff]  ;;  %4988 = vmatpush1.bf16.msra.mxu0 %v16488_v34 }
  0x25   : > { %v593_v32 = vld [vmem:[%s26499_s1 + $0x980] sm:$0xff]  ;;  %v16473_v36 = vcombine.high %v337_v30, %v345_v31  ;;  %5028 = vmatprep.subr.bf16.mxu1 %v16745_v29  ;;  %v16472_v42 = vcombine.low %v337_v30, %v345_v31 }
  0x26   : > { %v601_v33 = vld [vmem:[%s26499_s1 + $0x9c0] sm:$0xff]  ;;  %5029 = vmatpush1.bf16.msra.mxu1 %v16744_v35 }
  0x27   : > { %v16729_v37 = vcombine.high %v593_v32, %v601_v33  ;;  %v321_v38 = vld [vmem:[%s26499_s1 + $0x100] sm:$0xff]  ;;  %4989 = vmatprep.subr.bf16.mxu0 %v16473_v36  ;;  %v16728_v43 = vcombine.low %v593_v32, %v601_v33 }
  0x28   : > { %v329_v39 = vld [vmem:[%s26499_s1 + $0x140] sm:$0xff]  ;;  %4990 = vmatpush1.bf16.msra.mxu0 %v16472_v42 }
  0x29   : > { %v577_v40 = vld [vmem:[%s26499_s1 + $0x900] sm:$0xff]  ;;  %v16457_v44 = vcombine.high %v321_v38, %v329_v39  ;;  %5030 = vmatprep.subr.bf16.mxu1 %v16729_v37  ;;  %v16456_v50 = vcombine.low %v321_v38, %v329_v39 }
  0x2a   : > { %v585_v41 = vld [vmem:[%s26499_s1 + $0x940] sm:$0xff]  ;;  %5031 = vmatpush1.bf16.msra.mxu1 %v16728_v43 }
  0x2b   : > { %v16713_v45 = vcombine.high %v577_v40, %v585_v41  ;;  %v305_v46 = vld [vmem:[%s26499_s1 + $0x80] sm:$0xff]  ;;  %4991 = vmatprep.subr.bf16.mxu0 %v16457_v44  ;;  %v16712_v51 = vcombine.low %v577_v40, %v585_v41 }
  0x2c   : > { %v313_v47 = vld [vmem:[%s26499_s1 + $0xc0] sm:$0xff]  ;;  %4992 = vmatpush1.bf16.msra.mxu0 %v16456_v50 }
  0x2d   : > { %v561_v48 = vld [vmem:[%s26499_s1 + $0x880] sm:$0xff]  ;;  %v16441_v52 = vcombine.high %v305_v46, %v313_v47  ;;  %5032 = vmatprep.subr.bf16.mxu1 %v16713_v45  ;;  %v16440_v62 = vcombine.low %v305_v46, %v313_v47 }
  0x2e   : > { %v569_v49 = vld [vmem:[%s26499_s1 + $0x8c0] sm:$0xff]  ;;  %5033 = vmatpush1.bf16.msra.mxu1 %v16712_v51 }
  0x2f   : > { %v16697_v55 = vcombine.high %v561_v48, %v569_v49  ;;  %v289_v56 = vld [vmem:[%s26499_s1] sm:$0xff]  ;;  %4993 = vmatprep.subr.bf16.mxu0 %v16441_v52  ;;  %v16696_v63 = vcombine.low %v561_v48, %v569_v49 }
  0x30   : > { %v297_v57 = vld [vmem:[%s26499_s1 + $0x40] sm:$0xff]  ;;  %4994 = vmatpush1.bf16.msra.mxu0 %v16440_v62 }
  0x31   : > { %v545_v60 = vld [vmem:[%s26499_s1 + $0x800] sm:$0xff]  ;;  %v16425_v0 = vcombine.high %v289_v56, %v297_v57  ;;  %5034 = vmatprep.subr.bf16.mxu1 %v16697_v55  ;;  %v16424_v6 = vcombine.low %v289_v56, %v297_v57 }
  0x32   : > { %v553_v61 = vld [vmem:[%s26499_s1 + $0x840] sm:$0xff]  ;;  %5035 = vmatpush1.bf16.msra.mxu1 %v16696_v63 }
  0x33   : > { %v16681_v1 = vcombine.high %v545_v60, %v553_v61  ;;  %v529_v2 = vld [vmem:[%s26499_s1 + $0x780] sm:$0xff]  ;;  %4995 = vmatprep.subr.bf16.mxu0 %v16425_v0  ;;  %v16680_v7 = vcombine.low %v545_v60, %v553_v61 }
  0x34   : > { %v537_v3 = vld [vmem:[%s26499_s1 + $0x7c0] sm:$0xff]  ;;  %4996 = vmatpush1.bf16.msra.mxu0 %v16424_v6  ;;  %v402_v6 = vld [vmem:[%s26499_s1 + $0x388] sm:$0xff] }
  0x35   : > { %v785_v4 = vld [vmem:[%s26499_s1 + $0xf80] sm:$0xff]  ;;  %v16665_v8 = vcombine.high %v529_v2, %v537_v3  ;;  %5036 = vmatprep.subr.bf16.mxu1 %v16681_v1  ;;  %v16664_v14 = vcombine.low %v529_v2, %v537_v3 }
  0x36   : > { %v793_v5 = vld [vmem:[%s26499_s1 + $0xfc0] sm:$0xff]  ;;  %5037 = vmatpush1.bf16.msra.mxu1 %v16680_v7  ;;  %v410_v7 = vld [vmem:[%s26499_s1 + $0x3c8] sm:$0xff] }
  0x37   : > { %v16921_v9 = vcombine.high %v785_v4, %v793_v5  ;;  %v513_v10 = vld [vmem:[%s26499_s1 + $0x700] sm:$0xff]  ;;  %4997 = vmatprep.subr.bf16.mxu0 %v16665_v8  ;;  %v16920_v15 = vcombine.low %v785_v4, %v793_v5 }
  0x38   : > { %v521_v11 = vld [vmem:[%s26499_s1 + $0x740] sm:$0xff]  ;;  %4998 = vmatpush2.bf16.msra.mxu0 %v16664_v14 }
  0x39   : > { %v769_v12 = vld [vmem:[%s26499_s1 + $0xf00] sm:$0xff]  ;;  %v16649_v16 = vcombine.high %v513_v10, %v521_v11  ;;  %5038 = vmatprep.subr.bf16.mxu1 %v16921_v9  ;;  %v16648_v22 = vcombine.low %v513_v10, %v521_v11  ;;  %v279_v11 = vld [vmem:[%s19461_s13 + $0x10] sm:$0xff] }
  0x3a   : > { %v777_v13 = vld [vmem:[%s26499_s1 + $0xf40] sm:$0xff]  ;;  %5039 = vmatpush2.bf16.msra.mxu1 %v16920_v15 }
  0x3b   : > { %v16905_v17 = vcombine.high %v769_v12, %v777_v13  ;;  %v497_v18 = vld [vmem:[%s26499_s1 + $0x680] sm:$0xff]  ;;  %4999 = vmatprep.subr.bf16.mxu0 %v16649_v16  ;;  %v16904_v23 = vcombine.low %v769_v12, %v777_v13  ;;  %v16539_v13 = vcombine.high %v402_v6, %v410_v7 }
  0x3c   : > { %v505_v19 = vld [vmem:[%s26499_s1 + $0x6c0] sm:$0xff]  ;;  %5000 = vmatpush2.bf16.msra.mxu0 %v16648_v22  ;;  %v16538_v22 = vcombine.low %v402_v6, %v410_v7  ;;  %v298_v7 = vld [vmem:[%s26499_s1 + $0x48] sm:$0xff] }
  0x3d   : > { %v753_v20 = vld [vmem:[%s26499_s1 + $0xe80] sm:$0xff]  ;;  %v16633_v24 = vcombine.high %v497_v18, %v505_v19  ;;  %5040 = vmatprep.subr.bf16.mxu1 %v16905_v17  ;;  %v16632_v30 = vcombine.low %v497_v18, %v505_v19  ;;  %v386_v17 = vld [vmem:[%s26499_s1 + $0x308] sm:$0xff] }
  0x3e   : > { %v761_v21 = vld [vmem:[%s26499_s1 + $0xec0] sm:$0xff]  ;;  %5041 = vmatpush2.bf16.msra.mxu1 %v16904_v23  ;;  %v394_v18 = vld [vmem:[%s26499_s1 + $0x348] sm:$0xff] }
  0x3f   : > { %v16889_v25 = vcombine.high %v753_v20, %v761_v21  ;;  %v481_v26 = vld [vmem:[%s26499_s1 + $0x600] sm:$0xff]  ;;  %5001 = vmatprep.subr.bf16.mxu0 %v16633_v24  ;;  %v16888_v31 = vcombine.low %v753_v20, %v761_v21  ;;  %v282_v19 = vld [vmem:[%s19461_s13 + $0x28] sm:$0xff]  ;;  %v19614_v20 = vpack.c.bf16 %v279_v11, %v279_v11  ;;  %v16523_v24 = vcombine.high %v386_v17, %v394_v18 }
  0x40   : > { %v489_v27 = vld [vmem:[%s26499_s1 + $0x640] sm:$0xff]  ;;  %5002 = vmatpush2.bf16.msra.mxu0 %v16632_v30 }
  0x41   : > { %v737_v28 = vld [vmem:[%s26499_s1 + $0xe00] sm:$0xff]  ;;  %v16617_v32 = vcombine.high %v481_v26, %v489_v27  ;;  %5042 = vmatprep.subr.bf16.mxu1 %v16889_v25  ;;  %v16616_v38 = vcombine.low %v481_v26, %v489_v27  ;;  %v370_v27 = vld [vmem:[%s26499_s1 + $0x288] sm:$0xff] }
  0x42   : > { %v745_v29 = vld [vmem:[%s26499_s1 + $0xe40] sm:$0xff]  ;;  %5043 = vmatpush2.bf16.msra.mxu1 %v16888_v31  ;;  %v16522_v31 = vcombine.low %v386_v17, %v394_v18 }
  0x43   : > { %v16873_v33 = vcombine.high %v737_v28, %v745_v29  ;;  %v465_v34 = vld [vmem:[%s26499_s1 + $0x580] sm:$0xff]  ;;  %5003 = vmatprep.subr.bf16.mxu0 %v16617_v32  ;;  %v16872_v39 = vcombine.low %v737_v28, %v745_v29  ;;  %v19625_v28 = vpack.c.bf16 %v282_v19, %v282_v19  ;;  %v378_v29 = vld [vmem:[%s26499_s1 + $0x2c8] sm:$0xff] }
  0x44   : > { %v473_v35 = vld [vmem:[%s26499_s1 + $0x5c0] sm:$0xff]  ;;  %5004 = vmatpush2.bf16.msra.mxu0 %v16616_v38 }
  0x45   : > { %v721_v36 = vld [vmem:[%s26499_s1 + $0xd80] sm:$0xff]  ;;  %v16601_v40 = vcombine.high %v465_v34, %v473_v35  ;;  %5044 = vmatprep.subr.bf16.mxu1 %v16873_v33  ;;  %v16600_v46 = vcombine.low %v465_v34, %v473_v35  ;;  %v354_v35 = vld [vmem:[%s26499_s1 + $0x208] sm:$0xff] }
  0x46   : > { %v729_v37 = vld [vmem:[%s26499_s1 + $0xdc0] sm:$0xff]  ;;  %5045 = vmatpush2.bf16.msra.mxu1 %v16872_v39  ;;  %v16506_v39 = vcombine.low %v370_v27, %v378_v29 }
  0x47   : > { %v16857_v41 = vcombine.high %v721_v36, %v729_v37  ;;  %v449_v42 = vld [vmem:[%s26499_s1 + $0x500] sm:$0xff]  ;;  %5005 = vmatprep.subr.bf16.mxu0 %v16601_v40  ;;  %v16856_v47 = vcombine.low %v721_v36, %v729_v37  ;;  %v16507_v36 = vcombine.high %v370_v27, %v378_v29  ;;  %v362_v37 = vld [vmem:[%s26499_s1 + $0x248] sm:$0xff] }
  0x48   : > { %v457_v43 = vld [vmem:[%s26499_s1 + $0x540] sm:$0xff]  ;;  %5006 = vmatpush2.bf16.msra.mxu0 %v16600_v46 }
  0x49   : > { %v705_v44 = vld [vmem:[%s26499_s1 + $0xd00] sm:$0xff]  ;;  %v16585_v48 = vcombine.high %v449_v42, %v457_v43  ;;  %5046 = vmatprep.subr.bf16.mxu1 %v16857_v41  ;;  %v16584_v54 = vcombine.low %v449_v42, %v457_v43  ;;  %v338_v43 = vld [vmem:[%s26499_s1 + $0x188] sm:$0xff] }
  0x4a   : > { %v713_v45 = vld [vmem:[%s26499_s1 + $0xd40] sm:$0xff]  ;;  %5047 = vmatpush2.bf16.msra.mxu1 %v16856_v47  ;;  %v16490_v47 = vcombine.low %v354_v35, %v362_v37 }
  0x4b   : > { %v16841_v49 = vcombine.high %v705_v44, %v713_v45  ;;  %v433_v50 = vld [vmem:[%s26499_s1 + $0x480] sm:$0xff]  ;;  %5007 = vmatprep.subr.bf16.mxu0 %v16585_v48  ;;  %v16840_v55 = vcombine.low %v705_v44, %v713_v45  ;;  %v16491_v44 = vcombine.high %v354_v35, %v362_v37  ;;  %v346_v45 = vld [vmem:[%s26499_s1 + $0x1c8] sm:$0xff] }
  0x4c   : > { %v441_v51 = vld [vmem:[%s26499_s1 + $0x4c0] sm:$0xff]  ;;  %5008 = vmatpush2.bf16.msra.mxu0 %v16584_v54 }
  0x4d   : > { %v689_v52 = vld [vmem:[%s26499_s1 + $0xc80] sm:$0xff]  ;;  %v16569_v56 = vcombine.high %v433_v50, %v441_v51  ;;  %5048 = vmatprep.subr.bf16.mxu1 %v16841_v49  ;;  %v16568_v0 = vcombine.low %v433_v50, %v441_v51  ;;  %v322_v51 = vld [vmem:[%s26499_s1 + $0x108] sm:$0xff] }
  0x4e   : > { %v697_v53 = vld [vmem:[%s26499_s1 + $0xcc0] sm:$0xff]  ;;  %5049 = vmatpush2.bf16.msra.mxu1 %v16840_v55  ;;  %v16474_v55 = vcombine.low %v338_v43, %v346_v45 }
  0x4f   : > { %v16825_v57 = vcombine.high %v689_v52, %v697_v53  ;;  %v417_v60 = vld [vmem:[%s26499_s1 + $0x400] sm:$0xff]  ;;  %5009 = vmatprep.subr.bf16.mxu0 %v16569_v56  ;;  %v16824_v1 = vcombine.low %v689_v52, %v697_v53  ;;  %v16475_v52 = vcombine.high %v338_v43, %v346_v45  ;;  %v330_v53 = vld [vmem:[%s26499_s1 + $0x148] sm:$0xff] }
  0x50   : > { %v425_v61 = vld [vmem:[%s26499_s1 + $0x440] sm:$0xff]  ;;  %5010 = vmatpush2.bf16.msra.mxu0 %v16568_v0 }
  0x51   : > { %v673_v62 = vld [vmem:[%s26499_s1 + $0xc00] sm:$0xff]  ;;  %v16553_v2 = vcombine.high %v417_v60, %v425_v61  ;;  %5050 = vmatprep.subr.bf16.mxu1 %v16825_v57  ;;  %v16552_v8 = vcombine.low %v417_v60, %v425_v61  ;;  %v306_v61 = vld [vmem:[%s26499_s1 + $0x88] sm:$0xff] }
  0x52   : > { %v681_v63 = vld [vmem:[%s26499_s1 + $0xc40] sm:$0xff]  ;;  %5051 = vmatpush2.bf16.msra.mxu1 %v16824_v1  ;;  %v16458_v1 = vcombine.low %v322_v51, %v330_v53 }
  0x53   : > { %v16809_v3 = vcombine.high %v673_v62, %v681_v63  ;;  %v913_v4 = vld [vmem:[%s26499_s1 + $0x1380] sm:$0xff]  ;;  %5011 = vmatprep.subr.bf16.mxu0 %v16553_v2  ;;  %v16808_v10 = vcombine.low %v673_v62, %v681_v63  ;;  %v16459_v62 = vcombine.high %v322_v51, %v330_v53  ;;  %v314_v63 = vld [vmem:[%s26499_s1 + $0xc8] sm:$0xff] }
  0x54   : > { %v921_v5 = vld [vmem:[%s26499_s1 + $0x13c0] sm:$0xff]  ;;  %5012 = vmatpush2.bf16.msra.mxu0 %v16552_v8  ;;  %v16443_v6 = vcombine.high %v306_v61, %v314_v63 }
  0x55   : > { %v277_v9 = vld [vmem:[%s19461_s13] sm:$0xff]  ;;  %v17049_v12 = vcombine.high %v913_v4, %v921_v5  ;;  %5052 = vmatprep.subr.bf16.mxu1 %v16809_v3  ;;  %v17048_v21 = vcombine.low %v913_v4, %v921_v5  ;;  %v290_v5 = vld [vmem:[%s26499_s1 + $0x8] sm:$0xff] }
  0x56   : > { %v897_v14 = vld [vmem:[%s26499_s1 + $0x1300] sm:$0xff]  ;;  %v19605_v16 = vpack.c.bf16 %v277_v9, %v277_v9  ;;  %5053 = vmatpush2.bf16.msra.mxu1 %v16808_v10  ;;  %v16442_v9 = vcombine.low %v306_v61, %v314_v63  ;;  %v16426_v18 = vcombine.low %v290_v5, %v298_v7 }
  0x57   : > { %v905_v15 = vld [vmem:[%s26499_s1 + $0x1340] sm:$0xff]  ;;  %5063 = vmatprep.subr.bf16.mxu0 %v17049_v12  ;;  %5104 = vmatprep.subr.bf16.mxu1 %v16539_v13  ;;  %v530_v13 = vld [vmem:[%s26499_s1 + $0x788] sm:$0xff] }
  0x58   : > { %v17033_v23 = vcombine.high %v897_v14, %v905_v15  ;;  %v881_v25 = vld [vmem:[%s26499_s1 + $0x1280] sm:$0xff]  ;;  %5014 = vmatmul.mubr.bf16.vlgmr.msra.gmra.mxu0 %v19605_v16  ;;  %v17032_v30 = vcombine.low %v897_v14, %v905_v15  ;;  %v16427_v14 = vcombine.high %v290_v5, %v298_v7  ;;  %v538_v15 = vld [vmem:[%s26499_s1 + $0x7c8] sm:$0xff] }
  0x59   : > { %v889_v26 = vld [vmem:[%s26499_s1 + $0x12c0] sm:$0xff]  ;;  %5055 = vmatmul.mubr.bf16.vlgmr.msra.gmra.mxu1 %v19614_v20  ;;  %5064 = vmatpush1.bf16.msra.mxu0 %v17048_v21  ;;  %v16666_v27 = vcombine.low %v530_v13, %v538_v15 }
  0x5a   : > { %5105 = vmatpush1.bf16.msra.mxu1 %v16538_v22  ;;  %5065 = vmatprep.subr.bf16.mxu0 %v17033_v23  ;;  %v17017_v32 = vcombine.high %v881_v25, %v889_v26  ;;  %v865_v33 = vld [vmem:[%s26499_s1 + $0x1200] sm:$0xff]  ;;  %v17016_v38 = vcombine.low %v881_v25, %v889_v26  ;;  %v514_v23 = vld [vmem:[%s26499_s1 + $0x708] sm:$0xff] }
  0x5b   : > { %v873_v34 = vld [vmem:[%s26499_s1 + $0x1240] sm:$0xff]  ;;  %5106 = vmatprep.subr.bf16.mxu1 %v16523_v24  ;;  %5095 = vmatprep.mubr.bf16.mxu0 %v19625_v28  ;;  %v16667_v24 = vcombine.high %v530_v13, %v538_v15  ;;  %v522_v25 = vld [vmem:[%s26499_s1 + $0x748] sm:$0xff] }
  0x5c   : > { %5136 = vmatprep.mubr.bf16.mxu1 %v19477_v58  ;;  %v17001_v40 = vcombine.high %v865_v33, %v873_v34  ;;  %v849_v41 = vld [vmem:[%s26499_s1 + $0x1180] sm:$0xff]  ;;  %v17000_v46 = vcombine.low %v865_v33, %v873_v34  ;;  %v16651_v33 = vcombine.high %v514_v23, %v522_v25  ;;  %v506_v34 = vld [vmem:[%s26499_s1 + $0x6c8] sm:$0xff] }
  0x5d   : > { %5066 = vmatpush1.bf16.msra.mxu0 %v17032_v30  ;;  %v857_v42 = vld [vmem:[%s26499_s1 + $0x11c0] sm:$0xff] }
  0x5e   : > { %5107 = vmatpush1.bf16.msra.mxu1 %v16522_v31  ;;  %5067 = vmatprep.subr.bf16.mxu0 %v17017_v32  ;;  %v16985_v48 = vcombine.high %v849_v41, %v857_v42  ;;  %v833_v49 = vld [vmem:[%s26499_s1 + $0x1100] sm:$0xff]  ;;  %v16984_v54 = vcombine.low %v849_v41, %v857_v42  ;;  %v498_v32 = vld [vmem:[%s26499_s1 + $0x688] sm:$0xff] }
  0x5f   : > { %5108 = vmatprep.subr.bf16.mxu1 %v16507_v36  ;;  %v841_v50 = vld [vmem:[%s26499_s1 + $0x1140] sm:$0xff]  ;;  %v16650_v36 = vcombine.low %v514_v23, %v522_v25  ;;  %v16635_v41 = vcombine.high %v498_v32, %v506_v34  ;;  %v490_v42 = vld [vmem:[%s26499_s1 + $0x648] sm:$0xff] }
  0x60   : > { %v16969_v56 = vcombine.high %v833_v49, %v841_v50  ;;  %v817_v57 = vld [vmem:[%s26499_s1 + $0x1080] sm:$0xff]  ;;  %v16968_v0 = vcombine.low %v833_v49, %v841_v50  ;;  %v474_v50 = vld [vmem:[%s26499_s1 + $0x5c8] sm:$0xff] }
  0x61   : > { %5068 = vmatpush1.bf16.msra.mxu0 %v17016_v38  ;;  %v825_v60 = vld [vmem:[%s26499_s1 + $0x10c0] sm:$0xff]  ;;  %v922_v23 = vld [vmem:[%s26499_s1 + $0x13c8] sm:$0xff] }
  0x62   : > { %5109 = vmatpush1.bf16.msra.mxu1 %v16506_v39  ;;  %5069 = vmatprep.subr.bf16.mxu0 %v17001_v40  ;;  %v16953_v2 = vcombine.high %v817_v57, %v825_v60  ;;  %v801_v3 = vld [vmem:[%s26499_s1 + $0x1000] sm:$0xff]  ;;  %v16952_v8 = vcombine.low %v817_v57, %v825_v60  ;;  %v482_v40 = vld [vmem:[%s26499_s1 + $0x608] sm:$0xff] }
  0x63   : > { %5110 = vmatprep.subr.bf16.mxu1 %v16491_v44  ;;  %v809_v4 = vld [vmem:[%s26499_s1 + $0x1040] sm:$0xff]  ;;  %v16634_v44 = vcombine.low %v498_v32, %v506_v34  ;;  %v16619_v49 = vcombine.high %v482_v40, %v490_v42  ;;  %v458_v60 = vld [vmem:[%s26499_s1 + $0x548] sm:$0xff] }
  0x64   : > { %v16937_v10 = vcombine.high %v801_v3, %v809_v4  ;;  %v1041_v11 = vld [vmem:[%s26499_s1 + $0x1780] sm:$0xff]  ;;  %v16936_v17 = vcombine.low %v801_v3, %v809_v4  ;;  %v442_v4 = vld [vmem:[%s26499_s1 + $0x4c8] sm:$0xff] }
  0x65   : > { %5070 = vmatpush1.bf16.msra.mxu0 %v17000_v46  ;;  %v1049_v12 = vld [vmem:[%s26499_s1 + $0x17c0] sm:$0xff]  ;;  %v906_v32 = vld [vmem:[%s26499_s1 + $0x1348] sm:$0xff] }
  0x66   : > { %5111 = vmatpush1.bf16.msra.mxu1 %v16490_v47  ;;  %5071 = vmatprep.subr.bf16.mxu0 %v16985_v48  ;;  %v17177_v19 = vcombine.high %v1041_v11, %v1049_v12  ;;  %v1025_v21 = vld [vmem:[%s26499_s1 + $0x1700] sm:$0xff]  ;;  %v17176_v26 = vcombine.low %v1041_v11, %v1049_v12  ;;  %v466_v48 = vld [vmem:[%s26499_s1 + $0x588] sm:$0xff] }
  0x67   : > { %5112 = vmatprep.subr.bf16.mxu1 %v16475_v52  ;;  %v1033_v22 = vld [vmem:[%s26499_s1 + $0x1740] sm:$0xff]  ;;  %v16618_v52 = vcombine.low %v482_v40, %v490_v42  ;;  %v16603_v57 = vcombine.high %v466_v48, %v474_v50  ;;  %v426_v12 = vld [vmem:[%s26499_s1 + $0x448] sm:$0xff] }
  0x68   : > { %v17161_v29 = vcombine.high %v1025_v21, %v1033_v22  ;;  %v1009_v30 = vld [vmem:[%s26499_s1 + $0x1680] sm:$0xff]  ;;  %v17160_v35 = vcombine.low %v1025_v21, %v1033_v22  ;;  %v882_v40 = vld [vmem:[%s26499_s1 + $0x1288] sm:$0xff] }
  0x69   : > { %5072 = vmatpush1.bf16.msra.mxu0 %v16984_v54  ;;  %v1017_v31 = vld [vmem:[%s26499_s1 + $0x16c0] sm:$0xff] }
  0x6a   : > { %5113 = vmatpush1.bf16.msra.mxu1 %v16474_v55  ;;  %5073 = vmatprep.subr.bf16.mxu0 %v16969_v56  ;;  %v17145_v37 = vcombine.high %v1009_v30, %v1017_v31  ;;  %v993_v38 = vld [vmem:[%s26499_s1 + $0x1600] sm:$0xff]  ;;  %v17144_v43 = vcombine.low %v1009_v30, %v1017_v31  ;;  %v450_v56 = vld [vmem:[%s26499_s1 + $0x508] sm:$0xff] }
  0x6b   : > { %5114 = vmatprep.subr.bf16.mxu1 %v16459_v62  ;;  %v1001_v39 = vld [vmem:[%s26499_s1 + $0x1640] sm:$0xff]  ;;  %v16602_v62 = vcombine.low %v466_v48, %v474_v50  ;;  %v16587_v3 = vcombine.high %v450_v56, %v458_v60  ;;  %v898_v30 = vld [vmem:[%s26499_s1 + $0x1308] sm:$0xff] }
  0x6c   : > { %v17129_v45 = vcombine.high %v993_v38, %v1001_v39  ;;  %v977_v46 = vld [vmem:[%s26499_s1 + $0x1580] sm:$0xff]  ;;  %v17128_v51 = vcombine.low %v993_v38, %v1001_v39  ;;  %v634_v38 = vld [vmem:[%s26499_s1 + $0xac8] sm:$0xff]  ;;  %v17035_v39 = vcombine.high %v898_v30, %v906_v32 }
  0x6d   : > { %5074 = vmatpush1.bf16.msra.mxu0 %v16968_v0  ;;  %v985_v47 = vld [vmem:[%s26499_s1 + $0x15c0] sm:$0xff] }
  0x6e   : > { %5115 = vmatpush1.bf16.msra.mxu1 %v16458_v1  ;;  %5075 = vmatprep.subr.bf16.mxu0 %v16953_v2  ;;  %v17113_v53 = vcombine.high %v977_v46, %v985_v47  ;;  %v961_v54 = vld [vmem:[%s26499_s1 + $0x1500] sm:$0xff]  ;;  %v17112_v61 = vcombine.low %v977_v46, %v985_v47  ;;  %v434_v2 = vld [vmem:[%s26499_s1 + $0x488] sm:$0xff] }
  0x6f   : > { %5116 = vmatprep.subr.bf16.mxu1 %v16443_v6  ;;  %v969_v55 = vld [vmem:[%s26499_s1 + $0x1540] sm:$0xff]  ;;  %v16586_v6 = vcombine.low %v450_v56, %v458_v60  ;;  %v16571_v11 = vcombine.high %v434_v2, %v442_v4  ;;  %v618_v46 = vld [vmem:[%s26499_s1 + $0xa48] sm:$0xff] }
  0x70   : > { %v17097_v63 = vcombine.high %v961_v54, %v969_v55  ;;  %v945_v0 = vld [vmem:[%s26499_s1 + $0x1480] sm:$0xff]  ;;  %v17096_v5 = vcombine.low %v961_v54, %v969_v55  ;;  %v866_v47 = vld [vmem:[%s26499_s1 + $0x1208] sm:$0xff] }
  0x71   : > { %5076 = vmatpush1.bf16.msra.mxu0 %v16952_v8  ;;  %v953_v1 = vld [vmem:[%s26499_s1 + $0x14c0] sm:$0xff]  ;;  %v602_v54 = vld [vmem:[%s26499_s1 + $0x9c8] sm:$0xff] }
  0x72   : > { %5117 = vmatpush1.bf16.msra.mxu1 %v16442_v9  ;;  %5077 = vmatprep.subr.bf16.mxu0 %v16937_v10  ;;  %v17081_v7 = vcombine.high %v945_v0, %v953_v1  ;;  %v929_v8 = vld [vmem:[%s26499_s1 + $0x1400] sm:$0xff]  ;;  %v418_v10 = vld [vmem:[%s26499_s1 + $0x408] sm:$0xff]  ;;  %v17080_v13 = vcombine.low %v945_v0, %v953_v1 }
  0x73   : > { %5118 = vmatprep.subr.bf16.mxu1 %v16427_v14  ;;  %v937_v9 = vld [vmem:[%s26499_s1 + $0x1440] sm:$0xff]  ;;  %v16570_v14 = vcombine.low %v434_v2, %v442_v4  ;;  %v16555_v21 = vcombine.high %v418_v10, %v426_v12  ;;  %v16554_v25 = vcombine.low %v418_v10, %v426_v12  ;;  %v850_v55 = vld [vmem:[%s26499_s1 + $0x1188] sm:$0xff] }
  0x74   : > { %v17065_v15 = vcombine.high %v929_v8, %v937_v9  ;;  %v281_v22 = vld [vmem:[%s19461_s13 + $0x20] sm:$0xff]  ;;  %v586_v0 = vld [vmem:[%s26499_s1 + $0x948] sm:$0xff]  ;;  %s16360_s13 = sshll.u32 %s26349_s14, 4  ;;  %s26456_s13 = int_to_ptr.vmem [resolvable:$true] %s16360_s13 }
  0x75   : > { %5078 = vmatpush1.bf16.msra.mxu0 %v16936_v17  ;;  %v658_v17 = vld [vmem:[%s26499_s1 + $0xb88] sm:$0xff]  ;;  %s19227_s9 = scalar_lea.vmem %s26456_s13, 768  ;;  %p19234_p0 = scmp.lt.s32.totalorder %s26456_s13, %s19232_s18 }
  0x76   : > { %5119 = vmatpush1.bf16.msra.mxu1 %v16426_v18  ;;  %5079 = vmatprep.subr.bf16.mxu0 %v17177_v19  ;;  %v666_v18 = vld [vmem:[%s26499_s1 + $0xbc8] sm:$0xff]  ;;  %p19228_p11 = scmp.ne.s32.totalorder %s26456_s13, %s19227_s9  ;;  %p19235_p1 = scmp.lt.s32.totalorder %s19233_s16, %s19227_s9 }
  0x77   : > { %5120 = vmatprep.subr.bf16.mxu1 %v16667_v24  ;;  %v914_v19 = vld [vmem:[%s26499_s1 + $0x1388] sm:$0xff]  ;;  %v17064_v24 = vcombine.low %v929_v8, %v937_v9  ;;  %v16794_v34 = vcombine.low %v658_v17, %v666_v18 }
  0x78   : > { %v17051_v31 = vcombine.high %v914_v19, %v922_v23  ;;  %v834_v1 = vld [vmem:[%s26499_s1 + $0x1108] sm:$0xff]  ;;  %p19229_p12 = pnand %p19228_p11, %p19368_p5  ;;  %p19236_p2 = por %p19235_p1, %p19234_p0 }
  0x79   : > { %5080 = vmatpush2.bf16.msra.mxu0 %v17176_v26  ;;  %v16795_v26 = vcombine.high %v658_v17, %v666_v18  ;;  %v570_v8 = vld [vmem:[%s26499_s1 + $0x8c8] sm:$0xff] }
  0x7a   : > { %5121 = vmatpush2.bf16.msra.mxu1 %v16666_v27  ;;  %5081 = vmatprep.subr.bf16.mxu0 %v17161_v29  ;;  %v642_v27 = vld [vmem:[%s26499_s1 + $0xb08] sm:$0xff]  ;;  %p19230_p13 = pneg %p19229_p12 }
  0x7b   : > { %5122 = vmatprep.subr.bf16.mxu1 %v16651_v33  ;;  %v650_v29 = vld [vmem:[%s26499_s1 + $0xb48] sm:$0xff]  ;;  %v19815_v33 = vpack.c.bf16 %v281_v22, %v281_v22 }
  0x7c   : > { %v16778_v42 = vcombine.low %v642_v27, %v650_v29  ;;  %v818_v9 = vld [vmem:[%s26499_s1 + $0x1088] sm:$0xff]  ;;  %p19237_p3 = pnand %p19236_p2, %p19230_p13 }
  0x7d   : > { %5082 = vmatpush2.bf16.msra.mxu0 %v17160_v35  ;;  %v17050_v35 = vcombine.low %v914_v19, %v922_v23  ;;  %v554_v17 = vld [vmem:[%s26499_s1 + $0x848] sm:$0xff] }
  0x7e   : > { %5123 = vmatpush2.bf16.msra.mxu1 %v16650_v36  ;;  %5083 = vmatprep.subr.bf16.mxu0 %v17145_v37  ;;  %v16779_v36 = vcombine.high %v642_v27, %v650_v29  ;;  %v626_v37 = vld [vmem:[%s26499_s1 + $0xa88] sm:$0xff] }
  0x7f   : > { %5124 = vmatprep.subr.bf16.mxu1 %v16635_v41  ;;  %v890_v41 = vld [vmem:[%s26499_s1 + $0x12c8] sm:$0xff]  ;;  %v16762_v50 = vcombine.low %v626_v37, %v634_v38 }
  0x80   : > { %v17019_v48 = vcombine.high %v882_v40, %v890_v41  ;;  %v802_v18 = vld [vmem:[%s26499_s1 + $0x1008] sm:$0xff] }
  0x81   : > { %5084 = vmatpush2.bf16.msra.mxu0 %v17144_v43  ;;  %v17034_v43 = vcombine.low %v898_v30, %v906_v32  ;;  %v1042_v27 = vld [vmem:[%s26499_s1 + $0x1788] sm:$0xff] }
  0x82   : > { %5125 = vmatpush2.bf16.msra.mxu1 %v16634_v44  ;;  %5085 = vmatprep.subr.bf16.mxu0 %v17129_v45  ;;  %v16763_v44 = vcombine.high %v626_v37, %v634_v38  ;;  %v610_v45 = vld [vmem:[%s26499_s1 + $0xa08] sm:$0xff] }
  0x83   : > { %5126 = vmatprep.subr.bf16.mxu1 %v16619_v49  ;;  %v874_v49 = vld [vmem:[%s26499_s1 + $0x1248] sm:$0xff]  ;;  %v16746_v60 = vcombine.low %v610_v45, %v618_v46 }
  0x84   : > { %v17003_v56 = vcombine.high %v866_v47, %v874_v49  ;;  %v1050_v30 = vld [vmem:[%s26499_s1 + $0x17c8] sm:$0xff] }
  0x85   : > { %5086 = vmatpush2.bf16.msra.mxu0 %v17128_v51  ;;  %v17018_v51 = vcombine.low %v882_v40, %v890_v41  ;;  %v1026_v37 = vld [vmem:[%s26499_s1 + $0x1708] sm:$0xff]  ;;  %v17179_v38 = vcombine.high %v1042_v27, %v1050_v30  ;;  %v17178_v41 = vcombine.low %v1042_v27, %v1050_v30 }
  0x86   : > { %5127 = vmatpush2.bf16.msra.mxu1 %v16618_v52  ;;  %5087 = vmatprep.subr.bf16.mxu0 %v17113_v53  ;;  %v16747_v52 = vcombine.high %v610_v45, %v618_v46  ;;  %v594_v53 = vld [vmem:[%s26499_s1 + $0x988] sm:$0xff] }
  0x87   : > { %5128 = vmatprep.subr.bf16.mxu1 %v16603_v57  ;;  %v858_v57 = vld [vmem:[%s26499_s1 + $0x11c8] sm:$0xff]  ;;  %v16730_v4 = vcombine.low %v594_v53, %v602_v54 }
  0x88   : > { %v16987_v2 = vcombine.high %v850_v55, %v858_v57  ;;  %v1010_v45 = vld [vmem:[%s26499_s1 + $0x1688] sm:$0xff] }
  0x89   : > { %5088 = vmatpush2.bf16.msra.mxu0 %v17112_v61  ;;  %v17002_v61 = vcombine.low %v866_v47, %v874_v49  ;;  %v1018_v47 = vld [vmem:[%s26499_s1 + $0x16c8] sm:$0xff] }
  0x8a   : > { %5129 = vmatpush2.bf16.msra.mxu1 %v16602_v62  ;;  %5089 = vmatprep.subr.bf16.mxu0 %v17097_v63  ;;  %v16731_v62 = vcombine.high %v594_v53, %v602_v54  ;;  %v578_v63 = vld [vmem:[%s26499_s1 + $0x908] sm:$0xff]  ;;  %v17147_v54 = vcombine.high %v1010_v45, %v1018_v47 }
  0x8b   : > { %5130 = vmatprep.subr.bf16.mxu1 %v16587_v3  ;;  %v842_v3 = vld [vmem:[%s26499_s1 + $0x1148] sm:$0xff]  ;;  %v16714_v12 = vcombine.low %v578_v63, %v586_v0 }
  0x8c   : > { %v16971_v10 = vcombine.high %v834_v1, %v842_v3  ;;  %v994_v53 = vld [vmem:[%s26499_s1 + $0x1608] sm:$0xff] }
  0x8d   : > { %5090 = vmatpush2.bf16.msra.mxu0 %v17096_v5  ;;  %v16986_v5 = vcombine.low %v850_v55, %v858_v57  ;;  %v1002_v55 = vld [vmem:[%s26499_s1 + $0x1648] sm:$0xff]  ;;  %v17146_v57 = vcombine.low %v1010_v45, %v1018_v47  ;;  %v651_v45 = vld [vmem:[%s26499_s1 + $0xb50] sm:$0xff] }
  0x8e   : > { %5131 = vmatpush2.bf16.msra.mxu1 %v16586_v6  ;;  %5091 = vmatprep.subr.bf16.mxu0 %v17081_v7  ;;  %v16715_v6 = vcombine.high %v578_v63, %v586_v0  ;;  %v562_v7 = vld [vmem:[%s26499_s1 + $0x888] sm:$0xff]  ;;  %v17131_v0 = vcombine.high %v994_v53, %v1002_v55 }
  0x8f   : > { %5132 = vmatprep.subr.bf16.mxu1 %v16571_v11  ;;  %v826_v11 = vld [vmem:[%s26499_s1 + $0x10c8] sm:$0xff]  ;;  %v16698_v22 = vcombine.low %v562_v7, %v570_v8 }
  0x90   : > { %v16955_v19 = vcombine.high %v818_v9, %v826_v11  ;;  %v16954_v23 = vcombine.low %v818_v9, %v826_v11  ;;  %v978_v63 = vld [vmem:[%s26499_s1 + $0x1588] sm:$0xff] }
  0x91   : > { %5092 = vmatpush2.bf16.msra.mxu0 %v17080_v13  ;;  %v16970_v13 = vcombine.low %v834_v1, %v842_v3  ;;  %v986_v1 = vld [vmem:[%s26499_s1 + $0x15c8] sm:$0xff]  ;;  %v17130_v3 = vcombine.low %v994_v53, %v1002_v55  ;;  %v635_v53 = vld [vmem:[%s26499_s1 + $0xad0] sm:$0xff] }
  0x92   : > { %5133 = vmatpush2.bf16.msra.mxu1 %v16570_v14  ;;  %5093 = vmatprep.subr.bf16.mxu0 %v17065_v15  ;;  %v16699_v14 = vcombine.high %v562_v7, %v570_v8  ;;  %v546_v15 = vld [vmem:[%s26499_s1 + $0x808] sm:$0xff]  ;;  %v17115_v8 = vcombine.high %v978_v63, %v986_v1  ;;  %v17114_v11 = vcombine.low %v978_v63, %v986_v1  ;;  %v619_v63 = vld [vmem:[%s26499_s1 + $0xa50] sm:$0xff] }
  0x93   : > { %5134 = vmatprep.subr.bf16.mxu1 %v16555_v21  ;;  %v810_v21 = vld [vmem:[%s26499_s1 + $0x1048] sm:$0xff] }
  0x94   : > { %v16939_v29 = vcombine.high %v802_v18, %v810_v21  ;;  %v16938_v32 = vcombine.low %v802_v18, %v810_v21  ;;  %v962_v7 = vld [vmem:[%s26499_s1 + $0x1508] sm:$0xff] }
  0x95   : > { %5094 = vmatpush2.bf16.msra.mxu0 %v17064_v24  ;;  %v16683_v24 = vcombine.high %v546_v15, %v554_v17  ;;  %v970_v9 = vld [vmem:[%s26499_s1 + $0x1548] sm:$0xff] }
  0x96   : > { %5135 = vmatpush2.bf16.msra.mxu1 %v16554_v25  ;;  %5145 = vmatprep.subr.bf16.mxu0 %v16795_v26  ;;  %v786_v25 = vld [vmem:[%s26499_s1 + $0xf88] sm:$0xff]  ;;  %v17098_v21 = vcombine.low %v962_v7, %v970_v9 }
  0x97   : > { %5186 = vmatprep.subr.bf16.mxu1 %v17051_v31  ;;  %v794_v26 = vld [vmem:[%s26499_s1 + $0xfc8] sm:$0xff]  ;;  %v16682_v31 = vcombine.low %v546_v15, %v554_v17  ;;  %v17099_v17 = vcombine.high %v962_v7, %v970_v9  ;;  %v603_v7 = vld [vmem:[%s26499_s1 + $0x9d0] sm:$0xff] }
  0x98   : > { %5096 = vmatmul.mubr.bf16.vlgmr.msra.gmra.mxu0 %v19815_v33  ;;  %v16922_v40 = vcombine.low %v786_v25, %v794_v26  ;;  %v946_v15 = vld [vmem:[%s26499_s1 + $0x1488] sm:$0xff] }
  0x99   : > { %5137 = vmatmul.mubr.bf16.vlgmr.msra.gmra.mxu1 %v19605_v16  ;;  %5146 = vmatpush1.bf16.msra.mxu0 %v16794_v34  ;;  %v16923_v34 = vcombine.high %v786_v25, %v794_v26  ;;  %v954_v18 = vld [vmem:[%s26499_s1 + $0x14c8] sm:$0xff] }
  0x9a   : > { %5187 = vmatpush1.bf16.msra.mxu1 %v17050_v35  ;;  %5147 = vmatprep.subr.bf16.mxu0 %v16779_v36  ;;  %v770_v35 = vld [vmem:[%s26499_s1 + $0xf08] sm:$0xff]  ;;  %v17083_v26 = vcombine.high %v946_v15, %v954_v18  ;;  %v17082_v30 = vcombine.low %v946_v15, %v954_v18  ;;  %v587_v15 = vld [vmem:[%s26499_s1 + $0x950] sm:$0xff] }
  0x9b   : > { %5188 = vmatprep.subr.bf16.mxu1 %v17035_v39  ;;  %5177 = vmatprep.mubr.bf16.mxu0 %v19479_v59  ;;  %v778_v36 = vld [vmem:[%s26499_s1 + $0xf48] sm:$0xff] }
  0x9c   : > { %5218 = vmatprep.mubr.bf16.mxu1 %v19625_v28  ;;  %v1034_v39 = vld [vmem:[%s26499_s1 + $0x1748] sm:$0xff] }
  0x9d   : > { %5148 = vmatpush1.bf16.msra.mxu0 %v16778_v42  ;;  %v16907_v42 = vcombine.high %v770_v35, %v778_v36  ;;  %v17163_v46 = vcombine.high %v1026_v37, %v1034_v39  ;;  %v17162_v49 = vcombine.low %v1026_v37, %v1034_v39  ;;  %v930_v25 = vld [vmem:[%s26499_s1 + $0x1408] sm:$0xff]  ;;  %v667_v37 = vld [vmem:[%s26499_s1 + $0xbd0] sm:$0xff] }
  0x9e   : > { %5189 = vmatpush1.bf16.msra.mxu1 %v17034_v43  ;;  %5149 = vmatprep.subr.bf16.mxu0 %v16763_v44  ;;  %v754_v43 = vld [vmem:[%s26499_s1 + $0xe88] sm:$0xff] }
  0x9f   : > { %5190 = vmatprep.subr.bf16.mxu1 %v17019_v48  ;;  %v762_v44 = vld [vmem:[%s26499_s1 + $0xec8] sm:$0xff]  ;;  %v16906_v48 = vcombine.low %v770_v35, %v778_v36  ;;  %v659_v35 = vld [vmem:[%s26499_s1 + $0xb90] sm:$0xff] }
  0xa0   : > { %v938_v27 = vld [vmem:[%s26499_s1 + $0x1448] sm:$0xff]  ;;  %v16796_v47 = vcombine.low %v659_v35, %v667_v37 }
  0xa1   : > { %5150 = vmatpush1.bf16.msra.mxu0 %v16762_v50  ;;  %v16891_v50 = vcombine.high %v754_v43, %v762_v44  ;;  %v17067_v36 = vcombine.high %v930_v25, %v938_v27  ;;  %v17066_v39 = vcombine.low %v930_v25, %v938_v27  ;;  %v571_v25 = vld [vmem:[%s26499_s1 + $0x8d0] sm:$0xff] }
  0xa2   : > { %5191 = vmatpush1.bf16.msra.mxu1 %v17018_v51  ;;  %5151 = vmatprep.subr.bf16.mxu0 %v16747_v52  ;;  %v738_v51 = vld [vmem:[%s26499_s1 + $0xe08] sm:$0xff] }
  0xa3   : > { %5192 = vmatprep.subr.bf16.mxu1 %v17003_v56  ;;  %v746_v52 = vld [vmem:[%s26499_s1 + $0xe48] sm:$0xff]  ;;  %v16890_v56 = vcombine.low %v754_v43, %v762_v44  ;;  %v643_v43 = vld [vmem:[%s26499_s1 + $0xb10] sm:$0xff]  ;;  %v16797_v44 = vcombine.high %v659_v35, %v667_v37 }
  0xa4   : > { %v16780_v55 = vcombine.low %v643_v43, %v651_v45  ;;  %v555_v35 = vld [vmem:[%s26499_s1 + $0x850] sm:$0xff] }
  0xa5   : > { %5152 = vmatpush1.bf16.msra.mxu0 %v16746_v60  ;;  %v16875_v60 = vcombine.high %v738_v51, %v746_v52 }
  0xa6   : > { %5193 = vmatpush1.bf16.msra.mxu1 %v17002_v61  ;;  %5153 = vmatprep.subr.bf16.mxu0 %v16731_v62  ;;  %v722_v61 = vld [vmem:[%s26499_s1 + $0xd88] sm:$0xff] }
  0xa7   : > { %5194 = vmatprep.subr.bf16.mxu1 %v16987_v2  ;;  %v730_v62 = vld [vmem:[%s26499_s1 + $0xdc8] sm:$0xff]  ;;  %v16874_v2 = vcombine.low %v738_v51, %v746_v52  ;;  %v627_v51 = vld [vmem:[%s26499_s1 + $0xa90] sm:$0xff]  ;;  %v16781_v52 = vcombine.high %v643_v43, %v651_v45 }
  0xa8   : > { %v16764_v1 = vcombine.low %v627_v51, %v635_v53  ;;  %v795_v43 = vld [vmem:[%s26499_s1 + $0xfd0] sm:$0xff] }
  0xa9   : > { %5154 = vmatpush1.bf16.msra.mxu0 %v16730_v4  ;;  %v16859_v4 = vcombine.high %v722_v61, %v730_v62 }
  0xaa   : > { %5195 = vmatpush1.bf16.msra.mxu1 %v16986_v5  ;;  %5155 = vmatprep.subr.bf16.mxu0 %v16715_v6  ;;  %v706_v5 = vld [vmem:[%s26499_s1 + $0xd08] sm:$0xff] }
  0xab   : > { %5196 = vmatprep.subr.bf16.mxu1 %v16971_v10  ;;  %v714_v6 = vld [vmem:[%s26499_s1 + $0xd48] sm:$0xff]  ;;  %v16858_v10 = vcombine.low %v722_v61, %v730_v62  ;;  %v611_v61 = vld [vmem:[%s26499_s1 + $0xa10] sm:$0xff]  ;;  %v16765_v62 = vcombine.high %v627_v51, %v635_v53 }
  0xac   : > { %v16748_v9 = vcombine.low %v611_v61, %v619_v63  ;;  %v779_v51 = vld [vmem:[%s26499_s1 + $0xf50] sm:$0xff] }
  0xad   : > { %5156 = vmatpush1.bf16.msra.mxu0 %v16714_v12  ;;  %v16843_v12 = vcombine.high %v706_v5, %v714_v6 }
  0xae   : > { %5197 = vmatpush1.bf16.msra.mxu1 %v16970_v13  ;;  %5157 = vmatprep.subr.bf16.mxu0 %v16699_v14  ;;  %v690_v13 = vld [vmem:[%s26499_s1 + $0xc88] sm:$0xff] }
  0xaf   : > { %5198 = vmatprep.subr.bf16.mxu1 %v16955_v19  ;;  %v698_v14 = vld [vmem:[%s26499_s1 + $0xcc8] sm:$0xff]  ;;  %v16842_v19 = vcombine.low %v706_v5, %v714_v6  ;;  %v595_v5 = vld [vmem:[%s26499_s1 + $0x990] sm:$0xff]  ;;  %v16749_v6 = vcombine.high %v611_v61, %v619_v63 }
  0xb0   : > { %v16732_v18 = vcombine.low %v595_v5, %v603_v7  ;;  %v763_v61 = vld [vmem:[%s26499_s1 + $0xed0] sm:$0xff] }
  0xb1   : > { %5158 = vmatpush1.bf16.msra.mxu0 %v16698_v22  ;;  %v16827_v22 = vcombine.high %v690_v13, %v698_v14 }
  0xb2   : > { %5199 = vmatpush1.bf16.msra.mxu1 %v16954_v23  ;;  %5159 = vmatprep.subr.bf16.mxu0 %v16683_v24  ;;  %v674_v23 = vld [vmem:[%s26499_s1 + $0xc08] sm:$0xff] }
  0xb3   : > { %5200 = vmatprep.subr.bf16.mxu1 %v16939_v29  ;;  %v682_v24 = vld [vmem:[%s26499_s1 + $0xc48] sm:$0xff]  ;;  %v16826_v29 = vcombine.low %v690_v13, %v698_v14  ;;  %v579_v13 = vld [vmem:[%s26499_s1 + $0x910] sm:$0xff]  ;;  %v16733_v14 = vcombine.high %v595_v5, %v603_v7 }
  0xb4   : > { %v16716_v27 = vcombine.low %v579_v13, %v587_v15  ;;  %v747_v5 = vld [vmem:[%s26499_s1 + $0xe50] sm:$0xff] }
  0xb5   : > { %5160 = vmatpush1.bf16.msra.mxu0 %v16682_v31  ;;  %v16811_v31 = vcombine.high %v674_v23, %v682_v24 }
  0xb6   : > { %5201 = vmatpush1.bf16.msra.mxu1 %v16938_v32  ;;  %5161 = vmatprep.subr.bf16.mxu0 %v16923_v34  ;;  %v403_v32 = vld [vmem:[%s26499_s1 + $0x390] sm:$0xff] }
  0xb7   : > { %5202 = vmatprep.subr.bf16.mxu1 %v17179_v38  ;;  %v411_v34 = vld [vmem:[%s26499_s1 + $0x3d0] sm:$0xff]  ;;  %v16810_v38 = vcombine.low %v674_v23, %v682_v24  ;;  %v16717_v24 = vcombine.high %v579_v13, %v587_v15 }
  0xb8   : > { %v563_v23 = vld [vmem:[%s26499_s1 + $0x890] sm:$0xff] }
  0xb9   : > { %5162 = vmatpush2.bf16.msra.mxu0 %v16922_v40  ;;  %v16541_v40 = vcombine.high %v403_v32, %v411_v34  ;;  %v16700_v37 = vcombine.low %v563_v23, %v571_v25  ;;  %v731_v13 = vld [vmem:[%s26499_s1 + $0xdd0] sm:$0xff] }
  0xba   : > { %5203 = vmatpush2.bf16.msra.mxu1 %v17178_v41  ;;  %5163 = vmatprep.subr.bf16.mxu0 %v16907_v42  ;;  %v387_v41 = vld [vmem:[%s26499_s1 + $0x310] sm:$0xff] }
  0xbb   : > { %5204 = vmatprep.subr.bf16.mxu1 %v17163_v46  ;;  %v395_v42 = vld [vmem:[%s26499_s1 + $0x350] sm:$0xff]  ;;  %v16540_v46 = vcombine.low %v403_v32, %v411_v34  ;;  %v16701_v34 = vcombine.high %v563_v23, %v571_v25 }
  0xbc   : > { %v547_v32 = vld [vmem:[%s26499_s1 + $0x810] sm:$0xff] }
  0xbd   : > { %5164 = vmatpush2.bf16.msra.mxu0 %v16906_v48  ;;  %v16525_v48 = vcombine.high %v387_v41, %v395_v42  ;;  %v16684_v45 = vcombine.low %v547_v32, %v555_v35  ;;  %v715_v23 = vld [vmem:[%s26499_s1 + $0xd50] sm:$0xff] }
  0xbe   : > { %5205 = vmatpush2.bf16.msra.mxu1 %v17162_v49  ;;  %5165 = vmatprep.subr.bf16.mxu0 %v16891_v50  ;;  %v371_v49 = vld [vmem:[%s26499_s1 + $0x290] sm:$0xff] }
  0xbf   : > { %5206 = vmatprep.subr.bf16.mxu1 %v17147_v54  ;;  %v379_v50 = vld [vmem:[%s26499_s1 + $0x2d0] sm:$0xff]  ;;  %v16524_v54 = vcombine.low %v387_v41, %v395_v42  ;;  %v16685_v42 = vcombine.high %v547_v32, %v555_v35  ;;  %v1061_v35 = vlaneseq }
  0xc0   : > { %v787_v41 = vld [vmem:[%s26499_s1 + $0xf90] sm:$0xff] }
  0xc1   : > { %5166 = vmatpush2.bf16.msra.mxu0 %v16890_v56  ;;  %v16509_v56 = vcombine.high %v371_v49, %v379_v50  ;;  %v16924_v53 = vcombine.low %v787_v41, %v795_v43  ;;  %v699_v32 = vld [vmem:[%s26499_s1 + $0xcd0] sm:$0xff] }
  0xc2   : > { %5207 = vmatpush2.bf16.msra.mxu1 %v17146_v57  ;;  %5167 = vmatprep.subr.bf16.mxu0 %v16875_v60  ;;  %v355_v57 = vld [vmem:[%s26499_s1 + $0x210] sm:$0xff] }
  0xc3   : > { %5208 = vmatprep.subr.bf16.mxu1 %v17131_v0  ;;  %v363_v60 = vld [vmem:[%s26499_s1 + $0x250] sm:$0xff]  ;;  %v16508_v0 = vcombine.low %v371_v49, %v379_v50  ;;  %v16925_v50 = vcombine.high %v787_v41, %v795_v43 }
  0xc4   : > { %v771_v49 = vld [vmem:[%s26499_s1 + $0xf10] sm:$0xff] }
  0xc5   : > { %5168 = vmatpush2.bf16.msra.mxu0 %v16874_v2  ;;  %v16493_v2 = vcombine.high %v355_v57, %v363_v60  ;;  %v16908_v63 = vcombine.low %v771_v49, %v779_v51 }
  0xc6   : > { %5209 = vmatpush2.bf16.msra.mxu1 %v17130_v3  ;;  %5169 = vmatprep.subr.bf16.mxu0 %v16859_v4  ;;  %v339_v3 = vld [vmem:[%s26499_s1 + $0x190] sm:$0xff] }
  0xc7   : > { %5210 = vmatprep.subr.bf16.mxu1 %v17115_v8  ;;  %v347_v4 = vld [vmem:[%s26499_s1 + $0x1d0] sm:$0xff]  ;;  %v16492_v8 = vcombine.low %v355_v57, %v363_v60  ;;  %v16909_v60 = vcombine.high %v771_v49, %v779_v51  ;;  %v404_v49 = vld [vmem:[%s26499_s1 + $0x398] sm:$0xff] }
  0xc8   : > { %v755_v57 = vld [vmem:[%s26499_s1 + $0xe90] sm:$0xff]  ;;  %v412_v51 = vld [vmem:[%s26499_s1 + $0x3d8] sm:$0xff] }
  0xc9   : > { %5170 = vmatpush2.bf16.msra.mxu0 %v16858_v10  ;;  %v16477_v10 = vcombine.high %v339_v3, %v347_v4  ;;  %v16892_v7 = vcombine.low %v755_v57, %v763_v61 }
  0xca   : > { %5211 = vmatpush2.bf16.msra.mxu1 %v17114_v11  ;;  %5171 = vmatprep.subr.bf16.mxu0 %v16843_v12  ;;  %v323_v11 = vld [vmem:[%s26499_s1 + $0x110] sm:$0xff] }
  0xcb   : > { %5212 = vmatprep.subr.bf16.mxu1 %v17099_v17  ;;  %v331_v12 = vld [vmem:[%s26499_s1 + $0x150] sm:$0xff]  ;;  %v16476_v17 = vcombine.low %v339_v3, %v347_v4  ;;  %v16893_v4 = vcombine.high %v755_v57, %v763_v61  ;;  %v388_v61 = vld [vmem:[%s26499_s1 + $0x318] sm:$0xff] }
  0xcc   : > { %v739_v3 = vld [vmem:[%s26499_s1 + $0xe10] sm:$0xff] }
  0xcd   : > { %5172 = vmatpush2.bf16.msra.mxu0 %v16842_v19  ;;  %v16461_v19 = vcombine.high %v323_v11, %v331_v12  ;;  %v16876_v15 = vcombine.low %v739_v3, %v747_v5  ;;  %v899_v57 = vld [vmem:[%s26499_s1 + $0x1310] sm:$0xff] }
  0xce   : > { %5213 = vmatpush2.bf16.msra.mxu1 %v17098_v21  ;;  %5173 = vmatprep.subr.bf16.mxu0 %v16827_v22  ;;  %v307_v21 = vld [vmem:[%s26499_s1 + $0x90] sm:$0xff] }
  0xcf   : > { %5214 = vmatprep.subr.bf16.mxu1 %v17083_v26  ;;  %v315_v22 = vld [vmem:[%s26499_s1 + $0xd0] sm:$0xff]  ;;  %v16460_v26 = vcombine.low %v323_v11, %v331_v12  ;;  %v16877_v12 = vcombine.high %v739_v3, %v747_v5  ;;  %v16542_v3 = vcombine.low %v404_v49, %v412_v51 }
  0xd0   : > { %v723_v11 = vld [vmem:[%s26499_s1 + $0xd90] sm:$0xff] }
  0xd1   : > { %5174 = vmatpush2.bf16.msra.mxu0 %v16826_v29  ;;  %v16445_v29 = vcombine.high %v307_v21, %v315_v22  ;;  %v16860_v25 = vcombine.low %v723_v11, %v731_v13  ;;  %v883_v5 = vld [vmem:[%s26499_s1 + $0x1290] sm:$0xff] }
  0xd2   : > { %5215 = vmatpush2.bf16.msra.mxu1 %v17082_v30  ;;  %5175 = vmatprep.subr.bf16.mxu0 %v16811_v31  ;;  %v291_v30 = vld [vmem:[%s26499_s1 + $0x10] sm:$0xff] }
  0xd3   : > { %5216 = vmatprep.subr.bf16.mxu1 %v17067_v36  ;;  %v299_v31 = vld [vmem:[%s26499_s1 + $0x50] sm:$0xff]  ;;  %v16444_v36 = vcombine.low %v307_v21, %v315_v22  ;;  %v16861_v22 = vcombine.high %v723_v11, %v731_v13  ;;  %v380_v11 = vld [vmem:[%s26499_s1 + $0x2d8] sm:$0xff] }
  0xd4   : > { %v707_v21 = vld [vmem:[%s26499_s1 + $0xd10] sm:$0xff] }
  0xd5   : > { %5176 = vmatpush2.bf16.msra.mxu0 %v16810_v38  ;;  %v16429_v38 = vcombine.high %v291_v30, %v299_v31 }
  0xd6   : > { %5217 = vmatpush2.bf16.msra.mxu1 %v17066_v39  ;;  %5227 = vmatprep.subr.bf16.mxu0 %v16541_v40  ;;  %v531_v39 = vld [vmem:[%s26499_s1 + $0x790] sm:$0xff] }
  0xd7   : > { %5268 = vmatprep.subr.bf16.mxu1 %v16797_v44  ;;  %v539_v40 = vld [vmem:[%s26499_s1 + $0x7d0] sm:$0xff]  ;;  %v16428_v44 = vcombine.low %v291_v30, %v299_v31  ;;  %v16845_v31 = vcombine.high %v707_v21, %v715_v23 }
  0xd8   : > { %5178 = vmatmul.mubr.bf16.vlgmr.msra.gmra.mxu0 %v19614_v20  ;;  %v691_v30 = vld [vmem:[%s26499_s1 + $0xc90] sm:$0xff] }
  0xd9   : > { %5219 = vmatmul.mubr.bf16.vlgmr.msra.gmra.mxu1 %v19815_v33  ;;  %5228 = vmatpush1.bf16.msra.mxu0 %v16540_v46  ;;  %v16669_v46 = vcombine.high %v531_v39, %v539_v40  ;;  %v16829_v41 = vcombine.high %v691_v30, %v699_v32 }
  0xda   : > { %5269 = vmatpush1.bf16.msra.mxu1 %v16796_v47  ;;  %5229 = vmatprep.subr.bf16.mxu0 %v16525_v48  ;;  %v515_v47 = vld [vmem:[%s26499_s1 + $0x710] sm:$0xff] }
  0xdb   : > { %5270 = vmatprep.subr.bf16.mxu1 %v16781_v52  ;;  %5259 = vmatprep.mubr.bf16.mxu0 %v19477_v58  ;;  %v523_v48 = vld [vmem:[%s26499_s1 + $0x750] sm:$0xff]  ;;  %v16668_v52 = vcombine.low %v531_v39, %v539_v40 }
  0xdc   : > { %5300 = vmatprep.mubr.bf16.mxu1 %v19479_v59  ;;  %v427_v39 = vld [vmem:[%s26499_s1 + $0x450] sm:$0xff] }
  0xdd   : > { %5230 = vmatpush1.bf16.msra.mxu0 %v16524_v54  ;;  %v16653_v54 = vcombine.high %v515_v47, %v523_v48  ;;  %v675_v40 = vld [vmem:[%s26499_s1 + $0xc10] sm:$0xff] }
  0xde   : > { %5271 = vmatpush1.bf16.msra.mxu1 %v16780_v55  ;;  %5231 = vmatprep.subr.bf16.mxu0 %v16509_v56  ;;  %v499_v55 = vld [vmem:[%s26499_s1 + $0x690] sm:$0xff] }
  0xdf   : > { %5272 = vmatprep.subr.bf16.mxu1 %v16765_v62  ;;  %v507_v56 = vld [vmem:[%s26499_s1 + $0x6d0] sm:$0xff]  ;;  %v16652_v62 = vcombine.low %v515_v47, %v523_v48 }
  0xe0   : > { %v915_v47 = vld [vmem:[%s26499_s1 + $0x1390] sm:$0xff] }
  0xe1   : > { %5232 = vmatpush1.bf16.msra.mxu0 %v16508_v0  ;;  %v16637_v0 = vcombine.high %v499_v55, %v507_v56  ;;  %v923_v48 = vld [vmem:[%s26499_s1 + $0x13d0] sm:$0xff] }
  0xe2   : > { %5273 = vmatpush1.bf16.msra.mxu1 %v16764_v1  ;;  %5233 = vmatprep.subr.bf16.mxu0 %v16493_v2  ;;  %v483_v1 = vld [vmem:[%s26499_s1 + $0x610] sm:$0xff] }
  0xe3   : > { %5274 = vmatprep.subr.bf16.mxu1 %v16749_v6  ;;  %v491_v2 = vld [vmem:[%s26499_s1 + $0x650] sm:$0xff]  ;;  %v16636_v6 = vcombine.low %v499_v55, %v507_v56  ;;  %v17053_v56 = vcombine.high %v915_v47, %v923_v48 }
  0xe5   : > { %5234 = vmatpush1.bf16.msra.mxu0 %v16492_v8  ;;  %v16621_v8 = vcombine.high %v483_v1, %v491_v2 }
  0xe6   : > { %5275 = vmatpush1.bf16.msra.mxu1 %v16748_v9  ;;  %5235 = vmatprep.subr.bf16.mxu0 %v16477_v10  ;;  %v467_v9 = vld [vmem:[%s26499_s1 + $0x590] sm:$0xff] }
  0xe7   : > { %5276 = vmatprep.subr.bf16.mxu1 %v16733_v14  ;;  %v475_v10 = vld [vmem:[%s26499_s1 + $0x5d0] sm:$0xff]  ;;  %v16620_v14 = vcombine.low %v483_v1, %v491_v2  ;;  %v17052_v2 = vcombine.low %v915_v47, %v923_v48 }
  0xe8   : > { %v835_v48 = vld [vmem:[%s26499_s1 + $0x1110] sm:$0xff] }
  0xe9   : > { %5236 = vmatpush1.bf16.msra.mxu0 %v16476_v17  ;;  %v16605_v17 = vcombine.high %v467_v9, %v475_v10 }
  0xea   : > { %5277 = vmatpush1.bf16.msra.mxu1 %v16732_v18  ;;  %5237 = vmatprep.subr.bf16.mxu0 %v16461_v19  ;;  %v451_v18 = vld [vmem:[%s26499_s1 + $0x510] sm:$0xff] }
  0xeb   : > { %5278 = vmatprep.subr.bf16.mxu1 %v16717_v24  ;;  %v459_v19 = vld [vmem:[%s26499_s1 + $0x550] sm:$0xff]  ;;  %v16604_v24 = vcombine.low %v467_v9, %v475_v10  ;;  %v372_v9 = vld [vmem:[%s26499_s1 + $0x298] sm:$0xff] }
  0xed   : > { %5238 = vmatpush1.bf16.msra.mxu0 %v16460_v26  ;;  %v16589_v26 = vcombine.high %v451_v18, %v459_v19 }
  0xee   : > { %5279 = vmatpush1.bf16.msra.mxu1 %v16716_v27  ;;  %5239 = vmatprep.subr.bf16.mxu0 %v16445_v29  ;;  %v435_v27 = vld [vmem:[%s26499_s1 + $0x490] sm:$0xff] }
  0xef   : > { %5280 = vmatprep.subr.bf16.mxu1 %v16701_v34  ;;  %v443_v29 = vld [vmem:[%s26499_s1 + $0x4d0] sm:$0xff]  ;;  %v16588_v34 = vcombine.low %v451_v18, %v459_v19 }
  0xf0   : > { %v16572_v43 = vcombine.low %v435_v27, %v443_v29 }
  0xf1   : > { %5240 = vmatpush1.bf16.msra.mxu0 %v16444_v36  ;;  %v16844_v36 = vcombine.low %v707_v21, %v715_v23  ;;  %v16511_v23 = vcombine.high %v372_v9, %v380_v11 }
  0xf2   : > { %5281 = vmatpush1.bf16.msra.mxu1 %v16700_v37  ;;  %5241 = vmatprep.subr.bf16.mxu0 %v16429_v38  ;;  %v16573_v37 = vcombine.high %v435_v27, %v443_v29  ;;  %v419_v38 = vld [vmem:[%s26499_s1 + $0x410] sm:$0xff]  ;;  %v356_v27 = vld [vmem:[%s26499_s1 + $0x218] sm:$0xff] }
  0xf3   : > { %5282 = vmatprep.subr.bf16.mxu1 %v16685_v42  ;;  %v683_v42 = vld [vmem:[%s26499_s1 + $0xc50] sm:$0xff]  ;;  %v364_v29 = vld [vmem:[%s26499_s1 + $0x258] sm:$0xff] }
  0xf4   : > { %v16812_v55 = vcombine.low %v675_v40, %v683_v42 }
  0xf5   : > { %5242 = vmatpush1.bf16.msra.mxu0 %v16428_v44  ;;  %v20185_v44 = vshrl.u32 %v1061_v35, 7  ;;  %v16510_v35 = vcombine.low %v372_v9, %v380_v11 }
  0xf6   : > { %5283 = vmatpush1.bf16.msra.mxu1 %v16684_v45  ;;  %5243 = vmatprep.subr.bf16.mxu0 %v16669_v46  ;;  %v16828_v45 = vcombine.low %v691_v30, %v699_v32  ;;  %v16557_v46 = vcombine.high %v419_v38, %v427_v39 }
  0xf7   : > { %5284 = vmatprep.subr.bf16.mxu1 %v16925_v50  ;;  %v16813_v50 = vcombine.high %v675_v40, %v683_v42  ;;  %v859_v40 = vld [vmem:[%s26499_s1 + $0x11d0] sm:$0xff]  ;;  %v348_v42 = vld [vmem:[%s26499_s1 + $0x1d8] sm:$0xff] }
  0xf9   : > { %5244 = vmatpush2.bf16.msra.mxu0 %v16668_v52  ;;  %v20202_v52 = vld [vmem:[%s26500_s2] sm:$0xff] }
  0xfa   : > { %5285 = vmatpush2.bf16.msra.mxu1 %v16924_v53  ;;  %5245 = vmatprep.subr.bf16.mxu0 %v16653_v54  ;;  %v16556_v53 = vcombine.low %v419_v38, %v427_v39  ;;  %v20205_v54 = vsub.s32 0, %v20185_v44  ;;  %v16495_v38 = vcombine.high %v356_v27, %v364_v29  ;;  %v851_v39 = vld [vmem:[%s26499_s1 + $0x1190] sm:$0xff] }
  0xfb   : > { %5286 = vmatprep.subr.bf16.mxu1 %v16909_v60  ;;  %v907_v60 = vld [vmem:[%s26499_s1 + $0x1350] sm:$0xff] }
  0xfc   : > { %v1064_v1 = vrot.slane %v20202_v52, %v20205_v54 }
  0xfd   : > { %5246 = vmatpush2.bf16.msra.mxu0 %v16652_v62  ;;  %v16543_v62 = vcombine.high %v404_v49, %v412_v51  ;;  %v843_v49 = vld [vmem:[%s26499_s1 + $0x1150] sm:$0xff]  ;;  %v332_v51 = vld [vmem:[%s26499_s1 + $0x158] sm:$0xff] }
  0xfe   : > { %5287 = vmatpush2.bf16.msra.mxu1 %v16908_v63  ;;  %5247 = vmatprep.subr.bf16.mxu0 %v16637_v0  ;;  %v20217_v63 = vsub.s32 1, %v20185_v44  ;;  %v396_v0 = vld [vmem:[%s26499_s1 + $0x358] sm:$0xff] }
  0xff   : > { %5288 = vmatprep.subr.bf16.mxu1 %v16893_v4  ;;  %v17037_v4 = vcombine.high %v899_v57, %v907_v60 }
 0x101   : > { %5248 = vmatpush2.bf16.msra.mxu0 %v16636_v6  ;;  %v891_v6 = vld [vmem:[%s26499_s1 + $0x12d0] sm:$0xff] }
 0x102   : > { %5289 = vmatpush2.bf16.msra.mxu1 %v16892_v7  ;;  %5249 = vmatprep.subr.bf16.mxu0 %v16621_v8  ;;  %v1068_v7 = vrot.slane %v20202_v52, %v20217_v63  ;;  %v16527_v8 = vcombine.high %v388_v61, %v396_v0  ;;  %v17021_v18 = vcombine.high %v883_v5, %v891_v6 }
 0x103   : > { %5290 = vmatprep.subr.bf16.mxu1 %v16877_v12  ;;  %v17020_v32 = vcombine.low %v883_v5, %v891_v6  ;;  %v803_v5 = vld [vmem:[%s26499_s1 + $0x1010] sm:$0xff] }
 0x104   : > { %v811_v6 = vld [vmem:[%s26499_s1 + $0x1050] sm:$0xff] }
 0x105   : > { %5250 = vmatpush2.bf16.msra.mxu0 %v16620_v14  ;;  %v17036_v14 = vcombine.low %v899_v57, %v907_v60  ;;  %v819_v60 = vld [vmem:[%s26499_s1 + $0x1090] sm:$0xff]  ;;  %v16941_v11 = vcombine.high %v803_v5, %v811_v6 }
 0x106   : > { %5291 = vmatpush2.bf16.msra.mxu1 %v16876_v15  ;;  %5251 = vmatprep.subr.bf16.mxu0 %v16605_v17  ;;  %v16526_v17 = vcombine.low %v388_v61, %v396_v0  ;;  %v827_v61 = vld [vmem:[%s26499_s1 + $0x10d0] sm:$0xff]  ;;  %v316_v0 = vld [vmem:[%s26499_s1 + $0xd8] sm:$0xff] }
 0x107   : > { %5292 = vmatprep.subr.bf16.mxu1 %v16861_v22  ;;  %v16956_v9 = vcombine.low %v819_v60, %v827_v61 }
 0x109   : > { %5252 = vmatpush2.bf16.msra.mxu0 %v16604_v24  ;;  %v867_v24 = vld [vmem:[%s26499_s1 + $0x1210] sm:$0xff] }
 0x10a   : > { %5293 = vmatpush2.bf16.msra.mxu1 %v16860_v25  ;;  %5253 = vmatprep.subr.bf16.mxu0 %v16589_v26  ;;  %v875_v25 = vld [vmem:[%s26499_s1 + $0x1250] sm:$0xff] }
 0x10b   : > { %5294 = vmatprep.subr.bf16.mxu1 %v16845_v31 }
 0x10d   : > { %5254 = vmatpush2.bf16.msra.mxu0 %v16588_v34 }
 0x10e   : > { %5295 = vmatpush2.bf16.msra.mxu1 %v16844_v36  ;;  %5255 = vmatprep.subr.bf16.mxu0 %v16573_v37  ;;  %v17005_v36 = vcombine.high %v867_v24, %v875_v25 }
 0x10f   : > { %5296 = vmatprep.subr.bf16.mxu1 %v16829_v41  ;;  %v340_v41 = vld [vmem:[%s26499_s1 + $0x198] sm:$0xff] }
 0x110   : > { %v16479_v47 = vcombine.high %v340_v41, %v348_v42 }
 0x111   : > { %5256 = vmatpush2.bf16.msra.mxu0 %v16572_v43  ;;  %v17004_v43 = vcombine.low %v867_v24, %v875_v25  ;;  %v1027_v24 = vld [vmem:[%s26499_s1 + $0x1710] sm:$0xff] }
 0x112   : > { %5297 = vmatpush2.bf16.msra.mxu1 %v16828_v45  ;;  %5257 = vmatprep.subr.bf16.mxu0 %v16557_v46  ;;  %v16494_v45 = vcombine.low %v356_v27, %v364_v29  ;;  %v16989_v46 = vcombine.high %v851_v39, %v859_v40  ;;  %v1035_v25 = vld [vmem:[%s26499_s1 + $0x1750] sm:$0xff]  ;;  %v524_v27 = vld [vmem:[%s26499_s1 + $0x758] sm:$0xff] }
 0x113   : > { %5298 = vmatprep.subr.bf16.mxu1 %v16813_v50  ;;  %v324_v50 = vld [vmem:[%s26499_s1 + $0x118] sm:$0xff] }
 0x114   : > { %v16463_v57 = vcombine.high %v324_v50, %v332_v51 }
 0x115   : > { %5258 = vmatpush2.bf16.msra.mxu0 %v16556_v53  ;;  %v16988_v53 = vcombine.low %v851_v39, %v859_v40  ;;  %v17164_v39 = vcombine.low %v1027_v24, %v1035_v25 }
 0x116   : > { %5299 = vmatpush2.bf16.msra.mxu1 %v16812_v55  ;;  %5309 = vmatprep.subr.bf16.mxu0 %v17053_v56  ;;  %v16478_v55 = vcombine.low %v340_v41, %v348_v42  ;;  %v16973_v56 = vcombine.high %v835_v48, %v843_v49 }
 0x117   : > { %5350 = vmatprep.subr.bf16.mxu1 %v16543_v62  ;;  %v308_v62 = vld [vmem:[%s26499_s1 + $0x98] sm:$0xff] }
 0x118   : > { %v5015_v10 = vpop.f32.mrf.mxu0  ;;  %5260 = vmatmul.mubr.bf16.vlgmr.msra.gmra.mxu0 %v19605_v16 }
 0x119   : > { %v5016_v12 = vadd.f32 %v5015_v10, %v1064_v1  ;;  %v5056_v13 = vpop.f32.mrf.mxu1  ;;  %5301 = vmatmul.mubr.bf16.vlgmr.msra.gmra.mxu1 %v19614_v20  ;;  %5310 = vmatpush1.bf16.msra.mxu0 %v17052_v2  ;;  %v16972_v1 = vcombine.low %v835_v48, %v843_v49  ;;  %v16462_v2 = vcombine.low %v324_v50, %v332_v51 }
 0x11a   : > { %5351 = vmatpush1.bf16.msra.mxu1 %v16542_v3  ;;  %v5017_v15 = vpop.f32.mrf.mxu0  ;;  %5311 = vmatprep.subr.bf16.mxu0 %v17037_v4  ;;  %v16957_v3 = vcombine.high %v819_v60, %v827_v61  ;;  %v16447_v4 = vcombine.high %v308_v62, %v316_v0  ;;  %v16446_v10 = vcombine.low %v308_v62, %v316_v0 }
 0x11b   : > { %v20240_v19 = vadd.f32 %v5056_v13, %v5016_v12  ;;  %v5018_v21 = vadd.f32 %v5017_v15, %v1068_v7  ;;  %v5058_v22 = vpop.f32.mrf.mxu1  ;;  %5352 = vmatprep.subr.bf16.mxu1 %v16527_v8  ;;  %5341 = vmatprep.mubr.bf16.mxu0 %v19625_v28  ;;  %v292_v7 = vld [vmem:[%s26499_s1 + $0x18] sm:$0xff]  ;;  %v1043_v13 = vld [vmem:[%s26499_s1 + $0x1790] sm:$0xff] }
 0x11c   : > { %v5019_v26 = vpop.f32.mrf.mxu0  ;;  %5382 = vmatprep.mubr.bf16.mxu1 %v19477_v58  ;;  %v300_v8 = vld [vmem:[%s26499_s1 + $0x58] sm:$0xff] }
 0x11d   : > { %v20256_v30 = vadd.f32 %v5058_v22, %v5018_v21  ;;  %v5060_v31 = vpop.f32.mrf.mxu1  ;;  %5312 = vmatpush1.bf16.msra.mxu0 %v17036_v14  ;;  %v16431_v12 = vcombine.high %v292_v7, %v300_v8  ;;  %v1051_v14 = vld [vmem:[%s26499_s1 + $0x17d0] sm:$0xff]  ;;  %v532_v15 = vld [vmem:[%s26499_s1 + $0x798] sm:$0xff]  ;;  %v16430_v21 = vcombine.low %v292_v7, %v300_v8 }
 0x11e   : > { %5353 = vmatpush1.bf16.msra.mxu1 %v16526_v17  ;;  %v5020_v34 = vpop.f32.mrf.mxu0  ;;  %5313 = vmatprep.subr.bf16.mxu0 %v17021_v18  ;;  %v540_v17 = vld [vmem:[%s26499_s1 + $0x7d8] sm:$0xff]  ;;  %v16940_v18 = vcombine.low %v803_v5, %v811_v6  ;;  %v17181_v22 = vcombine.high %v1043_v13, %v1051_v14  ;;  %v17180_v29 = vcombine.low %v1043_v13, %v1051_v14 }
 0x11f   : > { %v5061_v37 = vpop.f32.mrf.mxu1  ;;  %5354 = vmatprep.subr.bf16.mxu1 %v16511_v23  ;;  %v16671_v23 = vcombine.high %v532_v15, %v540_v17  ;;  %v516_v26 = vld [vmem:[%s26499_s1 + $0x718] sm:$0xff]  ;;  %v16670_v31 = vcombine.low %v532_v15, %v540_v17 }
 0x120   : > { %v16655_v34 = vcombine.high %v516_v26, %v524_v27  ;;  %v500_v37 = vld [vmem:[%s26499_s1 + $0x698] sm:$0xff]  ;;  %v16654_v40 = vcombine.low %v516_v26, %v524_v27 }
 0x121   : > { %5314 = vmatpush1.bf16.msra.mxu0 %v17020_v32  ;;  %v17165_v32 = vcombine.high %v1027_v24, %v1035_v25 }
 0x122   : > { %5355 = vmatpush1.bf16.msra.mxu1 %v16510_v35  ;;  %5315 = vmatprep.subr.bf16.mxu0 %v17005_v36  ;;  %v1011_v35 = vld [vmem:[%s26499_s1 + $0x1690] sm:$0xff] }
 0x123   : > { %5356 = vmatprep.subr.bf16.mxu1 %v16495_v38  ;;  %v1019_v36 = vld [vmem:[%s26499_s1 + $0x16d0] sm:$0xff]  ;;  %v508_v38 = vld [vmem:[%s26499_s1 + $0x6d8] sm:$0xff] }
 0x124   : > { %v17149_v41 = vcombine.high %v1011_v35, %v1019_v36  ;;  %v16639_v42 = vcombine.high %v500_v37, %v508_v38  ;;  %v17148_v48 = vcombine.low %v1011_v35, %v1019_v36  ;;  %v16638_v49 = vcombine.low %v500_v37, %v508_v38 }
 0x125   : > { %5316 = vmatpush1.bf16.msra.mxu0 %v17004_v43  ;;  %v995_v43 = vld [vmem:[%s26499_s1 + $0x1610] sm:$0xff] }
 0x126   : > { %5357 = vmatpush1.bf16.msra.mxu1 %v16494_v45  ;;  %5317 = vmatprep.subr.bf16.mxu0 %v16989_v46  ;;  %v1003_v45 = vld [vmem:[%s26499_s1 + $0x1650] sm:$0xff]  ;;  %v484_v46 = vld [vmem:[%s26499_s1 + $0x618] sm:$0xff] }
 0x127   : > { %5358 = vmatprep.subr.bf16.mxu1 %v16479_v47  ;;  %v492_v47 = vld [vmem:[%s26499_s1 + $0x658] sm:$0xff]  ;;  %v17133_v50 = vcombine.high %v995_v43, %v1003_v45  ;;  %v17132_v60 = vcombine.low %v995_v43, %v1003_v45 }
 0x128   : > { %v16623_v51 = vcombine.high %v484_v46, %v492_v47  ;;  %v16622_v61 = vcombine.low %v484_v46, %v492_v47 }
 0x129   : > { %5318 = vmatpush1.bf16.msra.mxu0 %v16988_v53  ;;  %v979_v53 = vld [vmem:[%s26499_s1 + $0x1590] sm:$0xff] }
 0x12a   : > { %5359 = vmatpush1.bf16.msra.mxu1 %v16478_v55  ;;  %5319 = vmatprep.subr.bf16.mxu0 %v16973_v56  ;;  %v987_v55 = vld [vmem:[%s26499_s1 + $0x15d0] sm:$0xff]  ;;  %v468_v56 = vld [vmem:[%s26499_s1 + $0x598] sm:$0xff] }
 0x12b   : > { %5360 = vmatprep.subr.bf16.mxu1 %v16463_v57  ;;  %v476_v57 = vld [vmem:[%s26499_s1 + $0x5d8] sm:$0xff]  ;;  %v17117_v62 = vcombine.high %v979_v53, %v987_v55  ;;  %v17116_v5 = vcombine.low %v979_v53, %v987_v55 }
 0x12c   : > { %v16607_v0 = vcombine.high %v468_v56, %v476_v57  ;;  %v16606_v6 = vcombine.low %v468_v56, %v476_v57  ;;  %v892_v53 = vld [vmem:[%s26499_s1 + $0x12d8] sm:$0xff] }
 0x12d   : > { %5320 = vmatpush1.bf16.msra.mxu0 %v16972_v1  ;;  %v963_v1 = vld [vmem:[%s26499_s1 + $0x1510] sm:$0xff] }
 0x12e   : > { %5361 = vmatpush1.bf16.msra.mxu1 %v16462_v2  ;;  %5321 = vmatprep.subr.bf16.mxu0 %v16957_v3  ;;  %v971_v2 = vld [vmem:[%s26499_s1 + $0x1550] sm:$0xff]  ;;  %v452_v3 = vld [vmem:[%s26499_s1 + $0x518] sm:$0xff] }
 0x12f   : > { %5362 = vmatprep.subr.bf16.mxu1 %v16447_v4  ;;  %v460_v4 = vld [vmem:[%s26499_s1 + $0x558] sm:$0xff]  ;;  %v17101_v7 = vcombine.high %v963_v1, %v971_v2  ;;  %v17100_v13 = vcombine.low %v963_v1, %v971_v2 }
 0x130   : > { %v16591_v8 = vcombine.high %v452_v3, %v460_v4  ;;  %v16590_v14 = vcombine.low %v452_v3, %v460_v4  ;;  %v620_v3 = vld [vmem:[%s26499_s1 + $0xa58] sm:$0xff] }
 0x131   : > { %5322 = vmatpush1.bf16.msra.mxu0 %v16956_v9  ;;  %v947_v9 = vld [vmem:[%s26499_s1 + $0x1490] sm:$0xff] }
 0x132   : > { %5363 = vmatpush1.bf16.msra.mxu1 %v16446_v10  ;;  %5323 = vmatprep.subr.bf16.mxu0 %v16941_v11  ;;  %v955_v10 = vld [vmem:[%s26499_s1 + $0x14d0] sm:$0xff]  ;;  %v436_v11 = vld [vmem:[%s26499_s1 + $0x498] sm:$0xff] }
 0x133   : > { %5364 = vmatprep.subr.bf16.mxu1 %v16431_v12  ;;  %v444_v12 = vld [vmem:[%s26499_s1 + $0x4d8] sm:$0xff]  ;;  %v17085_v15 = vcombine.high %v947_v9, %v955_v10  ;;  %v17084_v24 = vcombine.low %v947_v9, %v955_v10 }
 0x134   : > { %v16575_v17 = vcombine.high %v436_v11, %v444_v12  ;;  %v16574_v25 = vcombine.low %v436_v11, %v444_v12 }
 0x135   : > { %5324 = vmatpush1.bf16.msra.mxu0 %v16940_v18  ;;  %v931_v18 = vld [vmem:[%s26499_s1 + $0x1410] sm:$0xff] }
 0x136   : > { %5365 = vmatpush1.bf16.msra.mxu1 %v16430_v21  ;;  %5325 = vmatprep.subr.bf16.mxu0 %v17181_v22  ;;  %v939_v21 = vld [vmem:[%s26499_s1 + $0x1450] sm:$0xff]  ;;  %v420_v22 = vld [vmem:[%s26499_s1 + $0x418] sm:$0xff] }
 0x137   : > { %5366 = vmatprep.subr.bf16.mxu1 %v16671_v23  ;;  %v428_v23 = vld [vmem:[%s26499_s1 + $0x458] sm:$0xff]  ;;  %v17069_v26 = vcombine.high %v931_v18, %v939_v21  ;;  %v17068_v35 = vcombine.low %v931_v18, %v939_v21 }
 0x138   : > { %v16559_v27 = vcombine.high %v420_v22, %v428_v23  ;;  %v16558_v36 = vcombine.low %v420_v22, %v428_v23 }
 0x139   : > { %5326 = vmatpush2.bf16.msra.mxu0 %v17180_v29  ;;  %v660_v29 = vld [vmem:[%s26499_s1 + $0xb98] sm:$0xff] }
 0x13a   : > { %5367 = vmatpush2.bf16.msra.mxu1 %v16670_v31  ;;  %5327 = vmatprep.subr.bf16.mxu0 %v17165_v32  ;;  %v668_v31 = vld [vmem:[%s26499_s1 + $0xbd8] sm:$0xff] }
 0x13b   : > { %5368 = vmatprep.subr.bf16.mxu1 %v16655_v34  ;;  %v916_v32 = vld [vmem:[%s26499_s1 + $0x1398] sm:$0xff]  ;;  %v16799_v37 = vcombine.high %v660_v29, %v668_v31  ;;  %v16798_v43 = vcombine.low %v660_v29, %v668_v31 }
 0x13c   : > { %v924_v34 = vld [vmem:[%s26499_s1 + $0x13d8] sm:$0xff] }
 0x13d   : > { %5328 = vmatpush2.bf16.msra.mxu0 %v17164_v39  ;;  %v17055_v38 = vcombine.high %v916_v32, %v924_v34  ;;  %v644_v39 = vld [vmem:[%s26499_s1 + $0xb18] sm:$0xff]  ;;  %v17054_v45 = vcombine.low %v916_v32, %v924_v34 }
 0x13e   : > { %5369 = vmatpush2.bf16.msra.mxu1 %v16654_v40  ;;  %5329 = vmatprep.subr.bf16.mxu0 %v17149_v41  ;;  %v652_v40 = vld [vmem:[%s26499_s1 + $0xb58] sm:$0xff] }
 0x13f   : > { %5370 = vmatprep.subr.bf16.mxu1 %v16639_v42  ;;  %v900_v41 = vld [vmem:[%s26499_s1 + $0x1318] sm:$0xff]  ;;  %v16783_v46 = vcombine.high %v644_v39, %v652_v40  ;;  %v16782_v57 = vcombine.low %v644_v39, %v652_v40 }
 0x140   : > { %v908_v42 = vld [vmem:[%s26499_s1 + $0x1358] sm:$0xff] }
 0x141   : > { %5330 = vmatpush2.bf16.msra.mxu0 %v17148_v48  ;;  %v17039_v47 = vcombine.high %v900_v41, %v908_v42  ;;  %v628_v48 = vld [vmem:[%s26499_s1 + $0xa98] sm:$0xff] }
 0x142   : > { %5371 = vmatpush2.bf16.msra.mxu1 %v16638_v49  ;;  %5331 = vmatprep.subr.bf16.mxu0 %v17133_v50  ;;  %v636_v49 = vld [vmem:[%s26499_s1 + $0xad8] sm:$0xff] }
 0x143   : > { %5372 = vmatprep.subr.bf16.mxu1 %v16623_v51  ;;  %v884_v51 = vld [vmem:[%s26499_s1 + $0x1298] sm:$0xff] }
 0x144   : > { %v17023_v2 = vcombine.high %v884_v51, %v892_v53  ;;  %v17022_v9 = vcombine.low %v884_v51, %v892_v53  ;;  %v788_v53 = vld [vmem:[%s26499_s1 + $0xf98] sm:$0xff] }
 0x145   : > { %5332 = vmatpush2.bf16.msra.mxu0 %v17132_v60 }
 0x146   : > { %5373 = vmatpush2.bf16.msra.mxu1 %v16622_v61  ;;  %5333 = vmatprep.subr.bf16.mxu0 %v17117_v62  ;;  %v17038_v61 = vcombine.low %v900_v41, %v908_v42  ;;  %v16767_v62 = vcombine.high %v628_v48, %v636_v49 }
 0x147   : > { %5374 = vmatprep.subr.bf16.mxu1 %v16607_v0 }
 0x149   : > { %5334 = vmatpush2.bf16.msra.mxu0 %v17116_v5  ;;  %v876_v5 = vld [vmem:[%s26499_s1 + $0x1258] sm:$0xff] }
 0x14a   : > { %5375 = vmatpush2.bf16.msra.mxu1 %v16606_v6  ;;  %5335 = vmatprep.subr.bf16.mxu0 %v17101_v7  ;;  %v16766_v7 = vcombine.low %v628_v48, %v636_v49 }
 0x14b   : > { %5376 = vmatprep.subr.bf16.mxu1 %v16591_v8 }
 0x14d   : > { %5336 = vmatpush2.bf16.msra.mxu0 %v17100_v13  ;;  %v596_v13 = vld [vmem:[%s26499_s1 + $0x998] sm:$0xff] }
 0x14e   : > { %5377 = vmatpush2.bf16.msra.mxu1 %v16590_v14  ;;  %5337 = vmatprep.subr.bf16.mxu0 %v17085_v15  ;;  %v604_v14 = vld [vmem:[%s26499_s1 + $0x9d8] sm:$0xff] }
 0x14f   : > { %5378 = vmatprep.subr.bf16.mxu1 %v16575_v17  ;;  %v852_v15 = vld [vmem:[%s26499_s1 + $0x1198] sm:$0xff]  ;;  %v16735_v22 = vcombine.high %v596_v13, %v604_v14  ;;  %v16734_v29 = vcombine.low %v596_v13, %v604_v14 }
 0x150   : > { %v860_v17 = vld [vmem:[%s26499_s1 + $0x11d8] sm:$0xff] }
 0x151   : > { %5338 = vmatpush2.bf16.msra.mxu0 %v17084_v24  ;;  %v16991_v23 = vcombine.high %v852_v15, %v860_v17  ;;  %v580_v24 = vld [vmem:[%s26499_s1 + $0x918] sm:$0xff]  ;;  %v16990_v31 = vcombine.low %v852_v15, %v860_v17 }
 0x152   : > { %5379 = vmatpush2.bf16.msra.mxu1 %v16574_v25  ;;  %5339 = vmatprep.subr.bf16.mxu0 %v17069_v26  ;;  %v588_v25 = vld [vmem:[%s26499_s1 + $0x958] sm:$0xff] }
 0x153   : > { %5380 = vmatprep.subr.bf16.mxu1 %v16559_v27  ;;  %v836_v26 = vld [vmem:[%s26499_s1 + $0x1118] sm:$0xff]  ;;  %v16719_v32 = vcombine.high %v580_v24, %v588_v25  ;;  %v16718_v39 = vcombine.low %v580_v24, %v588_v25 }
 0x154   : > { %v844_v27 = vld [vmem:[%s26499_s1 + $0x1158] sm:$0xff] }
 0x155   : > { %5340 = vmatpush2.bf16.msra.mxu0 %v17068_v35  ;;  %v16975_v34 = vcombine.high %v836_v26, %v844_v27  ;;  %v564_v35 = vld [vmem:[%s26499_s1 + $0x898] sm:$0xff]  ;;  %v16974_v40 = vcombine.low %v836_v26, %v844_v27 }
 0x156   : > { %5381 = vmatpush2.bf16.msra.mxu1 %v16558_v36  ;;  %5391 = vmatprep.subr.bf16.mxu0 %v16799_v37  ;;  %v572_v36 = vld [vmem:[%s26499_s1 + $0x8d8] sm:$0xff] }
 0x157   : > { %5432 = vmatprep.subr.bf16.mxu1 %v17055_v38  ;;  %v820_v37 = vld [vmem:[%s26499_s1 + $0x1098] sm:$0xff]  ;;  %v16703_v41 = vcombine.high %v564_v35, %v572_v36  ;;  %v16702_v48 = vcombine.low %v564_v35, %v572_v36 }
 0x158   : > { %v5097_v50 = vpop.f32.mrf.mxu0  ;;  %5342 = vmatmul.mubr.bf16.vlgmr.msra.gmra.mxu0 %v19815_v33  ;;  %v828_v38 = vld [vmem:[%s26499_s1 + $0x10d8] sm:$0xff] }
 0x159   : > { %v20440_v55 = vadd.f32 %v5097_v50, %v20240_v19  ;;  %v20442_v56 = vpop.f32.mrf.mxu1  ;;  %5383 = vmatmul.mubr.bf16.vlgmr.msra.gmra.mxu1 %v19605_v16  ;;  %5392 = vmatpush1.bf16.msra.mxu0 %v16798_v43  ;;  %v612_v19 = vld [vmem:[%s26499_s1 + $0xa18] sm:$0xff]  ;;  %v16959_v42 = vcombine.high %v820_v37, %v828_v38  ;;  %v16958_v49 = vcombine.low %v820_v37, %v828_v38 }
 0x15a   : > { %5433 = vmatpush1.bf16.msra.mxu1 %v17054_v45  ;;  %v5099_v60 = vpop.f32.mrf.mxu0  ;;  %5393 = vmatprep.subr.bf16.mxu0 %v16783_v46  ;;  %v16751_v10 = vcombine.high %v612_v19, %v620_v3  ;;  %v16750_v18 = vcombine.low %v612_v19, %v620_v3  ;;  %v548_v43 = vld [vmem:[%s26499_s1 + $0x818] sm:$0xff] }
 0x15b   : > { %v20446_v0 = vadd.f32 %v5099_v60, %v20256_v30  ;;  %v20448_v1 = vpop.f32.mrf.mxu1  ;;  %5434 = vmatprep.subr.bf16.mxu1 %v17039_v47  ;;  %5423 = vmatprep.mubr.bf16.mxu0 %v19479_v59  ;;  %v868_v30 = vld [vmem:[%s26499_s1 + $0x1218] sm:$0xff] }
 0x15c   : > { %v5101_v4 = vpop.f32.mrf.mxu0  ;;  %5464 = vmatprep.mubr.bf16.mxu1 %v19625_v28  ;;  %v17007_v12 = vcombine.high %v868_v30, %v876_v5  ;;  %v17006_v21 = vcombine.low %v868_v30, %v876_v5  ;;  %v556_v45 = vld [vmem:[%s26499_s1 + $0x858] sm:$0xff] }
 0x15d   : > { %v5142_v6 = vpop.f32.mrf.mxu1  ;;  %5394 = vmatpush1.bf16.msra.mxu0 %v16782_v57  ;;  %v804_v46 = vld [vmem:[%s26499_s1 + $0x1018] sm:$0xff]  ;;  %v16687_v50 = vcombine.high %v548_v43, %v556_v45 }
 0x15e   : > { %5435 = vmatpush1.bf16.msra.mxu1 %v17038_v61  ;;  %v5102_v8 = vpop.f32.mrf.mxu0  ;;  %5395 = vmatprep.subr.bf16.mxu0 %v16767_v62  ;;  %v812_v47 = vld [vmem:[%s26499_s1 + $0x1058] sm:$0xff]  ;;  %v16686_v62 = vcombine.low %v548_v43, %v556_v45 }
 0x15f   : > { %v5143_v11 = vpop.f32.mrf.mxu1  ;;  %5436 = vmatprep.subr.bf16.mxu1 %v17023_v2  ;;  %v16943_v51 = vcombine.high %v804_v46, %v812_v47  ;;  %v796_v57 = vld [vmem:[%s26499_s1 + $0xfd8] sm:$0xff]  ;;  %v16942_v2 = vcombine.low %v804_v46, %v812_v47 }
 0x160   : > { %v1044_v60 = vld [vmem:[%s26499_s1 + $0x1798] sm:$0xff]  ;;  %v16927_v19 = vcombine.high %v788_v53, %v796_v57 }
 0x161   : > { %5396 = vmatpush1.bf16.msra.mxu0 %v16766_v7  ;;  %v1052_v61 = vld [vmem:[%s26499_s1 + $0x17d8] sm:$0xff]  ;;  %v16926_v7 = vcombine.low %v788_v53, %v796_v57 }
 0x162   : > { %5437 = vmatpush1.bf16.msra.mxu1 %v17022_v9  ;;  %5397 = vmatprep.subr.bf16.mxu0 %v16751_v10  ;;  %v17183_v3 = vcombine.high %v1044_v60, %v1052_v61  ;;  %v772_v4 = vld [vmem:[%s26499_s1 + $0xf18] sm:$0xff]  ;;  %v17182_v8 = vcombine.low %v1044_v60, %v1052_v61 }
 0x163   : > { %5438 = vmatprep.subr.bf16.mxu1 %v17007_v12  ;;  %v780_v30 = vld [vmem:[%s26499_s1 + $0xf58] sm:$0xff] }
 0x164   : > { %v1028_v5 = vld [vmem:[%s26499_s1 + $0x1718] sm:$0xff]  ;;  %v16911_v9 = vcombine.high %v772_v4, %v780_v30  ;;  %v16910_v15 = vcombine.low %v772_v4, %v780_v30 }
 0x165   : > { %5398 = vmatpush1.bf16.msra.mxu0 %v16750_v18  ;;  %v1036_v6 = vld [vmem:[%s26499_s1 + $0x1758] sm:$0xff] }
 0x166   : > { %5439 = vmatpush1.bf16.msra.mxu1 %v17006_v21  ;;  %5399 = vmatprep.subr.bf16.mxu0 %v16735_v22  ;;  %v17167_v10 = vcombine.high %v1028_v5, %v1036_v6  ;;  %v756_v11 = vld [vmem:[%s26499_s1 + $0xe98] sm:$0xff]  ;;  %v17166_v17 = vcombine.low %v1028_v5, %v1036_v6 }
 0x167   : > { %5440 = vmatprep.subr.bf16.mxu1 %v16991_v23  ;;  %v764_v12 = vld [vmem:[%s26499_s1 + $0xed8] sm:$0xff] }
 0x168   : > { %v1012_v13 = vld [vmem:[%s26499_s1 + $0x1698] sm:$0xff]  ;;  %v16895_v18 = vcombine.high %v756_v11, %v764_v12  ;;  %v16894_v26 = vcombine.low %v756_v11, %v764_v12  ;;  %v413_v11 = vld [vmem:[%s26499_s1 + $0x3e0] sm:$0xff] }
 0x169   : > { %5400 = vmatpush1.bf16.msra.mxu0 %v16734_v29  ;;  %v1020_v14 = vld [vmem:[%s26499_s1 + $0x16d8] sm:$0xff]  ;;  %v661_v12 = vld [vmem:[%s26499_s1 + $0xba0] sm:$0xff] }
 0x16a   : > { %5441 = vmatpush1.bf16.msra.mxu1 %v16990_v31  ;;  %5401 = vmatprep.subr.bf16.mxu0 %v16719_v32  ;;  %v17151_v21 = vcombine.high %v1012_v13, %v1020_v14  ;;  %v740_v22 = vld [vmem:[%s26499_s1 + $0xe18] sm:$0xff]  ;;  %v17150_v27 = vcombine.low %v1012_v13, %v1020_v14  ;;  %v669_v13 = vld [vmem:[%s26499_s1 + $0xbe0] sm:$0xff]  ;;  %v20624_v14 = vsub.s32 3, %v20185_v44 }
 0x16b   : > { %5442 = vmatprep.subr.bf16.mxu1 %v16975_v34  ;;  %v748_v23 = vld [vmem:[%s26499_s1 + $0xe58] sm:$0xff] }
 0x16c   : > { %v996_v24 = vld [vmem:[%s26499_s1 + $0x1618] sm:$0xff]  ;;  %v16879_v29 = vcombine.high %v740_v22, %v748_v23  ;;  %v16878_v37 = vcombine.low %v740_v22, %v748_v23  ;;  %v16801_v22 = vcombine.high %v661_v12, %v669_v13  ;;  %v389_v23 = vld [vmem:[%s26499_s1 + $0x320] sm:$0xff] }
 0x16d   : > { %5402 = vmatpush1.bf16.msra.mxu0 %v16718_v39  ;;  %v1004_v25 = vld [vmem:[%s26499_s1 + $0x1658] sm:$0xff] }
 0x16e   : > { %5443 = vmatpush1.bf16.msra.mxu1 %v16974_v40  ;;  %5403 = vmatprep.subr.bf16.mxu0 %v16703_v41  ;;  %v17135_v31 = vcombine.high %v996_v24, %v1004_v25  ;;  %v724_v32 = vld [vmem:[%s26499_s1 + $0xd98] sm:$0xff]  ;;  %v17134_v38 = vcombine.low %v996_v24, %v1004_v25  ;;  %v397_v24 = vld [vmem:[%s26499_s1 + $0x360] sm:$0xff] }
 0x16f   : > { %5444 = vmatprep.subr.bf16.mxu1 %v16959_v42  ;;  %v732_v34 = vld [vmem:[%s26499_s1 + $0xdd8] sm:$0xff]  ;;  %v645_v25 = vld [vmem:[%s26499_s1 + $0xb20] sm:$0xff] }
 0x170   : > { %v980_v35 = vld [vmem:[%s26499_s1 + $0x1598] sm:$0xff]  ;;  %v16863_v39 = vcombine.high %v724_v32, %v732_v34  ;;  %v16862_v46 = vcombine.low %v724_v32, %v732_v34  ;;  %v16529_v32 = vcombine.high %v389_v23, %v397_v24 }
 0x171   : > { %5404 = vmatpush1.bf16.msra.mxu0 %v16702_v48  ;;  %v988_v36 = vld [vmem:[%s26499_s1 + $0x15d8] sm:$0xff] }
 0x172   : > { %5445 = vmatpush1.bf16.msra.mxu1 %v16958_v49  ;;  %5405 = vmatprep.subr.bf16.mxu0 %v16687_v50  ;;  %v17119_v40 = vcombine.high %v980_v35, %v988_v36  ;;  %v708_v41 = vld [vmem:[%s26499_s1 + $0xd18] sm:$0xff]  ;;  %v17118_v47 = vcombine.low %v980_v35, %v988_v36  ;;  %v373_v36 = vld [vmem:[%s26499_s1 + $0x2a0] sm:$0xff] }
 0x173   : > { %5446 = vmatprep.subr.bf16.mxu1 %v16943_v51  ;;  %v716_v42 = vld [vmem:[%s26499_s1 + $0xd58] sm:$0xff] }
 0x174   : > { %v964_v43 = vld [vmem:[%s26499_s1 + $0x1518] sm:$0xff]  ;;  %v16847_v48 = vcombine.high %v708_v41, %v716_v42  ;;  %v16846_v60 = vcombine.low %v708_v41, %v716_v42  ;;  %v16528_v42 = vcombine.low %v389_v23, %v397_v24 }
 0x175   : > { %5406 = vmatpush1.bf16.msra.mxu0 %v16686_v62  ;;  %v972_v45 = vld [vmem:[%s26499_s1 + $0x1558] sm:$0xff] }
 0x176   : > { %5447 = vmatpush1.bf16.msra.mxu1 %v16942_v2  ;;  %5407 = vmatprep.subr.bf16.mxu0 %v16927_v19  ;;  %v17103_v49 = vcombine.high %v964_v43, %v972_v45  ;;  %v692_v50 = vld [vmem:[%s26499_s1 + $0xc98] sm:$0xff]  ;;  %v17102_v61 = vcombine.low %v964_v43, %v972_v45 }
 0x177   : > { %5448 = vmatprep.subr.bf16.mxu1 %v17183_v3  ;;  %v700_v51 = vld [vmem:[%s26499_s1 + $0xcd8] sm:$0xff] }
 0x178   : > { %v948_v53 = vld [vmem:[%s26499_s1 + $0x1498] sm:$0xff]  ;;  %v16831_v62 = vcombine.high %v692_v50, %v700_v51  ;;  %v16830_v5 = vcombine.low %v692_v50, %v700_v51  ;;  %v365_v51 = vld [vmem:[%s26499_s1 + $0x260] sm:$0xff] }
 0x179   : > { %5408 = vmatpush2.bf16.msra.mxu0 %v16926_v7  ;;  %v956_v57 = vld [vmem:[%s26499_s1 + $0x14d8] sm:$0xff] }
 0x17a   : > { %5449 = vmatpush2.bf16.msra.mxu1 %v17182_v8  ;;  %5409 = vmatprep.subr.bf16.mxu0 %v16911_v9  ;;  %v17087_v2 = vcombine.high %v948_v53, %v956_v57  ;;  %v676_v19 = vld [vmem:[%s26499_s1 + $0xc18] sm:$0xff]  ;;  %v17086_v6 = vcombine.low %v948_v53, %v956_v57  ;;  %v20609_v8 = vsub.s32 2, %v20185_v44  ;;  %v613_v57 = vld [vmem:[%s26499_s1 + $0xa20] sm:$0xff] }
 0x17b   : > { %5450 = vmatprep.subr.bf16.mxu1 %v17167_v10  ;;  %v684_v3 = vld [vmem:[%s26499_s1 + $0xc58] sm:$0xff]  ;;  %v405_v10 = vld [vmem:[%s26499_s1 + $0x3a0] sm:$0xff] }
 0x17c   : > { %v932_v4 = vld [vmem:[%s26499_s1 + $0x1418] sm:$0xff]  ;;  %v16815_v7 = vcombine.high %v676_v19, %v684_v3 }
 0x17d   : > { %5410 = vmatpush2.bf16.msra.mxu0 %v16910_v15  ;;  %v940_v30 = vld [vmem:[%s26499_s1 + $0x1458] sm:$0xff]  ;;  %v16814_v15 = vcombine.low %v676_v19, %v684_v3 }
 0x17e   : > { %5451 = vmatpush2.bf16.msra.mxu1 %v17166_v17  ;;  %5411 = vmatprep.subr.bf16.mxu0 %v16895_v18  ;;  %v17071_v9 = vcombine.high %v932_v4, %v940_v30  ;;  %v17070_v17 = vcombine.low %v932_v4, %v940_v30  ;;  %v16545_v18 = vcombine.high %v405_v10, %v413_v11 }
 0x17f   : > { %5452 = vmatprep.subr.bf16.mxu1 %v17151_v21  ;;  %v1072_v21 = vrot.slane %v20202_v52, %v20609_v8 }
 0x181   : > { %5412 = vmatpush2.bf16.msra.mxu0 %v16894_v26  ;;  %v653_v26 = vld [vmem:[%s26499_s1 + $0xb60] sm:$0xff]  ;;  %v5139_v34 = vadd.f32 %v20442_v56, %v1072_v21 }
 0x182   : > { %5453 = vmatpush2.bf16.msra.mxu1 %v17150_v27  ;;  %5413 = vmatprep.subr.bf16.mxu0 %v16879_v29  ;;  %v1076_v27 = vrot.slane %v20202_v52, %v20624_v14  ;;  %v16544_v29 = vcombine.low %v405_v10, %v413_v11  ;;  %v16785_v35 = vcombine.high %v645_v25, %v653_v26  ;;  %v629_v52 = vld [vmem:[%s26499_s1 + $0xaa0] sm:$0xff] }
 0x183   : > { %5454 = vmatprep.subr.bf16.mxu1 %v17135_v31  ;;  %v16800_v31 = vcombine.low %v661_v12, %v669_v13  ;;  %v637_v56 = vld [vmem:[%s26499_s1 + $0xae0] sm:$0xff]  ;;  %v16784_v45 = vcombine.low %v645_v25, %v653_v26 }
 0x184   : > { %v16769_v50 = vcombine.high %v629_v52, %v637_v56  ;;  %v16768_v3 = vcombine.low %v629_v52, %v637_v56  ;;  %v605_v10 = vld [vmem:[%s26499_s1 + $0x9e0] sm:$0xff] }
 0x185   : > { %5414 = vmatpush2.bf16.msra.mxu0 %v16878_v37  ;;  %v381_v37 = vld [vmem:[%s26499_s1 + $0x2e0] sm:$0xff] }
 0x186   : > { %5455 = vmatpush2.bf16.msra.mxu1 %v17134_v38  ;;  %5415 = vmatprep.subr.bf16.mxu0 %v16863_v39  ;;  %v5141_v39 = vadd.f32 %v20448_v1, %v1076_v27  ;;  %v357_v1 = vld [vmem:[%s26499_s1 + $0x220] sm:$0xff] }
 0x187   : > { %5456 = vmatprep.subr.bf16.mxu1 %v17119_v40  ;;  %v16497_v4 = vcombine.high %v357_v1, %v365_v51  ;;  %v16496_v11 = vcombine.low %v357_v1, %v365_v51  ;;  %v581_v21 = vld [vmem:[%s26499_s1 + $0x920] sm:$0xff] }
 0x188   : > { %v309_v27 = vld [vmem:[%s26499_s1 + $0xa0] sm:$0xff] }
 0x189   : > { %5416 = vmatpush2.bf16.msra.mxu0 %v16862_v46  ;;  %v16513_v46 = vcombine.high %v373_v36, %v381_v37  ;;  %v301_v52 = vld [vmem:[%s26499_s1 + $0x60] sm:$0xff] }
 0x18a   : > { %5457 = vmatpush2.bf16.msra.mxu1 %v17118_v47  ;;  %5417 = vmatprep.subr.bf16.mxu0 %v16847_v48  ;;  %v549_v56 = vld [vmem:[%s26499_s1 + $0x820] sm:$0xff] }
 0x18b   : > { %5458 = vmatprep.subr.bf16.mxu1 %v17103_v49 }
 0x18d   : > { %5418 = vmatpush2.bf16.msra.mxu0 %v16846_v60  ;;  %v621_v60 = vld [vmem:[%s26499_s1 + $0xa60] sm:$0xff] }
 0x18e   : > { %5459 = vmatpush2.bf16.msra.mxu1 %v17102_v61  ;;  %5419 = vmatprep.subr.bf16.mxu0 %v16831_v62  ;;  %v16752_v12 = vcombine.low %v613_v57, %v621_v60 }
 0x18f   : > { %5460 = vmatprep.subr.bf16.mxu1 %v17087_v2  ;;  %v16512_v2 = vcombine.low %v373_v36, %v381_v37 }
 0x191   : > { %5420 = vmatpush2.bf16.msra.mxu0 %v16830_v5  ;;  %v16753_v5 = vcombine.high %v613_v57, %v621_v60  ;;  %v517_v57 = vld [vmem:[%s26499_s1 + $0x720] sm:$0xff] }
 0x192   : > { %5461 = vmatpush2.bf16.msra.mxu1 %v17086_v6  ;;  %5421 = vmatprep.subr.bf16.mxu0 %v16815_v7  ;;  %v341_v6 = vld [vmem:[%s26499_s1 + $0x1a0] sm:$0xff] }
 0x193   : > { %5462 = vmatprep.subr.bf16.mxu1 %v17071_v9  ;;  %v349_v7 = vld [vmem:[%s26499_s1 + $0x1e0] sm:$0xff] }
 0x194   : > { %v597_v9 = vld [vmem:[%s26499_s1 + $0x9a0] sm:$0xff]  ;;  %v16481_v13 = vcombine.high %v341_v6, %v349_v7  ;;  %v16480_v23 = vcombine.low %v341_v6, %v349_v7 }
 0x195   : > { %5422 = vmatpush2.bf16.msra.mxu0 %v16814_v15  ;;  %v16737_v15 = vcombine.high %v597_v9, %v605_v10  ;;  %v16736_v24 = vcombine.low %v597_v9, %v605_v10  ;;  %v525_v60 = vld [vmem:[%s26499_s1 + $0x760] sm:$0xff] }
 0x196   : > { %5463 = vmatpush2.bf16.msra.mxu1 %v17070_v17  ;;  %5473 = vmatprep.subr.bf16.mxu0 %v16545_v18  ;;  %v325_v17 = vld [vmem:[%s26499_s1 + $0x120] sm:$0xff]  ;;  %v16656_v10 = vcombine.low %v517_v57, %v525_v60 }
 0x197   : > { %5514 = vmatprep.subr.bf16.mxu1 %v16801_v22  ;;  %v333_v18 = vld [vmem:[%s26499_s1 + $0x160] sm:$0xff] }
 0x198   : > { %v5179_v38 = vpop.f32.mrf.mxu0  ;;  %5424 = vmatmul.mubr.bf16.vlgmr.msra.gmra.mxu0 %v19614_v20  ;;  %v589_v22 = vld [vmem:[%s26499_s1 + $0x960] sm:$0xff]  ;;  %v16465_v25 = vcombine.high %v325_v17, %v333_v18 }
 0x199   : > { %v5180_v40 = vadd.f32 %v5179_v38, %v5139_v34  ;;  %v5220_v41 = vpop.f32.mrf.mxu1  ;;  %5465 = vmatmul.mubr.bf16.vlgmr.msra.gmra.mxu1 %v19815_v33  ;;  %5474 = vmatpush1.bf16.msra.mxu0 %v16544_v29  ;;  %v16721_v26 = vcombine.high %v581_v21, %v589_v22  ;;  %v317_v29 = vld [vmem:[%s26499_s1 + $0xe0] sm:$0xff]  ;;  %v16464_v34 = vcombine.low %v325_v17, %v333_v18 }
 0x19a   : > { %5515 = vmatpush1.bf16.msra.mxu1 %v16800_v31  ;;  %v5181_v43 = vpop.f32.mrf.mxu0  ;;  %5475 = vmatprep.subr.bf16.mxu0 %v16529_v32  ;;  %v565_v31 = vld [vmem:[%s26499_s1 + $0x8a0] sm:$0xff]  ;;  %v16449_v36 = vcombine.high %v309_v27, %v317_v29 }
 0x19b   : > { %v20658_v47 = vadd.f32 %v5220_v41, %v5180_v40  ;;  %v5182_v48 = vadd.f32 %v5181_v43, %v5141_v39  ;;  %v5222_v49 = vpop.f32.mrf.mxu1  ;;  %5516 = vmatprep.subr.bf16.mxu1 %v16785_v35  ;;  %5505 = vmatprep.mubr.bf16.mxu0 %v19477_v58  ;;  %v573_v32 = vld [vmem:[%s26499_s1 + $0x8e0] sm:$0xff]  ;;  %v16720_v35 = vcombine.low %v581_v21, %v589_v22 }
 0x19c   : > { %v5183_v53 = vpop.f32.mrf.mxu0  ;;  %5546 = vmatprep.mubr.bf16.mxu1 %v19479_v59  ;;  %v16705_v37 = vcombine.high %v565_v31, %v573_v32  ;;  %v293_v38 = vld [vmem:[%s26499_s1 + $0x20] sm:$0xff]  ;;  %v16448_v40 = vcombine.low %v309_v27, %v317_v29  ;;  %v16704_v41 = vcombine.low %v565_v31, %v573_v32 }
 0x19d   : > { %v20674_v61 = vadd.f32 %v5222_v49, %v5182_v48  ;;  %v5224_v62 = vpop.f32.mrf.mxu1  ;;  %5476 = vmatpush1.bf16.msra.mxu0 %v16528_v42  ;;  %v557_v39 = vld [vmem:[%s26499_s1 + $0x860] sm:$0xff]  ;;  %v16433_v42 = vcombine.high %v293_v38, %v301_v52 }
 0x19e   : > { %5517 = vmatpush1.bf16.msra.mxu1 %v16784_v45  ;;  %v5184_v19 = vpop.f32.mrf.mxu0  ;;  %5477 = vmatprep.subr.bf16.mxu0 %v16513_v46  ;;  %v16689_v43 = vcombine.high %v549_v56, %v557_v39  ;;  %v533_v45 = vld [vmem:[%s26499_s1 + $0x7a0] sm:$0xff]  ;;  %v16688_v1 = vcombine.low %v549_v56, %v557_v39 }
 0x19f   : > { %v5225_v30 = vpop.f32.mrf.mxu1  ;;  %5518 = vmatprep.subr.bf16.mxu1 %v16769_v50  ;;  %v541_v46 = vld [vmem:[%s26499_s1 + $0x7e0] sm:$0xff]  ;;  %v16432_v50 = vcombine.low %v293_v38, %v301_v52 }
 0x1a0   : > { %v789_v48 = vld [vmem:[%s26499_s1 + $0xfa0] sm:$0xff]  ;;  %v16673_v51 = vcombine.high %v533_v45, %v541_v46  ;;  %v16672_v19 = vcombine.low %v533_v45, %v541_v46 }
 0x1a1   : > { %5478 = vmatpush1.bf16.msra.mxu0 %v16512_v2  ;;  %v797_v49 = vld [vmem:[%s26499_s1 + $0xfe0] sm:$0xff] }
 0x1a2   : > { %5519 = vmatpush1.bf16.msra.mxu1 %v16768_v3  ;;  %5479 = vmatprep.subr.bf16.mxu0 %v16497_v4  ;;  %v16929_v53 = vcombine.high %v789_v48, %v797_v49  ;;  %v773_v62 = vld [vmem:[%s26499_s1 + $0xf20] sm:$0xff]  ;;  %v16928_v3 = vcombine.low %v789_v48, %v797_v49  ;;  %v16657_v4 = vcombine.high %v517_v57, %v525_v60 }
 0x1a3   : > { %5520 = vmatprep.subr.bf16.mxu1 %v16753_v5  ;;  %v781_v2 = vld [vmem:[%s26499_s1 + $0xf60] sm:$0xff] }
 0x1a4   : > { %v16913_v30 = vcombine.high %v773_v62, %v781_v2  ;;  %v501_v5 = vld [vmem:[%s26499_s1 + $0x6a0] sm:$0xff] }
 0x1a5   : > { %5480 = vmatpush1.bf16.msra.mxu0 %v16496_v11  ;;  %v509_v6 = vld [vmem:[%s26499_s1 + $0x6e0] sm:$0xff]  ;;  %v16912_v11 = vcombine.low %v773_v62, %v781_v2 }
 0x1a6   : > { %5521 = vmatpush1.bf16.msra.mxu1 %v16752_v12  ;;  %5481 = vmatprep.subr.bf16.mxu0 %v16481_v13  ;;  %v757_v7 = vld [vmem:[%s26499_s1 + $0xea0] sm:$0xff]  ;;  %v16641_v12 = vcombine.high %v501_v5, %v509_v6  ;;  %v16640_v22 = vcombine.low %v501_v5, %v509_v6  ;;  %v406_v6 = vld [vmem:[%s26499_s1 + $0x3a8] sm:$0xff] }
 0x1a7   : > { %5522 = vmatprep.subr.bf16.mxu1 %v16737_v15  ;;  %v765_v9 = vld [vmem:[%s26499_s1 + $0xee0] sm:$0xff] }
 0x1a8   : > { %v16897_v13 = vcombine.high %v757_v7, %v765_v9  ;;  %v485_v15 = vld [vmem:[%s26499_s1 + $0x620] sm:$0xff] }
 0x1a9   : > { %5482 = vmatpush1.bf16.msra.mxu0 %v16480_v23  ;;  %v493_v17 = vld [vmem:[%s26499_s1 + $0x660] sm:$0xff]  ;;  %v16896_v23 = vcombine.low %v757_v7, %v765_v9  ;;  %v414_v7 = vld [vmem:[%s26499_s1 + $0x3e8] sm:$0xff] }
 0x1aa   : > { %5523 = vmatpush1.bf16.msra.mxu1 %v16736_v24  ;;  %5483 = vmatprep.subr.bf16.mxu0 %v16465_v25  ;;  %v741_v18 = vld [vmem:[%s26499_s1 + $0xe20] sm:$0xff]  ;;  %v16625_v24 = vcombine.high %v485_v15, %v493_v17  ;;  %v16624_v32 = vcombine.low %v485_v15, %v493_v17  ;;  %v20836_v15 = vsub.s32 5, %v20185_v44 }
 0x1ab   : > { %5524 = vmatprep.subr.bf16.mxu1 %v16721_v26  ;;  %v749_v21 = vld [vmem:[%s26499_s1 + $0xe60] sm:$0xff] }
 0x1ac   : > { %v16881_v25 = vcombine.high %v741_v18, %v749_v21  ;;  %v469_v26 = vld [vmem:[%s26499_s1 + $0x5a0] sm:$0xff] }
 0x1ad   : > { %5484 = vmatpush1.bf16.msra.mxu0 %v16464_v34  ;;  %v477_v27 = vld [vmem:[%s26499_s1 + $0x5e0] sm:$0xff]  ;;  %v16880_v34 = vcombine.low %v741_v18, %v749_v21  ;;  %v390_v21 = vld [vmem:[%s26499_s1 + $0x328] sm:$0xff] }
 0x1ae   : > { %5525 = vmatpush1.bf16.msra.mxu1 %v16720_v35  ;;  %5485 = vmatprep.subr.bf16.mxu0 %v16449_v36  ;;  %v725_v29 = vld [vmem:[%s26499_s1 + $0xda0] sm:$0xff]  ;;  %v16609_v35 = vcombine.high %v469_v26, %v477_v27  ;;  %v16608_v39 = vcombine.low %v469_v26, %v477_v27  ;;  %v16546_v26 = vcombine.low %v406_v6, %v414_v7 }
 0x1af   : > { %5526 = vmatprep.subr.bf16.mxu1 %v16705_v37  ;;  %v733_v31 = vld [vmem:[%s26499_s1 + $0xde0] sm:$0xff] }
 0x1b0   : > { %v16865_v36 = vcombine.high %v725_v29, %v733_v31  ;;  %v453_v37 = vld [vmem:[%s26499_s1 + $0x520] sm:$0xff] }
 0x1b1   : > { %5486 = vmatpush1.bf16.msra.mxu0 %v16448_v40  ;;  %v461_v38 = vld [vmem:[%s26499_s1 + $0x560] sm:$0xff]  ;;  %v16864_v40 = vcombine.low %v725_v29, %v733_v31 }
 0x1b2   : > { %5527 = vmatpush1.bf16.msra.mxu1 %v16704_v41  ;;  %5487 = vmatprep.subr.bf16.mxu0 %v16433_v42  ;;  %v709_v52 = vld [vmem:[%s26499_s1 + $0xd20] sm:$0xff]  ;;  %v16593_v41 = vcombine.high %v453_v37, %v461_v38  ;;  %v16592_v49 = vcombine.low %v453_v37, %v461_v38  ;;  %v382_v37 = vld [vmem:[%s26499_s1 + $0x2e8] sm:$0xff] }
 0x1b3   : > { %5528 = vmatprep.subr.bf16.mxu1 %v16689_v43  ;;  %v717_v56 = vld [vmem:[%s26499_s1 + $0xd60] sm:$0xff] }
 0x1b4   : > { %v16849_v42 = vcombine.high %v709_v52, %v717_v56  ;;  %v437_v43 = vld [vmem:[%s26499_s1 + $0x4a0] sm:$0xff] }
 0x1b5   : > { %5488 = vmatpush1.bf16.msra.mxu0 %v16432_v50  ;;  %v445_v45 = vld [vmem:[%s26499_s1 + $0x4e0] sm:$0xff]  ;;  %v16848_v50 = vcombine.low %v709_v52, %v717_v56 }
 0x1b6   : > { %5529 = vmatpush1.bf16.msra.mxu1 %v16688_v1  ;;  %5489 = vmatprep.subr.bf16.mxu0 %v16673_v51  ;;  %v693_v46 = vld [vmem:[%s26499_s1 + $0xca0] sm:$0xff]  ;;  %v16577_v1 = vcombine.high %v437_v43, %v445_v45  ;;  %v16576_v2 = vcombine.low %v437_v43, %v445_v45 }
 0x1b7   : > { %5530 = vmatprep.subr.bf16.mxu1 %v16929_v53  ;;  %v701_v48 = vld [vmem:[%s26499_s1 + $0xce0] sm:$0xff] }
 0x1b8   : > { %v16833_v51 = vcombine.high %v693_v46, %v701_v48  ;;  %v421_v53 = vld [vmem:[%s26499_s1 + $0x420] sm:$0xff] }
 0x1b9   : > { %5490 = vmatpush2.bf16.msra.mxu0 %v16672_v19  ;;  %v429_v57 = vld [vmem:[%s26499_s1 + $0x460] sm:$0xff]  ;;  %v16832_v19 = vcombine.low %v693_v46, %v701_v48 }
 0x1ba   : > { %5531 = vmatpush2.bf16.msra.mxu1 %v16928_v3  ;;  %5491 = vmatprep.subr.bf16.mxu0 %v16657_v4  ;;  %v677_v60 = vld [vmem:[%s26499_s1 + $0xc20] sm:$0xff]  ;;  %v16561_v3 = vcombine.high %v421_v53, %v429_v57  ;;  %v16560_v9 = vcombine.low %v421_v53, %v429_v57 }
 0x1bb   : > { %5532 = vmatprep.subr.bf16.mxu1 %v16913_v30  ;;  %v685_v62 = vld [vmem:[%s26499_s1 + $0xc60] sm:$0xff] }
 0x1bc   : > { %v16817_v4 = vcombine.high %v677_v60, %v685_v62  ;;  %v917_v30 = vld [vmem:[%s26499_s1 + $0x13a0] sm:$0xff] }
 0x1bd   : > { %5492 = vmatpush2.bf16.msra.mxu0 %v16656_v10  ;;  %v925_v5 = vld [vmem:[%s26499_s1 + $0x13e0] sm:$0xff]  ;;  %v20833_v10 = vsub.s32 4, %v20185_v44 }
 0x1be   : > { %5533 = vmatpush2.bf16.msra.mxu1 %v16912_v11  ;;  %5493 = vmatprep.subr.bf16.mxu0 %v16641_v12  ;;  %v16816_v11 = vcombine.low %v677_v60, %v685_v62  ;;  %v17057_v12 = vcombine.high %v917_v30, %v925_v5  ;;  %v901_v17 = vld [vmem:[%s26499_s1 + $0x1320] sm:$0xff] }
 0x1bf   : > { %5534 = vmatprep.subr.bf16.mxu1 %v16897_v13  ;;  %v16547_v13 = vcombine.high %v406_v6, %v414_v7  ;;  %v909_v18 = vld [vmem:[%s26499_s1 + $0x1360] sm:$0xff]  ;;  %v342_v6 = vld [vmem:[%s26499_s1 + $0x1a8] sm:$0xff] }
 0x1c0   : > { %v17041_v27 = vcombine.high %v901_v17, %v909_v18  ;;  %v17040_v56 = vcombine.low %v901_v17, %v909_v18  ;;  %v869_v48 = vld [vmem:[%s26499_s1 + $0x1220] sm:$0xff]  ;;  %v350_v7 = vld [vmem:[%s26499_s1 + $0x1e8] sm:$0xff] }
 0x1c1   : > { %5494 = vmatpush2.bf16.msra.mxu0 %v16640_v22  ;;  %v398_v22 = vld [vmem:[%s26499_s1 + $0x368] sm:$0xff]  ;;  %v837_v17 = vld [vmem:[%s26499_s1 + $0x1120] sm:$0xff] }
 0x1c2   : > { %5535 = vmatpush2.bf16.msra.mxu1 %v16896_v23  ;;  %5495 = vmatprep.subr.bf16.mxu0 %v16625_v24  ;;  %v20853_v23 = vld [vmem:[%s26500_s2] sm:$0xff]  ;;  %v16531_v31 = vcombine.high %v390_v21, %v398_v22 }
 0x1c3   : > { %5536 = vmatprep.subr.bf16.mxu1 %v16881_v25  ;;  %v1080_v24 = vrot.slane %v20853_v23, %v20833_v10  ;;  %v17056_v25 = vcombine.low %v917_v30, %v925_v5  ;;  %v1084_v29 = vrot.slane %v20853_v23, %v20836_v15  ;;  %v853_v30 = vld [vmem:[%s26499_s1 + $0x11a0] sm:$0xff] }
 0x1c4   : > { %v861_v5 = vld [vmem:[%s26499_s1 + $0x11e0] sm:$0xff] }
 0x1c5   : > { %5496 = vmatpush2.bf16.msra.mxu0 %v16624_v32  ;;  %v885_v32 = vld [vmem:[%s26499_s1 + $0x12a0] sm:$0xff] }
 0x1c6   : > { %5537 = vmatpush2.bf16.msra.mxu1 %v16880_v34  ;;  %5497 = vmatprep.subr.bf16.mxu0 %v16609_v35  ;;  %v893_v34 = vld [vmem:[%s26499_s1 + $0x12e0] sm:$0xff] }
 0x1c7   : > { %5538 = vmatprep.subr.bf16.mxu1 %v16865_v36  ;;  %v374_v36 = vld [vmem:[%s26499_s1 + $0x2a8] sm:$0xff]  ;;  %v17024_v60 = vcombine.low %v885_v32, %v893_v34  ;;  %v845_v18 = vld [vmem:[%s26499_s1 + $0x1160] sm:$0xff] }
 0x1c8   : > { %v16515_v46 = vcombine.high %v374_v36, %v382_v37 }
 0x1c9   : > { %5498 = vmatpush2.bf16.msra.mxu0 %v16608_v39 }
 0x1ca   : > { %5539 = vmatpush2.bf16.msra.mxu1 %v16864_v40  ;;  %5499 = vmatprep.subr.bf16.mxu0 %v16593_v41  ;;  %v16530_v40 = vcombine.low %v390_v21, %v398_v22  ;;  %v17025_v41 = vcombine.high %v885_v32, %v893_v34  ;;  %v326_v21 = vld [vmem:[%s26499_s1 + $0x128] sm:$0xff] }
 0x1cb   : > { %5540 = vmatprep.subr.bf16.mxu1 %v16849_v42  ;;  %v334_v22 = vld [vmem:[%s26499_s1 + $0x168] sm:$0xff] }
 0x1cc   : > { %v310_v32 = vld [vmem:[%s26499_s1 + $0xa8] sm:$0xff] }
 0x1cd   : > { %5500 = vmatpush2.bf16.msra.mxu0 %v16592_v49  ;;  %v877_v49 = vld [vmem:[%s26499_s1 + $0x1260] sm:$0xff]  ;;  %v318_v34 = vld [vmem:[%s26499_s1 + $0xe8] sm:$0xff] }
 0x1ce   : > { %5541 = vmatpush2.bf16.msra.mxu1 %v16848_v50  ;;  %5501 = vmatprep.subr.bf16.mxu0 %v16577_v1  ;;  %v358_v1 = vld [vmem:[%s26499_s1 + $0x228] sm:$0xff] }
 0x1cf   : > { %5542 = vmatprep.subr.bf16.mxu1 %v16833_v51  ;;  %v366_v51 = vld [vmem:[%s26499_s1 + $0x268] sm:$0xff] }
 0x1d1   : > { %5502 = vmatpush2.bf16.msra.mxu0 %v16576_v2  ;;  %v16514_v2 = vcombine.low %v374_v36, %v382_v37  ;;  %v16466_v36 = vcombine.low %v326_v21, %v334_v22 }
 0x1d2   : > { %5543 = vmatpush2.bf16.msra.mxu1 %v16832_v19  ;;  %5503 = vmatprep.subr.bf16.mxu0 %v16561_v3  ;;  %v17009_v19 = vcombine.high %v869_v48, %v877_v49 }
 0x1d3   : > { %5544 = vmatprep.subr.bf16.mxu1 %v16817_v4  ;;  %v16499_v4 = vcombine.high %v358_v1, %v366_v51 }
 0x1d5   : > { %5504 = vmatpush2.bf16.msra.mxu0 %v16560_v9  ;;  %v17008_v9 = vcombine.low %v869_v48, %v877_v49  ;;  %v1045_v48 = vld [vmem:[%s26499_s1 + $0x17a0] sm:$0xff] }
 0x1d6   : > { %5545 = vmatpush2.bf16.msra.mxu1 %v16816_v11  ;;  %5555 = vmatprep.subr.bf16.mxu0 %v17057_v12  ;;  %v16498_v11 = vcombine.low %v358_v1, %v366_v51  ;;  %v16993_v12 = vcombine.high %v853_v30, %v861_v5  ;;  %v1053_v49 = vld [vmem:[%s26499_s1 + $0x17e0] sm:$0xff]  ;;  %v542_v1 = vld [vmem:[%s26499_s1 + $0x7e8] sm:$0xff] }
 0x1d7   : > { %5596 = vmatprep.subr.bf16.mxu1 %v16547_v13  ;;  %v16483_v13 = vcombine.high %v342_v6, %v350_v7 }
 0x1d8   : > { %v5261_v35 = vpop.f32.mrf.mxu0  ;;  %5506 = vmatmul.mubr.bf16.vlgmr.msra.gmra.mxu0 %v19605_v16 }
 0x1d9   : > { %v5262_v38 = vadd.f32 %v5261_v35, %v1080_v24  ;;  %v5302_v52 = vpop.f32.mrf.mxu1  ;;  %5547 = vmatmul.mubr.bf16.vlgmr.msra.gmra.mxu1 %v19614_v20  ;;  %5556 = vmatpush1.bf16.msra.mxu0 %v17056_v25  ;;  %v16992_v24 = vcombine.low %v853_v30, %v861_v5  ;;  %v16482_v25 = vcombine.low %v342_v6, %v350_v7 }
 0x1da   : > { %5597 = vmatpush1.bf16.msra.mxu1 %v16546_v26  ;;  %v5263_v39 = vpop.f32.mrf.mxu0  ;;  %5557 = vmatprep.subr.bf16.mxu0 %v17041_v27  ;;  %v16977_v26 = vcombine.high %v837_v17, %v845_v18  ;;  %v16467_v27 = vcombine.high %v326_v21, %v334_v22  ;;  %v16976_v35 = vcombine.low %v837_v17, %v845_v18 }
 0x1db   : > { %v20873_v42 = vadd.f32 %v5302_v52, %v5262_v38  ;;  %v5264_v43 = vadd.f32 %v5263_v39, %v1084_v29  ;;  %v5304_v45 = vpop.f32.mrf.mxu1  ;;  %5598 = vmatprep.subr.bf16.mxu1 %v16531_v31  ;;  %5587 = vmatprep.mubr.bf16.mxu0 %v19625_v28  ;;  %v821_v29 = vld [vmem:[%s26499_s1 + $0x10a0] sm:$0xff]  ;;  %v16451_v38 = vcombine.high %v310_v32, %v318_v34  ;;  %v294_v39 = vld [vmem:[%s26499_s1 + $0x28] sm:$0xff] }
 0x1dc   : > { %v5265_v50 = vpop.f32.mrf.mxu0  ;;  %5628 = vmatprep.mubr.bf16.mxu1 %v19477_v58  ;;  %v829_v31 = vld [vmem:[%s26499_s1 + $0x10e0] sm:$0xff]  ;;  %v17184_v30 = vcombine.low %v1045_v48, %v1053_v49 }
 0x1dd   : > { %v20889_v53 = vadd.f32 %v5304_v45, %v5264_v43  ;;  %v5306_v57 = vpop.f32.mrf.mxu1  ;;  %5558 = vmatpush1.bf16.msra.mxu0 %v17040_v56  ;;  %v16961_v37 = vcombine.high %v821_v29, %v829_v31  ;;  %v805_v52 = vld [vmem:[%s26499_s1 + $0x1020] sm:$0xff]  ;;  %v16450_v43 = vcombine.low %v310_v32, %v318_v34  ;;  %v534_v50 = vld [vmem:[%s26499_s1 + $0x7a8] sm:$0xff] }
 0x1de   : > { %5599 = vmatpush1.bf16.msra.mxu1 %v16530_v40  ;;  %v5266_v62 = vpop.f32.mrf.mxu0  ;;  %5559 = vmatprep.subr.bf16.mxu0 %v17025_v41  ;;  %v813_v56 = vld [vmem:[%s26499_s1 + $0x1060] sm:$0xff]  ;;  %v302_v40 = vld [vmem:[%s26499_s1 + $0x68] sm:$0xff]  ;;  %v16960_v41 = vcombine.low %v821_v29, %v829_v31  ;;  %v16674_v5 = vcombine.low %v534_v50, %v542_v1 }
 0x1df   : > { %v5307_v3 = vpop.f32.mrf.mxu1  ;;  %5600 = vmatprep.subr.bf16.mxu1 %v16515_v46  ;;  %v16945_v45 = vcombine.high %v805_v52, %v813_v56  ;;  %v16435_v46 = vcombine.high %v294_v39, %v302_v40  ;;  %v16944_v51 = vcombine.low %v805_v52, %v813_v56  ;;  %v16434_v57 = vcombine.low %v294_v39, %v302_v40 }
 0x1e0   : > { %v16675_v62 = vcombine.high %v534_v50, %v542_v1  ;;  %v518_v3 = vld [vmem:[%s26499_s1 + $0x728] sm:$0xff] }
 0x1e1   : > { %5560 = vmatpush1.bf16.msra.mxu0 %v17024_v60  ;;  %v17185_v60 = vcombine.high %v1045_v48, %v1053_v49 }
 0x1e2   : > { %5601 = vmatpush1.bf16.msra.mxu1 %v16514_v2  ;;  %5561 = vmatprep.subr.bf16.mxu0 %v17009_v19  ;;  %v1029_v2 = vld [vmem:[%s26499_s1 + $0x1720] sm:$0xff] }
 0x1e3   : > { %5602 = vmatprep.subr.bf16.mxu1 %v16499_v4  ;;  %v1037_v19 = vld [vmem:[%s26499_s1 + $0x1760] sm:$0xff]  ;;  %v526_v4 = vld [vmem:[%s26499_s1 + $0x768] sm:$0xff] }
 0x1e4   : > { %v17169_v6 = vcombine.high %v1029_v2, %v1037_v19  ;;  %v16659_v7 = vcombine.high %v518_v3, %v526_v4  ;;  %v17168_v17 = vcombine.low %v1029_v2, %v1037_v19  ;;  %v16658_v18 = vcombine.low %v518_v3, %v526_v4 }
 0x1e5   : > { %5562 = vmatpush1.bf16.msra.mxu0 %v17008_v9  ;;  %v1013_v9 = vld [vmem:[%s26499_s1 + $0x16a0] sm:$0xff] }
 0x1e6   : > { %5603 = vmatpush1.bf16.msra.mxu1 %v16498_v11  ;;  %5563 = vmatprep.subr.bf16.mxu0 %v16993_v12  ;;  %v1021_v11 = vld [vmem:[%s26499_s1 + $0x16e0] sm:$0xff]  ;;  %v502_v12 = vld [vmem:[%s26499_s1 + $0x6a8] sm:$0xff] }
 0x1e7   : > { %5604 = vmatprep.subr.bf16.mxu1 %v16483_v13  ;;  %v510_v13 = vld [vmem:[%s26499_s1 + $0x6e8] sm:$0xff]  ;;  %v17153_v21 = vcombine.high %v1013_v9, %v1021_v11  ;;  %v17152_v29 = vcombine.low %v1013_v9, %v1021_v11 }
 0x1e8   : > { %v16643_v22 = vcombine.high %v502_v12, %v510_v13  ;;  %v16642_v31 = vcombine.low %v502_v12, %v510_v13 }
 0x1e9   : > { %5564 = vmatpush1.bf16.msra.mxu0 %v16992_v24  ;;  %v997_v24 = vld [vmem:[%s26499_s1 + $0x1620] sm:$0xff] }
 0x1ea   : > { %5605 = vmatpush1.bf16.msra.mxu1 %v16482_v25  ;;  %5565 = vmatprep.subr.bf16.mxu0 %v16977_v26  ;;  %v1005_v25 = vld [vmem:[%s26499_s1 + $0x1660] sm:$0xff]  ;;  %v486_v26 = vld [vmem:[%s26499_s1 + $0x628] sm:$0xff] }
 0x1eb   : > { %5606 = vmatprep.subr.bf16.mxu1 %v16467_v27  ;;  %v494_v27 = vld [vmem:[%s26499_s1 + $0x668] sm:$0xff]  ;;  %v17137_v32 = vcombine.high %v997_v24, %v1005_v25  ;;  %v17136_v52 = vcombine.low %v997_v24, %v1005_v25 }
 0x1ec   : > { %v16627_v34 = vcombine.high %v486_v26, %v494_v27  ;;  %v16626_v56 = vcombine.low %v486_v26, %v494_v27 }
 0x1ed   : > { %5566 = vmatpush1.bf16.msra.mxu0 %v16976_v35  ;;  %v981_v35 = vld [vmem:[%s26499_s1 + $0x15a0] sm:$0xff] }
 0x1ee   : > { %5607 = vmatpush1.bf16.msra.mxu1 %v16466_v36  ;;  %5567 = vmatprep.subr.bf16.mxu0 %v16961_v37  ;;  %v989_v36 = vld [vmem:[%s26499_s1 + $0x15e0] sm:$0xff]  ;;  %v470_v37 = vld [vmem:[%s26499_s1 + $0x5a8] sm:$0xff] }
 0x1ef   : > { %5608 = vmatprep.subr.bf16.mxu1 %v16451_v38  ;;  %v478_v38 = vld [vmem:[%s26499_s1 + $0x5e8] sm:$0xff]  ;;  %v17121_v39 = vcombine.high %v981_v35, %v989_v36  ;;  %v17120_v48 = vcombine.low %v981_v35, %v989_v36 }
 0x1f0   : > { %v16611_v40 = vcombine.high %v470_v37, %v478_v38  ;;  %v16610_v49 = vcombine.low %v470_v37, %v478_v38 }
 0x1f1   : > { %5568 = vmatpush1.bf16.msra.mxu0 %v16960_v41  ;;  %v965_v41 = vld [vmem:[%s26499_s1 + $0x1520] sm:$0xff] }
 0x1f2   : > { %5609 = vmatpush1.bf16.msra.mxu1 %v16450_v43  ;;  %5569 = vmatprep.subr.bf16.mxu0 %v16945_v45  ;;  %v973_v43 = vld [vmem:[%s26499_s1 + $0x1560] sm:$0xff]  ;;  %v454_v45 = vld [vmem:[%s26499_s1 + $0x528] sm:$0xff] }
 0x1f3   : > { %5610 = vmatprep.subr.bf16.mxu1 %v16435_v46  ;;  %v462_v46 = vld [vmem:[%s26499_s1 + $0x568] sm:$0xff]  ;;  %v17105_v50 = vcombine.high %v965_v41, %v973_v43  ;;  %v17104_v2 = vcombine.low %v965_v41, %v973_v43 }
 0x1f4   : > { %v16595_v1 = vcombine.high %v454_v45, %v462_v46  ;;  %v16594_v19 = vcombine.low %v454_v45, %v462_v46  ;;  %v894_v41 = vld [vmem:[%s26499_s1 + $0x12e8] sm:$0xff] }
 0x1f5   : > { %5570 = vmatpush1.bf16.msra.mxu0 %v16944_v51  ;;  %v949_v51 = vld [vmem:[%s26499_s1 + $0x14a0] sm:$0xff] }
 0x1f6   : > { %5611 = vmatpush1.bf16.msra.mxu1 %v16434_v57  ;;  %5571 = vmatprep.subr.bf16.mxu0 %v17185_v60  ;;  %v957_v57 = vld [vmem:[%s26499_s1 + $0x14e0] sm:$0xff]  ;;  %v438_v60 = vld [vmem:[%s26499_s1 + $0x4a8] sm:$0xff] }
 0x1f7   : > { %5612 = vmatprep.subr.bf16.mxu1 %v16675_v62  ;;  %v446_v62 = vld [vmem:[%s26499_s1 + $0x4e8] sm:$0xff]  ;;  %v17089_v3 = vcombine.high %v949_v51, %v957_v57  ;;  %v17088_v9 = vcombine.low %v949_v51, %v957_v57 }
 0x1f8   : > { %v16579_v4 = vcombine.high %v438_v60, %v446_v62  ;;  %v16578_v11 = vcombine.low %v438_v60, %v446_v62  ;;  %v622_v60 = vld [vmem:[%s26499_s1 + $0xa68] sm:$0xff] }
 0x1f9   : > { %5572 = vmatpush2.bf16.msra.mxu0 %v17184_v30  ;;  %v933_v30 = vld [vmem:[%s26499_s1 + $0x1420] sm:$0xff] }
 0x1fa   : > { %5613 = vmatpush2.bf16.msra.mxu1 %v16674_v5  ;;  %5573 = vmatprep.subr.bf16.mxu0 %v17169_v6  ;;  %v941_v5 = vld [vmem:[%s26499_s1 + $0x1460] sm:$0xff]  ;;  %v422_v6 = vld [vmem:[%s26499_s1 + $0x428] sm:$0xff] }
 0x1fb   : > { %5614 = vmatprep.subr.bf16.mxu1 %v16659_v7  ;;  %v430_v7 = vld [vmem:[%s26499_s1 + $0x468] sm:$0xff]  ;;  %v17073_v12 = vcombine.high %v933_v30, %v941_v5  ;;  %v17072_v24 = vcombine.low %v933_v30, %v941_v5 }
 0x1fc   : > { %v16563_v13 = vcombine.high %v422_v6, %v430_v7  ;;  %v16562_v25 = vcombine.low %v422_v6, %v430_v7 }
 0x1fd   : > { %5574 = vmatpush2.bf16.msra.mxu0 %v17168_v17  ;;  %v662_v17 = vld [vmem:[%s26499_s1 + $0xba8] sm:$0xff] }
 0x1fe   : > { %5615 = vmatpush2.bf16.msra.mxu1 %v16658_v18  ;;  %5575 = vmatprep.subr.bf16.mxu0 %v17153_v21  ;;  %v670_v18 = vld [vmem:[%s26499_s1 + $0xbe8] sm:$0xff] }
 0x1ff   : > { %5616 = vmatprep.subr.bf16.mxu1 %v16643_v22  ;;  %v918_v21 = vld [vmem:[%s26499_s1 + $0x13a8] sm:$0xff]  ;;  %v16803_v26 = vcombine.high %v662_v17, %v670_v18  ;;  %v16802_v35 = vcombine.low %v662_v17, %v670_v18 }
 0x200   : > { %v926_v22 = vld [vmem:[%s26499_s1 + $0x13e8] sm:$0xff] }
 0x201   : > { %5576 = vmatpush2.bf16.msra.mxu0 %v17152_v29  ;;  %v17059_v27 = vcombine.high %v918_v21, %v926_v22  ;;  %v646_v29 = vld [vmem:[%s26499_s1 + $0xb28] sm:$0xff]  ;;  %v17058_v36 = vcombine.low %v918_v21, %v926_v22 }
 0x202   : > { %5617 = vmatpush2.bf16.msra.mxu1 %v16642_v31  ;;  %5577 = vmatprep.subr.bf16.mxu0 %v17137_v32  ;;  %v654_v31 = vld [vmem:[%s26499_s1 + $0xb68] sm:$0xff] }
 0x203   : > { %5618 = vmatprep.subr.bf16.mxu1 %v16627_v34  ;;  %v902_v32 = vld [vmem:[%s26499_s1 + $0x1328] sm:$0xff]  ;;  %v16787_v37 = vcombine.high %v646_v29, %v654_v31  ;;  %v16786_v46 = vcombine.low %v646_v29, %v654_v31 }
 0x204   : > { %v910_v34 = vld [vmem:[%s26499_s1 + $0x1368] sm:$0xff] }
 0x205   : > { %5578 = vmatpush2.bf16.msra.mxu0 %v17136_v52  ;;  %v17043_v38 = vcombine.high %v902_v32, %v910_v34  ;;  %v630_v52 = vld [vmem:[%s26499_s1 + $0xaa8] sm:$0xff] }
 0x206   : > { %5619 = vmatpush2.bf16.msra.mxu1 %v16626_v56  ;;  %5579 = vmatprep.subr.bf16.mxu0 %v17121_v39  ;;  %v638_v56 = vld [vmem:[%s26499_s1 + $0xae8] sm:$0xff] }
 0x207   : > { %5620 = vmatprep.subr.bf16.mxu1 %v16611_v40  ;;  %v886_v40 = vld [vmem:[%s26499_s1 + $0x12a8] sm:$0xff] }
 0x208   : > { %v17027_v57 = vcombine.high %v886_v40, %v894_v41  ;;  %v17026_v30 = vcombine.low %v886_v40, %v894_v41  ;;  %v550_v41 = vld [vmem:[%s26499_s1 + $0x828] sm:$0xff] }
 0x209   : > { %5580 = vmatpush2.bf16.msra.mxu0 %v17120_v48 }
 0x20a   : > { %5621 = vmatpush2.bf16.msra.mxu1 %v16610_v49  ;;  %5581 = vmatprep.subr.bf16.mxu0 %v17105_v50  ;;  %v17042_v49 = vcombine.low %v902_v32, %v910_v34  ;;  %v16771_v50 = vcombine.high %v630_v52, %v638_v56 }
 0x20b   : > { %5622 = vmatprep.subr.bf16.mxu1 %v16595_v1 }
 0x20d   : > { %5582 = vmatpush2.bf16.msra.mxu0 %v17104_v2  ;;  %v878_v2 = vld [vmem:[%s26499_s1 + $0x1268] sm:$0xff] }
 0x20e   : > { %5623 = vmatpush2.bf16.msra.mxu1 %v16594_v19  ;;  %5583 = vmatprep.subr.bf16.mxu0 %v17089_v3  ;;  %v16770_v3 = vcombine.low %v630_v52, %v638_v56 }
 0x20f   : > { %5624 = vmatprep.subr.bf16.mxu1 %v16579_v4 }
 0x211   : > { %5584 = vmatpush2.bf16.msra.mxu0 %v17088_v9  ;;  %v598_v9 = vld [vmem:[%s26499_s1 + $0x9a8] sm:$0xff] }
 0x212   : > { %5625 = vmatpush2.bf16.msra.mxu1 %v16578_v11  ;;  %5585 = vmatprep.subr.bf16.mxu0 %v17073_v12  ;;  %v606_v11 = vld [vmem:[%s26499_s1 + $0x9e8] sm:$0xff] }
 0x213   : > { %5626 = vmatprep.subr.bf16.mxu1 %v16563_v13  ;;  %v854_v12 = vld [vmem:[%s26499_s1 + $0x11a8] sm:$0xff]  ;;  %v16739_v21 = vcombine.high %v598_v9, %v606_v11  ;;  %v16738_v29 = vcombine.low %v598_v9, %v606_v11 }
 0x214   : > { %v862_v13 = vld [vmem:[%s26499_s1 + $0x11e8] sm:$0xff] }
 0x215   : > { %5586 = vmatpush2.bf16.msra.mxu0 %v17072_v24  ;;  %v16995_v22 = vcombine.high %v854_v12, %v862_v13  ;;  %v582_v24 = vld [vmem:[%s26499_s1 + $0x928] sm:$0xff]  ;;  %v16994_v31 = vcombine.low %v854_v12, %v862_v13 }
 0x216   : > { %5627 = vmatpush2.bf16.msra.mxu1 %v16562_v25  ;;  %5637 = vmatprep.subr.bf16.mxu0 %v16803_v26  ;;  %v590_v25 = vld [vmem:[%s26499_s1 + $0x968] sm:$0xff] }
 0x217   : > { %5678 = vmatprep.subr.bf16.mxu1 %v17059_v27  ;;  %v838_v26 = vld [vmem:[%s26499_s1 + $0x1128] sm:$0xff]  ;;  %v16723_v32 = vcombine.high %v582_v24, %v590_v25  ;;  %v16722_v52 = vcombine.low %v582_v24, %v590_v25 }
 0x218   : > { %v5343_v39 = vpop.f32.mrf.mxu0  ;;  %5588 = vmatmul.mubr.bf16.vlgmr.msra.gmra.mxu0 %v19815_v33  ;;  %v846_v27 = vld [vmem:[%s26499_s1 + $0x1168] sm:$0xff] }
 0x219   : > { %v21073_v43 = vadd.f32 %v5343_v39, %v20873_v42  ;;  %v21075_v45 = vpop.f32.mrf.mxu1  ;;  %5629 = vmatmul.mubr.bf16.vlgmr.msra.gmra.mxu1 %v19605_v16  ;;  %5638 = vmatpush1.bf16.msra.mxu0 %v16802_v35  ;;  %v614_v42 = vld [vmem:[%s26499_s1 + $0xa28] sm:$0xff]  ;;  %v16979_v34 = vcombine.high %v838_v26, %v846_v27  ;;  %v16978_v56 = vcombine.low %v838_v26, %v846_v27 }
 0x21a   : > { %5679 = vmatpush1.bf16.msra.mxu1 %v17058_v36  ;;  %v5345_v48 = vpop.f32.mrf.mxu0  ;;  %5639 = vmatprep.subr.bf16.mxu0 %v16787_v37  ;;  %v16755_v5 = vcombine.high %v614_v42, %v622_v60  ;;  %v16754_v17 = vcombine.low %v614_v42, %v622_v60  ;;  %v566_v35 = vld [vmem:[%s26499_s1 + $0x8a8] sm:$0xff] }
 0x21b   : > { %v21079_v1 = vadd.f32 %v5345_v48, %v20889_v53  ;;  %v21081_v51 = vpop.f32.mrf.mxu1  ;;  %5680 = vmatprep.subr.bf16.mxu1 %v17043_v38  ;;  %5669 = vmatprep.mubr.bf16.mxu0 %v19479_v59  ;;  %v870_v53 = vld [vmem:[%s26499_s1 + $0x1228] sm:$0xff] }
 0x21c   : > { %v5347_v62 = vpop.f32.mrf.mxu0  ;;  %5710 = vmatprep.mubr.bf16.mxu1 %v19625_v28  ;;  %v17011_v7 = vcombine.high %v870_v53, %v878_v2  ;;  %v17010_v18 = vcombine.low %v870_v53, %v878_v2  ;;  %v574_v36 = vld [vmem:[%s26499_s1 + $0x8e8] sm:$0xff] }
 0x21d   : > { %v5388_v19 = vpop.f32.mrf.mxu1  ;;  %5640 = vmatpush1.bf16.msra.mxu0 %v16786_v46  ;;  %v822_v37 = vld [vmem:[%s26499_s1 + $0x10a8] sm:$0xff]  ;;  %v16707_v39 = vcombine.high %v566_v35, %v574_v36 }
 0x21e   : > { %5681 = vmatpush1.bf16.msra.mxu1 %v17042_v49  ;;  %v5348_v4 = vpop.f32.mrf.mxu0  ;;  %5641 = vmatprep.subr.bf16.mxu0 %v16771_v50  ;;  %v830_v38 = vld [vmem:[%s26499_s1 + $0x10e8] sm:$0xff]  ;;  %v16706_v50 = vcombine.low %v566_v35, %v574_v36 }
 0x21f   : > { %v5389_v6 = vpop.f32.mrf.mxu1  ;;  %5682 = vmatprep.subr.bf16.mxu1 %v17027_v57  ;;  %v16963_v40 = vcombine.high %v822_v37, %v830_v38  ;;  %v558_v46 = vld [vmem:[%s26499_s1 + $0x868] sm:$0xff]  ;;  %v16962_v57 = vcombine.low %v822_v37, %v830_v38 }
 0x220   : > { %v806_v48 = vld [vmem:[%s26499_s1 + $0x1028] sm:$0xff]  ;;  %v16691_v42 = vcombine.high %v550_v41, %v558_v46 }
 0x221   : > { %5642 = vmatpush1.bf16.msra.mxu0 %v16770_v3  ;;  %v814_v49 = vld [vmem:[%s26499_s1 + $0x1068] sm:$0xff]  ;;  %v16690_v3 = vcombine.low %v550_v41, %v558_v46 }
 0x222   : > { %5683 = vmatpush1.bf16.msra.mxu1 %v17026_v30  ;;  %5643 = vmatprep.subr.bf16.mxu0 %v16755_v5  ;;  %v16947_v60 = vcombine.high %v806_v48, %v814_v49  ;;  %v790_v62 = vld [vmem:[%s26499_s1 + $0xfa8] sm:$0xff]  ;;  %v16946_v4 = vcombine.low %v806_v48, %v814_v49 }
 0x223   : > { %5684 = vmatprep.subr.bf16.mxu1 %v17011_v7  ;;  %v798_v53 = vld [vmem:[%s26499_s1 + $0xfe8] sm:$0xff] }
 0x224   : > { %v1046_v2 = vld [vmem:[%s26499_s1 + $0x17a8] sm:$0xff]  ;;  %v16931_v30 = vcombine.high %v790_v62, %v798_v53  ;;  %v16930_v12 = vcombine.low %v790_v62, %v798_v53 }
 0x225   : > { %5644 = vmatpush1.bf16.msra.mxu0 %v16754_v17  ;;  %v1054_v19 = vld [vmem:[%s26499_s1 + $0x17e8] sm:$0xff] }
 0x226   : > { %5685 = vmatpush1.bf16.msra.mxu1 %v17010_v18  ;;  %5645 = vmatprep.subr.bf16.mxu0 %v16739_v21  ;;  %v17187_v5 = vcombine.high %v1046_v2, %v1054_v19  ;;  %v774_v6 = vld [vmem:[%s26499_s1 + $0xf28] sm:$0xff]  ;;  %v17186_v13 = vcombine.low %v1046_v2, %v1054_v19 }
 0x227   : > { %5686 = vmatprep.subr.bf16.mxu1 %v16995_v22  ;;  %v782_v7 = vld [vmem:[%s26499_s1 + $0xf68] sm:$0xff] }
 0x228   : > { %v1030_v9 = vld [vmem:[%s26499_s1 + $0x1728] sm:$0xff]  ;;  %v16915_v17 = vcombine.high %v774_v6, %v782_v7  ;;  %v16914_v26 = vcombine.low %v774_v6, %v782_v7 }
 0x229   : > { %5646 = vmatpush1.bf16.msra.mxu0 %v16738_v29  ;;  %v1038_v11 = vld [vmem:[%s26499_s1 + $0x1768] sm:$0xff] }
 0x22a   : > { %5687 = vmatpush1.bf16.msra.mxu1 %v16994_v31  ;;  %5647 = vmatprep.subr.bf16.mxu0 %v16723_v32  ;;  %v17171_v18 = vcombine.high %v1030_v9, %v1038_v11  ;;  %v758_v21 = vld [vmem:[%s26499_s1 + $0xea8] sm:$0xff]  ;;  %v17170_v27 = vcombine.low %v1030_v9, %v1038_v11 }
 0x22b   : > { %5688 = vmatprep.subr.bf16.mxu1 %v16979_v34  ;;  %v766_v22 = vld [vmem:[%s26499_s1 + $0xee8] sm:$0xff] }
 0x22c   : > { %v1014_v24 = vld [vmem:[%s26499_s1 + $0x16a8] sm:$0xff]  ;;  %v16899_v29 = vcombine.high %v758_v21, %v766_v22  ;;  %v16898_v37 = vcombine.low %v758_v21, %v766_v22 }
 0x22d   : > { %5648 = vmatpush1.bf16.msra.mxu0 %v16722_v52  ;;  %v1022_v25 = vld [vmem:[%s26499_s1 + $0x16e8] sm:$0xff] }
 0x22e   : > { %5689 = vmatpush1.bf16.msra.mxu1 %v16978_v56  ;;  %5649 = vmatprep.subr.bf16.mxu0 %v16707_v39  ;;  %v17155_v31 = vcombine.high %v1014_v24, %v1022_v25  ;;  %v742_v32 = vld [vmem:[%s26499_s1 + $0xe28] sm:$0xff]  ;;  %v17154_v38 = vcombine.low %v1014_v24, %v1022_v25 }
 0x22f   : > { %5690 = vmatprep.subr.bf16.mxu1 %v16963_v40  ;;  %v750_v34 = vld [vmem:[%s26499_s1 + $0xe68] sm:$0xff] }
 0x230   : > { %v998_v35 = vld [vmem:[%s26499_s1 + $0x1628] sm:$0xff]  ;;  %v16883_v52 = vcombine.high %v742_v32, %v750_v34  ;;  %v16882_v48 = vcombine.low %v742_v32, %v750_v34  ;;  %v415_v32 = vld [vmem:[%s26499_s1 + $0x3f0] sm:$0xff] }
 0x231   : > { %5650 = vmatpush1.bf16.msra.mxu0 %v16706_v50  ;;  %v1006_v36 = vld [vmem:[%s26499_s1 + $0x1668] sm:$0xff]  ;;  %v663_v34 = vld [vmem:[%s26499_s1 + $0xbb0] sm:$0xff] }
 0x232   : > { %5691 = vmatpush1.bf16.msra.mxu1 %v16962_v57  ;;  %5651 = vmatprep.subr.bf16.mxu0 %v16691_v42  ;;  %v17139_v56 = vcombine.high %v998_v35, %v1006_v36  ;;  %v726_v39 = vld [vmem:[%s26499_s1 + $0xda8] sm:$0xff]  ;;  %v17138_v49 = vcombine.low %v998_v35, %v1006_v36  ;;  %v671_v35 = vld [vmem:[%s26499_s1 + $0xbf0] sm:$0xff]  ;;  %v21257_v36 = vsub.s32 7, %v20185_v44 }
 0x233   : > { %5692 = vmatprep.subr.bf16.mxu1 %v16947_v60  ;;  %v734_v40 = vld [vmem:[%s26499_s1 + $0xde8] sm:$0xff] }
 0x234   : > { %v982_v41 = vld [vmem:[%s26499_s1 + $0x15a8] sm:$0xff]  ;;  %v16867_v50 = vcombine.high %v726_v39, %v734_v40  ;;  %v16866_v2 = vcombine.low %v726_v39, %v734_v40  ;;  %v16805_v39 = vcombine.high %v663_v34, %v671_v35  ;;  %v391_v40 = vld [vmem:[%s26499_s1 + $0x330] sm:$0xff] }
 0x235   : > { %5652 = vmatpush1.bf16.msra.mxu0 %v16690_v3  ;;  %v990_v46 = vld [vmem:[%s26499_s1 + $0x15e8] sm:$0xff] }
 0x236   : > { %5693 = vmatpush1.bf16.msra.mxu1 %v16946_v4  ;;  %5653 = vmatprep.subr.bf16.mxu0 %v16931_v30  ;;  %v17123_v57 = vcombine.high %v982_v41, %v990_v46  ;;  %v710_v42 = vld [vmem:[%s26499_s1 + $0xd28] sm:$0xff]  ;;  %v17122_v19 = vcombine.low %v982_v41, %v990_v46  ;;  %v647_v41 = vld [vmem:[%s26499_s1 + $0xb30] sm:$0xff] }
 0x237   : > { %5694 = vmatprep.subr.bf16.mxu1 %v17187_v5  ;;  %v718_v60 = vld [vmem:[%s26499_s1 + $0xd68] sm:$0xff]  ;;  %v655_v46 = vld [vmem:[%s26499_s1 + $0xb70] sm:$0xff] }
 0x238   : > { %v966_v62 = vld [vmem:[%s26499_s1 + $0x1528] sm:$0xff]  ;;  %v16851_v3 = vcombine.high %v710_v42, %v718_v60  ;;  %v16850_v9 = vcombine.low %v710_v42, %v718_v60  ;;  %v16789_v60 = vcombine.high %v647_v41, %v655_v46 }
 0x239   : > { %5654 = vmatpush2.bf16.msra.mxu0 %v16930_v12  ;;  %v974_v53 = vld [vmem:[%s26499_s1 + $0x1568] sm:$0xff] }
 0x23a   : > { %5695 = vmatpush2.bf16.msra.mxu1 %v17186_v13  ;;  %5655 = vmatprep.subr.bf16.mxu0 %v16915_v17  ;;  %v17107_v4 = vcombine.high %v966_v62, %v974_v53  ;;  %v694_v30 = vld [vmem:[%s26499_s1 + $0xca8] sm:$0xff]  ;;  %v17106_v11 = vcombine.low %v966_v62, %v974_v53  ;;  %v375_v62 = vld [vmem:[%s26499_s1 + $0x2b0] sm:$0xff] }
 0x23b   : > { %5696 = vmatprep.subr.bf16.mxu1 %v17171_v18  ;;  %v702_v5 = vld [vmem:[%s26499_s1 + $0xce8] sm:$0xff]  ;;  %v383_v53 = vld [vmem:[%s26499_s1 + $0x2f0] sm:$0xff] }
 0x23c   : > { %v950_v6 = vld [vmem:[%s26499_s1 + $0x14a8] sm:$0xff]  ;;  %v16835_v12 = vcombine.high %v694_v30, %v702_v5  ;;  %v16834_v24 = vcombine.low %v694_v30, %v702_v5 }
 0x23d   : > { %5656 = vmatpush2.bf16.msra.mxu0 %v16914_v26  ;;  %v958_v7 = vld [vmem:[%s26499_s1 + $0x14e8] sm:$0xff] }
 0x23e   : > { %5697 = vmatpush2.bf16.msra.mxu1 %v17170_v27  ;;  %5657 = vmatprep.subr.bf16.mxu0 %v16899_v29  ;;  %v17091_v13 = vcombine.high %v950_v6, %v958_v7  ;;  %v678_v17 = vld [vmem:[%s26499_s1 + $0xc28] sm:$0xff]  ;;  %v17090_v25 = vcombine.low %v950_v6, %v958_v7  ;;  %v21242_v27 = vsub.s32 6, %v20185_v44  ;;  %v399_v44 = vld [vmem:[%s26499_s1 + $0x370] sm:$0xff]  ;;  %v16788_v6 = vcombine.low %v647_v41, %v655_v46 }
 0x23f   : > { %5698 = vmatprep.subr.bf16.mxu1 %v17155_v31  ;;  %v686_v18 = vld [vmem:[%s26499_s1 + $0xc68] sm:$0xff]  ;;  %v407_v31 = vld [vmem:[%s26499_s1 + $0x3b0] sm:$0xff]  ;;  %v16532_v30 = vcombine.low %v391_v40, %v399_v44  ;;  %v16517_v7 = vcombine.high %v375_v62, %v383_v53 }
 0x240   : > { %v934_v21 = vld [vmem:[%s26499_s1 + $0x1428] sm:$0xff]  ;;  %v16819_v26 = vcombine.high %v678_v17, %v686_v18  ;;  %v327_v46 = vld [vmem:[%s26499_s1 + $0x130] sm:$0xff] }
 0x241   : > { %5658 = vmatpush2.bf16.msra.mxu0 %v16898_v37  ;;  %v942_v22 = vld [vmem:[%s26499_s1 + $0x1468] sm:$0xff]  ;;  %v16818_v37 = vcombine.low %v678_v17, %v686_v18  ;;  %v367_v17 = vld [vmem:[%s26499_s1 + $0x270] sm:$0xff] }
 0x242   : > { %5699 = vmatpush2.bf16.msra.mxu1 %v17154_v38  ;;  %5659 = vmatprep.subr.bf16.mxu0 %v16883_v52  ;;  %v17075_v29 = vcombine.high %v934_v21, %v942_v22  ;;  %v17074_v38 = vcombine.low %v934_v21, %v942_v22  ;;  %v16549_v52 = vcombine.high %v407_v31, %v415_v32  ;;  %v615_v21 = vld [vmem:[%s26499_s1 + $0xa30] sm:$0xff] }
 0x243   : > { %5700 = vmatprep.subr.bf16.mxu1 %v17139_v56  ;;  %v1088_v56 = vrot.slane %v20853_v23, %v21242_v27  ;;  %v623_v22 = vld [vmem:[%s26499_s1 + $0xa70] sm:$0xff] }
 0x245   : > { %5660 = vmatpush2.bf16.msra.mxu0 %v16882_v48  ;;  %v1092_v48 = vrot.slane %v20853_v23, %v21257_v36  ;;  %v5385_v42 = vadd.f32 %v21075_v45, %v1088_v56  ;;  %v631_v23 = vld [vmem:[%s26499_s1 + $0xab0] sm:$0xff] }
 0x246   : > { %5701 = vmatpush2.bf16.msra.mxu1 %v17138_v49  ;;  %5661 = vmatprep.subr.bf16.mxu0 %v16867_v50  ;;  %v16548_v49 = vcombine.low %v407_v31, %v415_v32  ;;  %v16804_v50 = vcombine.low %v663_v34, %v671_v35  ;;  %v639_v45 = vld [vmem:[%s26499_s1 + $0xaf0] sm:$0xff]  ;;  %v16757_v35 = vcombine.high %v615_v21, %v623_v22 }
 0x247   : > { %5702 = vmatprep.subr.bf16.mxu1 %v17123_v57  ;;  %v16533_v57 = vcombine.high %v391_v40, %v399_v44  ;;  %v16772_v31 = vcombine.low %v631_v23, %v639_v45  ;;  %v607_v56 = vld [vmem:[%s26499_s1 + $0x9f0] sm:$0xff]  ;;  %v16756_v40 = vcombine.low %v615_v21, %v623_v22 }
 0x248   : > { %v543_v21 = vld [vmem:[%s26499_s1 + $0x7f0] sm:$0xff] }
 0x249   : > { %5662 = vmatpush2.bf16.msra.mxu0 %v16866_v2  ;;  %v791_v22 = vld [vmem:[%s26499_s1 + $0xfb0] sm:$0xff] }
 0x24a   : > { %5703 = vmatpush2.bf16.msra.mxu1 %v17122_v19  ;;  %5663 = vmatprep.subr.bf16.mxu0 %v16851_v3  ;;  %v5387_v19 = vadd.f32 %v21081_v51, %v1092_v48  ;;  %v359_v51 = vld [vmem:[%s26499_s1 + $0x230] sm:$0xff] }
 0x24b   : > { %5704 = vmatprep.subr.bf16.mxu1 %v17107_v4  ;;  %v16501_v32 = vcombine.high %v359_v51, %v367_v17  ;;  %v335_v48 = vld [vmem:[%s26499_s1 + $0x170] sm:$0xff] }
 0x24d   : > { %5664 = vmatpush2.bf16.msra.mxu0 %v16850_v9 }
 0x24e   : > { %5705 = vmatpush2.bf16.msra.mxu1 %v17106_v11  ;;  %5665 = vmatprep.subr.bf16.mxu0 %v16835_v12 }
 0x24f   : > { %5706 = vmatprep.subr.bf16.mxu1 %v17091_v13  ;;  %v16773_v13 = vcombine.high %v631_v23, %v639_v45  ;;  %v567_v23 = vld [vmem:[%s26499_s1 + $0x8b0] sm:$0xff] }
 0x250   : > { %v575_v45 = vld [vmem:[%s26499_s1 + $0x8f0] sm:$0xff] }
 0x251   : > { %5666 = vmatpush2.bf16.msra.mxu0 %v16834_v24 }
 0x252   : > { %5707 = vmatpush2.bf16.msra.mxu1 %v17090_v25  ;;  %5667 = vmatprep.subr.bf16.mxu0 %v16819_v26  ;;  %v16516_v26 = vcombine.low %v375_v62, %v383_v53  ;;  %v311_v53 = vld [vmem:[%s26499_s1 + $0xb0] sm:$0xff] }
 0x253   : > { %5708 = vmatprep.subr.bf16.mxu1 %v17075_v29 }
 0x255   : > { %5668 = vmatpush2.bf16.msra.mxu0 %v16818_v37  ;;  %v343_v37 = vld [vmem:[%s26499_s1 + $0x1b0] sm:$0xff] }
 0x256   : > { %5709 = vmatpush2.bf16.msra.mxu1 %v17074_v38  ;;  %5719 = vmatprep.subr.bf16.mxu0 %v16549_v52  ;;  %v351_v38 = vld [vmem:[%s26499_s1 + $0x1f0] sm:$0xff] }
 0x257   : > { %5760 = vmatprep.subr.bf16.mxu1 %v16805_v39  ;;  %v599_v52 = vld [vmem:[%s26499_s1 + $0x9b0] sm:$0xff]  ;;  %v16500_v39 = vcombine.low %v359_v51, %v367_v17  ;;  %v16485_v44 = vcombine.high %v343_v37, %v351_v38 }
 0x258   : > { %v5425_v2 = vpop.f32.mrf.mxu0  ;;  %5670 = vmatmul.mubr.bf16.vlgmr.msra.gmra.mxu0 %v19614_v20  ;;  %v16741_v41 = vcombine.high %v599_v52, %v607_v56 }
 0x259   : > { %v5426_v3 = vadd.f32 %v5425_v2, %v5385_v42  ;;  %v5466_v4 = vpop.f32.mrf.mxu1  ;;  %5711 = vmatmul.mubr.bf16.vlgmr.msra.gmra.mxu1 %v19815_v33  ;;  %5720 = vmatpush1.bf16.msra.mxu0 %v16548_v49  ;;  %v583_v49 = vld [vmem:[%s26499_s1 + $0x930] sm:$0xff]  ;;  %v16740_v42 = vcombine.low %v599_v52, %v607_v56 }
 0x25a   : > { %5761 = vmatpush1.bf16.msra.mxu1 %v16804_v50  ;;  %v5427_v5 = vpop.f32.mrf.mxu0  ;;  %5721 = vmatprep.subr.bf16.mxu0 %v16533_v57  ;;  %v591_v50 = vld [vmem:[%s26499_s1 + $0x970] sm:$0xff]  ;;  %v16484_v57 = vcombine.low %v343_v37, %v351_v38 }
 0x25b   : > { %v21291_v9 = vadd.f32 %v5466_v4, %v5426_v3  ;;  %v5428_v11 = vadd.f32 %v5427_v5, %v5387_v19  ;;  %v5468_v12 = vpop.f32.mrf.mxu1  ;;  %5762 = vmatprep.subr.bf16.mxu1 %v16789_v60  ;;  %5751 = vmatprep.mubr.bf16.mxu0 %v19477_v58  ;;  %v16469_v60 = vcombine.high %v327_v46, %v335_v48  ;;  %v319_v2 = vld [vmem:[%s26499_s1 + $0xf0] sm:$0xff] }
 0x25c   : > { %v5429_v18 = vpop.f32.mrf.mxu0  ;;  %5792 = vmatprep.mubr.bf16.mxu1 %v19479_v59  ;;  %v16725_v62 = vcombine.high %v583_v49, %v591_v50  ;;  %v16468_v19 = vcombine.low %v327_v46, %v335_v48  ;;  %v16724_v3 = vcombine.low %v583_v49, %v591_v50  ;;  %v16453_v4 = vcombine.high %v311_v53, %v319_v2  ;;  %v295_v5 = vld [vmem:[%s26499_s1 + $0x30] sm:$0xff] }
 0x25d   : > { %v21307_v24 = vadd.f32 %v5468_v12, %v5428_v11  ;;  %v5470_v25 = vpop.f32.mrf.mxu1  ;;  %5722 = vmatpush1.bf16.msra.mxu0 %v16532_v30  ;;  %v16709_v30 = vcombine.high %v567_v23, %v575_v45  ;;  %v559_v11 = vld [vmem:[%s26499_s1 + $0x870] sm:$0xff]  ;;  %v16452_v12 = vcombine.low %v311_v53, %v319_v2 }
 0x25e   : > { %5763 = vmatpush1.bf16.msra.mxu1 %v16788_v6  ;;  %v5430_v29 = vpop.f32.mrf.mxu0  ;;  %5723 = vmatprep.subr.bf16.mxu0 %v16517_v7  ;;  %v303_v6 = vld [vmem:[%s26499_s1 + $0x70] sm:$0xff] }
 0x25f   : > { %v5471_v34 = vpop.f32.mrf.mxu1  ;;  %5764 = vmatprep.subr.bf16.mxu1 %v16773_v13  ;;  %v551_v7 = vld [vmem:[%s26499_s1 + $0x830] sm:$0xff]  ;;  %v16708_v13 = vcombine.low %v567_v23, %v575_v45  ;;  %v16437_v51 = vcombine.high %v295_v5, %v303_v6 }
 0x260   : > { %v16693_v17 = vcombine.high %v551_v7, %v559_v11  ;;  %v535_v18 = vld [vmem:[%s26499_s1 + $0x7b0] sm:$0xff]  ;;  %v16692_v29 = vcombine.low %v551_v7, %v559_v11 }
 0x261   : > { %5724 = vmatpush1.bf16.msra.mxu0 %v16516_v26  ;;  %v799_v25 = vld [vmem:[%s26499_s1 + $0xff0] sm:$0xff]  ;;  %v16436_v26 = vcombine.low %v295_v5, %v303_v6  ;;  %v16676_v52 = vcombine.low %v535_v18, %v543_v21 }
 0x262   : > { %5765 = vmatpush1.bf16.msra.mxu1 %v16772_v31  ;;  %5725 = vmatprep.subr.bf16.mxu0 %v16501_v32  ;;  %v16677_v31 = vcombine.high %v535_v18, %v543_v21  ;;  %v16933_v32 = vcombine.high %v791_v22, %v799_v25  ;;  %v519_v34 = vld [vmem:[%s26499_s1 + $0x730] sm:$0xff]  ;;  %v16932_v56 = vcombine.low %v791_v22, %v799_v25 }
 0x263   : > { %5766 = vmatprep.subr.bf16.mxu1 %v16757_v35  ;;  %v527_v35 = vld [vmem:[%s26499_s1 + $0x770] sm:$0xff] }
 0x264   : > { %v775_v37 = vld [vmem:[%s26499_s1 + $0xf30] sm:$0xff]  ;;  %v16660_v49 = vcombine.low %v519_v34, %v527_v35 }
 0x265   : > { %5726 = vmatpush1.bf16.msra.mxu0 %v16500_v39  ;;  %v783_v38 = vld [vmem:[%s26499_s1 + $0xf70] sm:$0xff]  ;;  %v16661_v39 = vcombine.high %v519_v34, %v527_v35 }
 0x266   : > { %5767 = vmatpush1.bf16.msra.mxu1 %v16756_v40  ;;  %5727 = vmatprep.subr.bf16.mxu0 %v16485_v44  ;;  %v16917_v40 = vcombine.high %v775_v37, %v783_v38  ;;  %v503_v44 = vld [vmem:[%s26499_s1 + $0x6b0] sm:$0xff]  ;;  %v16916_v50 = vcombine.low %v775_v37, %v783_v38 }
 0x267   : > { %5768 = vmatprep.subr.bf16.mxu1 %v16741_v41  ;;  %v511_v41 = vld [vmem:[%s26499_s1 + $0x6f0] sm:$0xff] }
 0x268   : > { %v759_v46 = vld [vmem:[%s26499_s1 + $0xeb0] sm:$0xff]  ;;  %v16644_v23 = vcombine.low %v503_v44, %v511_v41 }
 0x269   : > { %5728 = vmatpush1.bf16.msra.mxu0 %v16484_v57  ;;  %v767_v48 = vld [vmem:[%s26499_s1 + $0xef0] sm:$0xff]  ;;  %v16645_v57 = vcombine.high %v503_v44, %v511_v41 }
 0x26a   : > { %5769 = vmatpush1.bf16.msra.mxu1 %v16740_v42  ;;  %5729 = vmatprep.subr.bf16.mxu0 %v16469_v60  ;;  %v16901_v42 = vcombine.high %v759_v46, %v767_v48  ;;  %v487_v60 = vld [vmem:[%s26499_s1 + $0x630] sm:$0xff]  ;;  %v16900_v45 = vcombine.low %v759_v46, %v767_v48 }
 0x26b   : > { %5770 = vmatprep.subr.bf16.mxu1 %v16725_v62  ;;  %v495_v62 = vld [vmem:[%s26499_s1 + $0x670] sm:$0xff] }
 0x26c   : > { %v743_v53 = vld [vmem:[%s26499_s1 + $0xe30] sm:$0xff]  ;;  %v16628_v7 = vcombine.low %v487_v60, %v495_v62 }
 0x26d   : > { %5730 = vmatpush1.bf16.msra.mxu0 %v16468_v19  ;;  %v751_v2 = vld [vmem:[%s26499_s1 + $0xe70] sm:$0xff]  ;;  %v16629_v19 = vcombine.high %v487_v60, %v495_v62  ;;  %v408_v60 = vld [vmem:[%s26499_s1 + $0x3b8] sm:$0xff] }
 0x26e   : > { %5771 = vmatpush1.bf16.msra.mxu1 %v16724_v3  ;;  %5731 = vmatprep.subr.bf16.mxu0 %v16453_v4  ;;  %v16885_v3 = vcombine.high %v743_v53, %v751_v2  ;;  %v471_v4 = vld [vmem:[%s26499_s1 + $0x5b0] sm:$0xff]  ;;  %v16884_v11 = vcombine.low %v743_v53, %v751_v2  ;;  %v416_v62 = vld [vmem:[%s26499_s1 + $0x3f8] sm:$0xff] }
 0x26f   : > { %5772 = vmatprep.subr.bf16.mxu1 %v16709_v30  ;;  %v479_v30 = vld [vmem:[%s26499_s1 + $0x5f0] sm:$0xff] }
 0x270   : > { %v727_v5 = vld [vmem:[%s26499_s1 + $0xdb0] sm:$0xff]  ;;  %v16612_v22 = vcombine.low %v471_v4, %v479_v30 }
 0x271   : > { %5732 = vmatpush1.bf16.msra.mxu0 %v16452_v12  ;;  %v735_v6 = vld [vmem:[%s26499_s1 + $0xdf0] sm:$0xff]  ;;  %v16613_v12 = vcombine.high %v471_v4, %v479_v30  ;;  %v392_v30 = vld [vmem:[%s26499_s1 + $0x338] sm:$0xff] }
 0x272   : > { %5773 = vmatpush1.bf16.msra.mxu1 %v16708_v13  ;;  %5733 = vmatprep.subr.bf16.mxu0 %v16437_v51  ;;  %v16869_v13 = vcombine.high %v727_v5, %v735_v6  ;;  %v455_v51 = vld [vmem:[%s26499_s1 + $0x530] sm:$0xff]  ;;  %v16868_v25 = vcombine.low %v727_v5, %v735_v6  ;;  %v400_v5 = vld [vmem:[%s26499_s1 + $0x378] sm:$0xff] }
 0x273   : > { %5774 = vmatprep.subr.bf16.mxu1 %v16693_v17  ;;  %v463_v17 = vld [vmem:[%s26499_s1 + $0x570] sm:$0xff] }
 0x274   : > { %v711_v18 = vld [vmem:[%s26499_s1 + $0xd30] sm:$0xff]  ;;  %v16596_v37 = vcombine.low %v455_v51, %v463_v17 }
 0x275   : > { %5734 = vmatpush1.bf16.msra.mxu0 %v16436_v26  ;;  %v719_v21 = vld [vmem:[%s26499_s1 + $0xd70] sm:$0xff]  ;;  %v16597_v26 = vcombine.high %v455_v51, %v463_v17  ;;  %v16535_v51 = vcombine.high %v392_v30, %v400_v5 }
 0x276   : > { %5775 = vmatpush1.bf16.msra.mxu1 %v16692_v29  ;;  %5735 = vmatprep.subr.bf16.mxu0 %v16677_v31  ;;  %v16853_v29 = vcombine.high %v711_v18, %v719_v21  ;;  %v439_v31 = vld [vmem:[%s26499_s1 + $0x4b0] sm:$0xff]  ;;  %v16852_v38 = vcombine.low %v711_v18, %v719_v21 }
 0x277   : > { %5776 = vmatprep.subr.bf16.mxu1 %v16933_v32  ;;  %v447_v32 = vld [vmem:[%s26499_s1 + $0x4f0] sm:$0xff] }
 0x278   : > { %v695_v34 = vld [vmem:[%s26499_s1 + $0xcb0] sm:$0xff]  ;;  %v16580_v46 = vcombine.low %v439_v31, %v447_v32 }
 0x279   : > { %5736 = vmatpush2.bf16.msra.mxu0 %v16676_v52  ;;  %v703_v35 = vld [vmem:[%s26499_s1 + $0xcf0] sm:$0xff]  ;;  %v16581_v52 = vcombine.high %v439_v31, %v447_v32 }
 0x27a   : > { %5777 = vmatpush2.bf16.msra.mxu1 %v16932_v56  ;;  %5737 = vmatprep.subr.bf16.mxu0 %v16661_v39  ;;  %v16837_v56 = vcombine.high %v695_v34, %v703_v35  ;;  %v423_v39 = vld [vmem:[%s26499_s1 + $0x430] sm:$0xff]  ;;  %v16836_v48 = vcombine.low %v695_v34, %v703_v35  ;;  %v16534_v34 = vcombine.low %v392_v30, %v400_v5 }
 0x27b   : > { %5778 = vmatprep.subr.bf16.mxu1 %v16917_v40  ;;  %v431_v40 = vld [vmem:[%s26499_s1 + $0x470] sm:$0xff] }
 0x27c   : > { %v679_v44 = vld [vmem:[%s26499_s1 + $0xc30] sm:$0xff]  ;;  %v16564_v53 = vcombine.low %v423_v39, %v431_v40 }
 0x27d   : > { %5738 = vmatpush2.bf16.msra.mxu0 %v16660_v49  ;;  %v687_v41 = vld [vmem:[%s26499_s1 + $0xc70] sm:$0xff]  ;;  %v16565_v49 = vcombine.high %v423_v39, %v431_v40 }
 0x27e   : > { %5779 = vmatpush2.bf16.msra.mxu1 %v16916_v50  ;;  %5739 = vmatprep.subr.bf16.mxu0 %v16645_v57  ;;  %v16821_v50 = vcombine.high %v679_v44, %v687_v41  ;;  %v919_v57 = vld [vmem:[%s26499_s1 + $0x13b0] sm:$0xff]  ;;  %v16820_v2 = vcombine.low %v679_v44, %v687_v41  ;;  %v360_v41 = vld [vmem:[%s26499_s1 + $0x238] sm:$0xff] }
 0x27f   : > { %5780 = vmatprep.subr.bf16.mxu1 %v16901_v42  ;;  %v927_v42 = vld [vmem:[%s26499_s1 + $0x13f0] sm:$0xff] }
 0x280   : > { %v911_v4 = vld [vmem:[%s26499_s1 + $0x1370] sm:$0xff] }
 0x281   : > { %5740 = vmatpush2.bf16.msra.mxu0 %v16644_v23  ;;  %v21468_v23 = vld [vmem:[%s26500_s2 + $0x8] sm:$0xff]  ;;  %v887_v17 = vld [vmem:[%s26499_s1 + $0x12b0] sm:$0xff] }
 0x282   : > { %5781 = vmatpush2.bf16.msra.mxu1 %v16900_v45  ;;  %5741 = vmatprep.subr.bf16.mxu0 %v16629_v19  ;;  %v17061_v45 = vcombine.high %v919_v57, %v927_v42  ;;  %v16551_v19 = vcombine.high %v408_v60, %v416_v62  ;;  %v1096_v6 = vrot.slane %v21468_v23, %v20205_v54  ;;  %v895_v18 = vld [vmem:[%s26499_s1 + $0x12f0] sm:$0xff] }
 0x283   : > { %5782 = vmatprep.subr.bf16.mxu1 %v16885_v3  ;;  %v903_v3 = vld [vmem:[%s26499_s1 + $0x1330] sm:$0xff]  ;;  %v17029_v35 = vcombine.high %v887_v17, %v895_v18 }
 0x284   : > { %v17044_v31 = vcombine.low %v903_v3, %v911_v4  ;;  %v871_v39 = vld [vmem:[%s26499_s1 + $0x1230] sm:$0xff] }
 0x285   : > { %5742 = vmatpush2.bf16.msra.mxu0 %v16628_v7  ;;  %v17060_v7 = vcombine.low %v919_v57, %v927_v42  ;;  %v879_v40 = vld [vmem:[%s26499_s1 + $0x1270] sm:$0xff] }
 0x286   : > { %5783 = vmatpush2.bf16.msra.mxu1 %v16884_v11  ;;  %5743 = vmatprep.subr.bf16.mxu0 %v16613_v12  ;;  %v16550_v11 = vcombine.low %v408_v60, %v416_v62  ;;  %v17045_v12 = vcombine.high %v903_v3, %v911_v4  ;;  %v17013_v60 = vcombine.high %v871_v39, %v879_v40 }
 0x287   : > { %5784 = vmatprep.subr.bf16.mxu1 %v16869_v13  ;;  %v1100_v13 = vrot.slane %v21468_v23, %v20217_v63  ;;  %v17012_v3 = vcombine.low %v871_v39, %v879_v40 }
 0x289   : > { %5744 = vmatpush2.bf16.msra.mxu0 %v16612_v22  ;;  %v376_v22 = vld [vmem:[%s26499_s1 + $0x2b8] sm:$0xff] }
 0x28a   : > { %5785 = vmatpush2.bf16.msra.mxu1 %v16868_v25  ;;  %5745 = vmatprep.subr.bf16.mxu0 %v16597_v26  ;;  %v384_v25 = vld [vmem:[%s26499_s1 + $0x2f8] sm:$0xff] }
 0x28b   : > { %5786 = vmatprep.subr.bf16.mxu1 %v16853_v29  ;;  %v16518_v42 = vcombine.low %v376_v22, %v384_v25 }
 0x28d   : > { %5746 = vmatpush2.bf16.msra.mxu0 %v16596_v37 }
 0x28e   : > { %5787 = vmatpush2.bf16.msra.mxu1 %v16852_v38  ;;  %5747 = vmatprep.subr.bf16.mxu0 %v16581_v52 }
 0x28f   : > { %5788 = vmatprep.subr.bf16.mxu1 %v16837_v56  ;;  %v16519_v56 = vcombine.high %v376_v22, %v384_v25  ;;  %v831_v22 = vld [vmem:[%s26499_s1 + $0x10f0] sm:$0xff]  ;;  %v312_v25 = vld [vmem:[%s26499_s1 + $0xb8] sm:$0xff] }
 0x291   : > { %5748 = vmatpush2.bf16.msra.mxu0 %v16580_v46  ;;  %v368_v46 = vld [vmem:[%s26499_s1 + $0x278] sm:$0xff] }
 0x292   : > { %5789 = vmatpush2.bf16.msra.mxu1 %v16836_v48  ;;  %5749 = vmatprep.subr.bf16.mxu0 %v16565_v49  ;;  %v16502_v4 = vcombine.low %v360_v41, %v368_v46 }
 0x293   : > { %5790 = vmatprep.subr.bf16.mxu1 %v16821_v50  ;;  %v17028_v50 = vcombine.low %v887_v17, %v895_v18 }
 0x295   : > { %5750 = vmatpush2.bf16.msra.mxu0 %v16564_v53  ;;  %v16503_v53 = vcombine.high %v360_v41, %v368_v46  ;;  %v1047_v46 = vld [vmem:[%s26499_s1 + $0x17b0] sm:$0xff] }
 0x296   : > { %5791 = vmatpush2.bf16.msra.mxu1 %v16820_v2  ;;  %5801 = vmatprep.subr.bf16.mxu0 %v17061_v45  ;;  %v855_v2 = vld [vmem:[%s26499_s1 + $0x11b0] sm:$0xff]  ;;  %v344_v45 = vld [vmem:[%s26499_s1 + $0x1b8] sm:$0xff] }
 0x297   : > { %5842 = vmatprep.subr.bf16.mxu1 %v16551_v19  ;;  %v352_v19 = vld [vmem:[%s26499_s1 + $0x1f8] sm:$0xff] }
 0x298   : > { %v5507_v21 = vpop.f32.mrf.mxu0  ;;  %5752 = vmatmul.mubr.bf16.vlgmr.msra.gmra.mxu0 %v19605_v16  ;;  %v16487_v5 = vcombine.high %v344_v45, %v352_v19 }
 0x299   : > { %v5508_v26 = vadd.f32 %v5507_v21, %v1096_v6  ;;  %v5548_v29 = vpop.f32.mrf.mxu1  ;;  %5793 = vmatmul.mubr.bf16.vlgmr.msra.gmra.mxu1 %v19614_v20  ;;  %5802 = vmatpush1.bf16.msra.mxu0 %v17060_v7  ;;  %v839_v6 = vld [vmem:[%s26499_s1 + $0x1130] sm:$0xff] }
 0x29a   : > { %5843 = vmatpush1.bf16.msra.mxu1 %v16550_v11  ;;  %v5509_v32 = vpop.f32.mrf.mxu0  ;;  %5803 = vmatprep.subr.bf16.mxu0 %v17045_v12  ;;  %v847_v7 = vld [vmem:[%s26499_s1 + $0x1170] sm:$0xff]  ;;  %v328_v11 = vld [vmem:[%s26499_s1 + $0x138] sm:$0xff] }
 0x29b   : > { %v21500_v37 = vadd.f32 %v5548_v29, %v5508_v26  ;;  %v5510_v38 = vadd.f32 %v5509_v32, %v1100_v13  ;;  %v5550_v52 = vpop.f32.mrf.mxu1  ;;  %5844 = vmatprep.subr.bf16.mxu1 %v16535_v51  ;;  %5833 = vmatprep.mubr.bf16.mxu0 %v19625_v28  ;;  %v336_v12 = vld [vmem:[%s26499_s1 + $0x178] sm:$0xff]  ;;  %v16486_v51 = vcombine.low %v344_v45, %v352_v19  ;;  %v823_v21 = vld [vmem:[%s26499_s1 + $0x10b0] sm:$0xff] }
 0x29c   : > { %v5511_v44 = vpop.f32.mrf.mxu0  ;;  %5874 = vmatprep.mubr.bf16.mxu1 %v19477_v58  ;;  %v863_v58 = vld [vmem:[%s26499_s1 + $0x11f0] sm:$0xff]  ;;  %v16981_v17 = vcombine.high %v839_v6, %v847_v7  ;;  %v16471_v18 = vcombine.high %v328_v11, %v336_v12  ;;  %v320_v26 = vld [vmem:[%s26499_s1 + $0xf8] sm:$0xff]  ;;  %v16980_v29 = vcombine.low %v839_v6, %v847_v7  ;;  %v16965_v32 = vcombine.high %v823_v21, %v831_v22 }
 0x29d   : > { %v21516_v48 = vadd.f32 %v5550_v52, %v5510_v38  ;;  %v5552_v49 = vpop.f32.mrf.mxu1  ;;  %5804 = vmatpush1.bf16.msra.mxu0 %v17044_v31  ;;  %v16997_v30 = vcombine.high %v855_v2, %v863_v58  ;;  %v16996_v13 = vcombine.low %v855_v2, %v863_v58  ;;  %v16470_v31 = vcombine.low %v328_v11, %v336_v12  ;;  %v815_v38 = vld [vmem:[%s26499_s1 + $0x1070] sm:$0xff]  ;;  %v296_v52 = vld [vmem:[%s26499_s1 + $0x38] sm:$0xff] }
 0x29e   : > { %5845 = vmatpush1.bf16.msra.mxu1 %v16534_v34  ;;  %v5512_v57 = vpop.f32.mrf.mxu0  ;;  %5805 = vmatprep.subr.bf16.mxu0 %v17029_v35  ;;  %v16455_v34 = vcombine.high %v312_v25, %v320_v26  ;;  %v807_v35 = vld [vmem:[%s26499_s1 + $0x1030] sm:$0xff]  ;;  %v16964_v39 = vcombine.low %v823_v21, %v831_v22  ;;  %v16454_v40 = vcombine.low %v312_v25, %v320_v26  ;;  %v520_v45 = vld [vmem:[%s26499_s1 + $0x738] sm:$0xff] }
 0x29f   : > { %v5553_v62 = vpop.f32.mrf.mxu1  ;;  %5846 = vmatprep.subr.bf16.mxu1 %v16519_v56  ;;  %v304_v56 = vld [vmem:[%s26499_s1 + $0x78] sm:$0xff]  ;;  %v16949_v44 = vcombine.high %v807_v35, %v815_v38  ;;  %v1055_v49 = vld [vmem:[%s26499_s1 + $0x17f0] sm:$0xff] }
 0x2a0   : > { %v16439_v41 = vcombine.high %v296_v52, %v304_v56  ;;  %v544_v57 = vld [vmem:[%s26499_s1 + $0x7f8] sm:$0xff]  ;;  %v17189_v62 = vcombine.high %v1047_v46, %v1055_v49  ;;  %v1031_v2 = vld [vmem:[%s26499_s1 + $0x1730] sm:$0xff] }
 0x2a1   : > { %5806 = vmatpush1.bf16.msra.mxu0 %v17028_v50  ;;  %v536_v50 = vld [vmem:[%s26499_s1 + $0x7b8] sm:$0xff]  ;;  %v1039_v58 = vld [vmem:[%s26499_s1 + $0x1770] sm:$0xff] }
 0x2a2   : > { %5847 = vmatpush1.bf16.msra.mxu1 %v16518_v42  ;;  %5807 = vmatprep.subr.bf16.mxu0 %v17013_v60  ;;  %v16948_v42 = vcombine.low %v807_v35, %v815_v38  ;;  %v16438_v60 = vcombine.low %v296_v52, %v304_v56  ;;  %v528_v19 = vld [vmem:[%s26499_s1 + $0x778] sm:$0xff]  ;;  %v1015_v6 = vld [vmem:[%s26499_s1 + $0x16b0] sm:$0xff] }
 0x2a3   : > { %5848 = vmatprep.subr.bf16.mxu1 %v16503_v53  ;;  %v16679_v53 = vcombine.high %v536_v50, %v544_v57  ;;  %v1023_v7 = vld [vmem:[%s26499_s1 + $0x16f0] sm:$0xff]  ;;  %v504_v11 = vld [vmem:[%s26499_s1 + $0x6b8] sm:$0xff] }
 0x2a4   : > { %v512_v12 = vld [vmem:[%s26499_s1 + $0x6f8] sm:$0xff]  ;;  %v999_v21 = vld [vmem:[%s26499_s1 + $0x1630] sm:$0xff] }
 0x2a5   : > { %5808 = vmatpush1.bf16.msra.mxu0 %v17012_v3  ;;  %v17188_v3 = vcombine.low %v1047_v46, %v1055_v49  ;;  %v1007_v22 = vld [vmem:[%s26499_s1 + $0x1670] sm:$0xff]  ;;  %v488_v25 = vld [vmem:[%s26499_s1 + $0x638] sm:$0xff] }
 0x2a6   : > { %5849 = vmatpush1.bf16.msra.mxu1 %v16502_v4  ;;  %5809 = vmatprep.subr.bf16.mxu0 %v16997_v30  ;;  %v16678_v4 = vcombine.low %v536_v50, %v544_v57  ;;  %v17173_v30 = vcombine.high %v1031_v2, %v1039_v58  ;;  %v496_v26 = vld [vmem:[%s26499_s1 + $0x678] sm:$0xff]  ;;  %v983_v35 = vld [vmem:[%s26499_s1 + $0x15b0] sm:$0xff] }
 0x2a7   : > { %5850 = vmatprep.subr.bf16.mxu1 %v16487_v5  ;;  %v16663_v5 = vcombine.high %v520_v45, %v528_v19  ;;  %v991_v38 = vld [vmem:[%s26499_s1 + $0x15f0] sm:$0xff]  ;;  %v472_v52 = vld [vmem:[%s26499_s1 + $0x5b8] sm:$0xff] }
 0x2a8   : > { %v480_v56 = vld [vmem:[%s26499_s1 + $0x5f8] sm:$0xff]  ;;  %v967_v46 = vld [vmem:[%s26499_s1 + $0x1530] sm:$0xff] }
 0x2a9   : > { %5810 = vmatpush1.bf16.msra.mxu0 %v16996_v13  ;;  %v17172_v13 = vcombine.low %v1031_v2, %v1039_v58  ;;  %v975_v49 = vld [vmem:[%s26499_s1 + $0x1570] sm:$0xff]  ;;  %v456_v50 = vld [vmem:[%s26499_s1 + $0x538] sm:$0xff] }
 0x2aa   : > { %5851 = vmatpush1.bf16.msra.mxu1 %v16486_v51  ;;  %5811 = vmatprep.subr.bf16.mxu0 %v16981_v17  ;;  %v16662_v51 = vcombine.low %v520_v45, %v528_v19  ;;  %v17157_v17 = vcombine.high %v1015_v6, %v1023_v7  ;;  %v464_v57 = vld [vmem:[%s26499_s1 + $0x578] sm:$0xff]  ;;  %v951_v2 = vld [vmem:[%s26499_s1 + $0x14b0] sm:$0xff] }
 0x2ab   : > { %5852 = vmatprep.subr.bf16.mxu1 %v16471_v18  ;;  %v16647_v18 = vcombine.high %v504_v11, %v512_v12  ;;  %v959_v58 = vld [vmem:[%s26499_s1 + $0x14f0] sm:$0xff]  ;;  %v440_v45 = vld [vmem:[%s26499_s1 + $0x4b8] sm:$0xff] }
 0x2ac   : > { %v448_v19 = vld [vmem:[%s26499_s1 + $0x4f8] sm:$0xff] }
 0x2ad   : > { %5812 = vmatpush1.bf16.msra.mxu0 %v16980_v29  ;;  %v17156_v29 = vcombine.low %v1015_v6, %v1023_v7  ;;  %v935_v6 = vld [vmem:[%s26499_s1 + $0x1430] sm:$0xff] }
 0x2ae   : > { %5853 = vmatpush1.bf16.msra.mxu1 %v16470_v31  ;;  %5813 = vmatprep.subr.bf16.mxu0 %v16965_v32  ;;  %v16646_v31 = vcombine.low %v504_v11, %v512_v12  ;;  %v17141_v32 = vcombine.high %v999_v21, %v1007_v22  ;;  %v943_v7 = vld [vmem:[%s26499_s1 + $0x1470] sm:$0xff]  ;;  %v424_v11 = vld [vmem:[%s26499_s1 + $0x438] sm:$0xff] }
 0x2af   : > { %5854 = vmatprep.subr.bf16.mxu1 %v16455_v34  ;;  %v16631_v34 = vcombine.high %v488_v25, %v496_v26  ;;  %v432_v12 = vld [vmem:[%s26499_s1 + $0x478] sm:$0xff] }
 0x2b1   : > { %5814 = vmatpush1.bf16.msra.mxu0 %v16964_v39  ;;  %v17140_v39 = vcombine.low %v999_v21, %v1007_v22  ;;  %v664_v21 = vld [vmem:[%s26499_s1 + $0xbb8] sm:$0xff] }
 0x2b2   : > { %5855 = vmatpush1.bf16.msra.mxu1 %v16454_v40  ;;  %5815 = vmatprep.subr.bf16.mxu0 %v16949_v44  ;;  %v16630_v40 = vcombine.low %v488_v25, %v496_v26  ;;  %v17125_v44 = vcombine.high %v983_v35, %v991_v38  ;;  %v672_v22 = vld [vmem:[%s26499_s1 + $0xbf8] sm:$0xff] }
 0x2b3   : > { %5856 = vmatprep.subr.bf16.mxu1 %v16439_v41  ;;  %v16615_v41 = vcombine.high %v472_v52, %v480_v56  ;;  %v920_v25 = vld [vmem:[%s26499_s1 + $0x13b8] sm:$0xff] }
 0x2b4   : > { %v928_v26 = vld [vmem:[%s26499_s1 + $0x13f8] sm:$0xff] }
 0x2b5   : > { %5816 = vmatpush1.bf16.msra.mxu0 %v16948_v42  ;;  %v17124_v42 = vcombine.low %v983_v35, %v991_v38  ;;  %v648_v35 = vld [vmem:[%s26499_s1 + $0xb38] sm:$0xff] }
 0x2b6   : > { %5857 = vmatpush1.bf16.msra.mxu1 %v16438_v60  ;;  %5817 = vmatprep.subr.bf16.mxu0 %v17189_v62  ;;  %v16614_v60 = vcombine.low %v472_v52, %v480_v56  ;;  %v17109_v62 = vcombine.high %v967_v46, %v975_v49  ;;  %v656_v38 = vld [vmem:[%s26499_s1 + $0xb78] sm:$0xff] }
 0x2b7   : > { %5858 = vmatprep.subr.bf16.mxu1 %v16679_v53  ;;  %v16599_v53 = vcombine.high %v456_v50, %v464_v57  ;;  %v904_v52 = vld [vmem:[%s26499_s1 + $0x1338] sm:$0xff] }
 0x2b8   : > { %v912_v56 = vld [vmem:[%s26499_s1 + $0x1378] sm:$0xff] }
 0x2b9   : > { %5818 = vmatpush2.bf16.msra.mxu0 %v17188_v3  ;;  %v17108_v3 = vcombine.low %v967_v46, %v975_v49  ;;  %v632_v46 = vld [vmem:[%s26499_s1 + $0xab8] sm:$0xff] }
 0x2ba   : > { %5859 = vmatpush2.bf16.msra.mxu1 %v16678_v4  ;;  %5819 = vmatprep.subr.bf16.mxu0 %v17173_v30  ;;  %v16598_v4 = vcombine.low %v456_v50, %v464_v57  ;;  %v17093_v30 = vcombine.high %v951_v2, %v959_v58  ;;  %v640_v49 = vld [vmem:[%s26499_s1 + $0xaf8] sm:$0xff] }
 0x2bb   : > { %5860 = vmatprep.subr.bf16.mxu1 %v16663_v5  ;;  %v16583_v5 = vcombine.high %v440_v45, %v448_v19  ;;  %v888_v57 = vld [vmem:[%s26499_s1 + $0x12b8] sm:$0xff] }
 0x2bd   : > { %5820 = vmatpush2.bf16.msra.mxu0 %v17172_v13  ;;  %v17092_v13 = vcombine.low %v951_v2, %v959_v58  ;;  %v17046_v58 = vcombine.low %v904_v52, %v912_v56 }
 0x2be   : > { %5861 = vmatpush2.bf16.msra.mxu1 %v16662_v51  ;;  %5821 = vmatprep.subr.bf16.mxu0 %v17157_v17  ;;  %v16582_v51 = vcombine.low %v440_v45, %v448_v19  ;;  %v17077_v17 = vcombine.high %v935_v6, %v943_v7  ;;  %v16775_v45 = vcombine.high %v632_v46, %v640_v49 }
 0x2bf   : > { %5862 = vmatprep.subr.bf16.mxu1 %v16647_v18  ;;  %v16567_v18 = vcombine.high %v424_v11, %v432_v12 }
 0x2c1   : > { %5822 = vmatpush2.bf16.msra.mxu0 %v17156_v29  ;;  %v17076_v29 = vcombine.low %v935_v6, %v943_v7  ;;  %v16774_v7 = vcombine.low %v632_v46, %v640_v49  ;;  %v832_v46 = vld [vmem:[%s26499_s1 + $0x10f8] sm:$0xff] }
 0x2c2   : > { %5863 = vmatpush2.bf16.msra.mxu1 %v16646_v31  ;;  %5823 = vmatprep.subr.bf16.mxu0 %v17141_v32  ;;  %v16566_v31 = vcombine.low %v424_v11, %v432_v12  ;;  %v16807_v32 = vcombine.high %v664_v21, %v672_v22 }
 0x2c3   : > { %5864 = vmatprep.subr.bf16.mxu1 %v16631_v34  ;;  %v17063_v34 = vcombine.high %v920_v25, %v928_v26 }
 0x2c5   : > { %5824 = vmatpush2.bf16.msra.mxu0 %v17140_v39  ;;  %v16806_v39 = vcombine.low %v664_v21, %v672_v22  ;;  %v864_v21 = vld [vmem:[%s26499_s1 + $0x11f8] sm:$0xff] }
 0x2c6   : > { %5865 = vmatpush2.bf16.msra.mxu1 %v16630_v40  ;;  %5825 = vmatprep.subr.bf16.mxu0 %v17125_v44  ;;  %v17062_v40 = vcombine.low %v920_v25, %v928_v26  ;;  %v16791_v44 = vcombine.high %v648_v35, %v656_v38 }
 0x2c7   : > { %5866 = vmatprep.subr.bf16.mxu1 %v16615_v41  ;;  %v17047_v41 = vcombine.high %v904_v52, %v912_v56 }
 0x2c9   : > { %5826 = vmatpush2.bf16.msra.mxu0 %v17124_v42  ;;  %v896_v42 = vld [vmem:[%s26499_s1 + $0x12f8] sm:$0xff] }
 0x2ca   : > { %5867 = vmatpush2.bf16.msra.mxu1 %v16614_v60  ;;  %5827 = vmatprep.subr.bf16.mxu0 %v17109_v62  ;;  %v17030_v12 = vcombine.low %v888_v57, %v896_v42 }
 0x2cb   : > { %5868 = vmatprep.subr.bf16.mxu1 %v16599_v53  ;;  %v16790_v53 = vcombine.low %v648_v35, %v656_v38  ;;  %v848_v35 = vld [vmem:[%s26499_s1 + $0x1178] sm:$0xff] }
 0x2cd   : > { %5828 = vmatpush2.bf16.msra.mxu0 %v17108_v3 }
 0x2ce   : > { %5869 = vmatpush2.bf16.msra.mxu1 %v16598_v4  ;;  %5829 = vmatprep.subr.bf16.mxu0 %v17093_v30  ;;  %v17031_v4 = vcombine.high %v888_v57, %v896_v42 }
 0x2cf   : > { %5870 = vmatprep.subr.bf16.mxu1 %v16583_v5  ;;  %v880_v5 = vld [vmem:[%s26499_s1 + $0x1278] sm:$0xff] }
 0x2d1   : > { %5830 = vmatpush2.bf16.msra.mxu0 %v17092_v13 }
 0x2d2   : > { %5871 = vmatpush2.bf16.msra.mxu1 %v16582_v51  ;;  %5831 = vmatprep.subr.bf16.mxu0 %v17077_v17  ;;  %v600_v17 = vld [vmem:[%s26499_s1 + $0x9b8] sm:$0xff] }
 0x2d3   : > { %5872 = vmatprep.subr.bf16.mxu1 %v16567_v18  ;;  %v608_v18 = vld [vmem:[%s26499_s1 + $0x9f8] sm:$0xff] }
 0x2d4   : > { %v16743_v26 = vcombine.high %v600_v17, %v608_v18  ;;  %v16742_v38 = vcombine.low %v600_v17, %v608_v18  ;;  %v784_v17 = vld [vmem:[%s26499_s1 + $0xf78] sm:$0xff] }
 0x2d5   : > { %5832 = vmatpush2.bf16.msra.mxu0 %v17076_v29  ;;  %v1032_v18 = vld [vmem:[%s26499_s1 + $0x1738] sm:$0xff] }
 0x2d6   : > { %5873 = vmatpush2.bf16.msra.mxu1 %v16566_v31  ;;  %5883 = vmatprep.subr.bf16.mxu0 %v16807_v32  ;;  %v584_v31 = vld [vmem:[%s26499_s1 + $0x938] sm:$0xff] }
 0x2d7   : > { %5924 = vmatprep.subr.bf16.mxu1 %v17063_v34  ;;  %v592_v32 = vld [vmem:[%s26499_s1 + $0x978] sm:$0xff] }
 0x2d8   : > { %v5589_v50 = vpop.f32.mrf.mxu0  ;;  %5834 = vmatmul.mubr.bf16.vlgmr.msra.gmra.mxu0 %v19815_v33  ;;  %v840_v34 = vld [vmem:[%s26499_s1 + $0x1138] sm:$0xff]  ;;  %v16727_v56 = vcombine.high %v584_v31, %v592_v32  ;;  %v16726_v49 = vcombine.low %v584_v31, %v592_v32 }
 0x2d9   : > { %v21700_v60 = vadd.f32 %v5589_v50, %v21500_v37  ;;  %v21702_v62 = vpop.f32.mrf.mxu1  ;;  %5875 = vmatmul.mubr.bf16.vlgmr.msra.gmra.mxu1 %v19605_v16  ;;  %5884 = vmatpush1.bf16.msra.mxu0 %v16806_v39  ;;  %v616_v37 = vld [vmem:[%s26499_s1 + $0xa38] sm:$0xff]  ;;  %v16983_v39 = vcombine.high %v840_v34, %v848_v35  ;;  %v16982_v50 = vcombine.low %v840_v34, %v848_v35 }
 0x2da   : > { %5925 = vmatpush1.bf16.msra.mxu1 %v17062_v40  ;;  %v5591_v2 = vpop.f32.mrf.mxu0  ;;  %5885 = vmatprep.subr.bf16.mxu0 %v16791_v44  ;;  %v624_v16 = vld [vmem:[%s26499_s1 + $0xa78] sm:$0xff] }
 0x2db   : > { %v21706_v19 = vadd.f32 %v5591_v2, %v21516_v48  ;;  %v21708_v3 = vpop.f32.mrf.mxu1  ;;  %5926 = vmatprep.subr.bf16.mxu1 %v17047_v41  ;;  %5915 = vmatprep.mubr.bf16.mxu0 %v19479_v59  ;;  %v872_v48 = vld [vmem:[%s26499_s1 + $0x1238] sm:$0xff]  ;;  %v16759_v13 = vcombine.high %v616_v37, %v624_v16  ;;  %v16758_v22 = vcombine.low %v616_v37, %v624_v16 }
 0x2dc   : > { %v5593_v30 = vpop.f32.mrf.mxu0  ;;  %5956 = vmatprep.mubr.bf16.mxu1 %v19625_v28  ;;  %v17015_v51 = vcombine.high %v872_v48, %v880_v5  ;;  %v856_v28 = vld [vmem:[%s26499_s1 + $0x11b8] sm:$0xff]  ;;  %v17014_v25 = vcombine.low %v872_v48, %v880_v5 }
 0x2dd   : > { %v5634_v6 = vpop.f32.mrf.mxu1  ;;  %5886 = vmatpush1.bf16.msra.mxu0 %v16790_v53  ;;  %v16999_v29 = vcombine.high %v856_v28, %v864_v21  ;;  %v16998_v52 = vcombine.low %v856_v28, %v864_v21  ;;  %v568_v40 = vld [vmem:[%s26499_s1 + $0x8b8] sm:$0xff] }
 0x2de   : > { %5927 = vmatpush1.bf16.msra.mxu1 %v17046_v58  ;;  %v5594_v11 = vpop.f32.mrf.mxu0  ;;  %5887 = vmatprep.subr.bf16.mxu0 %v16775_v45  ;;  %v576_v44 = vld [vmem:[%s26499_s1 + $0x8f8] sm:$0xff] }
 0x2df   : > { %v5635_v59 = vpop.f32.mrf.mxu1  ;;  %5928 = vmatprep.subr.bf16.mxu1 %v17031_v4  ;;  %v824_v41 = vld [vmem:[%s26499_s1 + $0x10b8] sm:$0xff]  ;;  %v16711_v57 = vcombine.high %v568_v40, %v576_v44  ;;  %v16710_v4 = vcombine.low %v568_v40, %v576_v44 }
 0x2e0   : > { %v16967_v42 = vcombine.high %v824_v41, %v832_v46  ;;  %v552_v53 = vld [vmem:[%s26499_s1 + $0x838] sm:$0xff]  ;;  %v16966_v37 = vcombine.low %v824_v41, %v832_v46 }
 0x2e1   : > { %5888 = vmatpush1.bf16.msra.mxu0 %v16774_v7  ;;  %v560_v2 = vld [vmem:[%s26499_s1 + $0x878] sm:$0xff] }
 0x2e2   : > { %5929 = vmatpush1.bf16.msra.mxu1 %v17030_v12  ;;  %5889 = vmatprep.subr.bf16.mxu0 %v16759_v13  ;;  %v808_v58 = vld [vmem:[%s26499_s1 + $0x1038] sm:$0xff]  ;;  %v16695_v16 = vcombine.high %v552_v53, %v560_v2  ;;  %v16694_v11 = vcombine.low %v552_v53, %v560_v2 }
 0x2e3   : > { %5930 = vmatprep.subr.bf16.mxu1 %v17015_v51  ;;  %v816_v45 = vld [vmem:[%s26499_s1 + $0x1078] sm:$0xff] }
 0x2e4   : > { %v16951_v30 = vcombine.high %v808_v58, %v816_v45  ;;  %v792_v48 = vld [vmem:[%s26499_s1 + $0xfb8] sm:$0xff]  ;;  %v16950_v12 = vcombine.low %v808_v58, %v816_v45 }
 0x2e5   : > { %5890 = vmatpush1.bf16.msra.mxu0 %v16758_v22  ;;  %v800_v5 = vld [vmem:[%s26499_s1 + $0xff8] sm:$0xff] }
 0x2e6   : > { %5931 = vmatpush1.bf16.msra.mxu1 %v17014_v25  ;;  %5891 = vmatprep.subr.bf16.mxu0 %v16743_v26  ;;  %v1048_v6 = vld [vmem:[%s26499_s1 + $0x17b8] sm:$0xff]  ;;  %v16935_v13 = vcombine.high %v792_v48, %v800_v5  ;;  %v16934_v21 = vcombine.low %v792_v48, %v800_v5 }
 0x2e7   : > { %5932 = vmatprep.subr.bf16.mxu1 %v16999_v29  ;;  %v1056_v7 = vld [vmem:[%s26499_s1 + $0x17f8] sm:$0xff] }
 0x2e8   : > { %v17191_v59 = vcombine.high %v1048_v6, %v1056_v7  ;;  %v776_v51 = vld [vmem:[%s26499_s1 + $0xf38] sm:$0xff]  ;;  %v17190_v22 = vcombine.low %v1048_v6, %v1056_v7 }
 0x2e9   : > { %5892 = vmatpush1.bf16.msra.mxu0 %v16742_v38  ;;  %v1040_v28 = vld [vmem:[%s26499_s1 + $0x1778] sm:$0xff]  ;;  %v16919_v25 = vcombine.high %v776_v51, %v784_v17  ;;  %v16918_v35 = vcombine.low %v776_v51, %v784_v17 }
 0x2ea   : > { %5933 = vmatpush1.bf16.msra.mxu1 %v16998_v52  ;;  %5893 = vmatprep.subr.bf16.mxu0 %v16727_v56  ;;  %v17175_v26 = vcombine.high %v1032_v18, %v1040_v28  ;;  %v760_v29 = vld [vmem:[%s26499_s1 + $0xeb8] sm:$0xff]  ;;  %v17174_v38 = vcombine.low %v1032_v18, %v1040_v28 }
 0x2eb   : > { %5934 = vmatprep.subr.bf16.mxu1 %v16983_v39  ;;  %v768_v31 = vld [vmem:[%s26499_s1 + $0xef8] sm:$0xff] }
 0x2ec   : > { %v1016_v32 = vld [vmem:[%s26499_s1 + $0x16b8] sm:$0xff]  ;;  %v16903_v52 = vcombine.high %v760_v29, %v768_v31  ;;  %v16902_v46 = vcombine.low %v760_v29, %v768_v31 }
 0x2ed   : > { %5894 = vmatpush1.bf16.msra.mxu0 %v16726_v49  ;;  %v1024_v34 = vld [vmem:[%s26499_s1 + $0x16f8] sm:$0xff] }
 0x2ee   : > { %5935 = vmatpush1.bf16.msra.mxu1 %v16982_v50  ;;  %5895 = vmatprep.subr.bf16.mxu0 %v16711_v57  ;;  %v17159_v56 = vcombine.high %v1016_v32, %v1024_v34  ;;  %v744_v39 = vld [vmem:[%s26499_s1 + $0xe38] sm:$0xff]  ;;  %v17158_v49 = vcombine.low %v1016_v32, %v1024_v34 }
 0x2ef   : > { %5936 = vmatprep.subr.bf16.mxu1 %v16967_v42  ;;  %v752_v40 = vld [vmem:[%s26499_s1 + $0xe78] sm:$0xff] }
 0x2f0   : > { %v1000_v44 = vld [vmem:[%s26499_s1 + $0x1638] sm:$0xff]  ;;  %v16887_v50 = vcombine.high %v744_v39, %v752_v40  ;;  %v16886_v45 = vcombine.low %v744_v39, %v752_v40  ;;  %v6057_v39 = vld [vmem:[%s26501_s3 + $0x1e0] sm:$0xff] }
 0x2f1   : > { %5896 = vmatpush1.bf16.msra.mxu0 %v16710_v4  ;;  %v1008_v41 = vld [vmem:[%s26499_s1 + $0x1678] sm:$0xff]  ;;  %v6181_v40 = vld [vmem:[%s26501_s3 + $0x5c0] sm:$0xff] }
 0x2f2   : > { %5937 = vmatpush1.bf16.msra.mxu1 %v16966_v37  ;;  %5897 = vmatprep.subr.bf16.mxu0 %v16695_v16  ;;  %v17143_v57 = vcombine.high %v1000_v44, %v1008_v41  ;;  %v728_v42 = vld [vmem:[%s26499_s1 + $0xdb8] sm:$0xff]  ;;  %v17142_v4 = vcombine.low %v1000_v44, %v1008_v41  ;;  %v6185_v44 = vld [vmem:[%s26501_s3 + $0x5e0] sm:$0xff] }
 0x2f3   : > { %5938 = vmatprep.subr.bf16.mxu1 %v16951_v30  ;;  %v736_v53 = vld [vmem:[%s26499_s1 + $0xdf8] sm:$0xff] }
 0x2f4   : > { %v984_v2 = vld [vmem:[%s26499_s1 + $0x15b8] sm:$0xff]  ;;  %v16871_v37 = vcombine.high %v728_v42, %v736_v53  ;;  %v16870_v7 = vcombine.low %v728_v42, %v736_v53  ;;  %v5966_v42 = vmax.f32 %v20446_v0, 0.0  ;;  %v5968_v53 = vmax.f32 %v20674_v61, 0.0  ;;  %v6177_v0 = vld [vmem:[%s26501_s3 + $0x5a0] sm:$0xff] }
 0x2f5   : > { %5898 = vmatpush1.bf16.msra.mxu0 %v16694_v11  ;;  %v992_v58 = vld [vmem:[%s26499_s1 + $0x15f8] sm:$0xff]  ;;  %v17376_v61 = vcombine.low %v6181_v40, %v6185_v44 }
 0x2f6   : > { %5939 = vmatpush1.bf16.msra.mxu1 %v16950_v12  ;;  %5899 = vmatprep.subr.bf16.mxu0 %v16935_v13  ;;  %v17127_v16 = vcombine.high %v984_v2, %v992_v58  ;;  %v712_v30 = vld [vmem:[%s26499_s1 + $0xd38] sm:$0xff]  ;;  %v17126_v11 = vcombine.low %v984_v2, %v992_v58  ;;  %v6045_v2 = vld [vmem:[%s26501_s3 + $0x180] sm:$0xff] }
 0x2f7   : > { %5940 = vmatprep.subr.bf16.mxu1 %v17191_v59  ;;  %v720_v48 = vld [vmem:[%s26499_s1 + $0xd78] sm:$0xff]  ;;  %v6049_v58 = vld [vmem:[%s26501_s3 + $0x1a0] sm:$0xff] }
 0x2f8   : > { %v968_v5 = vld [vmem:[%s26499_s1 + $0x1538] sm:$0xff]  ;;  %v16855_v12 = vcombine.high %v712_v30, %v720_v48  ;;  %v16854_v28 = vcombine.low %v712_v30, %v720_v48  ;;  %v17241_v30 = vcombine.high %v6045_v2, %v6049_v58  ;;  %v6041_v48 = vld [vmem:[%s26501_s3 + $0x160] sm:$0xff] }
 0x2f9   : > { %5900 = vmatpush2.bf16.msra.mxu0 %v16934_v21  ;;  %v976_v6 = vld [vmem:[%s26499_s1 + $0x1578] sm:$0xff] }
 0x2fa   : > { %5941 = vmatpush2.bf16.msra.mxu1 %v17190_v22  ;;  %5901 = vmatprep.subr.bf16.mxu0 %v16919_v25  ;;  %v17111_v13 = vcombine.high %v968_v5, %v976_v6  ;;  %v696_v59 = vld [vmem:[%s26499_s1 + $0xcb8] sm:$0xff]  ;;  %v17110_v21 = vcombine.low %v968_v5, %v976_v6  ;;  %v21905_v5 = vpack.c.bf16 %v5966_v42, %v5966_v42 }
 0x2fb   : > { %5942 = vmatprep.subr.bf16.mxu1 %v17175_v26  ;;  %v704_v51 = vld [vmem:[%s26499_s1 + $0xcf8] sm:$0xff]  ;;  %v21907_v6 = vpack.c.bf16 %v5968_v53, %v5968_v53 }
 0x2fc   : > { %v952_v17 = vld [vmem:[%s26499_s1 + $0x14b8] sm:$0xff]  ;;  %v16839_v22 = vcombine.high %v696_v59, %v704_v51  ;;  %v16838_v34 = vcombine.low %v696_v59, %v704_v51 }
 0x2fd   : > { %5902 = vmatpush2.bf16.msra.mxu0 %v16918_v35  ;;  %v960_v18 = vld [vmem:[%s26499_s1 + $0x14f8] sm:$0xff] }
 0x2fe   : > { %5943 = vmatpush2.bf16.msra.mxu1 %v17174_v38  ;;  %5903 = vmatprep.subr.bf16.mxu0 %v16903_v52  ;;  %v17095_v25 = vcombine.high %v952_v17, %v960_v18  ;;  %v680_v26 = vld [vmem:[%s26499_s1 + $0xc38] sm:$0xff]  ;;  %v17094_v35 = vcombine.low %v952_v17, %v960_v18  ;;  %v17240_v17 = vcombine.low %v6045_v2, %v6049_v58  ;;  %v6013_v58 = vld [vmem:[%s26501_s3 + $0x80] sm:$0xff] }
 0x2ff   : > { %5944 = vmatprep.subr.bf16.mxu1 %v17159_v56  ;;  %v688_v29 = vld [vmem:[%s26499_s1 + $0xc78] sm:$0xff]  ;;  %v6053_v56 = vld [vmem:[%s26501_s3 + $0x1c0] sm:$0xff] }
 0x300   : > { %v936_v31 = vld [vmem:[%s26499_s1 + $0x1438] sm:$0xff]  ;;  %v16823_v38 = vcombine.high %v680_v26, %v688_v29  ;;  %v16822_v41 = vcombine.low %v680_v26, %v688_v29  ;;  %v6033_v26 = vld [vmem:[%s26501_s3 + $0x120] sm:$0xff] }
 0x301   : > { %5904 = vmatpush2.bf16.msra.mxu0 %v16902_v46  ;;  %v944_v32 = vld [vmem:[%s26499_s1 + $0x1478] sm:$0xff] }
 0x302   : > { %5945 = vmatpush2.bf16.msra.mxu1 %v17158_v49  ;;  %5905 = vmatprep.subr.bf16.mxu0 %v16887_v50  ;;  %v17079_v52 = vcombine.high %v936_v31, %v944_v32  ;;  %v17078_v46 = vcombine.low %v936_v31, %v944_v32  ;;  %v17249_v49 = vcombine.high %v6053_v56, %v6057_v39  ;;  %v6157_v31 = vld [vmem:[%s26501_s3 + $0x500] sm:$0xff] }
 0x303   : > { %5946 = vmatprep.subr.bf16.mxu1 %v17143_v57  ;;  %v1104_v50 = vrot.slane %v21468_v23, %v20609_v8  ;;  %v17377_v57 = vcombine.high %v6181_v40, %v6185_v44  ;;  %v6161_v32 = vld [vmem:[%s26501_s3 + $0x520] sm:$0xff] }
 0x304   : > { %v17353_v44 = vcombine.high %v6157_v31, %v6161_v32  ;;  %v17352_v42 = vcombine.low %v6157_v31, %v6161_v32  ;;  %v6249_v31 = vld [vmem:[%s26501_s3 + $0x7e0] sm:$0xff] }
 0x305   : > { %5906 = vmatpush2.bf16.msra.mxu0 %v16886_v45  ;;  %v1108_v45 = vrot.slane %v21468_v23, %v20624_v14  ;;  %v6037_v23 = vld [vmem:[%s26501_s3 + $0x140] sm:$0xff] }
 0x306   : > { %5947 = vmatpush2.bf16.msra.mxu1 %v17142_v4  ;;  %5907 = vmatprep.subr.bf16.mxu0 %v16871_v37  ;;  %v17248_v4 = vcombine.low %v6053_v56, %v6057_v39  ;;  %v6173_v37 = vld [vmem:[%s26501_s3 + $0x580] sm:$0xff] }
 0x307   : > { %5948 = vmatprep.subr.bf16.mxu1 %v17127_v16  ;;  %v5631_v16 = vadd.f32 %v21702_v62, %v1104_v50  ;;  %v6165_v62 = vld [vmem:[%s26501_s3 + $0x540] sm:$0xff]  ;;  %v17368_v18 = vcombine.low %v6173_v37, %v6177_v0 }
 0x308   : > { %v6153_v50 = vld [vmem:[%s26501_s3 + $0x4e0] sm:$0xff] }
 0x309   : > { %5908 = vmatpush2.bf16.msra.mxu0 %v16870_v7 }
 0x30a   : > { %5949 = vmatpush2.bf16.msra.mxu1 %v17126_v11  ;;  %5909 = vmatprep.subr.bf16.mxu0 %v16855_v12  ;;  %v17369_v11 = vcombine.high %v6173_v37, %v6177_v0  ;;  %v6169_v12 = vld [vmem:[%s26501_s3 + $0x560] sm:$0xff] }
 0x30b   : > { %5950 = vmatprep.subr.bf16.mxu1 %v17111_v13  ;;  %v5633_v13 = vadd.f32 %v21708_v3, %v1108_v45  ;;  %v17361_v3 = vcombine.high %v6165_v62, %v6169_v12  ;;  %v17360_v56 = vcombine.low %v6165_v62, %v6169_v12  ;;  %v6017_v45 = vld [vmem:[%s26501_s3 + $0xa0] sm:$0xff] }
 0x30c   : > { %v6145_v37 = vld [vmem:[%s26501_s3 + $0x4a0] sm:$0xff]  ;;  %v17208_v62 = vcombine.low %v6013_v58, %v6017_v45 }
 0x30d   : > { %5910 = vmatpush2.bf16.msra.mxu0 %v16854_v28  ;;  %v17233_v28 = vcombine.high %v6037_v23, %v6041_v48 }
 0x30e   : > { %5951 = vmatpush2.bf16.msra.mxu1 %v17110_v21  ;;  %5911 = vmatprep.subr.bf16.mxu0 %v16839_v22 }
 0x30f   : > { %5952 = vmatprep.subr.bf16.mxu1 %v17095_v25 }
 0x311   : > { %5912 = vmatpush2.bf16.msra.mxu0 %v16838_v34 }
 0x312   : > { %5953 = vmatpush2.bf16.msra.mxu1 %v17094_v35  ;;  %5913 = vmatprep.subr.bf16.mxu0 %v16823_v38  ;;  %v17232_v38 = vcombine.low %v6037_v23, %v6041_v48  ;;  %v6005_v23 = vld [vmem:[%s26501_s3 + $0x40] sm:$0xff] }
 0x313   : > { %5954 = vmatprep.subr.bf16.mxu1 %v17079_v52  ;;  %v6009_v48 = vld [vmem:[%s26501_s3 + $0x60] sm:$0xff] }
 0x315   : > { %5914 = vmatpush2.bf16.msra.mxu0 %v16822_v41  ;;  %v6021_v41 = vld [vmem:[%s26501_s3 + $0xc0] sm:$0xff] }
 0x316   : > { %5955 = vmatpush2.bf16.msra.mxu1 %v17078_v46  ;;  %12183 = vmatprep.subr.bf16.mxu0 %v17249_v49  ;;  %v6025_v46 = vld [vmem:[%s26501_s3 + $0xe0] sm:$0xff] }
 0x317   : > { %12224 = vmatprep.subr.bf16.mxu1 %v17377_v57  ;;  %v6149_v49 = vld [vmem:[%s26501_s3 + $0x4c0] sm:$0xff]  ;;  %v17217_v53 = vcombine.high %v6021_v41, %v6025_v46  ;;  %v17216_v0 = vcombine.low %v6021_v41, %v6025_v46 }
 0x318   : > { %v5671_v7 = vpop.f32.mrf.mxu0  ;;  %5916 = vmatmul.mubr.bf16.vlgmr.msra.gmra.mxu0 %v19614_v20  ;;  %v17345_v2 = vcombine.high %v6149_v49, %v6153_v50 }
 0x319   : > { %v5672_v59 = vadd.f32 %v5671_v7, %v5631_v16  ;;  %v5712_v51 = vpop.f32.mrf.mxu1  ;;  %5957 = vmatmul.mubr.bf16.vlgmr.msra.gmra.mxu1 %v19815_v33  ;;  %12184 = vmatpush1.bf16.msra.mxu0 %v17248_v4  ;;  %v6029_v33 = vld [vmem:[%s26501_s3 + $0x100] sm:$0xff]  ;;  %v17209_v16 = vcombine.high %v6013_v58, %v6017_v45 }
 0x31a   : > { %12215 = vmatprep.mubr.bf16.mxu0 %v21905_v5  ;;  %12225 = vmatpush1.bf16.msra.mxu1 %v17376_v61  ;;  %v5673_v20 = vpop.f32.mrf.mxu0  ;;  %v17225_v39 = vcombine.high %v6029_v33, %v6033_v26  ;;  %v17224_v57 = vcombine.low %v6029_v33, %v6033_v26  ;;  %v6141_v4 = vld [vmem:[%s26501_s3 + $0x480] sm:$0xff]  ;;  %v17344_v61 = vcombine.low %v6149_v49, %v6153_v50 }
 0x31b   : > { %v21919_v21 = vadd.f32 %v5712_v51, %v5672_v59  ;;  %12256 = vmatprep.mubr.bf16.mxu1 %v21907_v6  ;;  %v5674_v22 = vadd.f32 %v5673_v20, %v5633_v13  ;;  %v5714_v25 = vpop.f32.mrf.mxu1  ;;  %12185 = vmatprep.subr.bf16.mxu0 %v17241_v30  ;;  %v17337_v30 = vcombine.high %v6141_v4, %v6145_v37  ;;  %v6133_v7 = vld [vmem:[%s26501_s3 + $0x440] sm:$0xff] }
 0x31c   : > { %v5675_v29 = vpop.f32.mrf.mxu0  ;;  %12226 = vmatprep.subr.bf16.mxu1 %v17369_v11  ;;  %v6137_v11 = vld [vmem:[%s26501_s3 + $0x460] sm:$0xff]  ;;  %v17336_v12 = vcombine.low %v6141_v4, %v6145_v37  ;;  %v17201_v13 = vcombine.high %v6005_v23, %v6009_v48 }
 0x31d   : > { %v21934_v34 = vadd.f32 %v5714_v25, %v5674_v22  ;;  %v5716_v35 = vpop.f32.mrf.mxu1  ;;  %12186 = vmatpush1.bf16.msra.mxu0 %v17240_v17  ;;  %v17329_v59 = vcombine.high %v6133_v7, %v6137_v11  ;;  %v5997_v51 = vld [vmem:[%s26501_s3] sm:$0xff]  ;;  %v17328_v22 = vcombine.low %v6133_v7, %v6137_v11 }
 0x31e   : > { %12227 = vmatpush1.bf16.msra.mxu1 %v17368_v18  ;;  %v5676_v52 = vpop.f32.mrf.mxu0  ;;  %12187 = vmatprep.subr.bf16.mxu0 %v17233_v28  ;;  %v6001_v17 = vld [vmem:[%s26501_s3 + $0x20] sm:$0xff]  ;;  %v17200_v28 = vcombine.low %v6005_v23, %v6009_v48 }
 0x31f   : > { %v5717_v40 = vpop.f32.mrf.mxu1  ;;  %12228 = vmatprep.subr.bf16.mxu1 %v17361_v3  ;;  %v6125_v20 = vld [vmem:[%s26501_s3 + $0x400] sm:$0xff]  ;;  %v17193_v25 = vcombine.high %v5997_v51, %v6001_v17  ;;  %v17192_v32 = vcombine.low %v5997_v51, %v6001_v17 }
 0x320   : > { %v6129_v18 = vld [vmem:[%s26501_s3 + $0x420] sm:$0xff] }
 0x321   : > { %12188 = vmatpush1.bf16.msra.mxu0 %v17232_v38  ;;  %v17321_v3 = vcombine.high %v6125_v20, %v6129_v18  ;;  %v6117_v33 = vld [vmem:[%s26501_s3 + $0x3c0] sm:$0xff]  ;;  %v17320_v35 = vcombine.low %v6125_v20, %v6129_v18 }
 0x322   : > { %12229 = vmatpush1.bf16.msra.mxu1 %v17360_v56  ;;  %12189 = vmatprep.subr.bf16.mxu0 %v17225_v39  ;;  %v6121_v26 = vld [vmem:[%s26501_s3 + $0x3e0] sm:$0xff] }
 0x323   : > { %12230 = vmatprep.subr.bf16.mxu1 %v17353_v44  ;;  %v6245_v29 = vld [vmem:[%s26501_s3 + $0x7c0] sm:$0xff]  ;;  %v17313_v38 = vcombine.high %v6117_v33, %v6121_v26  ;;  %v17312_v41 = vcombine.low %v6117_v33, %v6121_v26 }
 0x324   : > { %v17441_v52 = vcombine.high %v6245_v29, %v6249_v31  ;;  %v6109_v56 = vld [vmem:[%s26501_s3 + $0x380] sm:$0xff]  ;;  %v17440_v46 = vcombine.low %v6245_v29, %v6249_v31 }
 0x325   : > { %12190 = vmatpush1.bf16.msra.mxu0 %v17224_v57  ;;  %v6113_v39 = vld [vmem:[%s26501_s3 + $0x3a0] sm:$0xff] }
 0x326   : > { %12231 = vmatpush1.bf16.msra.mxu1 %v17352_v42  ;;  %12191 = vmatprep.subr.bf16.mxu0 %v17217_v53  ;;  %v6237_v40 = vld [vmem:[%s26501_s3 + $0x780] sm:$0xff]  ;;  %v17305_v49 = vcombine.high %v6109_v56, %v6113_v39  ;;  %v17304_v58 = vcombine.low %v6109_v56, %v6113_v39 }
 0x327   : > { %12232 = vmatprep.subr.bf16.mxu1 %v17345_v2  ;;  %v6241_v44 = vld [vmem:[%s26501_s3 + $0x7a0] sm:$0xff] }
 0x328   : > { %v17433_v50 = vcombine.high %v6237_v40, %v6241_v44  ;;  %v6101_v57 = vld [vmem:[%s26501_s3 + $0x340] sm:$0xff]  ;;  %v17432_v45 = vcombine.low %v6237_v40, %v6241_v44 }
 0x329   : > { %12192 = vmatpush1.bf16.msra.mxu0 %v17216_v0  ;;  %v6105_v42 = vld [vmem:[%s26501_s3 + $0x360] sm:$0xff] }
 0x32a   : > { %12233 = vmatpush1.bf16.msra.mxu1 %v17344_v61  ;;  %12193 = vmatprep.subr.bf16.mxu0 %v17209_v16  ;;  %v6229_v53 = vld [vmem:[%s26501_s3 + $0x740] sm:$0xff]  ;;  %v17297_v4 = vcombine.high %v6101_v57, %v6105_v42  ;;  %v17296_v23 = vcombine.low %v6101_v57, %v6105_v42 }
 0x32b   : > { %12234 = vmatprep.subr.bf16.mxu1 %v17337_v30  ;;  %v6233_v2 = vld [vmem:[%s26501_s3 + $0x760] sm:$0xff] }
 0x32c   : > { %v17425_v37 = vcombine.high %v6229_v53, %v6233_v2  ;;  %v6093_v0 = vld [vmem:[%s26501_s3 + $0x300] sm:$0xff]  ;;  %v17424_v48 = vcombine.low %v6229_v53, %v6233_v2 }
 0x32d   : > { %12194 = vmatpush1.bf16.msra.mxu0 %v17208_v62  ;;  %v6097_v61 = vld [vmem:[%s26501_s3 + $0x320] sm:$0xff] }
 0x32e   : > { %12235 = vmatpush1.bf16.msra.mxu1 %v17336_v12  ;;  %12195 = vmatprep.subr.bf16.mxu0 %v17201_v13  ;;  %v6221_v16 = vld [vmem:[%s26501_s3 + $0x700] sm:$0xff]  ;;  %v17289_v7 = vcombine.high %v6093_v0, %v6097_v61  ;;  %v17288_v51 = vcombine.low %v6093_v0, %v6097_v61  ;;  %v5965_v61 = vmax.f32 %v20440_v55, 0.0  ;;  %v5972_v55 = vmax.f32 %v21307_v24, 0.0 }
 0x32f   : > { %12236 = vmatprep.subr.bf16.mxu1 %v17329_v59  ;;  %v6225_v30 = vld [vmem:[%s26501_s3 + $0x720] sm:$0xff] }
 0x330   : > { %v17417_v11 = vcombine.high %v6221_v16, %v6225_v30  ;;  %v6085_v62 = vld [vmem:[%s26501_s3 + $0x2c0] sm:$0xff]  ;;  %v17416_v17 = vcombine.low %v6221_v16, %v6225_v30 }
 0x331   : > { %12196 = vmatpush1.bf16.msra.mxu0 %v17200_v28  ;;  %v6089_v12 = vld [vmem:[%s26501_s3 + $0x2e0] sm:$0xff] }
 0x332   : > { %12237 = vmatpush1.bf16.msra.mxu1 %v17328_v22  ;;  %12197 = vmatprep.subr.bf16.mxu0 %v17193_v25  ;;  %v6213_v13 = vld [vmem:[%s26501_s3 + $0x6c0] sm:$0xff]  ;;  %v17281_v20 = vcombine.high %v6085_v62, %v6089_v12  ;;  %v17280_v33 = vcombine.low %v6085_v62, %v6089_v12  ;;  %v22105_v12 = vld [vmem:[%s26500_s2 + $0x8] sm:$0xff] }
 0x333   : > { %12238 = vmatprep.subr.bf16.mxu1 %v17321_v3  ;;  %v6217_v59 = vld [vmem:[%s26501_s3 + $0x6e0] sm:$0xff] }
 0x334   : > { %v17409_v18 = vcombine.high %v6213_v13, %v6217_v59  ;;  %v6077_v28 = vld [vmem:[%s26501_s3 + $0x280] sm:$0xff]  ;;  %v17408_v26 = vcombine.low %v6213_v13, %v6217_v59 }
 0x335   : > { %12198 = vmatpush1.bf16.msra.mxu0 %v17192_v32  ;;  %v6081_v22 = vld [vmem:[%s26501_s3 + $0x2a0] sm:$0xff] }
 0x336   : > { %12239 = vmatpush1.bf16.msra.mxu1 %v17320_v35  ;;  %12199 = vmatprep.subr.bf16.mxu0 %v17313_v38  ;;  %v6205_v25 = vld [vmem:[%s26501_s3 + $0x680] sm:$0xff]  ;;  %v17273_v29 = vcombine.high %v6077_v28, %v6081_v22  ;;  %v17272_v56 = vcombine.low %v6077_v28, %v6081_v22 }
 0x337   : > { %12240 = vmatprep.subr.bf16.mxu1 %v17441_v52  ;;  %v6209_v3 = vld [vmem:[%s26501_s3 + $0x6a0] sm:$0xff] }
 0x338   : > { %v17401_v31 = vcombine.high %v6205_v25, %v6209_v3  ;;  %v6069_v32 = vld [vmem:[%s26501_s3 + $0x240] sm:$0xff]  ;;  %v17400_v39 = vcombine.low %v6205_v25, %v6209_v3 }
 0x339   : > { %12200 = vmatpush2.bf16.msra.mxu0 %v17312_v41  ;;  %v6073_v35 = vld [vmem:[%s26501_s3 + $0x260] sm:$0xff] }
 0x33a   : > { %12241 = vmatpush2.bf16.msra.mxu1 %v17440_v46  ;;  %12201 = vmatprep.subr.bf16.mxu0 %v17305_v49  ;;  %v6197_v38 = vld [vmem:[%s26501_s3 + $0x640] sm:$0xff]  ;;  %v17265_v40 = vcombine.high %v6069_v32, %v6073_v35  ;;  %v17264_v57 = vcombine.low %v6069_v32, %v6073_v35 }
 0x33b   : > { %12242 = vmatprep.subr.bf16.mxu1 %v17433_v50  ;;  %v6201_v52 = vld [vmem:[%s26501_s3 + $0x660] sm:$0xff] }
 0x33c   : > { %v17393_v44 = vcombine.high %v6197_v38, %v6201_v52  ;;  %v6061_v41 = vld [vmem:[%s26501_s3 + $0x200] sm:$0xff]  ;;  %v17392_v42 = vcombine.low %v6197_v38, %v6201_v52 }
 0x33d   : > { %12202 = vmatpush2.bf16.msra.mxu0 %v17304_v58  ;;  %v6065_v46 = vld [vmem:[%s26501_s3 + $0x220] sm:$0xff] }
 0x33e   : > { %12243 = vmatpush2.bf16.msra.mxu1 %v17432_v45  ;;  %12203 = vmatprep.subr.bf16.mxu0 %v17297_v4  ;;  %v6189_v49 = vld [vmem:[%s26501_s3 + $0x600] sm:$0xff]  ;;  %v17257_v53 = vcombine.high %v6061_v41, %v6065_v46  ;;  %v17256_v0 = vcombine.low %v6061_v41, %v6065_v46 }
 0x33f   : > { %12244 = vmatprep.subr.bf16.mxu1 %v17425_v37  ;;  %v6193_v50 = vld [vmem:[%s26501_s3 + $0x620] sm:$0xff] }
 0x340   : > { %v17385_v2 = vcombine.high %v6189_v49, %v6193_v50  ;;  %v6309_v58 = vld [vmem:[%s26501_s3 + $0x9c0] sm:$0xff]  ;;  %v17384_v16 = vcombine.low %v6189_v49, %v6193_v50 }
 0x341   : > { %12204 = vmatpush2.bf16.msra.mxu0 %v17296_v23  ;;  %v6313_v45 = vld [vmem:[%s26501_s3 + $0x9e0] sm:$0xff]  ;;  %v5967_v23 = vmax.f32 %v20658_v47, 0.0  ;;  %v1112_v47 = vrot.slane %v22105_v12, %v20833_v10 }
 0x342   : > { %12245 = vmatpush2.bf16.msra.mxu1 %v17424_v48  ;;  %12205 = vmatprep.subr.bf16.mxu0 %v17289_v7  ;;  %v6437_v4 = vld [vmem:[%s26501_s3 + $0xdc0] sm:$0xff]  ;;  %v17505_v30 = vcombine.high %v6309_v58, %v6313_v45  ;;  %v5970_v7 = vmax.f32 %v21079_v1, 0.0  ;;  %v17504_v1 = vcombine.low %v6309_v58, %v6313_v45 }
 0x343   : > { %12246 = vmatprep.subr.bf16.mxu1 %v17417_v11  ;;  %v6441_v37 = vld [vmem:[%s26501_s3 + $0xde0] sm:$0xff] }
 0x344   : > { %v17633_v48 = vcombine.high %v6437_v4, %v6441_v37  ;;  %v6301_v11 = vld [vmem:[%s26501_s3 + $0x980] sm:$0xff]  ;;  %v17632_v24 = vcombine.low %v6437_v4, %v6441_v37  ;;  %v22127_v25 = vpack.c.bf16 %v5970_v7, %v5970_v7 }
 0x345   : > { %12206 = vmatpush2.bf16.msra.mxu0 %v17288_v51  ;;  %v6305_v62 = vld [vmem:[%s26501_s3 + $0x9a0] sm:$0xff]  ;;  %v22115_v51 = vpack.c.bf16 %v5965_v61, %v5965_v61 }
 0x346   : > { %12247 = vmatpush2.bf16.msra.mxu1 %v17416_v17  ;;  %12207 = vmatprep.subr.bf16.mxu0 %v17281_v20  ;;  %v6429_v13 = vld [vmem:[%s26501_s3 + $0xd80] sm:$0xff]  ;;  %v22117_v17 = vpack.c.bf16 %v5967_v23, %v5967_v23  ;;  %v1116_v20 = vrot.slane %v22105_v12, %v20836_v15  ;;  %v17496_v38 = vcombine.low %v6301_v11, %v6305_v62 }
 0x347   : > { %12248 = vmatprep.subr.bf16.mxu1 %v17409_v18  ;;  %v6433_v59 = vld [vmem:[%s26501_s3 + $0xda0] sm:$0xff]  ;;  %v17497_v18 = vcombine.high %v6301_v11, %v6305_v62 }
 0x348   : > { %v6293_v28 = vld [vmem:[%s26501_s3 + $0x940] sm:$0xff] }
 0x349   : > { %12208 = vmatpush2.bf16.msra.mxu0 %v17280_v33  ;;  %v6297_v22 = vld [vmem:[%s26501_s3 + $0x960] sm:$0xff]  ;;  %v17625_v33 = vcombine.high %v6429_v13, %v6433_v59 }
 0x34a   : > { %12249 = vmatpush2.bf16.msra.mxu1 %v17408_v26  ;;  %12209 = vmatprep.subr.bf16.mxu0 %v17273_v29  ;;  %v6421_v26 = vld [vmem:[%s26501_s3 + $0xd40] sm:$0xff]  ;;  %v17488_v45 = vcombine.low %v6293_v28, %v6297_v22 }
 0x34b   : > { %12250 = vmatprep.subr.bf16.mxu1 %v17401_v31  ;;  %v6425_v29 = vld [vmem:[%s26501_s3 + $0xd60] sm:$0xff]  ;;  %v22136_v31 = vpack.c.bf16 %v5972_v55, %v5972_v55 }
 0x34c   : > { %v17617_v46 = vcombine.high %v6421_v26, %v6425_v29  ;;  %v6285_v49 = vld [vmem:[%s26501_s3 + $0x900] sm:$0xff]  ;;  %v17616_v37 = vcombine.low %v6421_v26, %v6425_v29 }
 0x34d   : > { %12210 = vmatpush2.bf16.msra.mxu0 %v17272_v56  ;;  %v17624_v56 = vcombine.low %v6429_v13, %v6433_v59  ;;  %v6289_v50 = vld [vmem:[%s26501_s3 + $0x920] sm:$0xff] }
 0x34e   : > { %12251 = vmatpush2.bf16.msra.mxu1 %v17400_v39  ;;  %12211 = vmatprep.subr.bf16.mxu0 %v17265_v40  ;;  %v17489_v39 = vcombine.high %v6293_v28, %v6297_v22  ;;  %v6281_v23 = vld [vmem:[%s26501_s3 + $0x8e0] sm:$0xff]  ;;  %v17480_v11 = vcombine.low %v6285_v49, %v6289_v50 }
 0x34f   : > { %12252 = vmatprep.subr.bf16.mxu1 %v17393_v44  ;;  %v6409_v7 = vld [vmem:[%s26501_s3 + $0xce0] sm:$0xff] }
 0x350   : > { %v6273_v13 = vld [vmem:[%s26501_s3 + $0x8a0] sm:$0xff] }
 0x351   : > { %12212 = vmatpush2.bf16.msra.mxu0 %v17264_v57  ;;  %v6397_v59 = vld [vmem:[%s26501_s3 + $0xc80] sm:$0xff] }
 0x352   : > { %12253 = vmatpush2.bf16.msra.mxu1 %v17392_v42  ;;  %12213 = vmatprep.subr.bf16.mxu0 %v17257_v53  ;;  %v6413_v42 = vld [vmem:[%s26501_s3 + $0xd00] sm:$0xff] }
 0x353   : > { %12254 = vmatprep.subr.bf16.mxu1 %v17385_v2  ;;  %v6417_v53 = vld [vmem:[%s26501_s3 + $0xd20] sm:$0xff] }
 0x354   : > { %v17608_v62 = vcombine.low %v6413_v42, %v6417_v53  ;;  %v6389_v26 = vld [vmem:[%s26501_s3 + $0xc40] sm:$0xff] }
 0x355   : > { %12214 = vmatpush2.bf16.msra.mxu0 %v17256_v0  ;;  %v17481_v0 = vcombine.high %v6285_v49, %v6289_v50  ;;  %v6393_v29 = vld [vmem:[%s26501_s3 + $0xc60] sm:$0xff] }
 0x356   : > { %12255 = vmatpush2.bf16.msra.mxu1 %v17384_v16  ;;  %12265 = vmatprep.subr.bf16.mxu0 %v17505_v30  ;;  %v17609_v16 = vcombine.high %v6413_v42, %v6417_v53  ;;  %v6277_v30 = vld [vmem:[%s26501_s3 + $0x8c0] sm:$0xff]  ;;  %v17584_v49 = vcombine.low %v6389_v26, %v6393_v29 }
 0x357   : > { %12306 = vmatprep.subr.bf16.mxu1 %v17633_v48  ;;  %v6405_v48 = vld [vmem:[%s26501_s3 + $0xcc0] sm:$0xff]  ;;  %v17473_v55 = vcombine.high %v6277_v30, %v6281_v23 }
 0x358   : > { %v5753_v3 = vpop.f32.mrf.mxu0  ;;  %12216 = vmatmul.mubr.bf16.vlgmr.msra.gmra.mxu0 %v22115_v51  ;;  %v6373_v42 = vld [vmem:[%s26501_s3 + $0xbc0] sm:$0xff] }
 0x359   : > { %v5754_v32 = vadd.f32 %v5753_v3, %v1112_v47  ;;  %v5794_v35 = vpop.f32.mrf.mxu1  ;;  %12257 = vmatmul.mubr.bf16.vlgmr.msra.gmra.mxu1 %v22117_v17  ;;  %12266 = vmatpush1.bf16.msra.mxu0 %v17504_v1  ;;  %v17601_v47 = vcombine.high %v6405_v48, %v6409_v7  ;;  %v6269_v1 = vld [vmem:[%s26501_s3 + $0x880] sm:$0xff] }
 0x35a   : > { %12297 = vmatprep.mubr.bf16.mxu0 %v22127_v25  ;;  %12307 = vmatpush1.bf16.msra.mxu1 %v17632_v24  ;;  %v5755_v52 = vpop.f32.mrf.mxu0  ;;  %v6401_v24 = vld [vmem:[%s26501_s3 + $0xca0] sm:$0xff]  ;;  %v17465_v28 = vcombine.high %v6269_v1, %v6273_v13 }
 0x35b   : > { %v22140_v40 = vadd.f32 %v5794_v35, %v5754_v32  ;;  %12338 = vmatprep.mubr.bf16.mxu1 %v22136_v31  ;;  %v5756_v44 = vadd.f32 %v5755_v52, %v1116_v20  ;;  %v5796_v41 = vpop.f32.mrf.mxu1  ;;  %12267 = vmatprep.subr.bf16.mxu0 %v17497_v18  ;;  %v17472_v20 = vcombine.low %v6277_v30, %v6281_v23  ;;  %v6261_v3 = vld [vmem:[%s26501_s3 + $0x840] sm:$0xff] }
 0x35c   : > { %v5757_v57 = vpop.f32.mrf.mxu0  ;;  %12308 = vmatprep.subr.bf16.mxu1 %v17625_v33  ;;  %v17600_v18 = vcombine.low %v6405_v48, %v6409_v7  ;;  %v17593_v22 = vcombine.high %v6397_v59, %v6401_v24  ;;  %v6265_v33 = vld [vmem:[%s26501_s3 + $0x860] sm:$0xff]  ;;  %v17464_v32 = vcombine.low %v6269_v1, %v6273_v13  ;;  %v17592_v35 = vcombine.low %v6397_v59, %v6401_v24 }
 0x35d   : > { %v22155_v2 = vadd.f32 %v5796_v41, %v5756_v44  ;;  %v5798_v58 = vpop.f32.mrf.mxu1  ;;  %12268 = vmatpush1.bf16.msra.mxu0 %v17496_v38  ;;  %v17457_v38 = vcombine.high %v6261_v3, %v6265_v33  ;;  %v17585_v52 = vcombine.high %v6389_v26, %v6393_v29  ;;  %v6381_v44 = vld [vmem:[%s26501_s3 + $0xc00] sm:$0xff] }
 0x35e   : > { %12309 = vmatpush1.bf16.msra.mxu1 %v17624_v56  ;;  %v5758_v4 = vpop.f32.mrf.mxu0  ;;  %12269 = vmatprep.subr.bf16.mxu0 %v17489_v39  ;;  %v6253_v56 = vld [vmem:[%s26501_s3 + $0x800] sm:$0xff] }
 0x35f   : > { %v5799_v61 = vpop.f32.mrf.mxu1  ;;  %12310 = vmatprep.subr.bf16.mxu1 %v17617_v46  ;;  %v6257_v39 = vld [vmem:[%s26501_s3 + $0x820] sm:$0xff]  ;;  %v17456_v46 = vcombine.low %v6261_v3, %v6265_v33 }
 0x360   : > { %v6385_v41 = vld [vmem:[%s26501_s3 + $0xc20] sm:$0xff]  ;;  %v17449_v50 = vcombine.high %v6253_v56, %v6257_v39  ;;  %v17448_v4 = vcombine.low %v6253_v56, %v6257_v39 }
 0x361   : > { %12270 = vmatpush1.bf16.msra.mxu0 %v17488_v45  ;;  %v17577_v57 = vcombine.high %v6381_v44, %v6385_v41  ;;  %v6377_v53 = vld [vmem:[%s26501_s3 + $0xbe0] sm:$0xff] }
 0x362   : > { %12311 = vmatpush1.bf16.msra.mxu1 %v17616_v37  ;;  %12271 = vmatprep.subr.bf16.mxu0 %v17481_v0  ;;  %v6501_v58 = vld [vmem:[%s26501_s3 + $0xfc0] sm:$0xff]  ;;  %v17576_v37 = vcombine.low %v6381_v44, %v6385_v41  ;;  %v17569_v0 = vcombine.high %v6373_v42, %v6377_v53  ;;  %v17568_v7 = vcombine.low %v6373_v42, %v6377_v53 }
 0x363   : > { %12312 = vmatprep.subr.bf16.mxu1 %v17609_v16  ;;  %v6505_v45 = vld [vmem:[%s26501_s3 + $0xfe0] sm:$0xff] }
 0x364   : > { %v17697_v61 = vcombine.high %v6501_v58, %v6505_v45  ;;  %v6365_v16 = vld [vmem:[%s26501_s3 + $0xb80] sm:$0xff] }
 0x365   : > { %12272 = vmatpush1.bf16.msra.mxu0 %v17480_v11  ;;  %v6369_v30 = vld [vmem:[%s26501_s3 + $0xba0] sm:$0xff]  ;;  %v17696_v11 = vcombine.low %v6501_v58, %v6505_v45 }
 0x366   : > { %12313 = vmatpush1.bf16.msra.mxu1 %v17608_v62  ;;  %12273 = vmatprep.subr.bf16.mxu0 %v17473_v55  ;;  %v6493_v23 = vld [vmem:[%s26501_s3 + $0xf80] sm:$0xff]  ;;  %v17561_v62 = vcombine.high %v6365_v16, %v6369_v30  ;;  %v17560_v24 = vcombine.low %v6365_v16, %v6369_v30 }
 0x367   : > { %12314 = vmatprep.subr.bf16.mxu1 %v17601_v47  ;;  %v6497_v48 = vld [vmem:[%s26501_s3 + $0xfa0] sm:$0xff] }
 0x368   : > { %v17689_v55 = vcombine.high %v6493_v23, %v6497_v48  ;;  %v6357_v47 = vld [vmem:[%s26501_s3 + $0xb40] sm:$0xff] }
 0x369   : > { %12274 = vmatpush1.bf16.msra.mxu0 %v17472_v20  ;;  %v6361_v1 = vld [vmem:[%s26501_s3 + $0xb60] sm:$0xff]  ;;  %v17688_v20 = vcombine.low %v6493_v23, %v6497_v48 }
 0x36a   : > { %12315 = vmatpush1.bf16.msra.mxu1 %v17600_v18  ;;  %12275 = vmatprep.subr.bf16.mxu0 %v17465_v28  ;;  %v6485_v13 = vld [vmem:[%s26501_s3 + $0xf40] sm:$0xff]  ;;  %v17553_v18 = vcombine.high %v6357_v47, %v6361_v1  ;;  %v17552_v29 = vcombine.low %v6357_v47, %v6361_v1 }
 0x36b   : > { %12316 = vmatprep.subr.bf16.mxu1 %v17593_v22  ;;  %v6489_v59 = vld [vmem:[%s26501_s3 + $0xf60] sm:$0xff] }
 0x36c   : > { %v17681_v28 = vcombine.high %v6485_v13, %v6489_v59  ;;  %v6349_v22 = vld [vmem:[%s26501_s3 + $0xb00] sm:$0xff] }
 0x36d   : > { %12276 = vmatpush1.bf16.msra.mxu0 %v17464_v32  ;;  %v6353_v3 = vld [vmem:[%s26501_s3 + $0xb20] sm:$0xff]  ;;  %v17680_v32 = vcombine.low %v6485_v13, %v6489_v59 }
 0x36e   : > { %12317 = vmatpush1.bf16.msra.mxu1 %v17592_v35  ;;  %12277 = vmatprep.subr.bf16.mxu0 %v17457_v38  ;;  %v6477_v33 = vld [vmem:[%s26501_s3 + $0xf00] sm:$0xff]  ;;  %v17545_v35 = vcombine.high %v6349_v22, %v6353_v3  ;;  %v17544_v41 = vcombine.low %v6349_v22, %v6353_v3 }
 0x36f   : > { %12318 = vmatprep.subr.bf16.mxu1 %v17585_v52  ;;  %v6481_v26 = vld [vmem:[%s26501_s3 + $0xf20] sm:$0xff] }
 0x370   : > { %v17673_v38 = vcombine.high %v6477_v33, %v6481_v26  ;;  %v6341_v52 = vld [vmem:[%s26501_s3 + $0xac0] sm:$0xff] }
 0x371   : > { %12278 = vmatpush1.bf16.msra.mxu0 %v17456_v46  ;;  %v6345_v56 = vld [vmem:[%s26501_s3 + $0xae0] sm:$0xff]  ;;  %v17672_v46 = vcombine.low %v6477_v33, %v6481_v26 }
 0x372   : > { %12319 = vmatpush1.bf16.msra.mxu1 %v17584_v49  ;;  %12279 = vmatprep.subr.bf16.mxu0 %v17449_v50  ;;  %v6469_v39 = vld [vmem:[%s26501_s3 + $0xec0] sm:$0xff]  ;;  %v17537_v49 = vcombine.high %v6341_v52, %v6345_v56  ;;  %v17536_v45 = vcombine.low %v6341_v52, %v6345_v56  ;;  %v5974_v56 = vmax.f32 %v21706_v19, 0.0 }
 0x373   : > { %12320 = vmatprep.subr.bf16.mxu1 %v17577_v57  ;;  %v6473_v44 = vld [vmem:[%s26501_s3 + $0xee0] sm:$0xff] }
 0x374   : > { %v17665_v50 = vcombine.high %v6469_v39, %v6473_v44  ;;  %v6333_v57 = vld [vmem:[%s26501_s3 + $0xa80] sm:$0xff] }
 0x375   : > { %12280 = vmatpush1.bf16.msra.mxu0 %v17448_v4  ;;  %v6337_v42 = vld [vmem:[%s26501_s3 + $0xaa0] sm:$0xff]  ;;  %v17664_v4 = vcombine.low %v6469_v39, %v6473_v44 }
 0x376   : > { %12321 = vmatpush1.bf16.msra.mxu1 %v17576_v37  ;;  %12281 = vmatprep.subr.bf16.mxu0 %v17569_v0  ;;  %v6461_v53 = vld [vmem:[%s26501_s3 + $0xe80] sm:$0xff]  ;;  %v17529_v37 = vcombine.high %v6333_v57, %v6337_v42  ;;  %v17528_v48 = vcombine.low %v6333_v57, %v6337_v42 }
 0x377   : > { %12322 = vmatprep.subr.bf16.mxu1 %v17697_v61  ;;  %v6465_v58 = vld [vmem:[%s26501_s3 + $0xea0] sm:$0xff] }
 0x378   : > { %v17657_v0 = vcombine.high %v6461_v53, %v6465_v58  ;;  %v6325_v61 = vld [vmem:[%s26501_s3 + $0xa40] sm:$0xff] }
 0x379   : > { %12282 = vmatpush2.bf16.msra.mxu0 %v17568_v7  ;;  %v6329_v16 = vld [vmem:[%s26501_s3 + $0xa60] sm:$0xff]  ;;  %v17656_v7 = vcombine.low %v6461_v53, %v6465_v58  ;;  %v22339_v53 = vpack.c.bf16 %v5974_v56, %v5974_v56 }
 0x37a   : > { %12323 = vmatpush2.bf16.msra.mxu1 %v17696_v11  ;;  %12283 = vmatprep.subr.bf16.mxu0 %v17561_v62  ;;  %v6453_v30 = vld [vmem:[%s26501_s3 + $0xe40] sm:$0xff]  ;;  %v17521_v11 = vcombine.high %v6325_v61, %v6329_v16  ;;  %v17520_v59 = vcombine.low %v6325_v61, %v6329_v16 }
 0x37b   : > { %12324 = vmatprep.subr.bf16.mxu1 %v17689_v55  ;;  %v6457_v23 = vld [vmem:[%s26501_s3 + $0xe60] sm:$0xff] }
 0x37c   : > { %v17649_v62 = vcombine.high %v6453_v30, %v6457_v23  ;;  %v6317_v55 = vld [vmem:[%s26501_s3 + $0xa00] sm:$0xff] }
 0x37d   : > { %12284 = vmatpush2.bf16.msra.mxu0 %v17560_v24  ;;  %v6321_v47 = vld [vmem:[%s26501_s3 + $0xa20] sm:$0xff]  ;;  %v17648_v24 = vcombine.low %v6453_v30, %v6457_v23 }
 0x37e   : > { %12325 = vmatpush2.bf16.msra.mxu1 %v17688_v20  ;;  %12285 = vmatprep.subr.bf16.mxu0 %v17553_v18  ;;  %v6445_v1 = vld [vmem:[%s26501_s3 + $0xe00] sm:$0xff]  ;;  %v17513_v20 = vcombine.high %v6317_v55, %v6321_v47  ;;  %v17512_v26 = vcombine.low %v6317_v55, %v6321_v47 }
 0x37f   : > { %12326 = vmatprep.subr.bf16.mxu1 %v17681_v28  ;;  %v6449_v13 = vld [vmem:[%s26501_s3 + $0xe20] sm:$0xff] }
 0x380   : > { %v17641_v18 = vcombine.high %v6445_v1, %v6449_v13  ;;  %v6565_v28 = vld [vmem:[%s26501_s3 + $0x11c0] sm:$0xff] }
 0x381   : > { %12286 = vmatpush2.bf16.msra.mxu0 %v17552_v29  ;;  %v6569_v22 = vld [vmem:[%s26501_s3 + $0x11e0] sm:$0xff]  ;;  %v5969_v29 = vmax.f32 %v21073_v43, 0.0  ;;  %v5976_v43 = vmax.f32 %v21934_v34, 0.0 }
 0x382   : > { %12327 = vmatpush2.bf16.msra.mxu1 %v17680_v32  ;;  %12287 = vmatprep.subr.bf16.mxu0 %v17545_v35  ;;  %v6693_v3 = vld [vmem:[%s26501_s3 + $0x15c0] sm:$0xff]  ;;  %v17640_v32 = vcombine.low %v6445_v1, %v6449_v13  ;;  %v17761_v35 = vcombine.high %v6565_v28, %v6569_v22 }
 0x383   : > { %12328 = vmatprep.subr.bf16.mxu1 %v17673_v38  ;;  %v6697_v33 = vld [vmem:[%s26501_s3 + $0x15e0] sm:$0xff]  ;;  %v5971_v38 = vmax.f32 %v21291_v9, 0.0 }
 0x384   : > { %v17889_v52 = vcombine.high %v6693_v3, %v6697_v33  ;;  %v6557_v39 = vld [vmem:[%s26501_s3 + $0x1180] sm:$0xff] }
 0x385   : > { %12288 = vmatpush2.bf16.msra.mxu0 %v17544_v41  ;;  %v6561_v44 = vld [vmem:[%s26501_s3 + $0x11a0] sm:$0xff]  ;;  %v17760_v41 = vcombine.low %v6565_v28, %v6569_v22 }
 0x386   : > { %12329 = vmatpush2.bf16.msra.mxu1 %v17672_v46  ;;  %12289 = vmatprep.subr.bf16.mxu0 %v17537_v49  ;;  %v6685_v9 = vld [vmem:[%s26501_s3 + $0x1580] sm:$0xff]  ;;  %v22329_v46 = vpack.c.bf16 %v5969_v29, %v5969_v29  ;;  %v17888_v49 = vcombine.low %v6693_v3, %v6697_v33  ;;  %v17753_v57 = vcombine.high %v6557_v39, %v6561_v44 }
 0x387   : > { %12330 = vmatprep.subr.bf16.mxu1 %v17665_v50  ;;  %v6689_v19 = vld [vmem:[%s26501_s3 + $0x15a0] sm:$0xff]  ;;  %v22331_v50 = vpack.c.bf16 %v5971_v38, %v5971_v38  ;;  %v17752_v30 = vcombine.low %v6557_v39, %v6561_v44 }
 0x388   : > { %v6549_v34 = vld [vmem:[%s26501_s3 + $0x1140] sm:$0xff] }
 0x389   : > { %12290 = vmatpush2.bf16.msra.mxu0 %v17536_v45  ;;  %v6553_v42 = vld [vmem:[%s26501_s3 + $0x1160] sm:$0xff]  ;;  %v17881_v45 = vcombine.high %v6685_v9, %v6689_v19 }
 0x38a   : > { %12331 = vmatpush2.bf16.msra.mxu1 %v17664_v4  ;;  %12291 = vmatprep.subr.bf16.mxu0 %v17529_v37  ;;  %v6677_v4 = vld [vmem:[%s26501_s3 + $0x1540] sm:$0xff] }
 0x38b   : > { %12332 = vmatprep.subr.bf16.mxu1 %v17657_v0  ;;  %v6681_v37 = vld [vmem:[%s26501_s3 + $0x1560] sm:$0xff]  ;;  %v22348_v0 = vpack.c.bf16 %v5976_v43, %v5976_v43 }
 0x38c   : > { %v6545_v55 = vld [vmem:[%s26501_s3 + $0x1120] sm:$0xff] }
 0x38d   : > { %12292 = vmatpush2.bf16.msra.mxu0 %v17528_v48  ;;  %v17880_v48 = vcombine.low %v6685_v9, %v6689_v19  ;;  %v6669_v1 = vld [vmem:[%s26501_s3 + $0x1500] sm:$0xff] }
 0x38e   : > { %12333 = vmatpush2.bf16.msra.mxu1 %v17656_v7  ;;  %12293 = vmatprep.subr.bf16.mxu0 %v17521_v11  ;;  %v17745_v7 = vcombine.high %v6549_v34, %v6553_v42  ;;  %v6673_v13 = vld [vmem:[%s26501_s3 + $0x1520] sm:$0xff] }
 0x38f   : > { %12334 = vmatprep.subr.bf16.mxu1 %v17649_v62  ;;  %v6541_v62 = vld [vmem:[%s26501_s3 + $0x1100] sm:$0xff]  ;;  %v17865_v3 = vcombine.high %v6669_v1, %v6673_v13  ;;  %v17864_v38 = vcombine.low %v6669_v1, %v6673_v13 }
 0x390   : > { %v17737_v28 = vcombine.high %v6541_v62, %v6545_v55  ;;  %v6533_v33 = vld [vmem:[%s26501_s3 + $0x10c0] sm:$0xff] }
 0x391   : > { %12294 = vmatpush2.bf16.msra.mxu0 %v17520_v59  ;;  %v6661_v29 = vld [vmem:[%s26501_s3 + $0x14c0] sm:$0xff] }
 0x392   : > { %12335 = vmatpush2.bf16.msra.mxu1 %v17648_v24  ;;  %12295 = vmatprep.subr.bf16.mxu0 %v17513_v20  ;;  %v17744_v24 = vcombine.low %v6549_v34, %v6553_v42  ;;  %v6525_v39 = vld [vmem:[%s26501_s3 + $0x1080] sm:$0xff] }
 0x393   : > { %12336 = vmatprep.subr.bf16.mxu1 %v17641_v18  ;;  %v17872_v18 = vcombine.low %v6677_v4, %v6681_v37  ;;  %v6529_v44 = vld [vmem:[%s26501_s3 + $0x10a0] sm:$0xff] }
 0x394   : > { %v6653_v43 = vld [vmem:[%s26501_s3 + $0x1480] sm:$0xff] }
 0x395   : > { %12296 = vmatpush2.bf16.msra.mxu0 %v17512_v26  ;;  %v6537_v26 = vld [vmem:[%s26501_s3 + $0x10e0] sm:$0xff] }
 0x396   : > { %12337 = vmatpush2.bf16.msra.mxu1 %v17640_v32  ;;  %12347 = vmatprep.subr.bf16.mxu0 %v17761_v35  ;;  %v6665_v32 = vld [vmem:[%s26501_s3 + $0x14e0] sm:$0xff]  ;;  %v17736_v35 = vcombine.low %v6541_v62, %v6545_v55  ;;  %v17728_v9 = vcombine.low %v6533_v33, %v6537_v26 }
 0x397   : > { %12388 = vmatprep.subr.bf16.mxu1 %v17889_v52  ;;  %v17729_v52 = vcombine.high %v6533_v33, %v6537_v26  ;;  %v17857_v56 = vcombine.high %v6661_v29, %v6665_v32  ;;  %v17856_v19 = vcombine.low %v6661_v29, %v6665_v32  ;;  %v6517_v34 = vld [vmem:[%s26501_s3 + $0x1040] sm:$0xff] }
 0x398   : > { %v5835_v58 = vpop.f32.mrf.mxu0  ;;  %12298 = vmatmul.mubr.bf16.vlgmr.msra.gmra.mxu0 %v22329_v46  ;;  %v6521_v42 = vld [vmem:[%s26501_s3 + $0x1060] sm:$0xff] }
 0x399   : > { %v22351_v61 = vadd.f32 %v5835_v58, %v22140_v40  ;;  %v22353_v16 = vpop.f32.mrf.mxu1  ;;  %12339 = vmatmul.mubr.bf16.vlgmr.msra.gmra.mxu1 %v22331_v50  ;;  %12348 = vmatpush1.bf16.msra.mxu0 %v17760_v41  ;;  %v17873_v40 = vcombine.high %v6677_v4, %v6681_v37  ;;  %v6657_v41 = vld [vmem:[%s26501_s3 + $0x14a0] sm:$0xff]  ;;  %v17720_v4 = vcombine.low %v6525_v39, %v6529_v44 }
 0x39a   : > { %12379 = vmatprep.mubr.bf16.mxu0 %v22339_v53  ;;  %12389 = vmatpush1.bf16.msra.mxu1 %v17888_v49  ;;  %v22357_v23 = vpop.f32.mrf.mxu0  ;;  %v17721_v49 = vcombine.high %v6525_v39, %v6529_v44  ;;  %v6645_v58 = vld [vmem:[%s26501_s3 + $0x1440] sm:$0xff]  ;;  %v17848_v37 = vcombine.low %v6653_v43, %v6657_v41 }
 0x39b   : > { %12420 = vmatprep.mubr.bf16.mxu1 %v22348_v0  ;;  %v22360_v11 = vpop.f32.mrf.mxu1  ;;  %12349 = vmatprep.subr.bf16.mxu0 %v17753_v57  ;;  %v17849_v57 = vcombine.high %v6653_v43, %v6657_v41  ;;  %v6637_v62 = vld [vmem:[%s26501_s3 + $0x1400] sm:$0xff] }
 0x39c   : > { %v5839_v47 = vpop.f32.mrf.mxu0  ;;  %12390 = vmatprep.subr.bf16.mxu1 %v17881_v45  ;;  %v6649_v45 = vld [vmem:[%s26501_s3 + $0x1460] sm:$0xff] }
 0x39d   : > { %v5880_v59 = vpop.f32.mrf.mxu1  ;;  %12350 = vmatpush1.bf16.msra.mxu0 %v17752_v30  ;;  %v17713_v30 = vcombine.high %v6517_v34, %v6521_v42  ;;  %v6641_v55 = vld [vmem:[%s26501_s3 + $0x1420] sm:$0xff]  ;;  %v17712_v47 = vcombine.low %v6517_v34, %v6521_v42  ;;  %v17840_v1 = vcombine.low %v6645_v58, %v6649_v45 }
 0x39e   : > { %12391 = vmatpush1.bf16.msra.mxu1 %v17880_v48  ;;  %v5840_v20 = vpop.f32.mrf.mxu0  ;;  %12351 = vmatprep.subr.bf16.mxu0 %v17745_v7  ;;  %v17841_v48 = vcombine.high %v6645_v58, %v6649_v45  ;;  %v6509_v7 = vld [vmem:[%s26501_s3 + $0x1000] sm:$0xff]  ;;  %v17833_v59 = vcombine.high %v6637_v62, %v6641_v55 }
 0x39f   : > { %v5881_v22 = vpop.f32.mrf.mxu1  ;;  %12392 = vmatprep.subr.bf16.mxu1 %v17873_v40  ;;  %v6513_v40 = vld [vmem:[%s26501_s3 + $0x1020] sm:$0xff] }
 0x3a0   : > { %v17705_v13 = vcombine.high %v6509_v7, %v6513_v40  ;;  %v6633_v20 = vld [vmem:[%s26501_s3 + $0x13e0] sm:$0xff]  ;;  %v17704_v22 = vcombine.low %v6509_v7, %v6513_v40 }
 0x3a1   : > { %12352 = vmatpush1.bf16.msra.mxu0 %v17744_v24  ;;  %v6629_v24 = vld [vmem:[%s26501_s3 + $0x13c0] sm:$0xff] }
 0x3a2   : > { %12393 = vmatpush1.bf16.msra.mxu1 %v17872_v18  ;;  %12353 = vmatprep.subr.bf16.mxu0 %v17737_v28  ;;  %v6757_v18 = vld [vmem:[%s26501_s3 + $0x17c0] sm:$0xff]  ;;  %v17825_v33 = vcombine.high %v6629_v24, %v6633_v20 }
 0x3a3   : > { %12394 = vmatprep.subr.bf16.mxu1 %v17865_v3  ;;  %v6761_v28 = vld [vmem:[%s26501_s3 + $0x17e0] sm:$0xff]  ;;  %v17832_v3 = vcombine.low %v6637_v62, %v6641_v55 }
 0x3a4   : > { %v17953_v26 = vcombine.high %v6757_v18, %v6761_v28  ;;  %v6621_v29 = vld [vmem:[%s26501_s3 + $0x1380] sm:$0xff] }
 0x3a5   : > { %12354 = vmatpush1.bf16.msra.mxu0 %v17736_v35  ;;  %v6625_v32 = vld [vmem:[%s26501_s3 + $0x13a0] sm:$0xff] }
 0x3a6   : > { %12395 = vmatpush1.bf16.msra.mxu1 %v17864_v38  ;;  %12355 = vmatprep.subr.bf16.mxu0 %v17729_v52  ;;  %v6749_v35 = vld [vmem:[%s26501_s3 + $0x1780] sm:$0xff]  ;;  %v17824_v52 = vcombine.low %v6629_v24, %v6633_v20  ;;  %v17817_v39 = vcombine.high %v6621_v29, %v6625_v32 }
 0x3a7   : > { %12396 = vmatprep.subr.bf16.mxu1 %v17857_v56  ;;  %v6753_v38 = vld [vmem:[%s26501_s3 + $0x17a0] sm:$0xff]  ;;  %v17952_v56 = vcombine.low %v6757_v18, %v6761_v28 }
 0x3a8   : > { %v17945_v44 = vcombine.high %v6749_v35, %v6753_v38  ;;  %v6613_v43 = vld [vmem:[%s26501_s3 + $0x1340] sm:$0xff] }
 0x3a9   : > { %12356 = vmatpush1.bf16.msra.mxu0 %v17728_v9  ;;  %v6617_v41 = vld [vmem:[%s26501_s3 + $0x1360] sm:$0xff] }
 0x3aa   : > { %12397 = vmatpush1.bf16.msra.mxu1 %v17856_v19  ;;  %12357 = vmatprep.subr.bf16.mxu0 %v17721_v49  ;;  %v6741_v9 = vld [vmem:[%s26501_s3 + $0x1740] sm:$0xff]  ;;  %v17816_v49 = vcombine.low %v6621_v29, %v6625_v32  ;;  %v17809_v34 = vcombine.high %v6613_v43, %v6617_v41 }
 0x3ab   : > { %12398 = vmatprep.subr.bf16.mxu1 %v17849_v57  ;;  %v6745_v19 = vld [vmem:[%s26501_s3 + $0x1760] sm:$0xff]  ;;  %v17944_v57 = vcombine.low %v6749_v35, %v6753_v38 }
 0x3ac   : > { %v17937_v42 = vcombine.high %v6741_v9, %v6745_v19  ;;  %v6605_v58 = vld [vmem:[%s26501_s3 + $0x1300] sm:$0xff] }
 0x3ad   : > { %12358 = vmatpush1.bf16.msra.mxu0 %v17720_v4  ;;  %v6609_v45 = vld [vmem:[%s26501_s3 + $0x1320] sm:$0xff] }
 0x3ae   : > { %12399 = vmatpush1.bf16.msra.mxu1 %v17848_v37  ;;  %12359 = vmatprep.subr.bf16.mxu0 %v17713_v30  ;;  %v6733_v4 = vld [vmem:[%s26501_s3 + $0x1700] sm:$0xff]  ;;  %v17808_v30 = vcombine.low %v6613_v43, %v6617_v41  ;;  %v17801_v7 = vcombine.high %v6605_v58, %v6609_v45 }
 0x3af   : > { %12400 = vmatprep.subr.bf16.mxu1 %v17841_v48  ;;  %v6737_v37 = vld [vmem:[%s26501_s3 + $0x1720] sm:$0xff]  ;;  %v17936_v48 = vcombine.low %v6741_v9, %v6745_v19 }
 0x3b0   : > { %v17929_v40 = vcombine.high %v6733_v4, %v6737_v37  ;;  %v6597_v62 = vld [vmem:[%s26501_s3 + $0x12c0] sm:$0xff] }
 0x3b1   : > { %12360 = vmatpush1.bf16.msra.mxu0 %v17712_v47  ;;  %v6601_v55 = vld [vmem:[%s26501_s3 + $0x12e0] sm:$0xff] }
 0x3b2   : > { %12401 = vmatpush1.bf16.msra.mxu1 %v17840_v1  ;;  %12361 = vmatprep.subr.bf16.mxu0 %v17705_v13  ;;  %v6725_v47 = vld [vmem:[%s26501_s3 + $0x16c0] sm:$0xff]  ;;  %v17800_v13 = vcombine.low %v6605_v58, %v6609_v45  ;;  %v17793_v24 = vcombine.high %v6597_v62, %v6601_v55 }
 0x3b3   : > { %12402 = vmatprep.subr.bf16.mxu1 %v17833_v59  ;;  %v6729_v1 = vld [vmem:[%s26501_s3 + $0x16e0] sm:$0xff]  ;;  %v17928_v59 = vcombine.low %v6733_v4, %v6737_v37 }
 0x3b4   : > { %v17921_v20 = vcombine.high %v6725_v47, %v6729_v1  ;;  %v6589_v18 = vld [vmem:[%s26501_s3 + $0x1280] sm:$0xff] }
 0x3b5   : > { %12362 = vmatpush1.bf16.msra.mxu0 %v17704_v22  ;;  %v6593_v28 = vld [vmem:[%s26501_s3 + $0x12a0] sm:$0xff] }
 0x3b6   : > { %12403 = vmatpush1.bf16.msra.mxu1 %v17832_v3  ;;  %12363 = vmatprep.subr.bf16.mxu0 %v17825_v33  ;;  %v6717_v22 = vld [vmem:[%s26501_s3 + $0x1680] sm:$0xff]  ;;  %v17792_v33 = vcombine.low %v6597_v62, %v6601_v55  ;;  %v17785_v29 = vcombine.high %v6589_v18, %v6593_v28  ;;  %v5973_v62 = vmax.f32 %v21700_v60, 0.0 }
 0x3b7   : > { %12404 = vmatprep.subr.bf16.mxu1 %v17953_v26  ;;  %v6721_v3 = vld [vmem:[%s26501_s3 + $0x16a0] sm:$0xff]  ;;  %v17920_v26 = vcombine.low %v6725_v47, %v6729_v1  ;;  %v5975_v1 = vmax.f32 %v21919_v21, 0.0  ;;  %v1124_v21 = vrot.slane %v22105_v12, %v21257_v36 }
 0x3b8   : > { %v17913_v32 = vcombine.high %v6717_v22, %v6721_v3  ;;  %v6581_v35 = vld [vmem:[%s26501_s3 + $0x1240] sm:$0xff] }
 0x3b9   : > { %12364 = vmatpush2.bf16.msra.mxu0 %v17824_v52  ;;  %v6585_v38 = vld [vmem:[%s26501_s3 + $0x1260] sm:$0xff] }
 0x3ba   : > { %12405 = vmatpush2.bf16.msra.mxu1 %v17952_v56  ;;  %12365 = vmatprep.subr.bf16.mxu0 %v17817_v39  ;;  %v6709_v52 = vld [vmem:[%s26501_s3 + $0x1640] sm:$0xff]  ;;  %v17784_v39 = vcombine.low %v6589_v18, %v6593_v28  ;;  %v17777_v43 = vcombine.high %v6581_v35, %v6585_v38  ;;  %v22548_v18 = vpack.c.bf16 %v5973_v62, %v5973_v62 }
 0x3bb   : > { %12406 = vmatprep.subr.bf16.mxu1 %v17945_v44  ;;  %v6713_v56 = vld [vmem:[%s26501_s3 + $0x1660] sm:$0xff]  ;;  %v17912_v44 = vcombine.low %v6717_v22, %v6721_v3  ;;  %v22550_v22 = vpack.c.bf16 %v5975_v1, %v5975_v1 }
 0x3bc   : > { %v17905_v41 = vcombine.high %v6709_v52, %v6713_v56  ;;  %v6573_v9 = vld [vmem:[%s26501_s3 + $0x1200] sm:$0xff] }
 0x3bd   : > { %12366 = vmatpush2.bf16.msra.mxu0 %v17816_v49  ;;  %v6577_v19 = vld [vmem:[%s26501_s3 + $0x1220] sm:$0xff] }
 0x3be   : > { %12407 = vmatpush2.bf16.msra.mxu1 %v17944_v57  ;;  %12367 = vmatprep.subr.bf16.mxu0 %v17809_v34  ;;  %v6701_v49 = vld [vmem:[%s26501_s3 + $0x1600] sm:$0xff]  ;;  %v17776_v34 = vcombine.low %v6581_v35, %v6585_v38  ;;  %v17769_v58 = vcombine.high %v6573_v9, %v6577_v19 }
 0x3bf   : > { %12408 = vmatprep.subr.bf16.mxu1 %v17937_v42  ;;  %v6705_v57 = vld [vmem:[%s26501_s3 + $0x1620] sm:$0xff]  ;;  %v17904_v42 = vcombine.low %v6709_v52, %v6713_v56  ;;  %v5879_v52 = vadd.f32 %v22360_v11, %v1124_v21 }
 0x3c0   : > { %v17897_v45 = vcombine.high %v6701_v49, %v6705_v57  ;;  %v6821_v4 = vld [vmem:[%s26501_s3 + $0x19c0] sm:$0xff]  ;;  %v17896_v55 = vcombine.low %v6701_v49, %v6705_v57 }
 0x3c1   : > { %12368 = vmatpush2.bf16.msra.mxu0 %v17808_v30  ;;  %v6825_v37 = vld [vmem:[%s26501_s3 + $0x19e0] sm:$0xff]  ;;  %v5838_v30 = vadd.f32 %v22357_v23, %v22155_v2 }
 0x3c2   : > { %12409 = vmatpush2.bf16.msra.mxu1 %v17936_v48  ;;  %12369 = vmatprep.subr.bf16.mxu0 %v17801_v7  ;;  %v6949_v48 = vld [vmem:[%s26501_s3 + $0x1dc0] sm:$0xff]  ;;  %v18017_v47 = vcombine.high %v6821_v4, %v6825_v37 }
 0x3c3   : > { %12410 = vmatprep.subr.bf16.mxu1 %v17929_v40  ;;  %v6953_v7 = vld [vmem:[%s26501_s3 + $0x1de0] sm:$0xff]  ;;  %v17768_v40 = vcombine.low %v6573_v9, %v6577_v19 }
 0x3c4   : > { %v18145_v2 = vcombine.high %v6949_v48, %v6953_v7  ;;  %v6813_v23 = vld [vmem:[%s26501_s3 + $0x1980] sm:$0xff]  ;;  %v18144_v28 = vcombine.low %v6949_v48, %v6953_v7 }
 0x3c5   : > { %12370 = vmatpush2.bf16.msra.mxu0 %v17800_v13  ;;  %v5978_v13 = vmax.f32 %v5838_v30, 0.0  ;;  %v6941_v60 = vld [vmem:[%s26501_s3 + $0x1d80] sm:$0xff] }
 0x3c6   : > { %12411 = vmatpush2.bf16.msra.mxu1 %v17928_v59  ;;  %12371 = vmatprep.subr.bf16.mxu0 %v17793_v24  ;;  %v6817_v59 = vld [vmem:[%s26501_s3 + $0x19a0] sm:$0xff] }
 0x3c7   : > { %12412 = vmatprep.subr.bf16.mxu1 %v17921_v20  ;;  %v6945_v24 = vld [vmem:[%s26501_s3 + $0x1da0] sm:$0xff]  ;;  %v18016_v20 = vcombine.low %v6821_v4, %v6825_v37  ;;  %v18009_v3 = vcombine.high %v6813_v23, %v6817_v59 }
 0x3c8   : > { %v6809_v12 = vld [vmem:[%s26501_s3 + $0x1960] sm:$0xff] }
 0x3c9   : > { %12372 = vmatpush2.bf16.msra.mxu0 %v17792_v33  ;;  %v18137_v33 = vcombine.high %v6941_v60, %v6945_v24  ;;  %v6933_v35 = vld [vmem:[%s26501_s3 + $0x1d40] sm:$0xff] }
 0x3ca   : > { %12413 = vmatpush2.bf16.msra.mxu1 %v17920_v26  ;;  %12373 = vmatprep.subr.bf16.mxu0 %v17785_v29  ;;  %v6805_v26 = vld [vmem:[%s26501_s3 + $0x1940] sm:$0xff]  ;;  %v22558_v29 = vpack.c.bf16 %v5978_v13, %v5978_v13 }
 0x3cb   : > { %12414 = vmatprep.subr.bf16.mxu1 %v17913_v32  ;;  %v6937_v38 = vld [vmem:[%s26501_s3 + $0x1d60] sm:$0xff]  ;;  %v18000_v37 = vcombine.low %v6805_v26, %v6809_v12 }
 0x3cc   : > { %v18129_v49 = vcombine.high %v6933_v35, %v6937_v38  ;;  %v6797_v11 = vld [vmem:[%s26501_s3 + $0x1900] sm:$0xff]  ;;  %v18128_v48 = vcombine.low %v6933_v35, %v6937_v38 }
 0x3cd   : > { %12374 = vmatpush2.bf16.msra.mxu0 %v17784_v39  ;;  %v18008_v39 = vcombine.low %v6813_v23, %v6817_v59  ;;  %v6801_v57 = vld [vmem:[%s26501_s3 + $0x1920] sm:$0xff] }
 0x3ce   : > { %12415 = vmatpush2.bf16.msra.mxu1 %v17912_v44  ;;  %12375 = vmatprep.subr.bf16.mxu0 %v17777_v43  ;;  %v18136_v43 = vcombine.low %v6941_v60, %v6945_v24  ;;  %v17993_v7 = vcombine.high %v6797_v11, %v6801_v57  ;;  %v6793_v1 = vld [vmem:[%s26501_s3 + $0x18e0] sm:$0xff]  ;;  %v17992_v59 = vcombine.low %v6797_v11, %v6801_v57 }
 0x3cf   : > { %12416 = vmatprep.subr.bf16.mxu1 %v17905_v41  ;;  %v18001_v41 = vcombine.high %v6805_v26, %v6809_v12  ;;  %v6921_v23 = vld [vmem:[%s26501_s3 + $0x1ce0] sm:$0xff] }
 0x3d0   : > { %v6765_v11 = vld [vmem:[%s26501_s3 + $0x1800] sm:$0xff] }
 0x3d1   : > { %12376 = vmatpush2.bf16.msra.mxu0 %v17776_v34  ;;  %v6769_v57 = vld [vmem:[%s26501_s3 + $0x1820] sm:$0xff] }
 0x3d2   : > { %12417 = vmatpush2.bf16.msra.mxu1 %v17904_v42  ;;  %12377 = vmatprep.subr.bf16.mxu0 %v17769_v58  ;;  %v6925_v42 = vld [vmem:[%s26501_s3 + $0x1d00] sm:$0xff] }
 0x3d3   : > { %12418 = vmatprep.subr.bf16.mxu1 %v17897_v45  ;;  %v6929_v58 = vld [vmem:[%s26501_s3 + $0x1d20] sm:$0xff] }
 0x3d4   : > { %v18120_v60 = vcombine.low %v6925_v42, %v6929_v58 }
 0x3d5   : > { %12378 = vmatpush2.bf16.msra.mxu0 %v17768_v40 }
 0x3d6   : > { %12419 = vmatpush2.bf16.msra.mxu1 %v17896_v55  ;;  %12429 = vmatprep.subr.bf16.mxu0 %v18017_v47  ;;  %v18121_v55 = vcombine.high %v6925_v42, %v6929_v58  ;;  %v6789_v47 = vld [vmem:[%s26501_s3 + $0x18c0] sm:$0xff] }
 0x3d7   : > { %12470 = vmatprep.subr.bf16.mxu1 %v18145_v2  ;;  %v6917_v2 = vld [vmem:[%s26501_s3 + $0x1cc0] sm:$0xff]  ;;  %v17985_v24 = vcombine.high %v6789_v47, %v6793_v1  ;;  %v17984_v26 = vcombine.low %v6789_v47, %v6793_v1 }
 0x3d8   : > { %v22560_v32 = vpop.f32.mrf.mxu0  ;;  %12380 = vmatmul.mubr.bf16.vlgmr.msra.gmra.mxu0 %v22548_v18  ;;  %v18113_v21 = vcombine.high %v6917_v2, %v6921_v23  ;;  %v18112_v12 = vcombine.low %v6917_v2, %v6921_v23  ;;  %v6897_v42 = vld [vmem:[%s26501_s3 + $0x1c20] sm:$0xff] }
 0x3d9   : > { %v22570_v56 = vpop.f32.mrf.mxu1  ;;  %12421 = vmatmul.mubr.bf16.vlgmr.msra.gmra.mxu1 %v22550_v22  ;;  %12430 = vmatpush1.bf16.msra.mxu0 %v18016_v20  ;;  %v6781_v20 = vld [vmem:[%s26501_s3 + $0x1880] sm:$0xff] }
 0x3da   : > { %12461 = vmatprep.mubr.bf16.mxu0 %v22558_v29  ;;  %12471 = vmatpush1.bf16.msra.mxu1 %v18144_v28  ;;  %v5919_v44 = vpop.f32.mrf.mxu0  ;;  %v6785_v28 = vld [vmem:[%s26501_s3 + $0x18a0] sm:$0xff] }
 0x3db   : > { %v5920_v9 = vadd.f32 %v5919_v44, %v5879_v52  ;;  %v5960_v19 = vpop.f32.mrf.mxu1  ;;  %12431 = vmatprep.subr.bf16.mxu0 %v18009_v3  ;;  %12472 = vmatprep.subr.bf16.mxu1 %v18137_v33  ;;  %v6909_v3 = vld [vmem:[%s26501_s3 + $0x1c80] sm:$0xff]  ;;  %v17977_v35 = vcombine.high %v6781_v20, %v6785_v28 }
 0x3dc   : > { %v5921_v34 = vpop.f32.mrf.mxu0  ;;  %v6913_v33 = vld [vmem:[%s26501_s3 + $0x1ca0] sm:$0xff] }
 0x3dd   : > { %v5961_v45 = vadd.f32 %v5960_v19, %v5920_v9  ;;  %v5962_v4 = vpop.f32.mrf.mxu1  ;;  %12432 = vmatpush1.bf16.msra.mxu0 %v18008_v39  ;;  %v18105_v38 = vcombine.high %v6909_v3, %v6913_v33  ;;  %v6773_v52 = vld [vmem:[%s26501_s3 + $0x1840] sm:$0xff]  ;;  %v18104_v9 = vcombine.low %v6909_v3, %v6913_v33 }
 0x3de   : > { %12473 = vmatpush1.bf16.msra.mxu1 %v18136_v43  ;;  %v5922_v30 = vpop.f32.mrf.mxu0  ;;  %12433 = vmatprep.subr.bf16.mxu0 %v18001_v41  ;;  %v6777_v39 = vld [vmem:[%s26501_s3 + $0x1860] sm:$0xff]  ;;  %v17976_v41 = vcombine.low %v6781_v20, %v6785_v28  ;;  %v17961_v4 = vcombine.high %v6765_v11, %v6769_v57 }
 0x3df   : > { %v5980_v40 = vmax.f32 %v5961_v45, 0.0  ;;  %v5963_v62 = vpop.f32.mrf.mxu1  ;;  %12474 = vmatprep.subr.bf16.mxu1 %v18129_v49  ;;  %v6901_v44 = vld [vmem:[%s26501_s3 + $0x1c40] sm:$0xff]  ;;  %v17969_v19 = vcombine.high %v6773_v52, %v6777_v39  ;;  %v17968_v58 = vcombine.low %v6773_v52, %v6777_v39 }
 0x3e0   : > { %v6905_v43 = vld [vmem:[%s26501_s3 + $0x1c60] sm:$0xff]  ;;  %v17960_v62 = vcombine.low %v6765_v11, %v6769_v57 }
 0x3e1   : > { %v22598_v13 = vpack.c.bf16 %v5980_v40, %v5980_v40  ;;  %12434 = vmatpush1.bf16.msra.mxu0 %v18000_v37  ;;  %v18097_v49 = vcombine.high %v6901_v44, %v6905_v43  ;;  %v6893_v34 = vld [vmem:[%s26501_s3 + $0x1c00] sm:$0xff]  ;;  %v18096_v45 = vcombine.low %v6901_v44, %v6905_v43 }
 0x3e2   : > { %12475 = vmatpush1.bf16.msra.mxu1 %v18128_v48  ;;  %12435 = vmatprep.subr.bf16.mxu0 %v17993_v7  ;;  %v18089_v37 = vcombine.high %v6893_v34, %v6897_v42  ;;  %v6885_v30 = vld [vmem:[%s26501_s3 + $0x1bc0] sm:$0xff] }
 0x3e3   : > { %12502 = vmatprep.mubr.bf16.mxu1 %v22598_v13  ;;  %12476 = vmatprep.subr.bf16.mxu1 %v18121_v55  ;;  %v6889_v48 = vld [vmem:[%s26501_s3 + $0x1be0] sm:$0xff]  ;;  %v18088_v55 = vcombine.low %v6893_v34, %v6897_v42 }
 0x3e4   : > { %v7013_v7 = vld [vmem:[%s26501_s3 + $0x1fc0] sm:$0xff]  ;;  %v18081_v47 = vcombine.high %v6885_v30, %v6889_v48 }
 0x3e5   : > { %12436 = vmatpush1.bf16.msra.mxu0 %v17992_v59  ;;  %v7017_v40 = vld [vmem:[%s26501_s3 + $0x1fe0] sm:$0xff] }
 0x3e6   : > { %12477 = vmatpush1.bf16.msra.mxu1 %v18120_v60  ;;  %12437 = vmatprep.subr.bf16.mxu0 %v17985_v24  ;;  %v18209_v1 = vcombine.high %v7013_v7, %v7017_v40  ;;  %v6877_v2 = vld [vmem:[%s26501_s3 + $0x1b80] sm:$0xff]  ;;  %v18080_v24 = vcombine.low %v6885_v30, %v6889_v48 }
 0x3e7   : > { %12478 = vmatprep.subr.bf16.mxu1 %v18113_v21  ;;  %v6881_v23 = vld [vmem:[%s26501_s3 + $0x1ba0] sm:$0xff]  ;;  %v18208_v21 = vcombine.low %v7013_v7, %v7017_v40 }
 0x3e8   : > { %v7005_v59 = vld [vmem:[%s26501_s3 + $0x1f80] sm:$0xff]  ;;  %v18073_v20 = vcombine.high %v6877_v2, %v6881_v23 }
 0x3e9   : > { %12438 = vmatpush1.bf16.msra.mxu0 %v17984_v26  ;;  %v7009_v60 = vld [vmem:[%s26501_s3 + $0x1fa0] sm:$0xff] }
 0x3ea   : > { %12479 = vmatpush1.bf16.msra.mxu1 %v18112_v12  ;;  %12439 = vmatprep.subr.bf16.mxu0 %v17977_v35  ;;  %v18201_v28 = vcombine.high %v7005_v59, %v7009_v60  ;;  %v6869_v3 = vld [vmem:[%s26501_s3 + $0x1b40] sm:$0xff]  ;;  %v18072_v35 = vcombine.low %v6877_v2, %v6881_v23 }
 0x3eb   : > { %12480 = vmatprep.subr.bf16.mxu1 %v18105_v38  ;;  %v6873_v33 = vld [vmem:[%s26501_s3 + $0x1b60] sm:$0xff]  ;;  %v18200_v38 = vcombine.low %v7005_v59, %v7009_v60 }
 0x3ec   : > { %v6997_v26 = vld [vmem:[%s26501_s3 + $0x1f40] sm:$0xff]  ;;  %v18065_v52 = vcombine.high %v6869_v3, %v6873_v33 }
 0x3ed   : > { %12440 = vmatpush1.bf16.msra.mxu0 %v17976_v41  ;;  %v7001_v12 = vld [vmem:[%s26501_s3 + $0x1f60] sm:$0xff] }
 0x3ee   : > { %12481 = vmatpush1.bf16.msra.mxu1 %v18104_v9  ;;  %12441 = vmatprep.subr.bf16.mxu0 %v17969_v19  ;;  %v18193_v39 = vcombine.high %v6997_v26, %v7001_v12  ;;  %v6861_v44 = vld [vmem:[%s26501_s3 + $0x1b00] sm:$0xff]  ;;  %v18064_v19 = vcombine.low %v6869_v3, %v6873_v33 }
 0x3ef   : > { %12482 = vmatprep.subr.bf16.mxu1 %v18097_v49  ;;  %v6865_v43 = vld [vmem:[%s26501_s3 + $0x1b20] sm:$0xff]  ;;  %v18192_v49 = vcombine.low %v6997_v26, %v7001_v12 }
 0x3f0   : > { %v6989_v41 = vld [vmem:[%s26501_s3 + $0x1f00] sm:$0xff]  ;;  %v18057_v11 = vcombine.high %v6861_v44, %v6865_v43 }
 0x3f1   : > { %12442 = vmatpush1.bf16.msra.mxu0 %v17968_v58  ;;  %v6993_v9 = vld [vmem:[%s26501_s3 + $0x1f20] sm:$0xff] }
 0x3f2   : > { %12483 = vmatpush1.bf16.msra.mxu1 %v18096_v45  ;;  %12443 = vmatprep.subr.bf16.mxu0 %v17961_v4  ;;  %v18185_v57 = vcombine.high %v6989_v41, %v6993_v9  ;;  %v6853_v34 = vld [vmem:[%s26501_s3 + $0x1ac0] sm:$0xff]  ;;  %v18056_v4 = vcombine.low %v6861_v44, %v6865_v43 }
 0x3f3   : > { %12484 = vmatprep.subr.bf16.mxu1 %v18089_v37  ;;  %v6857_v42 = vld [vmem:[%s26501_s3 + $0x1ae0] sm:$0xff]  ;;  %v18184_v37 = vcombine.low %v6989_v41, %v6993_v9 }
 0x3f4   : > { %v6981_v58 = vld [vmem:[%s26501_s3 + $0x1ec0] sm:$0xff]  ;;  %v18049_v30 = vcombine.high %v6853_v34, %v6857_v42  ;;  %v18048_v2 = vcombine.low %v6853_v34, %v6857_v42  ;;  %v6186_v34 = vld [vmem:[%s26501_s3 + $0x5e8] sm:$0xff]  ;;  %v5977_v42 = vmax.f32 %v22351_v61, 0.0 }
 0x3f5   : > { %12444 = vmatpush1.bf16.msra.mxu0 %v17960_v62  ;;  %v6985_v45 = vld [vmem:[%s26501_s3 + $0x1ee0] sm:$0xff] }
 0x3f6   : > { %12485 = vmatpush1.bf16.msra.mxu1 %v18088_v55  ;;  %12445 = vmatprep.subr.bf16.mxu0 %v18081_v47  ;;  %v18177_v48 = vcombine.high %v6981_v58, %v6985_v45  ;;  %v6845_v7 = vld [vmem:[%s26501_s3 + $0x1a80] sm:$0xff]  ;;  %v19223_v47 = vld [vmem:[%s26500_s2 + $0x8] sm:$0xff]  ;;  %v18176_v23 = vcombine.low %v6981_v58, %v6985_v45 }
 0x3f7   : > { %12486 = vmatprep.subr.bf16.mxu1 %v18209_v1  ;;  %v6849_v40 = vld [vmem:[%s26501_s3 + $0x1aa0] sm:$0xff]  ;;  %v1120_v1 = vrot.slane %v19223_v47, %v21242_v27  ;;  %v22769_v47 = vpack.c.bf16 %v5977_v42, %v5977_v42 }
 0x3f8   : > { %v6973_v62 = vld [vmem:[%s26501_s3 + $0x1e80] sm:$0xff]  ;;  %v18041_v59 = vcombine.high %v6845_v7, %v6849_v40  ;;  %v18040_v33 = vcombine.low %v6845_v7, %v6849_v40  ;;  %v6050_v7 = vld [vmem:[%s26501_s3 + $0x1a8] sm:$0xff] }
 0x3f9   : > { %12446 = vmatpush2.bf16.msra.mxu0 %v18080_v24  ;;  %v6977_v55 = vld [vmem:[%s26501_s3 + $0x1ea0] sm:$0xff]  ;;  %v5877_v3 = vadd.f32 %v22353_v16, %v1120_v1 }
 0x3fa   : > { %12487 = vmatpush2.bf16.msra.mxu1 %v18208_v21  ;;  %12447 = vmatprep.subr.bf16.mxu0 %v18073_v20  ;;  %v18169_v60 = vcombine.high %v6973_v62, %v6977_v55  ;;  %v6837_v24 = vld [vmem:[%s26501_s3 + $0x1a40] sm:$0xff]  ;;  %v18168_v26 = vcombine.low %v6973_v62, %v6977_v55  ;;  %v6174_v62 = vld [vmem:[%s26501_s3 + $0x588] sm:$0xff] }
 0x3fb   : > { %12488 = vmatprep.subr.bf16.mxu1 %v18201_v28  ;;  %v6841_v21 = vld [vmem:[%s26501_s3 + $0x1a60] sm:$0xff]  ;;  %v6178_v55 = vld [vmem:[%s26501_s3 + $0x5a8] sm:$0xff] }
 0x3fc   : > { %v6965_v20 = vld [vmem:[%s26501_s3 + $0x1e40] sm:$0xff]  ;;  %v18033_v12 = vcombine.high %v6837_v24, %v6841_v21 }
 0x3fd   : > { %12448 = vmatpush2.bf16.msra.mxu0 %v18072_v35  ;;  %v6969_v28 = vld [vmem:[%s26501_s3 + $0x1e60] sm:$0xff]  ;;  %v5918_v35 = vadd.f32 %v22560_v32, %v5877_v3  ;;  %v18032_v32 = vcombine.low %v6837_v24, %v6841_v21  ;;  %v6042_v24 = vld [vmem:[%s26501_s3 + $0x168] sm:$0xff] }
 0x3fe   : > { %12489 = vmatpush2.bf16.msra.mxu1 %v18200_v38  ;;  %12449 = vmatprep.subr.bf16.mxu0 %v18065_v52  ;;  %v18161_v38 = vcombine.high %v6965_v20, %v6969_v28  ;;  %v6829_v52 = vld [vmem:[%s26501_s3 + $0x1a00] sm:$0xff]  ;;  %v18160_v43 = vcombine.low %v6965_v20, %v6969_v28  ;;  %v17371_v20 = vcombine.high %v6174_v62, %v6178_v55  ;;  %v6166_v28 = vld [vmem:[%s26501_s3 + $0x548] sm:$0xff] }
 0x3ff   : > { %12490 = vmatprep.subr.bf16.mxu1 %v18193_v39  ;;  %v6833_v39 = vld [vmem:[%s26501_s3 + $0x1a20] sm:$0xff]  ;;  %v5959_v9 = vadd.f32 %v22570_v56, %v5918_v35  ;;  %v6170_v3 = vld [vmem:[%s26501_s3 + $0x568] sm:$0xff] }
 0x400   : > { %v6957_v16 = vld [vmem:[%s26501_s3 + $0x1e00] sm:$0xff]  ;;  %v18025_v41 = vcombine.high %v6829_v52, %v6833_v39  ;;  %v18024_v56 = vcombine.low %v6829_v52, %v6833_v39  ;;  %v17362_v42 = vcombine.low %v6166_v28, %v6170_v3 }
 0x401   : > { %12450 = vmatpush2.bf16.msra.mxu0 %v18064_v19  ;;  %v6961_v44 = vld [vmem:[%s26501_s3 + $0x1e20] sm:$0xff] }
 0x402   : > { %12491 = vmatpush2.bf16.msra.mxu1 %v18192_v49  ;;  %12451 = vmatprep.subr.bf16.mxu0 %v18057_v11  ;;  %v18153_v19 = vcombine.high %v6957_v16, %v6961_v44  ;;  %v6054_v49 = vld [vmem:[%s26501_s3 + $0x1c8] sm:$0xff]  ;;  %v18152_v58 = vcombine.low %v6957_v16, %v6961_v44  ;;  %v7021_v45 = vld [vmem:[%s26502_s4] sm:$0xff] }
 0x403   : > { %12492 = vmatprep.subr.bf16.mxu1 %v18185_v57  ;;  %v6058_v11 = vld [vmem:[%s26501_s3 + $0x1e8] sm:$0xff]  ;;  %v7026_v61 = vrot.slane %v7021_v45, %v20205_v54 }
 0x404   : > { %v6182_v57 = vld [vmem:[%s26501_s3 + $0x5c8] sm:$0xff]  ;;  %v17250_v40 = vcombine.low %v6054_v49, %v6058_v11 }
 0x405   : > { %12452 = vmatpush2.bf16.msra.mxu0 %v18056_v4  ;;  %v17251_v4 = vcombine.high %v6054_v49, %v6058_v11  ;;  %v17378_v1 = vcombine.low %v6182_v57, %v6186_v34  ;;  %v6162_v49 = vld [vmem:[%s26501_s3 + $0x528] sm:$0xff] }
 0x406   : > { %12493 = vmatpush2.bf16.msra.mxu1 %v18184_v37  ;;  %12453 = vmatprep.subr.bf16.mxu0 %v18049_v30  ;;  %v5979_v37 = vmax.f32 %v5959_v9, 0.0  ;;  %v17379_v30 = vcombine.high %v6182_v57, %v6186_v34 }
 0x407   : > { %12494 = vmatprep.subr.bf16.mxu1 %v18177_v48  ;;  %v6046_v48 = vld [vmem:[%s26501_s3 + $0x188] sm:$0xff] }
 0x409   : > { %12454 = vmatpush2.bf16.msra.mxu0 %v18048_v2  ;;  %v22771_v2 = vpack.c.bf16 %v5979_v37, %v5979_v37  ;;  %v6022_v37 = vld [vmem:[%s26501_s3 + $0xc8] sm:$0xff] }
 0x40a   : > { %12495 = vmatpush2.bf16.msra.mxu1 %v18176_v23  ;;  %12455 = vmatprep.subr.bf16.mxu0 %v18041_v59  ;;  %v7030_v23 = vrot.slane %v7021_v45, %v20217_v63  ;;  %v17243_v59 = vcombine.high %v6046_v48, %v6050_v7 }
 0x40b   : > { %12496 = vmatprep.subr.bf16.mxu1 %v18169_v60  ;;  %v6038_v60 = vld [vmem:[%s26501_s3 + $0x148] sm:$0xff] }
 0x40c   : > { %v17235_v52 = vcombine.high %v6038_v60, %v6042_v24  ;;  %v17234_v34 = vcombine.low %v6038_v60, %v6042_v24  ;;  %v6146_v60 = vld [vmem:[%s26501_s3 + $0x4a8] sm:$0xff] }
 0x40d   : > { %12456 = vmatpush2.bf16.msra.mxu0 %v18040_v33 }
 0x40e   : > { %12497 = vmatpush2.bf16.msra.mxu1 %v18168_v26  ;;  %12457 = vmatprep.subr.bf16.mxu0 %v18033_v12  ;;  %v17242_v12 = vcombine.low %v6046_v48, %v6050_v7  ;;  %v6150_v48 = vld [vmem:[%s26501_s3 + $0x4c8] sm:$0xff] }
 0x40f   : > { %12498 = vmatprep.subr.bf16.mxu1 %v18161_v38  ;;  %v17370_v38 = vcombine.low %v6174_v62, %v6178_v55  ;;  %v6154_v7 = vld [vmem:[%s26501_s3 + $0x4e8] sm:$0xff] }
 0x410   : > { %v17347_v55 = vcombine.high %v6150_v48, %v6154_v7 }
 0x411   : > { %12458 = vmatpush2.bf16.msra.mxu0 %v18032_v32  ;;  %v17363_v32 = vcombine.high %v6166_v28, %v6170_v3  ;;  %v6006_v3 = vld [vmem:[%s26501_s3 + $0x48] sm:$0xff] }
 0x412   : > { %12499 = vmatpush2.bf16.msra.mxu1 %v18160_v43  ;;  %12459 = vmatprep.subr.bf16.mxu0 %v18025_v41  ;;  %v6030_v43 = vld [vmem:[%s26501_s3 + $0x108] sm:$0xff] }
 0x413   : > { %12500 = vmatprep.subr.bf16.mxu1 %v18153_v19  ;;  %v6034_v41 = vld [vmem:[%s26501_s3 + $0x128] sm:$0xff] }
 0x414   : > { %v6158_v19 = vld [vmem:[%s26501_s3 + $0x508] sm:$0xff] }
 0x415   : > { %12460 = vmatpush2.bf16.msra.mxu0 %v18024_v56 }
 0x416   : > { %12501 = vmatpush2.bf16.msra.mxu1 %v18152_v58  ;;  %12511 = vmatprep.subr.bf16.mxu0 %v17251_v4  ;;  %v17227_v58 = vcombine.high %v6030_v43, %v6034_v41  ;;  %v17355_v4 = vcombine.high %v6158_v19, %v6162_v49 }
 0x417   : > { %12552 = vmatprep.subr.bf16.mxu1 %v17379_v30  ;;  %v6026_v30 = vld [vmem:[%s26501_s3 + $0xe8] sm:$0xff] }
 0x418   : > { %v12217_v21 = vpop.f32.mrf.mxu0  ;;  %12462 = vmatmul.mubr.bf16.vlgmr.msra.gmra.mxu0 %v22769_v47  ;;  %v17219_v62 = vcombine.high %v6022_v37, %v6026_v30  ;;  %v17218_v24 = vcombine.low %v6022_v37, %v6026_v30 }
 0x419   : > { %v12218_v33 = vadd.f32 %v12217_v21, %v7026_v61  ;;  %v12258_v26 = vpop.f32.mrf.mxu1  ;;  %12503 = vmatmul.mubr.bf16.vlgmr.msra.gmra.mxu1 %v22771_v2  ;;  %12512 = vmatpush1.bf16.msra.mxu0 %v17250_v40  ;;  %v17226_v61 = vcombine.low %v6030_v43, %v6034_v41  ;;  %v17354_v40 = vcombine.low %v6158_v19, %v6162_v49  ;;  %v6126_v43 = vld [vmem:[%s26501_s3 + $0x408] sm:$0xff] }
 0x41a   : > { %12543 = vmatprep.mubr.bf16.mxu0 %v21905_v5  ;;  %12553 = vmatpush1.bf16.msra.mxu1 %v17378_v1  ;;  %v12219_v35 = vpop.f32.mrf.mxu0  ;;  %v6014_v1 = vld [vmem:[%s26501_s3 + $0x88] sm:$0xff]  ;;  %v17346_v21 = vcombine.low %v6150_v48, %v6154_v7 }
 0x41b   : > { %v22789_v39 = vadd.f32 %v12258_v26, %v12218_v33  ;;  %12584 = vmatprep.mubr.bf16.mxu1 %v21907_v6  ;;  %v12220_v16 = vadd.f32 %v12219_v35, %v7030_v23  ;;  %v12260_v44 = vpop.f32.mrf.mxu1  ;;  %12513 = vmatprep.subr.bf16.mxu0 %v17243_v59  ;;  %v6018_v23 = vld [vmem:[%s26501_s3 + $0xa8] sm:$0xff] }
 0x41c   : > { %v12221_v9 = vpop.f32.mrf.mxu0  ;;  %12554 = vmatprep.subr.bf16.mxu1 %v17371_v20  ;;  %v6142_v59 = vld [vmem:[%s26501_s3 + $0x488] sm:$0xff]  ;;  %v17211_v20 = vcombine.high %v6014_v1, %v6018_v23  ;;  %v17210_v35 = vcombine.low %v6014_v1, %v6018_v23 }
 0x41d   : > { %v22804_v11 = vadd.f32 %v12260_v44, %v12220_v16  ;;  %v12262_v57 = vpop.f32.mrf.mxu1  ;;  %12514 = vmatpush1.bf16.msra.mxu0 %v17242_v12  ;;  %v17339_v28 = vcombine.high %v6142_v59, %v6146_v60  ;;  %v6010_v33 = vld [vmem:[%s26501_s3 + $0x68] sm:$0xff] }
 0x41e   : > { %12555 = vmatpush1.bf16.msra.mxu1 %v17370_v38  ;;  %v12222_v56 = vpop.f32.mrf.mxu0  ;;  %12515 = vmatprep.subr.bf16.mxu0 %v17235_v52  ;;  %v6134_v26 = vld [vmem:[%s26501_s3 + $0x448] sm:$0xff]  ;;  %v17338_v38 = vcombine.low %v6142_v59, %v6146_v60  ;;  %v17203_v52 = vcombine.high %v6006_v3, %v6010_v33  ;;  %v17202_v9 = vcombine.low %v6006_v3, %v6010_v33 }
 0x41f   : > { %v12263_v45 = vpop.f32.mrf.mxu1  ;;  %12556 = vmatprep.subr.bf16.mxu1 %v17363_v32  ;;  %v6138_v12 = vld [vmem:[%s26501_s3 + $0x468] sm:$0xff] }
 0x420   : > { %v17331_v16 = vcombine.high %v6134_v26, %v6138_v12  ;;  %v5998_v44 = vld [vmem:[%s26501_s3 + $0x8] sm:$0xff]  ;;  %v17330_v19 = vcombine.low %v6134_v26, %v6138_v12 }
 0x421   : > { %12516 = vmatpush1.bf16.msra.mxu0 %v17234_v34  ;;  %v6002_v32 = vld [vmem:[%s26501_s3 + $0x28] sm:$0xff] }
 0x422   : > { %12557 = vmatpush1.bf16.msra.mxu1 %v17362_v42  ;;  %12517 = vmatprep.subr.bf16.mxu0 %v17227_v58  ;;  %v6130_v41 = vld [vmem:[%s26501_s3 + $0x428] sm:$0xff]  ;;  %v17195_v49 = vcombine.high %v5998_v44, %v6002_v32  ;;  %v17194_v45 = vcombine.low %v5998_v44, %v6002_v32 }
 0x423   : > { %12558 = vmatprep.subr.bf16.mxu1 %v17355_v4  ;;  %v17323_v57 = vcombine.high %v6126_v43, %v6130_v41  ;;  %v6118_v34 = vld [vmem:[%s26501_s3 + $0x3c8] sm:$0xff]  ;;  %v17322_v4 = vcombine.low %v6126_v43, %v6130_v41 }
 0x424   : > { %v6122_v56 = vld [vmem:[%s26501_s3 + $0x3e8] sm:$0xff] }
 0x425   : > { %12518 = vmatpush1.bf16.msra.mxu0 %v17226_v61  ;;  %v6246_v42 = vld [vmem:[%s26501_s3 + $0x7c8] sm:$0xff]  ;;  %v17315_v37 = vcombine.high %v6118_v34, %v6122_v56 }
 0x426   : > { %12559 = vmatpush1.bf16.msra.mxu1 %v17354_v40  ;;  %12519 = vmatprep.subr.bf16.mxu0 %v17219_v62  ;;  %v6250_v58 = vld [vmem:[%s26501_s3 + $0x7e8] sm:$0xff]  ;;  %v17314_v62 = vcombine.low %v6118_v34, %v6122_v56 }
 0x427   : > { %12560 = vmatprep.subr.bf16.mxu1 %v17347_v55  ;;  %v17443_v30 = vcombine.high %v6246_v42, %v6250_v58  ;;  %v6110_v48 = vld [vmem:[%s26501_s3 + $0x388] sm:$0xff]  ;;  %v17442_v55 = vcombine.low %v6246_v42, %v6250_v58 }
 0x428   : > { %v6114_v7 = vld [vmem:[%s26501_s3 + $0x3a8] sm:$0xff] }
 0x429   : > { %12520 = vmatpush1.bf16.msra.mxu0 %v17218_v24  ;;  %v6238_v61 = vld [vmem:[%s26501_s3 + $0x788] sm:$0xff]  ;;  %v17307_v1 = vcombine.high %v6110_v48, %v6114_v7 }
 0x42a   : > { %12561 = vmatpush1.bf16.msra.mxu1 %v17346_v21  ;;  %12521 = vmatprep.subr.bf16.mxu0 %v17211_v20  ;;  %v6242_v40 = vld [vmem:[%s26501_s3 + $0x7a8] sm:$0xff]  ;;  %v17306_v20 = vcombine.low %v6110_v48, %v6114_v7 }
 0x42b   : > { %12562 = vmatprep.subr.bf16.mxu1 %v17339_v28  ;;  %v17435_v23 = vcombine.high %v6238_v61, %v6242_v40  ;;  %v6102_v59 = vld [vmem:[%s26501_s3 + $0x348] sm:$0xff]  ;;  %v17434_v28 = vcombine.low %v6238_v61, %v6242_v40 }
 0x42c   : > { %v6106_v60 = vld [vmem:[%s26501_s3 + $0x368] sm:$0xff] }
 0x42d   : > { %12522 = vmatpush1.bf16.msra.mxu0 %v17210_v35  ;;  %v6230_v24 = vld [vmem:[%s26501_s3 + $0x748] sm:$0xff]  ;;  %v17299_v3 = vcombine.high %v6102_v59, %v6106_v60 }
 0x42e   : > { %12563 = vmatpush1.bf16.msra.mxu1 %v17338_v38  ;;  %12523 = vmatprep.subr.bf16.mxu0 %v17203_v52  ;;  %v6234_v21 = vld [vmem:[%s26501_s3 + $0x768] sm:$0xff]  ;;  %v17298_v52 = vcombine.low %v6102_v59, %v6106_v60 }
 0x42f   : > { %12564 = vmatprep.subr.bf16.mxu1 %v17331_v16  ;;  %v17427_v33 = vcombine.high %v6230_v24, %v6234_v21  ;;  %v6094_v26 = vld [vmem:[%s26501_s3 + $0x308] sm:$0xff]  ;;  %v17426_v16 = vcombine.low %v6230_v24, %v6234_v21 }
 0x430   : > { %v6098_v12 = vld [vmem:[%s26501_s3 + $0x328] sm:$0xff] }
 0x431   : > { %12524 = vmatpush1.bf16.msra.mxu0 %v17202_v9  ;;  %v6222_v35 = vld [vmem:[%s26501_s3 + $0x708] sm:$0xff]  ;;  %v17291_v44 = vcombine.high %v6094_v26, %v6098_v12 }
 0x432   : > { %12565 = vmatpush1.bf16.msra.mxu1 %v17330_v19  ;;  %12525 = vmatprep.subr.bf16.mxu0 %v17195_v49  ;;  %v6226_v38 = vld [vmem:[%s26501_s3 + $0x728] sm:$0xff]  ;;  %v17290_v49 = vcombine.low %v6094_v26, %v6098_v12 }
 0x433   : > { %12566 = vmatprep.subr.bf16.mxu1 %v17323_v57  ;;  %v17419_v32 = vcombine.high %v6222_v35, %v6226_v38  ;;  %v6086_v43 = vld [vmem:[%s26501_s3 + $0x2c8] sm:$0xff]  ;;  %v17418_v57 = vcombine.low %v6222_v35, %v6226_v38 }
 0x434   : > { %v6090_v41 = vld [vmem:[%s26501_s3 + $0x2e8] sm:$0xff] }
 0x435   : > { %12526 = vmatpush1.bf16.msra.mxu0 %v17194_v45  ;;  %v6214_v9 = vld [vmem:[%s26501_s3 + $0x6c8] sm:$0xff]  ;;  %v17283_v34 = vcombine.high %v6086_v43, %v6090_v41 }
 0x436   : > { %12567 = vmatpush1.bf16.msra.mxu1 %v17322_v4  ;;  %12527 = vmatprep.subr.bf16.mxu0 %v17315_v37  ;;  %v6218_v19 = vld [vmem:[%s26501_s3 + $0x6e8] sm:$0xff]  ;;  %v17282_v37 = vcombine.low %v6086_v43, %v6090_v41 }
 0x437   : > { %12568 = vmatprep.subr.bf16.mxu1 %v17443_v30  ;;  %v17411_v56 = vcombine.high %v6214_v9, %v6218_v19  ;;  %v6078_v42 = vld [vmem:[%s26501_s3 + $0x288] sm:$0xff]  ;;  %v17410_v30 = vcombine.low %v6214_v9, %v6218_v19 }
 0x438   : > { %v6082_v58 = vld [vmem:[%s26501_s3 + $0x2a8] sm:$0xff] }
 0x439   : > { %12528 = vmatpush2.bf16.msra.mxu0 %v17314_v62  ;;  %v6206_v45 = vld [vmem:[%s26501_s3 + $0x688] sm:$0xff]  ;;  %v17275_v48 = vcombine.high %v6078_v42, %v6082_v58 }
 0x43a   : > { %12569 = vmatpush2.bf16.msra.mxu1 %v17442_v55  ;;  %12529 = vmatprep.subr.bf16.mxu0 %v17307_v1  ;;  %v6210_v4 = vld [vmem:[%s26501_s3 + $0x6a8] sm:$0xff]  ;;  %v17274_v1 = vcombine.low %v6078_v42, %v6082_v58 }
 0x43b   : > { %12570 = vmatprep.subr.bf16.mxu1 %v17435_v23  ;;  %v17403_v7 = vcombine.high %v6206_v45, %v6210_v4  ;;  %v6070_v61 = vld [vmem:[%s26501_s3 + $0x248] sm:$0xff]  ;;  %v17402_v23 = vcombine.low %v6206_v45, %v6210_v4 }
 0x43c   : > { %v6074_v40 = vld [vmem:[%s26501_s3 + $0x268] sm:$0xff] }
 0x43d   : > { %12530 = vmatpush2.bf16.msra.mxu0 %v17306_v20  ;;  %v6198_v62 = vld [vmem:[%s26501_s3 + $0x648] sm:$0xff]  ;;  %v17267_v59 = vcombine.high %v6070_v61, %v6074_v40 }
 0x43e   : > { %12571 = vmatpush2.bf16.msra.mxu1 %v17434_v28  ;;  %12531 = vmatprep.subr.bf16.mxu0 %v17299_v3  ;;  %v6202_v55 = vld [vmem:[%s26501_s3 + $0x668] sm:$0xff]  ;;  %v17266_v3 = vcombine.low %v6070_v61, %v6074_v40 }
 0x43f   : > { %12572 = vmatprep.subr.bf16.mxu1 %v17427_v33  ;;  %v17395_v60 = vcombine.high %v6198_v62, %v6202_v55  ;;  %v6062_v24 = vld [vmem:[%s26501_s3 + $0x208] sm:$0xff]  ;;  %v17394_v33 = vcombine.low %v6198_v62, %v6202_v55 }
 0x440   : > { %v6066_v21 = vld [vmem:[%s26501_s3 + $0x228] sm:$0xff] }
 0x441   : > { %12532 = vmatpush2.bf16.msra.mxu0 %v17298_v52  ;;  %v6190_v20 = vld [vmem:[%s26501_s3 + $0x608] sm:$0xff]  ;;  %v17259_v26 = vcombine.high %v6062_v24, %v6066_v21 }
 0x442   : > { %12573 = vmatpush2.bf16.msra.mxu1 %v17426_v16  ;;  %12533 = vmatprep.subr.bf16.mxu0 %v17291_v44  ;;  %v6194_v28 = vld [vmem:[%s26501_s3 + $0x628] sm:$0xff]  ;;  %v17258_v44 = vcombine.low %v6062_v24, %v6066_v21 }
 0x443   : > { %12574 = vmatprep.subr.bf16.mxu1 %v17419_v32  ;;  %v17387_v12 = vcombine.high %v6190_v20, %v6194_v28  ;;  %v6310_v35 = vld [vmem:[%s26501_s3 + $0x9c8] sm:$0xff]  ;;  %v17386_v32 = vcombine.low %v6190_v20, %v6194_v28 }
 0x444   : > { %v6314_v38 = vld [vmem:[%s26501_s3 + $0x9e8] sm:$0xff] }
 0x445   : > { %12534 = vmatpush2.bf16.msra.mxu0 %v17290_v49  ;;  %v6438_v52 = vld [vmem:[%s26501_s3 + $0xdc8] sm:$0xff]  ;;  %v17507_v43 = vcombine.high %v6310_v35, %v6314_v38  ;;  %v17506_v49 = vcombine.low %v6310_v35, %v6314_v38 }
 0x446   : > { %12575 = vmatpush2.bf16.msra.mxu1 %v17418_v57  ;;  %12535 = vmatprep.subr.bf16.mxu0 %v17283_v34  ;;  %v6442_v16 = vld [vmem:[%s26501_s3 + $0xde8] sm:$0xff] }
 0x447   : > { %12576 = vmatprep.subr.bf16.mxu1 %v17411_v56  ;;  %v17635_v41 = vcombine.high %v6438_v52, %v6442_v16  ;;  %v6302_v9 = vld [vmem:[%s26501_s3 + $0x988] sm:$0xff]  ;;  %v17634_v56 = vcombine.low %v6438_v52, %v6442_v16 }
 0x448   : > { %v6306_v19 = vld [vmem:[%s26501_s3 + $0x9a8] sm:$0xff] }
 0x449   : > { %12536 = vmatpush2.bf16.msra.mxu0 %v17282_v37  ;;  %v6430_v57 = vld [vmem:[%s26501_s3 + $0xd88] sm:$0xff]  ;;  %v17499_v42 = vcombine.high %v6302_v9, %v6306_v19  ;;  %v17498_v40 = vcombine.low %v6302_v9, %v6306_v19 }
 0x44a   : > { %12577 = vmatpush2.bf16.msra.mxu1 %v17410_v30  ;;  %12537 = vmatprep.subr.bf16.mxu0 %v17275_v48  ;;  %v6434_v34 = vld [vmem:[%s26501_s3 + $0xda8] sm:$0xff] }
 0x44b   : > { %12578 = vmatprep.subr.bf16.mxu1 %v17403_v7  ;;  %v6294_v58 = vld [vmem:[%s26501_s3 + $0x948] sm:$0xff]  ;;  %v17627_v37 = vcombine.high %v6430_v57, %v6434_v34  ;;  %v17626_v55 = vcombine.low %v6430_v57, %v6434_v34 }
 0x44c   : > { %v6298_v45 = vld [vmem:[%s26501_s3 + $0x968] sm:$0xff] }
 0x44d   : > { %12538 = vmatpush2.bf16.msra.mxu0 %v17274_v1  ;;  %v6422_v30 = vld [vmem:[%s26501_s3 + $0xd48] sm:$0xff]  ;;  %v17491_v1 = vcombine.high %v6294_v58, %v6298_v45 }
 0x44e   : > { %12579 = vmatpush2.bf16.msra.mxu1 %v17402_v23  ;;  %12539 = vmatprep.subr.bf16.mxu0 %v17267_v59  ;;  %v6426_v48 = vld [vmem:[%s26501_s3 + $0xd68] sm:$0xff] }
 0x44f   : > { %12580 = vmatprep.subr.bf16.mxu1 %v17395_v60  ;;  %v6286_v24 = vld [vmem:[%s26501_s3 + $0x908] sm:$0xff]  ;;  %v17618_v35 = vcombine.low %v6422_v30, %v6426_v48 }
 0x450   : > { %v6290_v21 = vld [vmem:[%s26501_s3 + $0x928] sm:$0xff] }
 0x451   : > { %12540 = vmatpush2.bf16.msra.mxu0 %v17266_v3  ;;  %v6414_v28 = vld [vmem:[%s26501_s3 + $0xd08] sm:$0xff]  ;;  %v17483_v38 = vcombine.high %v6286_v24, %v6290_v21  ;;  %v17482_v9 = vcombine.low %v6286_v24, %v6290_v21 }
 0x452   : > { %12581 = vmatpush2.bf16.msra.mxu1 %v17394_v33  ;;  %12541 = vmatprep.subr.bf16.mxu0 %v17259_v26  ;;  %v17490_v26 = vcombine.low %v6294_v58, %v6298_v45  ;;  %v6270_v34 = vld [vmem:[%s26501_s3 + $0x888] sm:$0xff] }
 0x453   : > { %12582 = vmatprep.subr.bf16.mxu1 %v17387_v12  ;;  %v6402_v58 = vld [vmem:[%s26501_s3 + $0xca8] sm:$0xff] }
 0x454   : > { %v6382_v24 = vld [vmem:[%s26501_s3 + $0xc08] sm:$0xff] }
 0x455   : > { %12542 = vmatpush2.bf16.msra.mxu0 %v17258_v44  ;;  %v6278_v44 = vld [vmem:[%s26501_s3 + $0x8c8] sm:$0xff] }
 0x456   : > { %12583 = vmatpush2.bf16.msra.mxu1 %v17386_v32  ;;  %12593 = vmatprep.subr.bf16.mxu0 %v17507_v43  ;;  %v6282_v32 = vld [vmem:[%s26501_s3 + $0x8e8] sm:$0xff] }
 0x457   : > { %12634 = vmatprep.subr.bf16.mxu1 %v17635_v41  ;;  %v6406_v43 = vld [vmem:[%s26501_s3 + $0xcc8] sm:$0xff]  ;;  %v17474_v45 = vcombine.low %v6278_v44, %v6282_v32 }
 0x458   : > { %v12299_v4 = vpop.f32.mrf.mxu0  ;;  %12544 = vmatmul.mubr.bf16.vlgmr.msra.gmra.mxu0 %v22115_v51  ;;  %v6410_v41 = vld [vmem:[%s26501_s3 + $0xce8] sm:$0xff] }
 0x459   : > { %v12300_v7 = vadd.f32 %v12299_v4, %v22789_v39  ;;  %v12340_v61 = vpop.f32.mrf.mxu1  ;;  %12585 = vmatmul.mubr.bf16.vlgmr.msra.gmra.mxu1 %v22117_v17  ;;  %12594 = vmatpush1.bf16.msra.mxu0 %v17506_v49  ;;  %v17619_v39 = vcombine.high %v6422_v30, %v6426_v48  ;;  %v17475_v49 = vcombine.high %v6278_v44, %v6282_v32  ;;  %v6262_v48 = vld [vmem:[%s26501_s3 + $0x848] sm:$0xff] }
 0x45a   : > { %12625 = vmatprep.mubr.bf16.mxu0 %v22127_v25  ;;  %12635 = vmatpush1.bf16.msra.mxu1 %v17634_v56  ;;  %v12301_v62 = vpop.f32.mrf.mxu0  ;;  %v17603_v57 = vcombine.high %v6406_v43, %v6410_v41  ;;  %v6274_v56 = vld [vmem:[%s26501_s3 + $0x8a8] sm:$0xff]  ;;  %v17602_v4 = vcombine.low %v6406_v43, %v6410_v41 }
 0x45b   : > { %v22990_v23 = vadd.f32 %v12340_v61, %v12300_v7  ;;  %12666 = vmatprep.mubr.bf16.mxu1 %v22136_v31  ;;  %v12302_v59 = vadd.f32 %v12301_v62, %v22804_v11  ;;  %v12342_v60 = vpop.f32.mrf.mxu1  ;;  %12595 = vmatprep.subr.bf16.mxu0 %v17499_v42  ;;  %v6418_v11 = vld [vmem:[%s26501_s3 + $0xd28] sm:$0xff]  ;;  %v17466_v62 = vcombine.low %v6270_v34, %v6274_v56 }
 0x45c   : > { %v12303_v20 = vpop.f32.mrf.mxu0  ;;  %12636 = vmatprep.subr.bf16.mxu1 %v17627_v37  ;;  %v17611_v16 = vcombine.high %v6414_v28, %v6418_v11  ;;  %v17610_v19 = vcombine.low %v6414_v28, %v6418_v11  ;;  %v6398_v42 = vld [vmem:[%s26501_s3 + $0xc88] sm:$0xff]  ;;  %v17467_v37 = vcombine.high %v6270_v34, %v6274_v56 }
 0x45d   : > { %v23006_v3 = vadd.f32 %v12342_v60, %v12302_v59  ;;  %v12344_v33 = vpop.f32.mrf.mxu1  ;;  %12596 = vmatpush1.bf16.msra.mxu0 %v17498_v40  ;;  %v17595_v30 = vcombine.high %v6398_v42, %v6402_v58  ;;  %v6266_v7 = vld [vmem:[%s26501_s3 + $0x868] sm:$0xff] }
 0x45e   : > { %12637 = vmatpush1.bf16.msra.mxu1 %v17626_v55  ;;  %v12304_v12 = vpop.f32.mrf.mxu0  ;;  %12597 = vmatprep.subr.bf16.mxu0 %v17491_v1  ;;  %v6390_v61 = vld [vmem:[%s26501_s3 + $0xc48] sm:$0xff]  ;;  %v17594_v55 = vcombine.low %v6398_v42, %v6402_v58  ;;  %v17459_v1 = vcombine.high %v6262_v48, %v6266_v7  ;;  %v17458_v20 = vcombine.low %v6262_v48, %v6266_v7 }
 0x45f   : > { %v12345_v52 = vpop.f32.mrf.mxu1  ;;  %12638 = vmatprep.subr.bf16.mxu1 %v17619_v39  ;;  %v6394_v40 = vld [vmem:[%s26501_s3 + $0xc68] sm:$0xff] }
 0x460   : > { %v17587_v59 = vcombine.high %v6390_v61, %v6394_v40  ;;  %v6254_v60 = vld [vmem:[%s26501_s3 + $0x808] sm:$0xff]  ;;  %v17586_v28 = vcombine.low %v6390_v61, %v6394_v40 }
 0x461   : > { %12598 = vmatpush1.bf16.msra.mxu0 %v17490_v26  ;;  %v6258_v39 = vld [vmem:[%s26501_s3 + $0x828] sm:$0xff] }
 0x462   : > { %12639 = vmatpush1.bf16.msra.mxu1 %v17618_v35  ;;  %12599 = vmatprep.subr.bf16.mxu0 %v17483_v38  ;;  %v6386_v21 = vld [vmem:[%s26501_s3 + $0xc28] sm:$0xff]  ;;  %v17451_v11 = vcombine.high %v6254_v60, %v6258_v39  ;;  %v17450_v52 = vcombine.low %v6254_v60, %v6258_v39 }
 0x463   : > { %12640 = vmatprep.subr.bf16.mxu1 %v17611_v16  ;;  %v17579_v33 = vcombine.high %v6382_v24, %v6386_v21  ;;  %v6374_v26 = vld [vmem:[%s26501_s3 + $0xbc8] sm:$0xff]  ;;  %v17578_v16 = vcombine.low %v6382_v24, %v6386_v21 }
 0x464   : > { %v6378_v12 = vld [vmem:[%s26501_s3 + $0xbe8] sm:$0xff] }
 0x465   : > { %12600 = vmatpush1.bf16.msra.mxu0 %v17482_v9  ;;  %v6502_v35 = vld [vmem:[%s26501_s3 + $0xfc8] sm:$0xff]  ;;  %v17571_v44 = vcombine.high %v6374_v26, %v6378_v12 }
 0x466   : > { %12641 = vmatpush1.bf16.msra.mxu1 %v17610_v19  ;;  %12601 = vmatprep.subr.bf16.mxu0 %v17475_v49  ;;  %v6506_v38 = vld [vmem:[%s26501_s3 + $0xfe8] sm:$0xff]  ;;  %v17570_v49 = vcombine.low %v6374_v26, %v6378_v12 }
 0x467   : > { %12642 = vmatprep.subr.bf16.mxu1 %v17603_v57  ;;  %v17699_v32 = vcombine.high %v6502_v35, %v6506_v38  ;;  %v6366_v43 = vld [vmem:[%s26501_s3 + $0xb88] sm:$0xff]  ;;  %v17698_v57 = vcombine.low %v6502_v35, %v6506_v38 }
 0x468   : > { %v6370_v41 = vld [vmem:[%s26501_s3 + $0xba8] sm:$0xff] }
 0x469   : > { %12602 = vmatpush1.bf16.msra.mxu0 %v17474_v45  ;;  %v6494_v9 = vld [vmem:[%s26501_s3 + $0xf88] sm:$0xff]  ;;  %v17563_v34 = vcombine.high %v6366_v43, %v6370_v41 }
 0x46a   : > { %12643 = vmatpush1.bf16.msra.mxu1 %v17602_v4  ;;  %12603 = vmatprep.subr.bf16.mxu0 %v17467_v37  ;;  %v6498_v19 = vld [vmem:[%s26501_s3 + $0xfa8] sm:$0xff]  ;;  %v17562_v37 = vcombine.low %v6366_v43, %v6370_v41 }
 0x46b   : > { %12644 = vmatprep.subr.bf16.mxu1 %v17595_v30  ;;  %v17691_v56 = vcombine.high %v6494_v9, %v6498_v19  ;;  %v6358_v42 = vld [vmem:[%s26501_s3 + $0xb48] sm:$0xff]  ;;  %v17690_v30 = vcombine.low %v6494_v9, %v6498_v19 }
 0x46c   : > { %v6362_v58 = vld [vmem:[%s26501_s3 + $0xb68] sm:$0xff] }
 0x46d   : > { %12604 = vmatpush1.bf16.msra.mxu0 %v17466_v62  ;;  %v6486_v45 = vld [vmem:[%s26501_s3 + $0xf48] sm:$0xff]  ;;  %v17555_v48 = vcombine.high %v6358_v42, %v6362_v58 }
 0x46e   : > { %12645 = vmatpush1.bf16.msra.mxu1 %v17594_v55  ;;  %12605 = vmatprep.subr.bf16.mxu0 %v17459_v1  ;;  %v6490_v4 = vld [vmem:[%s26501_s3 + $0xf68] sm:$0xff]  ;;  %v17554_v1 = vcombine.low %v6358_v42, %v6362_v58 }
 0x46f   : > { %12646 = vmatprep.subr.bf16.mxu1 %v17587_v59  ;;  %v17683_v7 = vcombine.high %v6486_v45, %v6490_v4  ;;  %v6350_v61 = vld [vmem:[%s26501_s3 + $0xb08] sm:$0xff]  ;;  %v17682_v59 = vcombine.low %v6486_v45, %v6490_v4 }
 0x470   : > { %v6354_v40 = vld [vmem:[%s26501_s3 + $0xb28] sm:$0xff] }
 0x471   : > { %12606 = vmatpush1.bf16.msra.mxu0 %v17458_v20  ;;  %v6478_v62 = vld [vmem:[%s26501_s3 + $0xf08] sm:$0xff]  ;;  %v17547_v60 = vcombine.high %v6350_v61, %v6354_v40 }
 0x472   : > { %12647 = vmatpush1.bf16.msra.mxu1 %v17586_v28  ;;  %12607 = vmatprep.subr.bf16.mxu0 %v17451_v11  ;;  %v6482_v55 = vld [vmem:[%s26501_s3 + $0xf28] sm:$0xff]  ;;  %v17546_v11 = vcombine.low %v6350_v61, %v6354_v40 }
 0x473   : > { %12648 = vmatprep.subr.bf16.mxu1 %v17579_v33  ;;  %v17675_v39 = vcombine.high %v6478_v62, %v6482_v55  ;;  %v6342_v24 = vld [vmem:[%s26501_s3 + $0xac8] sm:$0xff]  ;;  %v17674_v33 = vcombine.low %v6478_v62, %v6482_v55 }
 0x474   : > { %v6346_v21 = vld [vmem:[%s26501_s3 + $0xae8] sm:$0xff] }
 0x475   : > { %12608 = vmatpush1.bf16.msra.mxu0 %v17450_v52  ;;  %v6470_v20 = vld [vmem:[%s26501_s3 + $0xec8] sm:$0xff]  ;;  %v17539_v26 = vcombine.high %v6342_v24, %v6346_v21 }
 0x476   : > { %12649 = vmatpush1.bf16.msra.mxu1 %v17578_v16  ;;  %12609 = vmatprep.subr.bf16.mxu0 %v17571_v44  ;;  %v6474_v28 = vld [vmem:[%s26501_s3 + $0xee8] sm:$0xff]  ;;  %v17538_v44 = vcombine.low %v6342_v24, %v6346_v21 }
 0x477   : > { %12650 = vmatprep.subr.bf16.mxu1 %v17699_v32  ;;  %v17667_v12 = vcombine.high %v6470_v20, %v6474_v28  ;;  %v6334_v35 = vld [vmem:[%s26501_s3 + $0xa88] sm:$0xff]  ;;  %v17666_v32 = vcombine.low %v6470_v20, %v6474_v28 }
 0x478   : > { %v6338_v38 = vld [vmem:[%s26501_s3 + $0xaa8] sm:$0xff] }
 0x479   : > { %12610 = vmatpush2.bf16.msra.mxu0 %v17570_v49  ;;  %v6462_v52 = vld [vmem:[%s26501_s3 + $0xe88] sm:$0xff]  ;;  %v17531_v43 = vcombine.high %v6334_v35, %v6338_v38 }
 0x47a   : > { %12651 = vmatpush2.bf16.msra.mxu1 %v17698_v57  ;;  %12611 = vmatprep.subr.bf16.mxu0 %v17563_v34  ;;  %v6466_v16 = vld [vmem:[%s26501_s3 + $0xea8] sm:$0xff]  ;;  %v17530_v34 = vcombine.low %v6334_v35, %v6338_v38 }
 0x47b   : > { %12652 = vmatprep.subr.bf16.mxu1 %v17691_v56  ;;  %v17659_v41 = vcombine.high %v6462_v52, %v6466_v16  ;;  %v6326_v9 = vld [vmem:[%s26501_s3 + $0xa48] sm:$0xff]  ;;  %v17658_v56 = vcombine.low %v6462_v52, %v6466_v16 }
 0x47c   : > { %v6330_v19 = vld [vmem:[%s26501_s3 + $0xa68] sm:$0xff] }
 0x47d   : > { %12612 = vmatpush2.bf16.msra.mxu0 %v17562_v37  ;;  %v6454_v49 = vld [vmem:[%s26501_s3 + $0xe48] sm:$0xff]  ;;  %v17523_v42 = vcombine.high %v6326_v9, %v6330_v19 }
 0x47e   : > { %12653 = vmatpush2.bf16.msra.mxu1 %v17690_v30  ;;  %12613 = vmatprep.subr.bf16.mxu0 %v17555_v48  ;;  %v6458_v57 = vld [vmem:[%s26501_s3 + $0xe68] sm:$0xff]  ;;  %v17522_v48 = vcombine.low %v6326_v9, %v6330_v19 }
 0x47f   : > { %12654 = vmatprep.subr.bf16.mxu1 %v17683_v7  ;;  %v17651_v58 = vcombine.high %v6454_v49, %v6458_v57  ;;  %v6318_v45 = vld [vmem:[%s26501_s3 + $0xa08] sm:$0xff]  ;;  %v17650_v7 = vcombine.low %v6454_v49, %v6458_v57 }
 0x480   : > { %v6322_v4 = vld [vmem:[%s26501_s3 + $0xa28] sm:$0xff] }
 0x481   : > { %12614 = vmatpush2.bf16.msra.mxu0 %v17554_v1  ;;  %v6446_v37 = vld [vmem:[%s26501_s3 + $0xe08] sm:$0xff]  ;;  %v17515_v61 = vcombine.high %v6318_v45, %v6322_v4 }
 0x482   : > { %12655 = vmatpush2.bf16.msra.mxu1 %v17682_v59  ;;  %12615 = vmatprep.subr.bf16.mxu0 %v17547_v60  ;;  %v6450_v30 = vld [vmem:[%s26501_s3 + $0xe28] sm:$0xff]  ;;  %v17514_v60 = vcombine.low %v6318_v45, %v6322_v4 }
 0x483   : > { %12656 = vmatprep.subr.bf16.mxu1 %v17675_v39  ;;  %v17643_v40 = vcombine.high %v6446_v37, %v6450_v30  ;;  %v6566_v62 = vld [vmem:[%s26501_s3 + $0x11c8] sm:$0xff]  ;;  %v17642_v39 = vcombine.low %v6446_v37, %v6450_v30 }
 0x484   : > { %v6570_v55 = vld [vmem:[%s26501_s3 + $0x11e8] sm:$0xff] }
 0x485   : > { %12616 = vmatpush2.bf16.msra.mxu0 %v17546_v11  ;;  %v6694_v1 = vld [vmem:[%s26501_s3 + $0x15c8] sm:$0xff]  ;;  %v17763_v24 = vcombine.high %v6566_v62, %v6570_v55  ;;  %v17762_v11 = vcombine.low %v6566_v62, %v6570_v55 }
 0x486   : > { %12657 = vmatpush2.bf16.msra.mxu1 %v17674_v33  ;;  %12617 = vmatprep.subr.bf16.mxu0 %v17539_v26  ;;  %v6698_v59 = vld [vmem:[%s26501_s3 + $0x15e8] sm:$0xff] }
 0x487   : > { %12658 = vmatprep.subr.bf16.mxu1 %v17667_v12  ;;  %v17891_v21 = vcombine.high %v6694_v1, %v6698_v59  ;;  %v6558_v20 = vld [vmem:[%s26501_s3 + $0x1188] sm:$0xff]  ;;  %v17890_v12 = vcombine.low %v6694_v1, %v6698_v59 }
 0x488   : > { %v6562_v28 = vld [vmem:[%s26501_s3 + $0x11a8] sm:$0xff] }
 0x489   : > { %12618 = vmatpush2.bf16.msra.mxu0 %v17538_v44  ;;  %v6686_v33 = vld [vmem:[%s26501_s3 + $0x1588] sm:$0xff]  ;;  %v17755_v35 = vcombine.high %v6558_v20, %v6562_v28  ;;  %v17754_v19 = vcombine.low %v6558_v20, %v6562_v28 }
 0x48a   : > { %12659 = vmatpush2.bf16.msra.mxu1 %v17666_v32  ;;  %12619 = vmatprep.subr.bf16.mxu0 %v17531_v43  ;;  %v6690_v26 = vld [vmem:[%s26501_s3 + $0x15a8] sm:$0xff] }
 0x48b   : > { %12660 = vmatprep.subr.bf16.mxu1 %v17659_v41  ;;  %v6550_v38 = vld [vmem:[%s26501_s3 + $0x1148] sm:$0xff]  ;;  %v17883_v44 = vcombine.high %v6686_v33, %v6690_v26  ;;  %v17882_v57 = vcombine.low %v6686_v33, %v6690_v26 }
 0x48c   : > { %v6554_v52 = vld [vmem:[%s26501_s3 + $0x1168] sm:$0xff] }
 0x48d   : > { %12620 = vmatpush2.bf16.msra.mxu0 %v17530_v34  ;;  %v6678_v32 = vld [vmem:[%s26501_s3 + $0x1548] sm:$0xff]  ;;  %v17747_v34 = vcombine.high %v6550_v38, %v6554_v52 }
 0x48e   : > { %12661 = vmatpush2.bf16.msra.mxu1 %v17658_v56  ;;  %12621 = vmatprep.subr.bf16.mxu0 %v17523_v42  ;;  %v6682_v43 = vld [vmem:[%s26501_s3 + $0x1568] sm:$0xff] }
 0x48f   : > { %12662 = vmatprep.subr.bf16.mxu1 %v17651_v58  ;;  %v6542_v45 = vld [vmem:[%s26501_s3 + $0x1108] sm:$0xff]  ;;  %v17874_v62 = vcombine.low %v6678_v32, %v6682_v43 }
 0x490   : > { %v6546_v4 = vld [vmem:[%s26501_s3 + $0x1128] sm:$0xff] }
 0x491   : > { %12622 = vmatpush2.bf16.msra.mxu0 %v17522_v48  ;;  %v6670_v30 = vld [vmem:[%s26501_s3 + $0x1508] sm:$0xff]  ;;  %v17739_v55 = vcombine.high %v6542_v45, %v6546_v4  ;;  %v17738_v20 = vcombine.low %v6542_v45, %v6546_v4 }
 0x492   : > { %12663 = vmatpush2.bf16.msra.mxu1 %v17650_v7  ;;  %12623 = vmatprep.subr.bf16.mxu0 %v17515_v61  ;;  %v17746_v61 = vcombine.low %v6550_v38, %v6554_v52  ;;  %v6526_v26 = vld [vmem:[%s26501_s3 + $0x1088] sm:$0xff] }
 0x493   : > { %12664 = vmatprep.subr.bf16.mxu1 %v17643_v40  ;;  %v6658_v38 = vld [vmem:[%s26501_s3 + $0x14a8] sm:$0xff] }
 0x494   : > { %v6638_v45 = vld [vmem:[%s26501_s3 + $0x1408] sm:$0xff] }
 0x495   : > { %12624 = vmatpush2.bf16.msra.mxu0 %v17514_v60  ;;  %v6534_v60 = vld [vmem:[%s26501_s3 + $0x10c8] sm:$0xff] }
 0x496   : > { %12665 = vmatpush2.bf16.msra.mxu1 %v17642_v39  ;;  %12675 = vmatprep.subr.bf16.mxu0 %v17763_v24  ;;  %v6538_v39 = vld [vmem:[%s26501_s3 + $0x10e8] sm:$0xff] }
 0x497   : > { %12716 = vmatprep.subr.bf16.mxu1 %v17891_v21  ;;  %v6662_v24 = vld [vmem:[%s26501_s3 + $0x14c8] sm:$0xff]  ;;  %v17730_v52 = vcombine.low %v6534_v60, %v6538_v39 }
 0x498   : > { %v12381_v16 = vpop.f32.mrf.mxu0  ;;  %12626 = vmatmul.mubr.bf16.vlgmr.msra.gmra.mxu0 %v22329_v46  ;;  %v6666_v21 = vld [vmem:[%s26501_s3 + $0x14e8] sm:$0xff] }
 0x499   : > { %v12382_v41 = vadd.f32 %v12381_v16, %v22990_v23  ;;  %v12422_v9 = vpop.f32.mrf.mxu1  ;;  %12667 = vmatmul.mubr.bf16.vlgmr.msra.gmra.mxu1 %v22331_v50  ;;  %12676 = vmatpush1.bf16.msra.mxu0 %v17762_v11  ;;  %v17875_v23 = vcombine.high %v6678_v32, %v6682_v43  ;;  %v17731_v11 = vcombine.high %v6534_v60, %v6538_v39  ;;  %v6518_v43 = vld [vmem:[%s26501_s3 + $0x1048] sm:$0xff] }
 0x49a   : > { %12707 = vmatprep.mubr.bf16.mxu0 %v22339_v53  ;;  %12717 = vmatpush1.bf16.msra.mxu1 %v17890_v12  ;;  %v12383_v49 = vpop.f32.mrf.mxu0  ;;  %v17859_v33 = vcombine.high %v6662_v24, %v6666_v21  ;;  %v6530_v12 = vld [vmem:[%s26501_s3 + $0x10a8] sm:$0xff]  ;;  %v17858_v16 = vcombine.low %v6662_v24, %v6666_v21 }
 0x49b   : > { %v23192_v56 = vadd.f32 %v12422_v9, %v12382_v41  ;;  %12748 = vmatprep.mubr.bf16.mxu1 %v22348_v0  ;;  %v12384_v42 = vadd.f32 %v12383_v49, %v23006_v3  ;;  %v12424_v58 = vpop.f32.mrf.mxu1  ;;  %12677 = vmatprep.subr.bf16.mxu0 %v17755_v35  ;;  %v6674_v3 = vld [vmem:[%s26501_s3 + $0x1528] sm:$0xff]  ;;  %v17722_v49 = vcombine.low %v6526_v26, %v6530_v12 }
 0x49c   : > { %v12385_v37 = vpop.f32.mrf.mxu0  ;;  %12718 = vmatprep.subr.bf16.mxu1 %v17883_v44  ;;  %v17867_v59 = vcombine.high %v6670_v30, %v6674_v3  ;;  %v17866_v28 = vcombine.low %v6670_v30, %v6674_v3  ;;  %v6654_v35 = vld [vmem:[%s26501_s3 + $0x1488] sm:$0xff]  ;;  %v17723_v44 = vcombine.high %v6526_v26, %v6530_v12 }
 0x49d   : > { %v23208_v48 = vadd.f32 %v12424_v58, %v12384_v42  ;;  %v12426_v7 = vpop.f32.mrf.mxu1  ;;  %12678 = vmatpush1.bf16.msra.mxu0 %v17754_v19  ;;  %v17851_v32 = vcombine.high %v6654_v35, %v6658_v38  ;;  %v6522_v41 = vld [vmem:[%s26501_s3 + $0x1068] sm:$0xff] }
 0x49e   : > { %12719 = vmatpush1.bf16.msra.mxu1 %v17882_v57  ;;  %v12386_v40 = vpop.f32.mrf.mxu0  ;;  %12679 = vmatprep.subr.bf16.mxu0 %v17747_v34  ;;  %v6646_v9 = vld [vmem:[%s26501_s3 + $0x1448] sm:$0xff]  ;;  %v17850_v57 = vcombine.low %v6654_v35, %v6658_v38  ;;  %v17715_v34 = vcombine.high %v6518_v43, %v6522_v41  ;;  %v17714_v37 = vcombine.low %v6518_v43, %v6522_v41 }
 0x49f   : > { %v12427_v1 = vpop.f32.mrf.mxu1  ;;  %12720 = vmatprep.subr.bf16.mxu1 %v17875_v23  ;;  %v6650_v19 = vld [vmem:[%s26501_s3 + $0x1468] sm:$0xff] }
 0x4a0   : > { %v17843_v42 = vcombine.high %v6646_v9, %v6650_v19  ;;  %v6510_v58 = vld [vmem:[%s26501_s3 + $0x1008] sm:$0xff]  ;;  %v17842_v30 = vcombine.low %v6646_v9, %v6650_v19 }
 0x4a1   : > { %12680 = vmatpush1.bf16.msra.mxu0 %v17746_v61  ;;  %v6514_v23 = vld [vmem:[%s26501_s3 + $0x1028] sm:$0xff] }
 0x4a2   : > { %12721 = vmatpush1.bf16.msra.mxu1 %v17874_v62  ;;  %12681 = vmatprep.subr.bf16.mxu0 %v17739_v55  ;;  %v6642_v4 = vld [vmem:[%s26501_s3 + $0x1428] sm:$0xff]  ;;  %v17707_v3 = vcombine.high %v6510_v58, %v6514_v23  ;;  %v17706_v1 = vcombine.low %v6510_v58, %v6514_v23 }
 0x4a3   : > { %12722 = vmatprep.subr.bf16.mxu1 %v17867_v59  ;;  %v17835_v7 = vcombine.high %v6638_v45, %v6642_v4  ;;  %v6630_v61 = vld [vmem:[%s26501_s3 + $0x13c8] sm:$0xff]  ;;  %v17834_v59 = vcombine.low %v6638_v45, %v6642_v4 }
 0x4a4   : > { %v6634_v40 = vld [vmem:[%s26501_s3 + $0x13e8] sm:$0xff] }
 0x4a5   : > { %12682 = vmatpush1.bf16.msra.mxu0 %v17738_v20  ;;  %v6758_v62 = vld [vmem:[%s26501_s3 + $0x17c8] sm:$0xff]  ;;  %v17827_v60 = vcombine.high %v6630_v61, %v6634_v40 }
 0x4a6   : > { %12723 = vmatpush1.bf16.msra.mxu1 %v17866_v28  ;;  %12683 = vmatprep.subr.bf16.mxu0 %v17731_v11  ;;  %v6762_v55 = vld [vmem:[%s26501_s3 + $0x17e8] sm:$0xff]  ;;  %v17826_v11 = vcombine.low %v6630_v61, %v6634_v40 }
 0x4a7   : > { %12724 = vmatprep.subr.bf16.mxu1 %v17859_v33  ;;  %v17955_v39 = vcombine.high %v6758_v62, %v6762_v55  ;;  %v6622_v24 = vld [vmem:[%s26501_s3 + $0x1388] sm:$0xff]  ;;  %v17954_v33 = vcombine.low %v6758_v62, %v6762_v55 }
 0x4a8   : > { %v6626_v21 = vld [vmem:[%s26501_s3 + $0x13a8] sm:$0xff] }
 0x4a9   : > { %12684 = vmatpush1.bf16.msra.mxu0 %v17730_v52  ;;  %v6750_v20 = vld [vmem:[%s26501_s3 + $0x1788] sm:$0xff]  ;;  %v17819_v26 = vcombine.high %v6622_v24, %v6626_v21 }
 0x4aa   : > { %12725 = vmatpush1.bf16.msra.mxu1 %v17858_v16  ;;  %12685 = vmatprep.subr.bf16.mxu0 %v17723_v44  ;;  %v6754_v28 = vld [vmem:[%s26501_s3 + $0x17a8] sm:$0xff]  ;;  %v17818_v44 = vcombine.low %v6622_v24, %v6626_v21 }
 0x4ab   : > { %12726 = vmatprep.subr.bf16.mxu1 %v17851_v32  ;;  %v17947_v12 = vcombine.high %v6750_v20, %v6754_v28  ;;  %v6614_v35 = vld [vmem:[%s26501_s3 + $0x1348] sm:$0xff]  ;;  %v17946_v32 = vcombine.low %v6750_v20, %v6754_v28 }
 0x4ac   : > { %v6618_v38 = vld [vmem:[%s26501_s3 + $0x1368] sm:$0xff] }
 0x4ad   : > { %12686 = vmatpush1.bf16.msra.mxu0 %v17722_v49  ;;  %v6742_v52 = vld [vmem:[%s26501_s3 + $0x1748] sm:$0xff]  ;;  %v17811_v43 = vcombine.high %v6614_v35, %v6618_v38 }
 0x4ae   : > { %12727 = vmatpush1.bf16.msra.mxu1 %v17850_v57  ;;  %12687 = vmatprep.subr.bf16.mxu0 %v17715_v34  ;;  %v6746_v16 = vld [vmem:[%s26501_s3 + $0x1768] sm:$0xff]  ;;  %v17810_v34 = vcombine.low %v6614_v35, %v6618_v38 }
 0x4af   : > { %12728 = vmatprep.subr.bf16.mxu1 %v17843_v42  ;;  %v17939_v41 = vcombine.high %v6742_v52, %v6746_v16  ;;  %v6606_v9 = vld [vmem:[%s26501_s3 + $0x1308] sm:$0xff]  ;;  %v17938_v42 = vcombine.low %v6742_v52, %v6746_v16 }
 0x4b0   : > { %v6610_v19 = vld [vmem:[%s26501_s3 + $0x1328] sm:$0xff] }
 0x4b1   : > { %12688 = vmatpush1.bf16.msra.mxu0 %v17714_v37  ;;  %v6734_v49 = vld [vmem:[%s26501_s3 + $0x1708] sm:$0xff]  ;;  %v17803_v58 = vcombine.high %v6606_v9, %v6610_v19 }
 0x4b2   : > { %12729 = vmatpush1.bf16.msra.mxu1 %v17842_v30  ;;  %12689 = vmatprep.subr.bf16.mxu0 %v17707_v3  ;;  %v6738_v57 = vld [vmem:[%s26501_s3 + $0x1728] sm:$0xff]  ;;  %v17802_v3 = vcombine.low %v6606_v9, %v6610_v19 }
 0x4b3   : > { %12730 = vmatprep.subr.bf16.mxu1 %v17835_v7  ;;  %v17931_v23 = vcombine.high %v6734_v49, %v6738_v57  ;;  %v6598_v45 = vld [vmem:[%s26501_s3 + $0x12c8] sm:$0xff]  ;;  %v17930_v7 = vcombine.low %v6734_v49, %v6738_v57 }
 0x4b4   : > { %v6602_v4 = vld [vmem:[%s26501_s3 + $0x12e8] sm:$0xff] }
 0x4b5   : > { %12690 = vmatpush1.bf16.msra.mxu0 %v17706_v1  ;;  %v6726_v37 = vld [vmem:[%s26501_s3 + $0x16c8] sm:$0xff]  ;;  %v17795_v61 = vcombine.high %v6598_v45, %v6602_v4 }
 0x4b6   : > { %12731 = vmatpush1.bf16.msra.mxu1 %v17834_v59  ;;  %12691 = vmatprep.subr.bf16.mxu0 %v17827_v60  ;;  %v6730_v30 = vld [vmem:[%s26501_s3 + $0x16e8] sm:$0xff]  ;;  %v17794_v60 = vcombine.low %v6598_v45, %v6602_v4 }
 0x4b7   : > { %12732 = vmatprep.subr.bf16.mxu1 %v17955_v39  ;;  %v17923_v40 = vcombine.high %v6726_v37, %v6730_v30  ;;  %v6590_v62 = vld [vmem:[%s26501_s3 + $0x1288] sm:$0xff]  ;;  %v17922_v39 = vcombine.low %v6726_v37, %v6730_v30 }
 0x4b8   : > { %v6594_v55 = vld [vmem:[%s26501_s3 + $0x12a8] sm:$0xff] }
 0x4b9   : > { %12692 = vmatpush2.bf16.msra.mxu0 %v17826_v11  ;;  %v6718_v1 = vld [vmem:[%s26501_s3 + $0x1688] sm:$0xff]  ;;  %v17787_v24 = vcombine.high %v6590_v62, %v6594_v55 }
 0x4ba   : > { %12733 = vmatpush2.bf16.msra.mxu1 %v17954_v33  ;;  %12693 = vmatprep.subr.bf16.mxu0 %v17819_v26  ;;  %v6722_v59 = vld [vmem:[%s26501_s3 + $0x16a8] sm:$0xff]  ;;  %v17786_v26 = vcombine.low %v6590_v62, %v6594_v55 }
 0x4bb   : > { %12734 = vmatprep.subr.bf16.mxu1 %v17947_v12  ;;  %v17915_v21 = vcombine.high %v6718_v1, %v6722_v59  ;;  %v6582_v20 = vld [vmem:[%s26501_s3 + $0x1248] sm:$0xff]  ;;  %v17914_v12 = vcombine.low %v6718_v1, %v6722_v59 }
 0x4bc   : > { %v6586_v28 = vld [vmem:[%s26501_s3 + $0x1268] sm:$0xff] }
 0x4bd   : > { %12694 = vmatpush2.bf16.msra.mxu0 %v17818_v44  ;;  %v6710_v11 = vld [vmem:[%s26501_s3 + $0x1648] sm:$0xff]  ;;  %v17779_v35 = vcombine.high %v6582_v20, %v6586_v28 }
 0x4be   : > { %12735 = vmatpush2.bf16.msra.mxu1 %v17946_v32  ;;  %12695 = vmatprep.subr.bf16.mxu0 %v17811_v43  ;;  %v6714_v33 = vld [vmem:[%s26501_s3 + $0x1668] sm:$0xff]  ;;  %v17778_v43 = vcombine.low %v6582_v20, %v6586_v28 }
 0x4bf   : > { %12736 = vmatprep.subr.bf16.mxu1 %v17939_v41  ;;  %v17907_v38 = vcombine.high %v6710_v11, %v6714_v33  ;;  %v6574_v52 = vld [vmem:[%s26501_s3 + $0x1208] sm:$0xff]  ;;  %v17906_v41 = vcombine.low %v6710_v11, %v6714_v33 }
 0x4c0   : > { %v6578_v16 = vld [vmem:[%s26501_s3 + $0x1228] sm:$0xff] }
 0x4c1   : > { %12696 = vmatpush2.bf16.msra.mxu0 %v17810_v34  ;;  %v6702_v44 = vld [vmem:[%s26501_s3 + $0x1608] sm:$0xff]  ;;  %v17771_v9 = vcombine.high %v6574_v52, %v6578_v16 }
 0x4c2   : > { %12737 = vmatpush2.bf16.msra.mxu1 %v17938_v42  ;;  %12697 = vmatprep.subr.bf16.mxu0 %v17803_v58  ;;  %v6706_v32 = vld [vmem:[%s26501_s3 + $0x1628] sm:$0xff]  ;;  %v17770_v58 = vcombine.low %v6574_v52, %v6578_v16 }
 0x4c3   : > { %12738 = vmatprep.subr.bf16.mxu1 %v17931_v23  ;;  %v17899_v19 = vcombine.high %v6702_v44, %v6706_v32  ;;  %v6822_v49 = vld [vmem:[%s26501_s3 + $0x19c8] sm:$0xff]  ;;  %v17898_v23 = vcombine.low %v6702_v44, %v6706_v32 }
 0x4c4   : > { %v6826_v57 = vld [vmem:[%s26501_s3 + $0x19e8] sm:$0xff] }
 0x4c5   : > { %12698 = vmatpush2.bf16.msra.mxu0 %v17802_v3  ;;  %v6950_v34 = vld [vmem:[%s26501_s3 + $0x1dc8] sm:$0xff]  ;;  %v18019_v45 = vcombine.high %v6822_v49, %v6826_v57  ;;  %v18018_v3 = vcombine.low %v6822_v49, %v6826_v57 }
 0x4c6   : > { %12739 = vmatpush2.bf16.msra.mxu1 %v17930_v7  ;;  %12699 = vmatprep.subr.bf16.mxu0 %v17795_v61  ;;  %v6954_v42 = vld [vmem:[%s26501_s3 + $0x1de8] sm:$0xff] }
 0x4c7   : > { %12740 = vmatprep.subr.bf16.mxu1 %v17923_v40  ;;  %v18147_v4 = vcombine.high %v6950_v34, %v6954_v42  ;;  %v6814_v37 = vld [vmem:[%s26501_s3 + $0x1988] sm:$0xff]  ;;  %v18146_v40 = vcombine.low %v6950_v34, %v6954_v42 }
 0x4c8   : > { %v6818_v30 = vld [vmem:[%s26501_s3 + $0x19a8] sm:$0xff] }
 0x4c9   : > { %12700 = vmatpush2.bf16.msra.mxu0 %v17794_v60  ;;  %v6942_v7 = vld [vmem:[%s26501_s3 + $0x1d88] sm:$0xff]  ;;  %v18011_v62 = vcombine.high %v6814_v37, %v6818_v30  ;;  %v18010_v28 = vcombine.low %v6814_v37, %v6818_v30 }
 0x4ca   : > { %12741 = vmatpush2.bf16.msra.mxu1 %v17922_v39  ;;  %12701 = vmatprep.subr.bf16.mxu0 %v17787_v24  ;;  %v6946_v61 = vld [vmem:[%s26501_s3 + $0x1da8] sm:$0xff] }
 0x4cb   : > { %12742 = vmatprep.subr.bf16.mxu1 %v17915_v21  ;;  %v6806_v55 = vld [vmem:[%s26501_s3 + $0x1948] sm:$0xff]  ;;  %v18139_v60 = vcombine.high %v6942_v7, %v6946_v61  ;;  %v18138_v33 = vcombine.low %v6942_v7, %v6946_v61 }
 0x4cc   : > { %v6810_v1 = vld [vmem:[%s26501_s3 + $0x1968] sm:$0xff] }
 0x4cd   : > { %12702 = vmatpush2.bf16.msra.mxu0 %v17786_v26  ;;  %v6934_v39 = vld [vmem:[%s26501_s3 + $0x1d48] sm:$0xff]  ;;  %v18003_v26 = vcombine.high %v6806_v55, %v6810_v1 }
 0x4ce   : > { %12743 = vmatpush2.bf16.msra.mxu1 %v17914_v12  ;;  %12703 = vmatprep.subr.bf16.mxu0 %v17779_v35  ;;  %v6938_v24 = vld [vmem:[%s26501_s3 + $0x1d68] sm:$0xff] }
 0x4cf   : > { %12744 = vmatprep.subr.bf16.mxu1 %v17907_v38  ;;  %v6798_v52 = vld [vmem:[%s26501_s3 + $0x1908] sm:$0xff]  ;;  %v18130_v49 = vcombine.low %v6934_v39, %v6938_v24 }
 0x4d0   : > { %v6802_v16 = vld [vmem:[%s26501_s3 + $0x1928] sm:$0xff] }
 0x4d1   : > { %12704 = vmatpush2.bf16.msra.mxu0 %v17778_v43  ;;  %v6926_v32 = vld [vmem:[%s26501_s3 + $0x1d08] sm:$0xff]  ;;  %v17995_v57 = vcombine.high %v6798_v52, %v6802_v16  ;;  %v17994_v37 = vcombine.low %v6798_v52, %v6802_v16 }
 0x4d2   : > { %12745 = vmatpush2.bf16.msra.mxu1 %v17906_v41  ;;  %12705 = vmatprep.subr.bf16.mxu0 %v17771_v9  ;;  %v18002_v9 = vcombine.low %v6806_v55, %v6810_v1  ;;  %v6782_v61 = vld [vmem:[%s26501_s3 + $0x1888] sm:$0xff] }
 0x4d3   : > { %12746 = vmatprep.subr.bf16.mxu1 %v17899_v19  ;;  %v6914_v55 = vld [vmem:[%s26501_s3 + $0x1ca8] sm:$0xff] }
 0x4d4   : > { %v6894_v52 = vld [vmem:[%s26501_s3 + $0x1c08] sm:$0xff] }
 0x4d5   : > { %12706 = vmatpush2.bf16.msra.mxu0 %v17770_v58  ;;  %v6790_v58 = vld [vmem:[%s26501_s3 + $0x18c8] sm:$0xff] }
 0x4d6   : > { %12747 = vmatpush2.bf16.msra.mxu1 %v17898_v23  ;;  %12757 = vmatprep.subr.bf16.mxu0 %v18019_v45  ;;  %v6794_v23 = vld [vmem:[%s26501_s3 + $0x18e8] sm:$0xff] }
 0x4d7   : > { %12798 = vmatprep.subr.bf16.mxu1 %v18147_v4  ;;  %v6918_v45 = vld [vmem:[%s26501_s3 + $0x1cc8] sm:$0xff]  ;;  %v17986_v1 = vcombine.low %v6790_v58, %v6794_v23 }
 0x4d8   : > { %v12463_v59 = vpop.f32.mrf.mxu0  ;;  %12708 = vmatmul.mubr.bf16.vlgmr.msra.gmra.mxu0 %v22548_v18  ;;  %v6922_v4 = vld [vmem:[%s26501_s3 + $0x1ce8] sm:$0xff] }
 0x4d9   : > { %v12464_v21 = vadd.f32 %v12463_v59, %v23192_v56  ;;  %v12504_v20 = vpop.f32.mrf.mxu1  ;;  %12749 = vmatmul.mubr.bf16.vlgmr.msra.gmra.mxu1 %v22550_v22  ;;  %12758 = vmatpush1.bf16.msra.mxu0 %v18018_v3  ;;  %v18131_v56 = vcombine.high %v6934_v39, %v6938_v24  ;;  %v17987_v3 = vcombine.high %v6790_v58, %v6794_v23  ;;  %v6774_v24 = vld [vmem:[%s26501_s3 + $0x1848] sm:$0xff] }
 0x4da   : > { %12789 = vmatprep.mubr.bf16.mxu0 %v22558_v29  ;;  %12799 = vmatpush1.bf16.msra.mxu1 %v18146_v40  ;;  %v12465_v11 = vpop.f32.mrf.mxu0  ;;  %v18115_v7 = vcombine.high %v6918_v45, %v6922_v4  ;;  %v6786_v40 = vld [vmem:[%s26501_s3 + $0x18a8] sm:$0xff]  ;;  %v18114_v59 = vcombine.low %v6918_v45, %v6922_v4 }
 0x4db   : > { %v23394_v12 = vadd.f32 %v12504_v20, %v12464_v21  ;;  %12830 = vmatprep.mubr.bf16.mxu1 %v22598_v13  ;;  %v12466_v35 = vadd.f32 %v12465_v11, %v23208_v48  ;;  %v12506_v38 = vpop.f32.mrf.mxu1  ;;  %12759 = vmatprep.subr.bf16.mxu0 %v18011_v62  ;;  %v6930_v48 = vld [vmem:[%s26501_s3 + $0x1d28] sm:$0xff]  ;;  %v17978_v11 = vcombine.low %v6782_v61, %v6786_v40 }
 0x4dc   : > { %v12467_v44 = vpop.f32.mrf.mxu0  ;;  %12800 = vmatprep.subr.bf16.mxu1 %v18139_v60  ;;  %v18123_v42 = vcombine.high %v6926_v32, %v6930_v48  ;;  %v18122_v30 = vcombine.low %v6926_v32, %v6930_v48  ;;  %v6910_v62 = vld [vmem:[%s26501_s3 + $0x1c88] sm:$0xff]  ;;  %v17979_v60 = vcombine.high %v6782_v61, %v6786_v40 }
 0x4dd   : > { %v23410_v43 = vadd.f32 %v12506_v38, %v12466_v35  ;;  %v12508_v41 = vpop.f32.mrf.mxu1  ;;  %12760 = vmatpush1.bf16.msra.mxu0 %v18010_v28  ;;  %v18107_v39 = vcombine.high %v6910_v62, %v6914_v55  ;;  %v6778_v21 = vld [vmem:[%s26501_s3 + $0x1868] sm:$0xff] }
 0x4de   : > { %12801 = vmatpush1.bf16.msra.mxu1 %v18138_v33  ;;  %v12468_v19 = vpop.f32.mrf.mxu0  ;;  %12761 = vmatprep.subr.bf16.mxu0 %v18003_v26  ;;  %v6902_v20 = vld [vmem:[%s26501_s3 + $0x1c48] sm:$0xff]  ;;  %v18106_v33 = vcombine.low %v6910_v62, %v6914_v55  ;;  %v17971_v26 = vcombine.high %v6774_v24, %v6778_v21  ;;  %v17970_v44 = vcombine.low %v6774_v24, %v6778_v21 }
 0x4df   : > { %v12509_v34 = vpop.f32.mrf.mxu1  ;;  %12802 = vmatprep.subr.bf16.mxu1 %v18131_v56  ;;  %v6906_v28 = vld [vmem:[%s26501_s3 + $0x1c68] sm:$0xff] }
 0x4e0   : > { %v18099_v35 = vcombine.high %v6902_v20, %v6906_v28  ;;  %v6766_v38 = vld [vmem:[%s26501_s3 + $0x1808] sm:$0xff]  ;;  %v18098_v32 = vcombine.low %v6902_v20, %v6906_v28 }
 0x4e1   : > { %12762 = vmatpush1.bf16.msra.mxu0 %v18002_v9  ;;  %v6770_v56 = vld [vmem:[%s26501_s3 + $0x1828] sm:$0xff] }
 0x4e2   : > { %12803 = vmatpush1.bf16.msra.mxu1 %v18130_v49  ;;  %12763 = vmatprep.subr.bf16.mxu0 %v17995_v57  ;;  %v6898_v16 = vld [vmem:[%s26501_s3 + $0x1c28] sm:$0xff]  ;;  %v17963_v48 = vcombine.high %v6766_v38, %v6770_v56  ;;  %v17962_v34 = vcombine.low %v6766_v38, %v6770_v56 }
 0x4e3   : > { %12804 = vmatprep.subr.bf16.mxu1 %v18123_v42  ;;  %v18091_v41 = vcombine.high %v6894_v52, %v6898_v16  ;;  %v6886_v9 = vld [vmem:[%s26501_s3 + $0x1bc8] sm:$0xff]  ;;  %v18090_v42 = vcombine.low %v6894_v52, %v6898_v16 }
 0x4e4   : > { %v6890_v19 = vld [vmem:[%s26501_s3 + $0x1be8] sm:$0xff] }
 0x4e5   : > { %12764 = vmatpush1.bf16.msra.mxu0 %v17994_v37  ;;  %v7014_v49 = vld [vmem:[%s26501_s3 + $0x1fc8] sm:$0xff]  ;;  %v18083_v58 = vcombine.high %v6886_v9, %v6890_v19 }
 0x4e6   : > { %12805 = vmatpush1.bf16.msra.mxu1 %v18122_v30  ;;  %12765 = vmatprep.subr.bf16.mxu0 %v17987_v3  ;;  %v7018_v57 = vld [vmem:[%s26501_s3 + $0x1fe8] sm:$0xff]  ;;  %v18082_v3 = vcombine.low %v6886_v9, %v6890_v19 }
 0x4e7   : > { %12806 = vmatprep.subr.bf16.mxu1 %v18115_v7  ;;  %v18211_v23 = vcombine.high %v7014_v49, %v7018_v57  ;;  %v6878_v45 = vld [vmem:[%s26501_s3 + $0x1b88] sm:$0xff]  ;;  %v18210_v7 = vcombine.low %v7014_v49, %v7018_v57 }
 0x4e8   : > { %v6882_v4 = vld [vmem:[%s26501_s3 + $0x1ba8] sm:$0xff] }
 0x4e9   : > { %12766 = vmatpush1.bf16.msra.mxu0 %v17986_v1  ;;  %v7006_v37 = vld [vmem:[%s26501_s3 + $0x1f88] sm:$0xff]  ;;  %v18075_v61 = vcombine.high %v6878_v45, %v6882_v4 }
 0x4ea   : > { %12807 = vmatpush1.bf16.msra.mxu1 %v18114_v59  ;;  %12767 = vmatprep.subr.bf16.mxu0 %v17979_v60  ;;  %v7010_v30 = vld [vmem:[%s26501_s3 + $0x1fa8] sm:$0xff]  ;;  %v18074_v60 = vcombine.low %v6878_v45, %v6882_v4 }
 0x4eb   : > { %12808 = vmatprep.subr.bf16.mxu1 %v18107_v39  ;;  %v18203_v40 = vcombine.high %v7006_v37, %v7010_v30  ;;  %v6870_v62 = vld [vmem:[%s26501_s3 + $0x1b48] sm:$0xff]  ;;  %v18202_v39 = vcombine.low %v7006_v37, %v7010_v30 }
 0x4ec   : > { %v6874_v55 = vld [vmem:[%s26501_s3 + $0x1b68] sm:$0xff] }
 0x4ed   : > { %12768 = vmatpush1.bf16.msra.mxu0 %v17978_v11  ;;  %v6998_v1 = vld [vmem:[%s26501_s3 + $0x1f48] sm:$0xff]  ;;  %v18067_v24 = vcombine.high %v6870_v62, %v6874_v55 }
 0x4ee   : > { %12809 = vmatpush1.bf16.msra.mxu1 %v18106_v33  ;;  %12769 = vmatprep.subr.bf16.mxu0 %v17971_v26  ;;  %v7002_v59 = vld [vmem:[%s26501_s3 + $0x1f68] sm:$0xff]  ;;  %v18066_v26 = vcombine.low %v6870_v62, %v6874_v55 }
 0x4ef   : > { %12810 = vmatprep.subr.bf16.mxu1 %v18099_v35  ;;  %v18195_v21 = vcombine.high %v6998_v1, %v7002_v59  ;;  %v6862_v20 = vld [vmem:[%s26501_s3 + $0x1b08] sm:$0xff]  ;;  %v18194_v35 = vcombine.low %v6998_v1, %v7002_v59 }
 0x4f0   : > { %v6866_v28 = vld [vmem:[%s26501_s3 + $0x1b28] sm:$0xff] }
 0x4f1   : > { %12770 = vmatpush1.bf16.msra.mxu0 %v17970_v44  ;;  %v6990_v11 = vld [vmem:[%s26501_s3 + $0x1f08] sm:$0xff]  ;;  %v18059_v38 = vcombine.high %v6862_v20, %v6866_v28 }
 0x4f2   : > { %12811 = vmatpush1.bf16.msra.mxu1 %v18098_v32  ;;  %12771 = vmatprep.subr.bf16.mxu0 %v17963_v48  ;;  %v6994_v33 = vld [vmem:[%s26501_s3 + $0x1f28] sm:$0xff]  ;;  %v18058_v48 = vcombine.low %v6862_v20, %v6866_v28 }
 0x4f3   : > { %12812 = vmatprep.subr.bf16.mxu1 %v18091_v41  ;;  %v18187_v56 = vcombine.high %v6990_v11, %v6994_v33  ;;  %v6854_v52 = vld [vmem:[%s26501_s3 + $0x1ac8] sm:$0xff]  ;;  %v18186_v41 = vcombine.low %v6990_v11, %v6994_v33  ;;  %v6055_v11 = vld [vmem:[%s26501_s3 + $0x1d0] sm:$0xff] }
 0x4f4   : > { %v6858_v16 = vld [vmem:[%s26501_s3 + $0x1ae8] sm:$0xff]  ;;  %v6059_v33 = vld [vmem:[%s26501_s3 + $0x1f0] sm:$0xff] }
 0x4f5   : > { %12772 = vmatpush1.bf16.msra.mxu0 %v17962_v34  ;;  %v6982_v44 = vld [vmem:[%s26501_s3 + $0x1ec8] sm:$0xff]  ;;  %v18051_v9 = vcombine.high %v6854_v52, %v6858_v16 }
 0x4f6   : > { %12813 = vmatpush1.bf16.msra.mxu1 %v18090_v42  ;;  %12773 = vmatprep.subr.bf16.mxu0 %v18083_v58  ;;  %v6986_v32 = vld [vmem:[%s26501_s3 + $0x1ee8] sm:$0xff]  ;;  %v18050_v58 = vcombine.low %v6854_v52, %v6858_v16  ;;  %v17253_v52 = vcombine.high %v6055_v11, %v6059_v33 }
 0x4f7   : > { %12814 = vmatprep.subr.bf16.mxu1 %v18211_v23  ;;  %v18179_v19 = vcombine.high %v6982_v44, %v6986_v32  ;;  %v6846_v49 = vld [vmem:[%s26501_s3 + $0x1a88] sm:$0xff]  ;;  %v18178_v23 = vcombine.low %v6982_v44, %v6986_v32  ;;  %v6047_v44 = vld [vmem:[%s26501_s3 + $0x190] sm:$0xff] }
 0x4f8   : > { %v6850_v57 = vld [vmem:[%s26501_s3 + $0x1aa8] sm:$0xff]  ;;  %v6051_v32 = vld [vmem:[%s26501_s3 + $0x1b0] sm:$0xff] }
 0x4f9   : > { %12774 = vmatpush2.bf16.msra.mxu0 %v18082_v3  ;;  %v6974_v34 = vld [vmem:[%s26501_s3 + $0x1e88] sm:$0xff]  ;;  %v18043_v45 = vcombine.high %v6846_v49, %v6850_v57 }
 0x4fa   : > { %12815 = vmatpush2.bf16.msra.mxu1 %v18210_v7  ;;  %12775 = vmatprep.subr.bf16.mxu0 %v18075_v61  ;;  %v6978_v42 = vld [vmem:[%s26501_s3 + $0x1ea8] sm:$0xff]  ;;  %v18042_v61 = vcombine.low %v6846_v49, %v6850_v57  ;;  %v6179_v49 = vld [vmem:[%s26501_s3 + $0x5b0] sm:$0xff] }
 0x4fb   : > { %12816 = vmatprep.subr.bf16.mxu1 %v18203_v40  ;;  %v18171_v4 = vcombine.high %v6974_v34, %v6978_v42  ;;  %v6838_v37 = vld [vmem:[%s26501_s3 + $0x1a48] sm:$0xff]  ;;  %v18170_v40 = vcombine.low %v6974_v34, %v6978_v42  ;;  %v17245_v42 = vcombine.high %v6047_v44, %v6051_v32 }
 0x4fc   : > { %v6842_v30 = vld [vmem:[%s26501_s3 + $0x1a68] sm:$0xff] }
 0x4fd   : > { %12776 = vmatpush2.bf16.msra.mxu0 %v18074_v60  ;;  %v6966_v3 = vld [vmem:[%s26501_s3 + $0x1e48] sm:$0xff]  ;;  %v18035_v62 = vcombine.high %v6838_v37, %v6842_v30 }
 0x4fe   : > { %12817 = vmatpush2.bf16.msra.mxu1 %v18202_v39  ;;  %12777 = vmatprep.subr.bf16.mxu0 %v18067_v24  ;;  %v6970_v7 = vld [vmem:[%s26501_s3 + $0x1e68] sm:$0xff]  ;;  %v18034_v24 = vcombine.low %v6838_v37, %v6842_v30  ;;  %v6167_v37 = vld [vmem:[%s26501_s3 + $0x550] sm:$0xff] }
 0x4ff   : > { %12818 = vmatprep.subr.bf16.mxu1 %v18195_v21  ;;  %v18163_v55 = vcombine.high %v6966_v3, %v6970_v7  ;;  %v6830_v1 = vld [vmem:[%s26501_s3 + $0x1a08] sm:$0xff]  ;;  %v18162_v21 = vcombine.low %v6966_v3, %v6970_v7  ;;  %v6171_v30 = vld [vmem:[%s26501_s3 + $0x570] sm:$0xff] }
 0x500   : > { %v6834_v59 = vld [vmem:[%s26501_s3 + $0x1a28] sm:$0xff] }
 0x501   : > { %12778 = vmatpush2.bf16.msra.mxu0 %v18066_v26  ;;  %v6958_v60 = vld [vmem:[%s26501_s3 + $0x1e08] sm:$0xff]  ;;  %v18027_v20 = vcombine.high %v6830_v1, %v6834_v59  ;;  %v6183_v26 = vld [vmem:[%s26501_s3 + $0x5d0] sm:$0xff] }
 0x502   : > { %12819 = vmatpush2.bf16.msra.mxu1 %v18194_v35  ;;  %12779 = vmatprep.subr.bf16.mxu0 %v18059_v38  ;;  %v6962_v39 = vld [vmem:[%s26501_s3 + $0x1e28] sm:$0xff]  ;;  %v6187_v35 = vld [vmem:[%s26501_s3 + $0x5f0] sm:$0xff]  ;;  %v18026_v38 = vcombine.low %v6830_v1, %v6834_v59 }
 0x503   : > { %12820 = vmatprep.subr.bf16.mxu1 %v18187_v56  ;;  %v18155_v28 = vcombine.high %v6958_v60, %v6962_v39  ;;  %v18154_v56 = vcombine.low %v6958_v60, %v6962_v39  ;;  %v17381_v16 = vcombine.high %v6183_v26, %v6187_v35  ;;  %v17380_v57 = vcombine.low %v6183_v26, %v6187_v35 }
 0x504   : > { %v17365_v39 = vcombine.high %v6167_v37, %v6171_v30 }
 0x505   : > { %12780 = vmatpush2.bf16.msra.mxu0 %v18058_v48  ;;  %v19224_v48 = vld [vmem:[%s26502_s4] sm:$0xff] }
 0x506   : > { %12821 = vmatpush2.bf16.msra.mxu1 %v18186_v41  ;;  %12781 = vmatprep.subr.bf16.mxu0 %v18051_v9  ;;  %v7034_v41 = vrot.slane %v19224_v48, %v20609_v8  ;;  %v17252_v9 = vcombine.low %v6055_v11, %v6059_v33  ;;  %v7038_v34 = vrot.slane %v19224_v48, %v20624_v14  ;;  %v6163_v11 = vld [vmem:[%s26501_s3 + $0x530] sm:$0xff] }
 0x507   : > { %12822 = vmatprep.subr.bf16.mxu1 %v18179_v19  ;;  %v6175_v19 = vld [vmem:[%s26501_s3 + $0x590] sm:$0xff] }
 0x508   : > { %v6027_v48 = vld [vmem:[%s26501_s3 + $0xf0] sm:$0xff] }
 0x509   : > { %12782 = vmatpush2.bf16.msra.mxu0 %v18050_v58  ;;  %v6039_v58 = vld [vmem:[%s26501_s3 + $0x150] sm:$0xff] }
 0x50a   : > { %12823 = vmatpush2.bf16.msra.mxu1 %v18178_v23  ;;  %12783 = vmatprep.subr.bf16.mxu0 %v18043_v45  ;;  %v6043_v23 = vld [vmem:[%s26501_s3 + $0x170] sm:$0xff] }
 0x50b   : > { %12824 = vmatprep.subr.bf16.mxu1 %v18171_v4  ;;  %v17373_v4 = vcombine.high %v6175_v19, %v6179_v49  ;;  %v17236_v35 = vcombine.low %v6039_v58, %v6043_v23 }
 0x50d   : > { %12784 = vmatpush2.bf16.msra.mxu0 %v18042_v61  ;;  %v17244_v61 = vcombine.low %v6047_v44, %v6051_v32  ;;  %v6023_v32 = vld [vmem:[%s26501_s3 + $0xd0] sm:$0xff] }
 0x50e   : > { %12825 = vmatpush2.bf16.msra.mxu1 %v18170_v40  ;;  %12785 = vmatprep.subr.bf16.mxu0 %v18035_v62  ;;  %v17372_v62 = vcombine.low %v6175_v19, %v6179_v49 }
 0x50f   : > { %12826 = vmatprep.subr.bf16.mxu1 %v18163_v55  ;;  %v17237_v55 = vcombine.high %v6039_v58, %v6043_v23  ;;  %v6019_v58 = vld [vmem:[%s26501_s3 + $0xb0] sm:$0xff] }
 0x510   : > { %v6143_v23 = vld [vmem:[%s26501_s3 + $0x490] sm:$0xff] }
 0x511   : > { %12786 = vmatpush2.bf16.msra.mxu0 %v18034_v24  ;;  %v6031_v24 = vld [vmem:[%s26501_s3 + $0x110] sm:$0xff] }
 0x512   : > { %12827 = vmatpush2.bf16.msra.mxu1 %v18162_v21  ;;  %12787 = vmatprep.subr.bf16.mxu0 %v18027_v20  ;;  %v6035_v21 = vld [vmem:[%s26501_s3 + $0x130] sm:$0xff] }
 0x513   : > { %12828 = vmatprep.subr.bf16.mxu1 %v18155_v28  ;;  %v6159_v28 = vld [vmem:[%s26501_s3 + $0x510] sm:$0xff]  ;;  %v17228_v19 = vcombine.low %v6031_v24, %v6035_v21 }
 0x514   : > { %v17357_v44 = vcombine.high %v6159_v28, %v6163_v11  ;;  %v17356_v49 = vcombine.low %v6159_v28, %v6163_v11  ;;  %v6131_v28 = vld [vmem:[%s26501_s3 + $0x430] sm:$0xff] }
 0x515   : > { %12788 = vmatpush2.bf16.msra.mxu0 %v18026_v38 }
 0x516   : > { %12829 = vmatpush2.bf16.msra.mxu1 %v18154_v56  ;;  %12839 = vmatprep.subr.bf16.mxu0 %v17253_v52  ;;  %v17364_v56 = vcombine.low %v6167_v37, %v6171_v30  ;;  %v17229_v52 = vcombine.high %v6031_v24, %v6035_v21  ;;  %v5999_v24 = vld [vmem:[%s26501_s3 + $0x10] sm:$0xff] }
 0x517   : > { %12880 = vmatprep.subr.bf16.mxu1 %v17381_v16  ;;  %v6003_v21 = vld [vmem:[%s26501_s3 + $0x30] sm:$0xff] }
 0x518   : > { %v12545_v45 = vpop.f32.mrf.mxu0  ;;  %12790 = vmatmul.mubr.bf16.vlgmr.msra.gmra.mxu0 %v22769_v47 }
 0x519   : > { %v12546_v3 = vadd.f32 %v12545_v45, %v7034_v41  ;;  %v12586_v7 = vpop.f32.mrf.mxu1  ;;  %12831 = vmatmul.mubr.bf16.vlgmr.msra.gmra.mxu1 %v22771_v2  ;;  %12840 = vmatpush1.bf16.msra.mxu0 %v17252_v9  ;;  %v6151_v41 = vld [vmem:[%s26501_s3 + $0x4d0] sm:$0xff] }
 0x51a   : > { %12871 = vmatprep.mubr.bf16.mxu0 %v21905_v5  ;;  %12881 = vmatpush1.bf16.msra.mxu1 %v17380_v57  ;;  %v12547_v40 = vpop.f32.mrf.mxu0  ;;  %v6155_v9 = vld [vmem:[%s26501_s3 + $0x4f0] sm:$0xff]  ;;  %v17221_v57 = vcombine.high %v6023_v32, %v6027_v48 }
 0x51b   : > { %v23600_v1 = vadd.f32 %v12586_v7, %v12546_v3  ;;  %12912 = vmatprep.mubr.bf16.mxu1 %v21907_v6  ;;  %v12548_v59 = vadd.f32 %v12547_v40, %v7038_v34  ;;  %v12588_v60 = vpop.f32.mrf.mxu1  ;;  %12841 = vmatprep.subr.bf16.mxu0 %v17245_v42  ;;  %v17349_v34 = vcombine.high %v6151_v41, %v6155_v9  ;;  %v6015_v42 = vld [vmem:[%s26501_s3 + $0x90] sm:$0xff] }
 0x51c   : > { %v12549_v20 = vpop.f32.mrf.mxu0  ;;  %12882 = vmatprep.subr.bf16.mxu1 %v17373_v4  ;;  %v6147_v45 = vld [vmem:[%s26501_s3 + $0x4b0] sm:$0xff]  ;;  %v17220_v4 = vcombine.low %v6023_v32, %v6027_v48  ;;  %v17348_v37 = vcombine.low %v6151_v41, %v6155_v9  ;;  %v17213_v30 = vcombine.high %v6015_v42, %v6019_v58  ;;  %v17196_v32 = vcombine.low %v5999_v24, %v6003_v21 }
 0x51d   : > { %v23615_v33 = vadd.f32 %v12588_v60, %v12548_v59  ;;  %v12590_v26 = vpop.f32.mrf.mxu1  ;;  %12842 = vmatpush1.bf16.msra.mxu0 %v17244_v61  ;;  %v17341_v3 = vcombine.high %v6143_v23, %v6147_v45  ;;  %v6007_v7 = vld [vmem:[%s26501_s3 + $0x50] sm:$0xff]  ;;  %v17340_v59 = vcombine.low %v6143_v23, %v6147_v45 }
 0x51e   : > { %12883 = vmatpush1.bf16.msra.mxu1 %v17372_v62  ;;  %v12550_v38 = vpop.f32.mrf.mxu0  ;;  %12843 = vmatprep.subr.bf16.mxu0 %v17237_v55  ;;  %v6011_v61 = vld [vmem:[%s26501_s3 + $0x70] sm:$0xff]  ;;  %v17212_v55 = vcombine.low %v6015_v42, %v6019_v58 }
 0x51f   : > { %v12591_v16 = vpop.f32.mrf.mxu1  ;;  %12884 = vmatprep.subr.bf16.mxu1 %v17365_v39  ;;  %v6135_v40 = vld [vmem:[%s26501_s3 + $0x450] sm:$0xff]  ;;  %v17205_v60 = vcombine.high %v6007_v7, %v6011_v61  ;;  %v17204_v11 = vcombine.low %v6007_v7, %v6011_v61 }
 0x520   : > { %v6139_v62 = vld [vmem:[%s26501_s3 + $0x470] sm:$0xff] }
 0x521   : > { %12844 = vmatpush1.bf16.msra.mxu0 %v17236_v35  ;;  %v17333_v39 = vcombine.high %v6135_v40, %v6139_v62  ;;  %v6127_v20 = vld [vmem:[%s26501_s3 + $0x410] sm:$0xff]  ;;  %v17332_v26 = vcombine.low %v6135_v40, %v6139_v62  ;;  %v17197_v35 = vcombine.high %v5999_v24, %v6003_v21 }
 0x522   : > { %12885 = vmatpush1.bf16.msra.mxu1 %v17364_v56  ;;  %12845 = vmatprep.subr.bf16.mxu0 %v17229_v52  ;;  %v17325_v38 = vcombine.high %v6127_v20, %v6131_v28  ;;  %v6119_v56 = vld [vmem:[%s26501_s3 + $0x3d0] sm:$0xff]  ;;  %v17324_v48 = vcombine.low %v6127_v20, %v6131_v28 }
 0x523   : > { %12886 = vmatprep.subr.bf16.mxu1 %v17357_v44  ;;  %v6123_v52 = vld [vmem:[%s26501_s3 + $0x3f0] sm:$0xff] }
 0x524   : > { %v6247_v16 = vld [vmem:[%s26501_s3 + $0x7d0] sm:$0xff]  ;;  %v17317_v41 = vcombine.high %v6119_v56, %v6123_v52  ;;  %v17316_v42 = vcombine.low %v6119_v56, %v6123_v52 }
 0x525   : > { %12846 = vmatpush1.bf16.msra.mxu0 %v17228_v19  ;;  %v6251_v44 = vld [vmem:[%s26501_s3 + $0x7f0] sm:$0xff] }
 0x526   : > { %12887 = vmatpush1.bf16.msra.mxu1 %v17356_v49  ;;  %12847 = vmatprep.subr.bf16.mxu0 %v17221_v57  ;;  %v17445_v9 = vcombine.high %v6247_v16, %v6251_v44  ;;  %v6111_v19 = vld [vmem:[%s26501_s3 + $0x390] sm:$0xff]  ;;  %v17444_v58 = vcombine.low %v6247_v16, %v6251_v44 }
 0x527   : > { %12888 = vmatprep.subr.bf16.mxu1 %v17349_v34  ;;  %v6115_v49 = vld [vmem:[%s26501_s3 + $0x3b0] sm:$0xff] }
 0x528   : > { %v6239_v57 = vld [vmem:[%s26501_s3 + $0x790] sm:$0xff]  ;;  %v17309_v23 = vcombine.high %v6111_v19, %v6115_v49  ;;  %v17308_v7 = vcombine.low %v6111_v19, %v6115_v49 }
 0x529   : > { %12848 = vmatpush1.bf16.msra.mxu0 %v17220_v4  ;;  %v6243_v34 = vld [vmem:[%s26501_s3 + $0x7b0] sm:$0xff] }
 0x52a   : > { %12889 = vmatpush1.bf16.msra.mxu1 %v17348_v37  ;;  %12849 = vmatprep.subr.bf16.mxu0 %v17213_v30  ;;  %v17437_v45 = vcombine.high %v6239_v57, %v6243_v34  ;;  %v6103_v4 = vld [vmem:[%s26501_s3 + $0x350] sm:$0xff]  ;;  %v17436_v61 = vcombine.low %v6239_v57, %v6243_v34 }
 0x52b   : > { %12890 = vmatprep.subr.bf16.mxu1 %v17341_v3  ;;  %v6107_v37 = vld [vmem:[%s26501_s3 + $0x370] sm:$0xff] }
 0x52c   : > { %v6231_v30 = vld [vmem:[%s26501_s3 + $0x750] sm:$0xff]  ;;  %v17301_v40 = vcombine.high %v6103_v4, %v6107_v37  ;;  %v17300_v24 = vcombine.low %v6103_v4, %v6107_v37 }
 0x52d   : > { %12850 = vmatpush1.bf16.msra.mxu0 %v17212_v55  ;;  %v6235_v3 = vld [vmem:[%s26501_s3 + $0x770] sm:$0xff] }
 0x52e   : > { %12891 = vmatpush1.bf16.msra.mxu1 %v17340_v59  ;;  %12851 = vmatprep.subr.bf16.mxu0 %v17205_v60  ;;  %v17429_v62 = vcombine.high %v6231_v30, %v6235_v3  ;;  %v6095_v55 = vld [vmem:[%s26501_s3 + $0x310] sm:$0xff]  ;;  %v17428_v21 = vcombine.low %v6231_v30, %v6235_v3 }
 0x52f   : > { %12892 = vmatprep.subr.bf16.mxu1 %v17333_v39  ;;  %v6099_v59 = vld [vmem:[%s26501_s3 + $0x330] sm:$0xff] }
 0x530   : > { %v6223_v60 = vld [vmem:[%s26501_s3 + $0x710] sm:$0xff]  ;;  %v17293_v20 = vcombine.high %v6095_v55, %v6099_v59  ;;  %v17292_v56 = vcombine.low %v6095_v55, %v6099_v59 }
 0x531   : > { %12852 = vmatpush1.bf16.msra.mxu0 %v17204_v11  ;;  %v6227_v39 = vld [vmem:[%s26501_s3 + $0x730] sm:$0xff] }
 0x532   : > { %12893 = vmatpush1.bf16.msra.mxu1 %v17332_v26  ;;  %12853 = vmatprep.subr.bf16.mxu0 %v17197_v35  ;;  %v17421_v28 = vcombine.high %v6223_v60, %v6227_v39  ;;  %v6087_v11 = vld [vmem:[%s26501_s3 + $0x2d0] sm:$0xff]  ;;  %v17420_v52 = vcombine.low %v6223_v60, %v6227_v39 }
 0x533   : > { %12894 = vmatprep.subr.bf16.mxu1 %v17325_v38  ;;  %v6091_v26 = vld [vmem:[%s26501_s3 + $0x2f0] sm:$0xff] }
 0x534   : > { %v6215_v35 = vld [vmem:[%s26501_s3 + $0x6d0] sm:$0xff]  ;;  %v17285_v16 = vcombine.high %v6087_v11, %v6091_v26  ;;  %v17284_v19 = vcombine.low %v6087_v11, %v6091_v26 }
 0x535   : > { %12854 = vmatpush1.bf16.msra.mxu0 %v17196_v32  ;;  %v6219_v38 = vld [vmem:[%s26501_s3 + $0x6f0] sm:$0xff] }
 0x536   : > { %12895 = vmatpush1.bf16.msra.mxu1 %v17324_v48  ;;  %12855 = vmatprep.subr.bf16.mxu0 %v17317_v41  ;;  %v17413_v44 = vcombine.high %v6215_v35, %v6219_v38  ;;  %v6079_v32 = vld [vmem:[%s26501_s3 + $0x290] sm:$0xff]  ;;  %v17412_v49 = vcombine.low %v6215_v35, %v6219_v38 }
 0x537   : > { %12896 = vmatprep.subr.bf16.mxu1 %v17445_v9  ;;  %v6083_v48 = vld [vmem:[%s26501_s3 + $0x2b0] sm:$0xff] }
 0x538   : > { %v6207_v41 = vld [vmem:[%s26501_s3 + $0x690] sm:$0xff]  ;;  %v17277_v57 = vcombine.high %v6079_v32, %v6083_v48  ;;  %v17276_v4 = vcombine.low %v6079_v32, %v6083_v48 }
 0x539   : > { %12856 = vmatpush2.bf16.msra.mxu0 %v17316_v42  ;;  %v6211_v9 = vld [vmem:[%s26501_s3 + $0x6b0] sm:$0xff] }
 0x53a   : > { %12897 = vmatpush2.bf16.msra.mxu1 %v17444_v58  ;;  %12857 = vmatprep.subr.bf16.mxu0 %v17309_v23  ;;  %v17405_v34 = vcombine.high %v6207_v41, %v6211_v9  ;;  %v6071_v42 = vld [vmem:[%s26501_s3 + $0x250] sm:$0xff]  ;;  %v17404_v37 = vcombine.low %v6207_v41, %v6211_v9 }
 0x53b   : > { %12898 = vmatprep.subr.bf16.mxu1 %v17437_v45  ;;  %v6075_v58 = vld [vmem:[%s26501_s3 + $0x270] sm:$0xff] }
 0x53c   : > { %v6199_v23 = vld [vmem:[%s26501_s3 + $0x650] sm:$0xff]  ;;  %v17269_v30 = vcombine.high %v6071_v42, %v6075_v58  ;;  %v17268_v55 = vcombine.low %v6071_v42, %v6075_v58 }
 0x53d   : > { %12858 = vmatpush2.bf16.msra.mxu0 %v17308_v7  ;;  %v6203_v45 = vld [vmem:[%s26501_s3 + $0x670] sm:$0xff] }
 0x53e   : > { %12899 = vmatpush2.bf16.msra.mxu1 %v17436_v61  ;;  %12859 = vmatprep.subr.bf16.mxu0 %v17301_v40  ;;  %v17397_v3 = vcombine.high %v6199_v23, %v6203_v45  ;;  %v6063_v7 = vld [vmem:[%s26501_s3 + $0x210] sm:$0xff]  ;;  %v17396_v59 = vcombine.low %v6199_v23, %v6203_v45 }
 0x53f   : > { %12900 = vmatprep.subr.bf16.mxu1 %v17429_v62  ;;  %v6067_v61 = vld [vmem:[%s26501_s3 + $0x230] sm:$0xff] }
 0x540   : > { %v6191_v40 = vld [vmem:[%s26501_s3 + $0x610] sm:$0xff]  ;;  %v17261_v60 = vcombine.high %v6063_v7, %v6067_v61  ;;  %v17260_v11 = vcombine.low %v6063_v7, %v6067_v61 }
 0x541   : > { %12860 = vmatpush2.bf16.msra.mxu0 %v17300_v24  ;;  %v6195_v62 = vld [vmem:[%s26501_s3 + $0x630] sm:$0xff] }
 0x542   : > { %12901 = vmatpush2.bf16.msra.mxu1 %v17428_v21  ;;  %12861 = vmatprep.subr.bf16.mxu0 %v17293_v20  ;;  %v17389_v39 = vcombine.high %v6191_v40, %v6195_v62  ;;  %v6311_v24 = vld [vmem:[%s26501_s3 + $0x9d0] sm:$0xff]  ;;  %v17388_v26 = vcombine.low %v6191_v40, %v6195_v62 }
 0x543   : > { %12902 = vmatprep.subr.bf16.mxu1 %v17421_v28  ;;  %v6315_v21 = vld [vmem:[%s26501_s3 + $0x9f0] sm:$0xff] }
 0x544   : > { %v6439_v20 = vld [vmem:[%s26501_s3 + $0xdd0] sm:$0xff]  ;;  %v17509_v35 = vcombine.high %v6311_v24, %v6315_v21 }
 0x545   : > { %12862 = vmatpush2.bf16.msra.mxu0 %v17292_v56  ;;  %v6443_v28 = vld [vmem:[%s26501_s3 + $0xdf0] sm:$0xff] }
 0x546   : > { %12903 = vmatpush2.bf16.msra.mxu1 %v17420_v52  ;;  %12863 = vmatprep.subr.bf16.mxu0 %v17285_v16  ;;  %v17637_v38 = vcombine.high %v6439_v20, %v6443_v28  ;;  %v6303_v56 = vld [vmem:[%s26501_s3 + $0x990] sm:$0xff]  ;;  %v17508_v16 = vcombine.low %v6311_v24, %v6315_v21  ;;  %v17636_v48 = vcombine.low %v6439_v20, %v6443_v28 }
 0x547   : > { %12904 = vmatprep.subr.bf16.mxu1 %v17413_v44  ;;  %v6307_v52 = vld [vmem:[%s26501_s3 + $0x9b0] sm:$0xff] }
 0x548   : > { %v6431_v44 = vld [vmem:[%s26501_s3 + $0xd90] sm:$0xff]  ;;  %v17501_v41 = vcombine.high %v6303_v56, %v6307_v52  ;;  %v17500_v45 = vcombine.low %v6303_v56, %v6307_v52 }
 0x549   : > { %12864 = vmatpush2.bf16.msra.mxu0 %v17284_v19  ;;  %v6435_v32 = vld [vmem:[%s26501_s3 + $0xdb0] sm:$0xff] }
 0x54a   : > { %12905 = vmatpush2.bf16.msra.mxu1 %v17412_v49  ;;  %12865 = vmatprep.subr.bf16.mxu0 %v17277_v57  ;;  %v6295_v9 = vld [vmem:[%s26501_s3 + $0x950] sm:$0xff]  ;;  %v17629_v57 = vcombine.high %v6431_v44, %v6435_v32 }
 0x54b   : > { %12906 = vmatprep.subr.bf16.mxu1 %v17405_v34  ;;  %v6299_v19 = vld [vmem:[%s26501_s3 + $0x970] sm:$0xff] }
 0x54c   : > { %v6423_v34 = vld [vmem:[%s26501_s3 + $0xd50] sm:$0xff]  ;;  %v17492_v24 = vcombine.low %v6295_v9, %v6299_v19 }
 0x54d   : > { %12866 = vmatpush2.bf16.msra.mxu0 %v17276_v4  ;;  %v6427_v42 = vld [vmem:[%s26501_s3 + $0xd70] sm:$0xff] }
 0x54e   : > { %12907 = vmatpush2.bf16.msra.mxu1 %v17404_v37  ;;  %12867 = vmatprep.subr.bf16.mxu0 %v17269_v30  ;;  %v17628_v37 = vcombine.low %v6431_v44, %v6435_v32  ;;  %v17493_v30 = vcombine.high %v6295_v9, %v6299_v19  ;;  %v6287_v40 = vld [vmem:[%s26501_s3 + $0x910] sm:$0xff]  ;;  %v17620_v20 = vcombine.low %v6423_v34, %v6427_v42 }
 0x54f   : > { %12908 = vmatprep.subr.bf16.mxu1 %v17397_v3  ;;  %v6291_v62 = vld [vmem:[%s26501_s3 + $0x930] sm:$0xff] }
 0x550   : > { %v17485_v28 = vcombine.high %v6287_v40, %v6291_v62  ;;  %v6407_v56 = vld [vmem:[%s26501_s3 + $0xcd0] sm:$0xff] }
 0x551   : > { %12868 = vmatpush2.bf16.msra.mxu0 %v17268_v55  ;;  %v6411_v52 = vld [vmem:[%s26501_s3 + $0xcf0] sm:$0xff] }
 0x552   : > { %12909 = vmatpush2.bf16.msra.mxu1 %v17396_v59  ;;  %12869 = vmatprep.subr.bf16.mxu0 %v17261_v60  ;;  %v6415_v59 = vld [vmem:[%s26501_s3 + $0xd10] sm:$0xff] }
 0x553   : > { %12910 = vmatprep.subr.bf16.mxu1 %v17389_v39  ;;  %v6275_v9 = vld [vmem:[%s26501_s3 + $0x8b0] sm:$0xff] }
 0x554   : > { %v6399_v19 = vld [vmem:[%s26501_s3 + $0xc90] sm:$0xff] }
 0x555   : > { %12870 = vmatpush2.bf16.msra.mxu0 %v17260_v11 }
 0x556   : > { %12911 = vmatpush2.bf16.msra.mxu1 %v17388_v26  ;;  %12921 = vmatprep.subr.bf16.mxu0 %v17509_v35  ;;  %v6279_v35 = vld [vmem:[%s26501_s3 + $0x8d0] sm:$0xff] }
 0x557   : > { %12962 = vmatprep.subr.bf16.mxu1 %v17637_v38  ;;  %v6283_v38 = vld [vmem:[%s26501_s3 + $0x8f0] sm:$0xff] }
 0x558   : > { %v12627_v49 = vpop.f32.mrf.mxu0  ;;  %12872 = vmatmul.mubr.bf16.vlgmr.msra.gmra.mxu0 %v22115_v51  ;;  %v17477_v32 = vcombine.high %v6279_v35, %v6283_v38 }
 0x559   : > { %v12628_v58 = vadd.f32 %v12627_v49, %v23600_v1  ;;  %v12668_v23 = vpop.f32.mrf.mxu1  ;;  %12913 = vmatmul.mubr.bf16.vlgmr.msra.gmra.mxu1 %v22117_v17  ;;  %12922 = vmatpush1.bf16.msra.mxu0 %v17508_v16  ;;  %v17621_v1 = vcombine.high %v6423_v34, %v6427_v42  ;;  %v17484_v16 = vcombine.low %v6287_v40, %v6291_v62  ;;  %v6403_v49 = vld [vmem:[%s26501_s3 + $0xcb0] sm:$0xff] }
 0x55a   : > { %12953 = vmatprep.mubr.bf16.mxu0 %v22127_v25  ;;  %12963 = vmatpush1.bf16.msra.mxu1 %v17636_v48  ;;  %v12629_v4 = vpop.f32.mrf.mxu0  ;;  %v17605_v48 = vcombine.high %v6407_v56, %v6411_v52  ;;  %v17604_v34 = vcombine.low %v6407_v56, %v6411_v52  ;;  %v6255_v40 = vld [vmem:[%s26501_s3 + $0x810] sm:$0xff] }
 0x55b   : > { %v23801_v3 = vadd.f32 %v12668_v23, %v12628_v58  ;;  %12994 = vmatprep.mubr.bf16.mxu1 %v22136_v31  ;;  %v12630_v7 = vadd.f32 %v12629_v4, %v23615_v33  ;;  %v12670_v61 = vpop.f32.mrf.mxu1  ;;  %12923 = vmatprep.subr.bf16.mxu0 %v17501_v41  ;;  %v6419_v33 = vld [vmem:[%s26501_s3 + $0xd30] sm:$0xff]  ;;  %v17597_v58 = vcombine.high %v6399_v19, %v6403_v49 }
 0x55c   : > { %v12631_v55 = vpop.f32.mrf.mxu0  ;;  %12964 = vmatprep.subr.bf16.mxu1 %v17629_v57  ;;  %v17613_v26 = vcombine.high %v6415_v59, %v6419_v33  ;;  %v17612_v44 = vcombine.low %v6415_v59, %v6419_v33  ;;  %v6271_v41 = vld [vmem:[%s26501_s3 + $0x890] sm:$0xff]  ;;  %v17476_v57 = vcombine.low %v6279_v35, %v6283_v38 }
 0x55d   : > { %v23817_v60 = vadd.f32 %v12670_v61, %v12630_v7  ;;  %v12672_v39 = vpop.f32.mrf.mxu1  ;;  %12924 = vmatpush1.bf16.msra.mxu0 %v17500_v45  ;;  %v17469_v42 = vcombine.high %v6271_v41, %v6275_v9  ;;  %v6263_v23 = vld [vmem:[%s26501_s3 + $0x850] sm:$0xff]  ;;  %v17596_v7 = vcombine.low %v6399_v19, %v6403_v49 }
 0x55e   : > { %12965 = vmatpush1.bf16.msra.mxu1 %v17628_v37  ;;  %v12632_v21 = vpop.f32.mrf.mxu0  ;;  %12925 = vmatprep.subr.bf16.mxu0 %v17493_v30  ;;  %v6267_v45 = vld [vmem:[%s26501_s3 + $0x870] sm:$0xff]  ;;  %v17468_v30 = vcombine.low %v6271_v41, %v6275_v9 }
 0x55f   : > { %v12673_v11 = vpop.f32.mrf.mxu1  ;;  %12966 = vmatprep.subr.bf16.mxu1 %v17621_v1  ;;  %v6391_v4 = vld [vmem:[%s26501_s3 + $0xc50] sm:$0xff]  ;;  %v17461_v61 = vcombine.high %v6263_v23, %v6267_v45  ;;  %v17460_v33 = vcombine.low %v6263_v23, %v6267_v45 }
 0x560   : > { %v6395_v37 = vld [vmem:[%s26501_s3 + $0xc70] sm:$0xff] }
 0x561   : > { %12926 = vmatpush1.bf16.msra.mxu0 %v17492_v24  ;;  %v17589_v1 = vcombine.high %v6391_v4, %v6395_v37  ;;  %v6259_v62 = vld [vmem:[%s26501_s3 + $0x830] sm:$0xff]  ;;  %v17588_v39 = vcombine.low %v6391_v4, %v6395_v37 }
 0x562   : > { %12967 = vmatpush1.bf16.msra.mxu1 %v17620_v20  ;;  %12927 = vmatprep.subr.bf16.mxu0 %v17485_v28  ;;  %v6383_v55 = vld [vmem:[%s26501_s3 + $0xc10] sm:$0xff]  ;;  %v17453_v24 = vcombine.high %v6255_v40, %v6259_v62  ;;  %v17452_v35 = vcombine.low %v6255_v40, %v6259_v62 }
 0x563   : > { %12968 = vmatprep.subr.bf16.mxu1 %v17613_v26  ;;  %v6387_v59 = vld [vmem:[%s26501_s3 + $0xc30] sm:$0xff] }
 0x564   : > { %v17581_v21 = vcombine.high %v6383_v55, %v6387_v59  ;;  %v6375_v20 = vld [vmem:[%s26501_s3 + $0xbd0] sm:$0xff]  ;;  %v17580_v38 = vcombine.low %v6383_v55, %v6387_v59 }
 0x565   : > { %12928 = vmatpush1.bf16.msra.mxu0 %v17484_v16  ;;  %v6379_v28 = vld [vmem:[%s26501_s3 + $0xbf0] sm:$0xff] }
 0x566   : > { %12969 = vmatpush1.bf16.msra.mxu1 %v17612_v44  ;;  %12929 = vmatprep.subr.bf16.mxu0 %v17477_v32  ;;  %v6503_v11 = vld [vmem:[%s26501_s3 + $0xfd0] sm:$0xff]  ;;  %v17573_v56 = vcombine.high %v6375_v20, %v6379_v28  ;;  %v17572_v41 = vcombine.low %v6375_v20, %v6379_v28 }
 0x567   : > { %12970 = vmatprep.subr.bf16.mxu1 %v17605_v48  ;;  %v6507_v26 = vld [vmem:[%s26501_s3 + $0xff0] sm:$0xff] }
 0x568   : > { %v17701_v52 = vcombine.high %v6503_v11, %v6507_v26  ;;  %v6367_v16 = vld [vmem:[%s26501_s3 + $0xb90] sm:$0xff]  ;;  %v17700_v9 = vcombine.low %v6503_v11, %v6507_v26 }
 0x569   : > { %12930 = vmatpush1.bf16.msra.mxu0 %v17476_v57  ;;  %v6371_v44 = vld [vmem:[%s26501_s3 + $0xbb0] sm:$0xff] }
 0x56a   : > { %12971 = vmatpush1.bf16.msra.mxu1 %v17604_v34  ;;  %12931 = vmatprep.subr.bf16.mxu0 %v17469_v42  ;;  %v6495_v32 = vld [vmem:[%s26501_s3 + $0xf90] sm:$0xff]  ;;  %v17565_v19 = vcombine.high %v6367_v16, %v6371_v44  ;;  %v17564_v23 = vcombine.low %v6367_v16, %v6371_v44 }
 0x56b   : > { %12972 = vmatprep.subr.bf16.mxu1 %v17597_v58  ;;  %v6499_v48 = vld [vmem:[%s26501_s3 + $0xfb0] sm:$0xff] }
 0x56c   : > { %v17693_v49 = vcombine.high %v6495_v32, %v6499_v48  ;;  %v6359_v57 = vld [vmem:[%s26501_s3 + $0xb50] sm:$0xff]  ;;  %v17692_v45 = vcombine.low %v6495_v32, %v6499_v48 }
 0x56d   : > { %12932 = vmatpush1.bf16.msra.mxu0 %v17468_v30  ;;  %v6363_v34 = vld [vmem:[%s26501_s3 + $0xb70] sm:$0xff] }
 0x56e   : > { %12973 = vmatpush1.bf16.msra.mxu1 %v17596_v7  ;;  %12933 = vmatprep.subr.bf16.mxu0 %v17461_v61  ;;  %v6487_v42 = vld [vmem:[%s26501_s3 + $0xf50] sm:$0xff]  ;;  %v17557_v4 = vcombine.high %v6359_v57, %v6363_v34  ;;  %v17556_v40 = vcombine.low %v6359_v57, %v6363_v34 }
 0x56f   : > { %12974 = vmatprep.subr.bf16.mxu1 %v17589_v1  ;;  %v6491_v58 = vld [vmem:[%s26501_s3 + $0xf70] sm:$0xff] }
 0x570   : > { %v17685_v37 = vcombine.high %v6487_v42, %v6491_v58  ;;  %v6351_v30 = vld [vmem:[%s26501_s3 + $0xb10] sm:$0xff]  ;;  %v17684_v62 = vcombine.low %v6487_v42, %v6491_v58 }
 0x571   : > { %12934 = vmatpush1.bf16.msra.mxu0 %v17460_v33  ;;  %v6355_v7 = vld [vmem:[%s26501_s3 + $0xb30] sm:$0xff] }
 0x572   : > { %12975 = vmatpush1.bf16.msra.mxu1 %v17588_v39  ;;  %12935 = vmatprep.subr.bf16.mxu0 %v17453_v24  ;;  %v6479_v61 = vld [vmem:[%s26501_s3 + $0xf10] sm:$0xff]  ;;  %v17549_v55 = vcombine.high %v6351_v30, %v6355_v7  ;;  %v17548_v20 = vcombine.low %v6351_v30, %v6355_v7 }
 0x573   : > { %12976 = vmatprep.subr.bf16.mxu1 %v17581_v21  ;;  %v6483_v1 = vld [vmem:[%s26501_s3 + $0xf30] sm:$0xff] }
 0x574   : > { %v17677_v59 = vcombine.high %v6479_v61, %v6483_v1  ;;  %v6343_v33 = vld [vmem:[%s26501_s3 + $0xad0] sm:$0xff]  ;;  %v17676_v28 = vcombine.low %v6479_v61, %v6483_v1 }
 0x575   : > { %12936 = vmatpush1.bf16.msra.mxu0 %v17452_v35  ;;  %v6347_v39 = vld [vmem:[%s26501_s3 + $0xaf0] sm:$0xff] }
 0x576   : > { %12977 = vmatpush1.bf16.msra.mxu1 %v17580_v38  ;;  %12937 = vmatprep.subr.bf16.mxu0 %v17573_v56  ;;  %v6471_v24 = vld [vmem:[%s26501_s3 + $0xed0] sm:$0xff]  ;;  %v17541_v11 = vcombine.high %v6343_v33, %v6347_v39  ;;  %v17540_v16 = vcombine.low %v6343_v33, %v6347_v39 }
 0x577   : > { %12978 = vmatprep.subr.bf16.mxu1 %v17701_v52  ;;  %v6475_v21 = vld [vmem:[%s26501_s3 + $0xef0] sm:$0xff] }
 0x578   : > { %v17669_v26 = vcombine.high %v6471_v24, %v6475_v21  ;;  %v6335_v35 = vld [vmem:[%s26501_s3 + $0xa90] sm:$0xff]  ;;  %v17668_v44 = vcombine.low %v6471_v24, %v6475_v21 }
 0x579   : > { %12938 = vmatpush2.bf16.msra.mxu0 %v17572_v41  ;;  %v6339_v38 = vld [vmem:[%s26501_s3 + $0xab0] sm:$0xff] }
 0x57a   : > { %12979 = vmatpush2.bf16.msra.mxu1 %v17700_v9  ;;  %12939 = vmatprep.subr.bf16.mxu0 %v17565_v19  ;;  %v6463_v56 = vld [vmem:[%s26501_s3 + $0xe90] sm:$0xff]  ;;  %v17533_v32 = vcombine.high %v6335_v35, %v6339_v38  ;;  %v17532_v57 = vcombine.low %v6335_v35, %v6339_v38 }
 0x57b   : > { %12980 = vmatprep.subr.bf16.mxu1 %v17693_v49  ;;  %v6467_v52 = vld [vmem:[%s26501_s3 + $0xeb0] sm:$0xff] }
 0x57c   : > { %v17661_v48 = vcombine.high %v6463_v56, %v6467_v52  ;;  %v6327_v41 = vld [vmem:[%s26501_s3 + $0xa50] sm:$0xff]  ;;  %v17660_v34 = vcombine.low %v6463_v56, %v6467_v52 }
 0x57d   : > { %12940 = vmatpush2.bf16.msra.mxu0 %v17564_v23  ;;  %v6331_v9 = vld [vmem:[%s26501_s3 + $0xa70] sm:$0xff] }
 0x57e   : > { %12981 = vmatpush2.bf16.msra.mxu1 %v17692_v45  ;;  %12941 = vmatprep.subr.bf16.mxu0 %v17557_v4  ;;  %v6455_v19 = vld [vmem:[%s26501_s3 + $0xe50] sm:$0xff]  ;;  %v17525_v42 = vcombine.high %v6327_v41, %v6331_v9  ;;  %v17524_v30 = vcombine.low %v6327_v41, %v6331_v9 }
 0x57f   : > { %12982 = vmatprep.subr.bf16.mxu1 %v17685_v37  ;;  %v6459_v49 = vld [vmem:[%s26501_s3 + $0xe70] sm:$0xff] }
 0x580   : > { %v17653_v58 = vcombine.high %v6455_v19, %v6459_v49  ;;  %v6319_v23 = vld [vmem:[%s26501_s3 + $0xa10] sm:$0xff]  ;;  %v17652_v7 = vcombine.low %v6455_v19, %v6459_v49 }
 0x581   : > { %12942 = vmatpush2.bf16.msra.mxu0 %v17556_v40  ;;  %v6323_v45 = vld [vmem:[%s26501_s3 + $0xa30] sm:$0xff] }
 0x582   : > { %12983 = vmatpush2.bf16.msra.mxu1 %v17684_v62  ;;  %12943 = vmatprep.subr.bf16.mxu0 %v17549_v55  ;;  %v6447_v4 = vld [vmem:[%s26501_s3 + $0xe10] sm:$0xff]  ;;  %v17517_v61 = vcombine.high %v6319_v23, %v6323_v45  ;;  %v17516_v33 = vcombine.low %v6319_v23, %v6323_v45 }
 0x583   : > { %12984 = vmatprep.subr.bf16.mxu1 %v17677_v59  ;;  %v6451_v37 = vld [vmem:[%s26501_s3 + $0xe30] sm:$0xff] }
 0x584   : > { %v17645_v1 = vcombine.high %v6447_v4, %v6451_v37  ;;  %v6567_v40 = vld [vmem:[%s26501_s3 + $0x11d0] sm:$0xff]  ;;  %v17644_v39 = vcombine.low %v6447_v4, %v6451_v37 }
 0x585   : > { %12944 = vmatpush2.bf16.msra.mxu0 %v17548_v20  ;;  %v6571_v62 = vld [vmem:[%s26501_s3 + $0x11f0] sm:$0xff] }
 0x586   : > { %12985 = vmatpush2.bf16.msra.mxu1 %v17676_v28  ;;  %12945 = vmatprep.subr.bf16.mxu0 %v17541_v11  ;;  %v6695_v55 = vld [vmem:[%s26501_s3 + $0x15d0] sm:$0xff]  ;;  %v17765_v24 = vcombine.high %v6567_v40, %v6571_v62  ;;  %v17764_v11 = vcombine.low %v6567_v40, %v6571_v62 }
 0x587   : > { %12986 = vmatprep.subr.bf16.mxu1 %v17669_v26  ;;  %v6699_v59 = vld [vmem:[%s26501_s3 + $0x15f0] sm:$0xff] }
 0x588   : > { %v17893_v21 = vcombine.high %v6695_v55, %v6699_v59  ;;  %v6559_v20 = vld [vmem:[%s26501_s3 + $0x1190] sm:$0xff]  ;;  %v17892_v38 = vcombine.low %v6695_v55, %v6699_v59 }
 0x589   : > { %12946 = vmatpush2.bf16.msra.mxu0 %v17540_v16  ;;  %v6563_v28 = vld [vmem:[%s26501_s3 + $0x11b0] sm:$0xff] }
 0x58a   : > { %12987 = vmatpush2.bf16.msra.mxu1 %v17668_v44  ;;  %12947 = vmatprep.subr.bf16.mxu0 %v17533_v32  ;;  %v6687_v26 = vld [vmem:[%s26501_s3 + $0x1590] sm:$0xff]  ;;  %v17757_v56 = vcombine.high %v6559_v20, %v6563_v28  ;;  %v17756_v49 = vcombine.low %v6559_v20, %v6563_v28 }
 0x58b   : > { %12988 = vmatprep.subr.bf16.mxu1 %v17661_v48  ;;  %v6691_v35 = vld [vmem:[%s26501_s3 + $0x15b0] sm:$0xff] }
 0x58c   : > { %v6551_v52 = vld [vmem:[%s26501_s3 + $0x1150] sm:$0xff]  ;;  %v17885_v32 = vcombine.high %v6687_v26, %v6691_v35 }
 0x58d   : > { %12948 = vmatpush2.bf16.msra.mxu0 %v17532_v57  ;;  %v6555_v16 = vld [vmem:[%s26501_s3 + $0x1170] sm:$0xff] }
 0x58e   : > { %12989 = vmatpush2.bf16.msra.mxu1 %v17660_v34  ;;  %12949 = vmatprep.subr.bf16.mxu0 %v17525_v42  ;;  %v6679_v48 = vld [vmem:[%s26501_s3 + $0x1550] sm:$0xff]  ;;  %v17884_v34 = vcombine.low %v6687_v26, %v6691_v35  ;;  %v17749_v42 = vcombine.high %v6551_v52, %v6555_v16  ;;  %v17748_v40 = vcombine.low %v6551_v52, %v6555_v16 }
 0x58f   : > { %12990 = vmatprep.subr.bf16.mxu1 %v17653_v58  ;;  %v6683_v41 = vld [vmem:[%s26501_s3 + $0x1570] sm:$0xff] }
 0x590   : > { %v6543_v4 = vld [vmem:[%s26501_s3 + $0x1110] sm:$0xff]  ;;  %v17876_v55 = vcombine.low %v6679_v48, %v6683_v41 }
 0x591   : > { %12950 = vmatpush2.bf16.msra.mxu0 %v17524_v30  ;;  %v6547_v37 = vld [vmem:[%s26501_s3 + $0x1130] sm:$0xff] }
 0x592   : > { %12991 = vmatpush2.bf16.msra.mxu1 %v17652_v7  ;;  %12951 = vmatprep.subr.bf16.mxu0 %v17517_v61  ;;  %v6671_v7 = vld [vmem:[%s26501_s3 + $0x1510] sm:$0xff]  ;;  %v17741_v59 = vcombine.high %v6543_v4, %v6547_v37 }
 0x593   : > { %12992 = vmatprep.subr.bf16.mxu1 %v17645_v1  ;;  %v6663_v20 = vld [vmem:[%s26501_s3 + $0x14d0] sm:$0xff] }
 0x594   : > { %v6667_v28 = vld [vmem:[%s26501_s3 + $0x14f0] sm:$0xff] }
 0x595   : > { %12952 = vmatpush2.bf16.msra.mxu0 %v17516_v33  ;;  %v6531_v52 = vld [vmem:[%s26501_s3 + $0x10b0] sm:$0xff] }
 0x596   : > { %12993 = vmatpush2.bf16.msra.mxu1 %v17644_v39  ;;  %13003 = vmatprep.subr.bf16.mxu0 %v17765_v24  ;;  %v6535_v24 = vld [vmem:[%s26501_s3 + $0x10d0] sm:$0xff] }
 0x597   : > { %13044 = vmatprep.subr.bf16.mxu1 %v17893_v21  ;;  %v6539_v21 = vld [vmem:[%s26501_s3 + $0x10f0] sm:$0xff] }
 0x598   : > { %v12709_v44 = vpop.f32.mrf.mxu0  ;;  %12954 = vmatmul.mubr.bf16.vlgmr.msra.gmra.mxu0 %v22329_v46  ;;  %v17733_v35 = vcombine.high %v6535_v24, %v6539_v21  ;;  %v6655_v16 = vld [vmem:[%s26501_s3 + $0x1490] sm:$0xff] }
 0x599   : > { %v12710_v9 = vadd.f32 %v12709_v44, %v23801_v3  ;;  %v12750_v19 = vpop.f32.mrf.mxu1  ;;  %12995 = vmatmul.mubr.bf16.vlgmr.msra.gmra.mxu1 %v22331_v50  ;;  %13004 = vmatpush1.bf16.msra.mxu0 %v17764_v11  ;;  %v17877_v3 = vcombine.high %v6679_v48, %v6683_v41  ;;  %v17740_v11 = vcombine.low %v6543_v4, %v6547_v37  ;;  %v6659_v44 = vld [vmem:[%s26501_s3 + $0x14b0] sm:$0xff] }
 0x59a   : > { %13035 = vmatprep.mubr.bf16.mxu0 %v22339_v53  ;;  %13045 = vmatpush1.bf16.msra.mxu1 %v17892_v38  ;;  %v12711_v57 = vpop.f32.mrf.mxu0  ;;  %v17861_v38 = vcombine.high %v6663_v20, %v6667_v28  ;;  %v17860_v48 = vcombine.low %v6663_v20, %v6667_v28  ;;  %v6511_v4 = vld [vmem:[%s26501_s3 + $0x1010] sm:$0xff] }
 0x59b   : > { %v24003_v58 = vadd.f32 %v12750_v19, %v12710_v9  ;;  %13076 = vmatprep.mubr.bf16.mxu1 %v22348_v0  ;;  %v12712_v23 = vadd.f32 %v12711_v57, %v23817_v60  ;;  %v12752_v45 = vpop.f32.mrf.mxu1  ;;  %13005 = vmatprep.subr.bf16.mxu0 %v17757_v56  ;;  %v6675_v60 = vld [vmem:[%s26501_s3 + $0x1530] sm:$0xff]  ;;  %v17853_v9 = vcombine.high %v6655_v16, %v6659_v44 }
 0x59c   : > { %v12713_v30 = vpop.f32.mrf.mxu0  ;;  %13046 = vmatprep.subr.bf16.mxu1 %v17885_v32  ;;  %v17869_v39 = vcombine.high %v6671_v7, %v6675_v60  ;;  %v17868_v26 = vcombine.low %v6671_v7, %v6675_v60  ;;  %v6527_v56 = vld [vmem:[%s26501_s3 + $0x1090] sm:$0xff]  ;;  %v17732_v32 = vcombine.low %v6535_v24, %v6539_v21 }
 0x59d   : > { %v24019_v61 = vadd.f32 %v12752_v45, %v12712_v23  ;;  %v12754_v1 = vpop.f32.mrf.mxu1  ;;  %13006 = vmatpush1.bf16.msra.mxu0 %v17756_v49  ;;  %v17725_v41 = vcombine.high %v6527_v56, %v6531_v52  ;;  %v6519_v19 = vld [vmem:[%s26501_s3 + $0x1050] sm:$0xff]  ;;  %v17852_v23 = vcombine.low %v6655_v16, %v6659_v44 }
 0x59e   : > { %13047 = vmatpush1.bf16.msra.mxu1 %v17884_v34  ;;  %v12714_v62 = vpop.f32.mrf.mxu0  ;;  %13007 = vmatprep.subr.bf16.mxu0 %v17749_v42  ;;  %v6523_v49 = vld [vmem:[%s26501_s3 + $0x1070] sm:$0xff]  ;;  %v17724_v42 = vcombine.low %v6527_v56, %v6531_v52 }
 0x59f   : > { %v12755_v33 = vpop.f32.mrf.mxu1  ;;  %13048 = vmatprep.subr.bf16.mxu1 %v17877_v3  ;;  %v6647_v57 = vld [vmem:[%s26501_s3 + $0x1450] sm:$0xff]  ;;  %v17717_v45 = vcombine.high %v6519_v19, %v6523_v49  ;;  %v17716_v60 = vcombine.low %v6519_v19, %v6523_v49 }
 0x5a0   : > { %v6651_v34 = vld [vmem:[%s26501_s3 + $0x1470] sm:$0xff] }
 0x5a1   : > { %13008 = vmatpush1.bf16.msra.mxu0 %v17748_v40  ;;  %v17845_v3 = vcombine.high %v6647_v57, %v6651_v34  ;;  %v6515_v37 = vld [vmem:[%s26501_s3 + $0x1030] sm:$0xff]  ;;  %v17844_v1 = vcombine.low %v6647_v57, %v6651_v34 }
 0x5a2   : > { %13049 = vmatpush1.bf16.msra.mxu1 %v17876_v55  ;;  %13009 = vmatprep.subr.bf16.mxu0 %v17741_v59  ;;  %v6639_v30 = vld [vmem:[%s26501_s3 + $0x1410] sm:$0xff]  ;;  %v17709_v40 = vcombine.high %v6511_v4, %v6515_v37  ;;  %v17708_v24 = vcombine.low %v6511_v4, %v6515_v37 }
 0x5a3   : > { %13050 = vmatprep.subr.bf16.mxu1 %v17869_v39  ;;  %v6643_v7 = vld [vmem:[%s26501_s3 + $0x1430] sm:$0xff] }
 0x5a4   : > { %v17837_v62 = vcombine.high %v6639_v30, %v6643_v7  ;;  %v6631_v55 = vld [vmem:[%s26501_s3 + $0x13d0] sm:$0xff]  ;;  %v17836_v21 = vcombine.low %v6639_v30, %v6643_v7 }
 0x5a5   : > { %13010 = vmatpush1.bf16.msra.mxu0 %v17740_v11  ;;  %v6635_v59 = vld [vmem:[%s26501_s3 + $0x13f0] sm:$0xff] }
 0x5a6   : > { %13051 = vmatpush1.bf16.msra.mxu1 %v17868_v26  ;;  %13011 = vmatprep.subr.bf16.mxu0 %v17733_v35  ;;  %v6759_v33 = vld [vmem:[%s26501_s3 + $0x17d0] sm:$0xff]  ;;  %v17829_v20 = vcombine.high %v6631_v55, %v6635_v59  ;;  %v17828_v56 = vcombine.low %v6631_v55, %v6635_v59 }
 0x5a7   : > { %13052 = vmatprep.subr.bf16.mxu1 %v17861_v38  ;;  %v6763_v39 = vld [vmem:[%s26501_s3 + $0x17f0] sm:$0xff] }
 0x5a8   : > { %v17957_v28 = vcombine.high %v6759_v33, %v6763_v39  ;;  %v6623_v11 = vld [vmem:[%s26501_s3 + $0x1390] sm:$0xff]  ;;  %v17956_v52 = vcombine.low %v6759_v33, %v6763_v39 }
 0x5a9   : > { %13012 = vmatpush1.bf16.msra.mxu0 %v17732_v32  ;;  %v6627_v26 = vld [vmem:[%s26501_s3 + $0x13b0] sm:$0xff] }
 0x5aa   : > { %13053 = vmatpush1.bf16.msra.mxu1 %v17860_v48  ;;  %13013 = vmatprep.subr.bf16.mxu0 %v17725_v41  ;;  %v6751_v35 = vld [vmem:[%s26501_s3 + $0x1790] sm:$0xff]  ;;  %v17821_v16 = vcombine.high %v6623_v11, %v6627_v26  ;;  %v17820_v19 = vcombine.low %v6623_v11, %v6627_v26 }
 0x5ab   : > { %13054 = vmatprep.subr.bf16.mxu1 %v17853_v9  ;;  %v6755_v38 = vld [vmem:[%s26501_s3 + $0x17b0] sm:$0xff] }
 0x5ac   : > { %v17949_v44 = vcombine.high %v6751_v35, %v6755_v38  ;;  %v6615_v32 = vld [vmem:[%s26501_s3 + $0x1350] sm:$0xff]  ;;  %v17948_v49 = vcombine.low %v6751_v35, %v6755_v38 }
 0x5ad   : > { %13014 = vmatpush1.bf16.msra.mxu0 %v17724_v42  ;;  %v6619_v48 = vld [vmem:[%s26501_s3 + $0x1370] sm:$0xff] }
 0x5ae   : > { %13055 = vmatpush1.bf16.msra.mxu1 %v17852_v23  ;;  %13015 = vmatprep.subr.bf16.mxu0 %v17717_v45  ;;  %v6743_v41 = vld [vmem:[%s26501_s3 + $0x1750] sm:$0xff]  ;;  %v17813_v57 = vcombine.high %v6615_v32, %v6619_v48  ;;  %v17812_v4 = vcombine.low %v6615_v32, %v6619_v48 }
 0x5af   : > { %13056 = vmatprep.subr.bf16.mxu1 %v17845_v3  ;;  %v6747_v9 = vld [vmem:[%s26501_s3 + $0x1770] sm:$0xff] }
 0x5b0   : > { %v17941_v34 = vcombine.high %v6743_v41, %v6747_v9  ;;  %v6607_v42 = vld [vmem:[%s26501_s3 + $0x1310] sm:$0xff]  ;;  %v17940_v37 = vcombine.low %v6743_v41, %v6747_v9 }
 0x5b1   : > { %13016 = vmatpush1.bf16.msra.mxu0 %v17716_v60  ;;  %v6611_v23 = vld [vmem:[%s26501_s3 + $0x1330] sm:$0xff] }
 0x5b2   : > { %13057 = vmatpush1.bf16.msra.mxu1 %v17844_v1  ;;  %13017 = vmatprep.subr.bf16.mxu0 %v17709_v40  ;;  %v6735_v45 = vld [vmem:[%s26501_s3 + $0x1710] sm:$0xff]  ;;  %v17805_v30 = vcombine.high %v6607_v42, %v6611_v23  ;;  %v17804_v55 = vcombine.low %v6607_v42, %v6611_v23 }
 0x5b3   : > { %13058 = vmatprep.subr.bf16.mxu1 %v17837_v62  ;;  %v6739_v3 = vld [vmem:[%s26501_s3 + $0x1730] sm:$0xff] }
 0x5b4   : > { %v17933_v7 = vcombine.high %v6735_v45, %v6739_v3  ;;  %v6599_v60 = vld [vmem:[%s26501_s3 + $0x12d0] sm:$0xff]  ;;  %v17932_v59 = vcombine.low %v6735_v45, %v6739_v3 }
 0x5b5   : > { %13018 = vmatpush1.bf16.msra.mxu0 %v17708_v24  ;;  %v6603_v1 = vld [vmem:[%s26501_s3 + $0x12f0] sm:$0xff] }
 0x5b6   : > { %13059 = vmatpush1.bf16.msra.mxu1 %v17836_v21  ;;  %13019 = vmatprep.subr.bf16.mxu0 %v17829_v20  ;;  %v6727_v40 = vld [vmem:[%s26501_s3 + $0x16d0] sm:$0xff]  ;;  %v17797_v33 = vcombine.high %v6599_v60, %v6603_v1  ;;  %v17796_v11 = vcombine.low %v6599_v60, %v6603_v1 }
 0x5b7   : > { %13060 = vmatprep.subr.bf16.mxu1 %v17957_v28  ;;  %v6731_v62 = vld [vmem:[%s26501_s3 + $0x16f0] sm:$0xff] }
 0x5b8   : > { %v17925_v39 = vcombine.high %v6727_v40, %v6731_v62  ;;  %v6591_v24 = vld [vmem:[%s26501_s3 + $0x1290] sm:$0xff]  ;;  %v17924_v26 = vcombine.low %v6727_v40, %v6731_v62 }
 0x5b9   : > { %13020 = vmatpush2.bf16.msra.mxu0 %v17828_v56  ;;  %v6595_v21 = vld [vmem:[%s26501_s3 + $0x12b0] sm:$0xff] }
 0x5ba   : > { %13061 = vmatpush2.bf16.msra.mxu1 %v17956_v52  ;;  %13021 = vmatprep.subr.bf16.mxu0 %v17821_v16  ;;  %v6719_v20 = vld [vmem:[%s26501_s3 + $0x1690] sm:$0xff]  ;;  %v17789_v35 = vcombine.high %v6591_v24, %v6595_v21  ;;  %v17788_v32 = vcombine.low %v6591_v24, %v6595_v21 }
 0x5bb   : > { %13062 = vmatprep.subr.bf16.mxu1 %v17949_v44  ;;  %v6723_v28 = vld [vmem:[%s26501_s3 + $0x16b0] sm:$0xff] }
 0x5bc   : > { %v17917_v38 = vcombine.high %v6719_v20, %v6723_v28  ;;  %v6583_v56 = vld [vmem:[%s26501_s3 + $0x1250] sm:$0xff]  ;;  %v17916_v48 = vcombine.low %v6719_v20, %v6723_v28 }
 0x5bd   : > { %13022 = vmatpush2.bf16.msra.mxu0 %v17820_v19  ;;  %v6587_v52 = vld [vmem:[%s26501_s3 + $0x1270] sm:$0xff] }
 0x5be   : > { %13063 = vmatpush2.bf16.msra.mxu1 %v17948_v49  ;;  %13023 = vmatprep.subr.bf16.mxu0 %v17813_v57  ;;  %v6711_v16 = vld [vmem:[%s26501_s3 + $0x1650] sm:$0xff]  ;;  %v17781_v41 = vcombine.high %v6583_v56, %v6587_v52  ;;  %v17780_v42 = vcombine.low %v6583_v56, %v6587_v52 }
 0x5bf   : > { %13064 = vmatprep.subr.bf16.mxu1 %v17941_v34  ;;  %v6715_v44 = vld [vmem:[%s26501_s3 + $0x1670] sm:$0xff] }
 0x5c0   : > { %v17909_v9 = vcombine.high %v6711_v16, %v6715_v44  ;;  %v6575_v19 = vld [vmem:[%s26501_s3 + $0x1210] sm:$0xff]  ;;  %v17908_v23 = vcombine.low %v6711_v16, %v6715_v44 }
 0x5c1   : > { %13024 = vmatpush2.bf16.msra.mxu0 %v17812_v4  ;;  %v6579_v49 = vld [vmem:[%s26501_s3 + $0x1230] sm:$0xff] }
 0x5c2   : > { %13065 = vmatpush2.bf16.msra.mxu1 %v17940_v37  ;;  %13025 = vmatprep.subr.bf16.mxu0 %v17805_v30  ;;  %v6703_v57 = vld [vmem:[%s26501_s3 + $0x1610] sm:$0xff]  ;;  %v17773_v45 = vcombine.high %v6575_v19, %v6579_v49  ;;  %v17772_v60 = vcombine.low %v6575_v19, %v6579_v49 }
 0x5c3   : > { %13066 = vmatprep.subr.bf16.mxu1 %v17933_v7  ;;  %v6707_v34 = vld [vmem:[%s26501_s3 + $0x1630] sm:$0xff] }
 0x5c4   : > { %v17901_v3 = vcombine.high %v6703_v57, %v6707_v34  ;;  %v6823_v4 = vld [vmem:[%s26501_s3 + $0x19d0] sm:$0xff]  ;;  %v17900_v1 = vcombine.low %v6703_v57, %v6707_v34 }
 0x5c5   : > { %13026 = vmatpush2.bf16.msra.mxu0 %v17804_v55  ;;  %v6827_v37 = vld [vmem:[%s26501_s3 + $0x19f0] sm:$0xff] }
 0x5c6   : > { %13067 = vmatpush2.bf16.msra.mxu1 %v17932_v59  ;;  %13027 = vmatprep.subr.bf16.mxu0 %v17797_v33  ;;  %v6951_v30 = vld [vmem:[%s26501_s3 + $0x1dd0] sm:$0xff]  ;;  %v18021_v40 = vcombine.high %v6823_v4, %v6827_v37  ;;  %v18020_v33 = vcombine.low %v6823_v4, %v6827_v37 }
 0x5c7   : > { %13068 = vmatprep.subr.bf16.mxu1 %v17925_v39  ;;  %v6955_v7 = vld [vmem:[%s26501_s3 + $0x1df0] sm:$0xff] }
 0x5c8   : > { %v18149_v62 = vcombine.high %v6951_v30, %v6955_v7  ;;  %v6815_v55 = vld [vmem:[%s26501_s3 + $0x1990] sm:$0xff]  ;;  %v18148_v21 = vcombine.low %v6951_v30, %v6955_v7 }
 0x5c9   : > { %13028 = vmatpush2.bf16.msra.mxu0 %v17796_v11  ;;  %v6819_v59 = vld [vmem:[%s26501_s3 + $0x19b0] sm:$0xff] }
 0x5ca   : > { %13069 = vmatpush2.bf16.msra.mxu1 %v17924_v26  ;;  %13029 = vmatprep.subr.bf16.mxu0 %v17789_v35  ;;  %v6943_v39 = vld [vmem:[%s26501_s3 + $0x1d90] sm:$0xff]  ;;  %v18013_v20 = vcombine.high %v6815_v55, %v6819_v59  ;;  %v18012_v44 = vcombine.low %v6815_v55, %v6819_v59 }
 0x5cb   : > { %13070 = vmatprep.subr.bf16.mxu1 %v17917_v38  ;;  %v6947_v24 = vld [vmem:[%s26501_s3 + $0x1db0] sm:$0xff] }
 0x5cc   : > { %v6807_v28 = vld [vmem:[%s26501_s3 + $0x1950] sm:$0xff]  ;;  %v18141_v35 = vcombine.high %v6943_v39, %v6947_v24 }
 0x5cd   : > { %13030 = vmatpush2.bf16.msra.mxu0 %v17788_v32  ;;  %v6811_v11 = vld [vmem:[%s26501_s3 + $0x1970] sm:$0xff] }
 0x5ce   : > { %13071 = vmatpush2.bf16.msra.mxu1 %v17916_v48  ;;  %13031 = vmatprep.subr.bf16.mxu0 %v17781_v41  ;;  %v6935_v38 = vld [vmem:[%s26501_s3 + $0x1d50] sm:$0xff]  ;;  %v18140_v48 = vcombine.low %v6943_v39, %v6947_v24  ;;  %v18005_v41 = vcombine.high %v6807_v28, %v6811_v11  ;;  %v18004_v4 = vcombine.low %v6807_v28, %v6811_v11 }
 0x5cf   : > { %13072 = vmatprep.subr.bf16.mxu1 %v17909_v9  ;;  %v6939_v56 = vld [vmem:[%s26501_s3 + $0x1d70] sm:$0xff] }
 0x5d0   : > { %v6799_v57 = vld [vmem:[%s26501_s3 + $0x1910] sm:$0xff]  ;;  %v18132_v30 = vcombine.low %v6935_v38, %v6939_v56 }
 0x5d1   : > { %13032 = vmatpush2.bf16.msra.mxu0 %v17780_v42  ;;  %v6803_v34 = vld [vmem:[%s26501_s3 + $0x1930] sm:$0xff] }
 0x5d2   : > { %13073 = vmatpush2.bf16.msra.mxu1 %v17908_v23  ;;  %13033 = vmatprep.subr.bf16.mxu0 %v17773_v45  ;;  %v6927_v23 = vld [vmem:[%s26501_s3 + $0x1d10] sm:$0xff]  ;;  %v17997_v7 = vcombine.high %v6799_v57, %v6803_v34 }
 0x5d3   : > { %13074 = vmatprep.subr.bf16.mxu1 %v17901_v3  ;;  %v6919_v55 = vld [vmem:[%s26501_s3 + $0x1cd0] sm:$0xff] }
 0x5d4   : > { %v6923_v59 = vld [vmem:[%s26501_s3 + $0x1cf0] sm:$0xff] }
 0x5d5   : > { %13034 = vmatpush2.bf16.msra.mxu0 %v17772_v60  ;;  %v6787_v28 = vld [vmem:[%s26501_s3 + $0x18b0] sm:$0xff] }
 0x5d6   : > { %13075 = vmatpush2.bf16.msra.mxu1 %v17900_v1  ;;  %13085 = vmatprep.subr.bf16.mxu0 %v18021_v40  ;;  %v6791_v40 = vld [vmem:[%s26501_s3 + $0x18d0] sm:$0xff] }
 0x5d7   : > { %13126 = vmatprep.subr.bf16.mxu1 %v18149_v62  ;;  %v6795_v62 = vld [vmem:[%s26501_s3 + $0x18f0] sm:$0xff] }
 0x5d8   : > { %v12791_v26 = vpop.f32.mrf.mxu0  ;;  %13036 = vmatmul.mubr.bf16.vlgmr.msra.gmra.mxu0 %v22548_v18  ;;  %v17989_v24 = vcombine.high %v6791_v40, %v6795_v62  ;;  %v6911_v11 = vld [vmem:[%s26501_s3 + $0x1c90] sm:$0xff] }
 0x5d9   : > { %v12792_v52 = vadd.f32 %v12791_v26, %v24003_v58  ;;  %v12832_v16 = vpop.f32.mrf.mxu1  ;;  %13077 = vmatmul.mubr.bf16.vlgmr.msra.gmra.mxu1 %v22550_v22  ;;  %13086 = vmatpush1.bf16.msra.mxu0 %v18020_v33  ;;  %v18133_v58 = vcombine.high %v6935_v38, %v6939_v56  ;;  %v17996_v33 = vcombine.low %v6799_v57, %v6803_v34  ;;  %v6915_v26 = vld [vmem:[%s26501_s3 + $0x1cb0] sm:$0xff] }
 0x5da   : > { %13117 = vmatprep.mubr.bf16.mxu0 %v22558_v29  ;;  %13127 = vmatpush1.bf16.msra.mxu1 %v18148_v21  ;;  %v12793_v32 = vpop.f32.mrf.mxu0  ;;  %v18117_v21 = vcombine.high %v6919_v55, %v6923_v59  ;;  %v18116_v38 = vcombine.low %v6919_v55, %v6923_v59  ;;  %v6767_v57 = vld [vmem:[%s26501_s3 + $0x1810] sm:$0xff] }
 0x5db   : > { %v24205_v9 = vadd.f32 %v12832_v16, %v12792_v52  ;;  %13158 = vmatprep.mubr.bf16.mxu1 %v22598_v13  ;;  %v12794_v19 = vadd.f32 %v12793_v32, %v24019_v61  ;;  %v12834_v49 = vpop.f32.mrf.mxu1  ;;  %13087 = vmatprep.subr.bf16.mxu0 %v18013_v20  ;;  %v6931_v61 = vld [vmem:[%s26501_s3 + $0x1d30] sm:$0xff]  ;;  %v18109_v52 = vcombine.high %v6911_v11, %v6915_v26 }
 0x5dc   : > { %v12795_v42 = vpop.f32.mrf.mxu0  ;;  %13128 = vmatprep.subr.bf16.mxu1 %v18141_v35  ;;  %v18125_v1 = vcombine.high %v6927_v23, %v6931_v61  ;;  %v18124_v39 = vcombine.low %v6927_v23, %v6931_v61  ;;  %v6783_v20 = vld [vmem:[%s26501_s3 + $0x1890] sm:$0xff]  ;;  %v17988_v35 = vcombine.low %v6791_v40, %v6795_v62 }
 0x5dd   : > { %v24221_v45 = vadd.f32 %v12834_v49, %v12794_v19  ;;  %v12836_v3 = vpop.f32.mrf.mxu1  ;;  %13088 = vmatpush1.bf16.msra.mxu0 %v18012_v44  ;;  %v17981_v56 = vcombine.high %v6783_v20, %v6787_v28  ;;  %v6775_v16 = vld [vmem:[%s26501_s3 + $0x1850] sm:$0xff]  ;;  %v18108_v19 = vcombine.low %v6911_v11, %v6915_v26 }
 0x5de   : > { %13129 = vmatpush1.bf16.msra.mxu1 %v18140_v48  ;;  %v12796_v37 = vpop.f32.mrf.mxu0  ;;  %13089 = vmatprep.subr.bf16.mxu0 %v18005_v41  ;;  %v6779_v44 = vld [vmem:[%s26501_s3 + $0x1870] sm:$0xff]  ;;  %v17980_v41 = vcombine.low %v6783_v20, %v6787_v28 }
 0x5df   : > { %v12837_v60 = vpop.f32.mrf.mxu1  ;;  %13130 = vmatprep.subr.bf16.mxu1 %v18133_v58  ;;  %v6903_v32 = vld [vmem:[%s26501_s3 + $0x1c50] sm:$0xff]  ;;  %v17973_v49 = vcombine.high %v6775_v16, %v6779_v44  ;;  %v17972_v61 = vcombine.low %v6775_v16, %v6779_v44 }
 0x5e0   : > { %v6907_v48 = vld [vmem:[%s26501_s3 + $0x1c70] sm:$0xff] }
 0x5e1   : > { %13090 = vmatpush1.bf16.msra.mxu0 %v18004_v4  ;;  %v18101_v58 = vcombine.high %v6903_v32, %v6907_v48  ;;  %v6771_v34 = vld [vmem:[%s26501_s3 + $0x1830] sm:$0xff]  ;;  %v18100_v3 = vcombine.low %v6903_v32, %v6907_v48 }
 0x5e2   : > { %13131 = vmatpush1.bf16.msra.mxu1 %v18132_v30  ;;  %13091 = vmatprep.subr.bf16.mxu0 %v17997_v7  ;;  %v6895_v42 = vld [vmem:[%s26501_s3 + $0x1c10] sm:$0xff]  ;;  %v17965_v4 = vcombine.high %v6767_v57, %v6771_v34  ;;  %v17964_v40 = vcombine.low %v6767_v57, %v6771_v34 }
 0x5e3   : > { %13132 = vmatprep.subr.bf16.mxu1 %v18125_v1  ;;  %v6899_v23 = vld [vmem:[%s26501_s3 + $0x1c30] sm:$0xff] }
 0x5e4   : > { %v18093_v37 = vcombine.high %v6895_v42, %v6899_v23  ;;  %v6887_v30 = vld [vmem:[%s26501_s3 + $0x1bd0] sm:$0xff]  ;;  %v18092_v62 = vcombine.low %v6895_v42, %v6899_v23 }
 0x5e5   : > { %13092 = vmatpush1.bf16.msra.mxu0 %v17996_v33  ;;  %v6891_v7 = vld [vmem:[%s26501_s3 + $0x1bf0] sm:$0xff] }
 0x5e6   : > { %13133 = vmatpush1.bf16.msra.mxu1 %v18124_v39  ;;  %13093 = vmatprep.subr.bf16.mxu0 %v17989_v24  ;;  %v7015_v60 = vld [vmem:[%s26501_s3 + $0x1fd0] sm:$0xff]  ;;  %v18085_v55 = vcombine.high %v6887_v30, %v6891_v7  ;;  %v18084_v20 = vcombine.low %v6887_v30, %v6891_v7 }
 0x5e7   : > { %13134 = vmatprep.subr.bf16.mxu1 %v18117_v21  ;;  %v7019_v1 = vld [vmem:[%s26501_s3 + $0x1ff0] sm:$0xff] }
 0x5e8   : > { %v18213_v59 = vcombine.high %v7015_v60, %v7019_v1  ;;  %v6879_v33 = vld [vmem:[%s26501_s3 + $0x1b90] sm:$0xff]  ;;  %v18212_v28 = vcombine.low %v7015_v60, %v7019_v1 }
 0x5e9   : > { %13094 = vmatpush1.bf16.msra.mxu0 %v17988_v35  ;;  %v6883_v39 = vld [vmem:[%s26501_s3 + $0x1bb0] sm:$0xff] }
 0x5ea   : > { %13135 = vmatpush1.bf16.msra.mxu1 %v18116_v38  ;;  %13095 = vmatprep.subr.bf16.mxu0 %v17981_v56  ;;  %v7007_v24 = vld [vmem:[%s26501_s3 + $0x1f90] sm:$0xff]  ;;  %v18077_v11 = vcombine.high %v6879_v33, %v6883_v39  ;;  %v18076_v16 = vcombine.low %v6879_v33, %v6883_v39 }
 0x5eb   : > { %13136 = vmatprep.subr.bf16.mxu1 %v18109_v52  ;;  %v7011_v21 = vld [vmem:[%s26501_s3 + $0x1fb0] sm:$0xff] }
 0x5ec   : > { %v18205_v26 = vcombine.high %v7007_v24, %v7011_v21  ;;  %v6871_v35 = vld [vmem:[%s26501_s3 + $0x1b50] sm:$0xff]  ;;  %v18204_v44 = vcombine.low %v7007_v24, %v7011_v21 }
 0x5ed   : > { %13096 = vmatpush1.bf16.msra.mxu0 %v17980_v41  ;;  %v6875_v38 = vld [vmem:[%s26501_s3 + $0x1b70] sm:$0xff] }
 0x5ee   : > { %13137 = vmatpush1.bf16.msra.mxu1 %v18108_v19  ;;  %13097 = vmatprep.subr.bf16.mxu0 %v17973_v49  ;;  %v6999_v56 = vld [vmem:[%s26501_s3 + $0x1f50] sm:$0xff]  ;;  %v18069_v32 = vcombine.high %v6871_v35, %v6875_v38  ;;  %v18068_v57 = vcombine.low %v6871_v35, %v6875_v38 }
 0x5ef   : > { %13138 = vmatprep.subr.bf16.mxu1 %v18101_v58  ;;  %v7003_v52 = vld [vmem:[%s26501_s3 + $0x1f70] sm:$0xff] }
 0x5f0   : > { %v18197_v48 = vcombine.high %v6999_v56, %v7003_v52  ;;  %v6863_v41 = vld [vmem:[%s26501_s3 + $0x1b10] sm:$0xff]  ;;  %v18196_v34 = vcombine.low %v6999_v56, %v7003_v52 }
 0x5f1   : > { %13098 = vmatpush1.bf16.msra.mxu0 %v17972_v61  ;;  %v6867_v19 = vld [vmem:[%s26501_s3 + $0x1b30] sm:$0xff] }
 0x5f2   : > { %13139 = vmatpush1.bf16.msra.mxu1 %v18100_v3  ;;  %13099 = vmatprep.subr.bf16.mxu0 %v17965_v4  ;;  %v6991_v49 = vld [vmem:[%s26501_s3 + $0x1f10] sm:$0xff]  ;;  %v18061_v42 = vcombine.high %v6863_v41, %v6867_v19  ;;  %v18060_v30 = vcombine.low %v6863_v41, %v6867_v19 }
 0x5f3   : > { %13140 = vmatprep.subr.bf16.mxu1 %v18093_v37  ;;  %v6995_v58 = vld [vmem:[%s26501_s3 + $0x1f30] sm:$0xff] }
 0x5f4   : > { %v18189_v23 = vcombine.high %v6991_v49, %v6995_v58  ;;  %v6855_v61 = vld [vmem:[%s26501_s3 + $0x1ad0] sm:$0xff]  ;;  %v18188_v7 = vcombine.low %v6991_v49, %v6995_v58 }
 0x5f5   : > { %13100 = vmatpush1.bf16.msra.mxu0 %v17964_v40  ;;  %v6859_v3 = vld [vmem:[%s26501_s3 + $0x1af0] sm:$0xff] }
 0x5f6   : > { %13141 = vmatpush1.bf16.msra.mxu1 %v18092_v62  ;;  %13101 = vmatprep.subr.bf16.mxu0 %v18085_v55  ;;  %v6983_v4 = vld [vmem:[%s26501_s3 + $0x1ed0] sm:$0xff]  ;;  %v18053_v60 = vcombine.high %v6855_v61, %v6859_v3  ;;  %v18052_v33 = vcombine.low %v6855_v61, %v6859_v3 }
 0x5f7   : > { %13142 = vmatprep.subr.bf16.mxu1 %v18213_v59  ;;  %v6987_v37 = vld [vmem:[%s26501_s3 + $0x1ef0] sm:$0xff] }
 0x5f8   : > { %v18181_v1 = vcombine.high %v6983_v4, %v6987_v37  ;;  %v6847_v40 = vld [vmem:[%s26501_s3 + $0x1a90] sm:$0xff]  ;;  %v18180_v39 = vcombine.low %v6983_v4, %v6987_v37 }
 0x5f9   : > { %13102 = vmatpush2.bf16.msra.mxu0 %v18084_v20  ;;  %v6851_v62 = vld [vmem:[%s26501_s3 + $0x1ab0] sm:$0xff] }
 0x5fa   : > { %13143 = vmatpush2.bf16.msra.mxu1 %v18212_v28  ;;  %13103 = vmatprep.subr.bf16.mxu0 %v18077_v11  ;;  %v6975_v55 = vld [vmem:[%s26501_s3 + $0x1e90] sm:$0xff]  ;;  %v18045_v24 = vcombine.high %v6847_v40, %v6851_v62  ;;  %v18044_v35 = vcombine.low %v6847_v40, %v6851_v62  ;;  %v6176_v62 = vld [vmem:[%s26501_s3 + $0x598] sm:$0xff] }
 0x5fb   : > { %13144 = vmatprep.subr.bf16.mxu1 %v18205_v26  ;;  %v6979_v59 = vld [vmem:[%s26501_s3 + $0x1eb0] sm:$0xff] }
 0x5fc   : > { %v18173_v21 = vcombine.high %v6975_v55, %v6979_v59  ;;  %v6839_v20 = vld [vmem:[%s26501_s3 + $0x1a50] sm:$0xff]  ;;  %v18172_v38 = vcombine.low %v6975_v55, %v6979_v59  ;;  %v6180_v55 = vld [vmem:[%s26501_s3 + $0x5b8] sm:$0xff] }
 0x5fd   : > { %13104 = vmatpush2.bf16.msra.mxu0 %v18076_v16  ;;  %v6843_v28 = vld [vmem:[%s26501_s3 + $0x1a70] sm:$0xff] }
 0x5fe   : > { %13145 = vmatpush2.bf16.msra.mxu1 %v18204_v44  ;;  %13105 = vmatprep.subr.bf16.mxu0 %v18069_v32  ;;  %v6967_v11 = vld [vmem:[%s26501_s3 + $0x1e50] sm:$0xff]  ;;  %v18037_v56 = vcombine.high %v6839_v20, %v6843_v28  ;;  %v18036_v41 = vcombine.low %v6839_v20, %v6843_v28  ;;  %v17375_v28 = vcombine.high %v6176_v62, %v6180_v55 }
 0x5ff   : > { %13146 = vmatprep.subr.bf16.mxu1 %v18197_v48  ;;  %v6971_v26 = vld [vmem:[%s26501_s3 + $0x1e70] sm:$0xff] }
 0x600   : > { %v18165_v52 = vcombine.high %v6967_v11, %v6971_v26  ;;  %v6831_v16 = vld [vmem:[%s26501_s3 + $0x1a10] sm:$0xff]  ;;  %v18164_v19 = vcombine.low %v6967_v11, %v6971_v26  ;;  %v6168_v11 = vld [vmem:[%s26501_s3 + $0x558] sm:$0xff] }
 0x601   : > { %13106 = vmatpush2.bf16.msra.mxu0 %v18068_v57  ;;  %v6835_v44 = vld [vmem:[%s26501_s3 + $0x1a30] sm:$0xff]  ;;  %v6056_v57 = vld [vmem:[%s26501_s3 + $0x1d8] sm:$0xff] }
 0x602   : > { %13147 = vmatpush2.bf16.msra.mxu1 %v18196_v34  ;;  %13107 = vmatprep.subr.bf16.mxu0 %v18061_v42  ;;  %v6959_v32 = vld [vmem:[%s26501_s3 + $0x1e10] sm:$0xff]  ;;  %v18029_v49 = vcombine.high %v6831_v16, %v6835_v44  ;;  %v6060_v34 = vld [vmem:[%s26501_s3 + $0x1f8] sm:$0xff]  ;;  %v18028_v61 = vcombine.low %v6831_v16, %v6835_v44  ;;  %v17374_v16 = vcombine.low %v6176_v62, %v6180_v55 }
 0x603   : > { %13148 = vmatprep.subr.bf16.mxu1 %v18189_v23  ;;  %v6963_v48 = vld [vmem:[%s26501_s3 + $0x1e30] sm:$0xff]  ;;  %v6184_v42 = vld [vmem:[%s26501_s3 + $0x5d8] sm:$0xff]  ;;  %v17255_v4 = vcombine.high %v6056_v57, %v6060_v34  ;;  %v17254_v40 = vcombine.low %v6056_v57, %v6060_v34 }
 0x604   : > { %v18157_v58 = vcombine.high %v6959_v32, %v6963_v48  ;;  %v6188_v23 = vld [vmem:[%s26501_s3 + $0x5f8] sm:$0xff]  ;;  %v18156_v3 = vcombine.low %v6959_v32, %v6963_v48 }
 0x605   : > { %13108 = vmatpush2.bf16.msra.mxu0 %v18060_v30  ;;  %v17383_v37 = vcombine.high %v6184_v42, %v6188_v23  ;;  %v6048_v30 = vld [vmem:[%s26501_s3 + $0x198] sm:$0xff]  ;;  %v17382_v59 = vcombine.low %v6184_v42, %v6188_v23 }
 0x606   : > { %13149 = vmatpush2.bf16.msra.mxu1 %v18188_v7  ;;  %13109 = vmatprep.subr.bf16.mxu0 %v18053_v60  ;;  %v6052_v7 = vld [vmem:[%s26501_s3 + $0x1b8] sm:$0xff]  ;;  %v19225_v60 = vld [vmem:[%s26502_s4] sm:$0xff] }
 0x607   : > { %13150 = vmatprep.subr.bf16.mxu1 %v18181_v1  ;;  %v7042_v1 = vrot.slane %v19225_v60, %v20833_v10  ;;  %v6172_v26 = vld [vmem:[%s26501_s3 + $0x578] sm:$0xff] }
 0x608   : > { %v6160_v57 = vld [vmem:[%s26501_s3 + $0x518] sm:$0xff] }
 0x609   : > { %13110 = vmatpush2.bf16.msra.mxu0 %v18052_v33  ;;  %v7046_v33 = vrot.slane %v19225_v60, %v20836_v15  ;;  %v6028_v60 = vld [vmem:[%s26501_s3 + $0xf8] sm:$0xff] }
 0x60a   : > { %13151 = vmatpush2.bf16.msra.mxu1 %v18180_v39  ;;  %13111 = vmatprep.subr.bf16.mxu0 %v18045_v24  ;;  %v17247_v39 = vcombine.high %v6048_v30, %v6052_v7  ;;  %v6040_v24 = vld [vmem:[%s26501_s3 + $0x158] sm:$0xff] }
 0x60b   : > { %13152 = vmatprep.subr.bf16.mxu1 %v18173_v21  ;;  %v6044_v21 = vld [vmem:[%s26501_s3 + $0x178] sm:$0xff] }
 0x60c   : > { %v17239_v44 = vcombine.high %v6040_v24, %v6044_v21  ;;  %v17238_v23 = vcombine.low %v6040_v24, %v6044_v21  ;;  %v6020_v24 = vld [vmem:[%s26501_s3 + $0xb8] sm:$0xff] }
 0x60d   : > { %13112 = vmatpush2.bf16.msra.mxu0 %v18044_v35  ;;  %v6144_v21 = vld [vmem:[%s26501_s3 + $0x498] sm:$0xff] }
 0x60e   : > { %13153 = vmatpush2.bf16.msra.mxu1 %v18172_v38  ;;  %13113 = vmatprep.subr.bf16.mxu0 %v18037_v56  ;;  %v17246_v56 = vcombine.low %v6048_v30, %v6052_v7  ;;  %v6024_v7 = vld [vmem:[%s26501_s3 + $0xd8] sm:$0xff] }
 0x60f   : > { %13154 = vmatprep.subr.bf16.mxu1 %v18165_v52 }
 0x611   : > { %13114 = vmatpush2.bf16.msra.mxu0 %v18036_v41 }
 0x612   : > { %13155 = vmatpush2.bf16.msra.mxu1 %v18164_v19  ;;  %13115 = vmatprep.subr.bf16.mxu0 %v18029_v49  ;;  %v17367_v19 = vcombine.high %v6168_v11, %v6172_v26  ;;  %v6032_v49 = vld [vmem:[%s26501_s3 + $0x118] sm:$0xff] }
 0x613   : > { %13156 = vmatprep.subr.bf16.mxu1 %v18157_v58 }
 0x615   : > { %13116 = vmatpush2.bf16.msra.mxu0 %v18028_v61 }
 0x616   : > { %13157 = vmatpush2.bf16.msra.mxu1 %v18156_v3  ;;  %13167 = vmatprep.subr.bf16.mxu0 %v17255_v4  ;;  %v17366_v3 = vcombine.low %v6168_v11, %v6172_v26 }
 0x617   : > { %13208 = vmatprep.subr.bf16.mxu1 %v17383_v37 }
 0x618   : > { %v12873_v20 = vpop.f32.mrf.mxu0  ;;  %13118 = vmatmul.mubr.bf16.vlgmr.msra.gmra.mxu0 %v22769_v47 }
 0x619   : > { %v12874_v35 = vadd.f32 %v12873_v20, %v7042_v1  ;;  %v12914_v38 = vpop.f32.mrf.mxu1  ;;  %13159 = vmatmul.mubr.bf16.vlgmr.msra.gmra.mxu1 %v22771_v2  ;;  %13168 = vmatpush1.bf16.msra.mxu0 %v17254_v40  ;;  %v6152_v1 = vld [vmem:[%s26501_s3 + $0x4d8] sm:$0xff] }
 0x61a   : > { %13199 = vmatprep.mubr.bf16.mxu0 %v21905_v5  ;;  %13209 = vmatpush1.bf16.msra.mxu1 %v17382_v59  ;;  %v12875_v52 = vpop.f32.mrf.mxu0  ;;  %v6036_v5 = vld [vmem:[%s26501_s3 + $0x138] sm:$0xff]  ;;  %v17223_v59 = vcombine.high %v6024_v7, %v6028_v60 }
 0x61b   : > { %v24411_v32 = vadd.f32 %v12914_v38, %v12874_v35  ;;  %13240 = vmatprep.mubr.bf16.mxu1 %v21907_v6  ;;  %v12876_v48 = vadd.f32 %v12875_v52, %v7046_v33  ;;  %v12916_v41 = vpop.f32.mrf.mxu1  ;;  %13169 = vmatprep.subr.bf16.mxu0 %v17247_v39  ;;  %v6164_v6 = vld [vmem:[%s26501_s3 + $0x538] sm:$0xff]  ;;  %v17231_v4 = vcombine.high %v6032_v49, %v6036_v5 }
 0x61c   : > { %v12877_v58 = vpop.f32.mrf.mxu0  ;;  %13210 = vmatprep.subr.bf16.mxu1 %v17375_v28  ;;  %v17359_v30 = vcombine.high %v6160_v57, %v6164_v6  ;;  %v6156_v40 = vld [vmem:[%s26501_s3 + $0x4f8] sm:$0xff]  ;;  %v17230_v62 = vcombine.low %v6032_v49, %v6036_v5  ;;  %v17358_v55 = vcombine.low %v6160_v57, %v6164_v6  ;;  %v17222_v28 = vcombine.low %v6024_v7, %v6028_v60 }
 0x61d   : > { %v24426_v34 = vadd.f32 %v12916_v41, %v12876_v48  ;;  %v12918_v42 = vpop.f32.mrf.mxu1  ;;  %13170 = vmatpush1.bf16.msra.mxu0 %v17246_v56  ;;  %v17351_v33 = vcombine.high %v6152_v1, %v6156_v40  ;;  %v6016_v39 = vld [vmem:[%s26501_s3 + $0x98] sm:$0xff]  ;;  %v17350_v11 = vcombine.low %v6152_v1, %v6156_v40 }
 0x61e   : > { %13211 = vmatpush1.bf16.msra.mxu1 %v17374_v16  ;;  %v12878_v61 = vpop.f32.mrf.mxu0  ;;  %13171 = vmatprep.subr.bf16.mxu0 %v17239_v44  ;;  %v6148_v20 = vld [vmem:[%s26501_s3 + $0x4b8] sm:$0xff]  ;;  %v17215_v26 = vcombine.high %v6016_v39, %v6020_v24  ;;  %v17214_v44 = vcombine.low %v6016_v39, %v6020_v24 }
 0x61f   : > { %v12919_v37 = vpop.f32.mrf.mxu1  ;;  %13212 = vmatprep.subr.bf16.mxu1 %v17367_v19  ;;  %v17343_v35 = vcombine.high %v6144_v21, %v6148_v20  ;;  %v6008_v38 = vld [vmem:[%s26501_s3 + $0x58] sm:$0xff]  ;;  %v17342_v48 = vcombine.low %v6144_v21, %v6148_v20 }
 0x620   : > { %v6012_v56 = vld [vmem:[%s26501_s3 + $0x78] sm:$0xff] }
 0x621   : > { %13172 = vmatpush1.bf16.msra.mxu0 %v17238_v23  ;;  %v6136_v52 = vld [vmem:[%s26501_s3 + $0x458] sm:$0xff]  ;;  %v17207_v41 = vcombine.high %v6008_v38, %v6012_v56  ;;  %v17206_v6 = vcombine.low %v6008_v38, %v6012_v56 }
 0x622   : > { %13213 = vmatpush1.bf16.msra.mxu1 %v17366_v3  ;;  %13173 = vmatprep.subr.bf16.mxu0 %v17231_v4  ;;  %v6140_v16 = vld [vmem:[%s26501_s3 + $0x478] sm:$0xff] }
 0x623   : > { %13214 = vmatprep.subr.bf16.mxu1 %v17359_v30  ;;  %v17335_v19 = vcombine.high %v6136_v52, %v6140_v16  ;;  %v6000_v49 = vld [vmem:[%s26501_s3 + $0x18] sm:$0xff]  ;;  %v17334_v42 = vcombine.low %v6136_v52, %v6140_v16 }
 0x624   : > { %v6004_v5 = vld [vmem:[%s26501_s3 + $0x38] sm:$0xff] }
 0x625   : > { %13174 = vmatpush1.bf16.msra.mxu0 %v17230_v62  ;;  %v6128_v58 = vld [vmem:[%s26501_s3 + $0x418] sm:$0xff]  ;;  %v17199_v23 = vcombine.high %v6000_v49, %v6004_v5  ;;  %v17198_v7 = vcombine.low %v6000_v49, %v6004_v5 }
 0x626   : > { %13215 = vmatpush1.bf16.msra.mxu1 %v17358_v55  ;;  %13175 = vmatprep.subr.bf16.mxu0 %v17223_v59  ;;  %v6132_v57 = vld [vmem:[%s26501_s3 + $0x438] sm:$0xff] }
 0x627   : > { %13216 = vmatprep.subr.bf16.mxu1 %v17351_v33  ;;  %v17327_v61 = vcombine.high %v6128_v58, %v6132_v57  ;;  %v6120_v3 = vld [vmem:[%s26501_s3 + $0x3d8] sm:$0xff]  ;;  %v17326_v60 = vcombine.low %v6128_v58, %v6132_v57 }
 0x628   : > { %v6124_v4 = vld [vmem:[%s26501_s3 + $0x3f8] sm:$0xff] }
 0x629   : > { %13176 = vmatpush1.bf16.msra.mxu0 %v17222_v28  ;;  %v6248_v37 = vld [vmem:[%s26501_s3 + $0x7d8] sm:$0xff]  ;;  %v17319_v1 = vcombine.high %v6120_v3, %v6124_v4  ;;  %v17318_v39 = vcombine.low %v6120_v3, %v6124_v4 }
 0x62a   : > { %13217 = vmatpush1.bf16.msra.mxu1 %v17350_v11  ;;  %13177 = vmatprep.subr.bf16.mxu0 %v17215_v26  ;;  %v6252_v30 = vld [vmem:[%s26501_s3 + $0x7f8] sm:$0xff] }
 0x62b   : > { %13218 = vmatprep.subr.bf16.mxu1 %v17343_v35  ;;  %v17447_v40 = vcombine.high %v6248_v37, %v6252_v30  ;;  %v6112_v62 = vld [vmem:[%s26501_s3 + $0x398] sm:$0xff]  ;;  %v17446_v24 = vcombine.low %v6248_v37, %v6252_v30 }
 0x62c   : > { %v6116_v55 = vld [vmem:[%s26501_s3 + $0x3b8] sm:$0xff] }
 0x62d   : > { %13178 = vmatpush1.bf16.msra.mxu0 %v17214_v44  ;;  %v6240_v59 = vld [vmem:[%s26501_s3 + $0x798] sm:$0xff]  ;;  %v17311_v21 = vcombine.high %v6112_v62, %v6116_v55  ;;  %v17310_v38 = vcombine.low %v6112_v62, %v6116_v55 }
 0x62e   : > { %13219 = vmatpush1.bf16.msra.mxu1 %v17342_v48  ;;  %13179 = vmatprep.subr.bf16.mxu0 %v17207_v41  ;;  %v6244_v33 = vld [vmem:[%s26501_s3 + $0x7b8] sm:$0xff] }
 0x62f   : > { %13220 = vmatprep.subr.bf16.mxu1 %v17335_v19  ;;  %v17439_v20 = vcombine.high %v6240_v59, %v6244_v33  ;;  %v6104_v28 = vld [vmem:[%s26501_s3 + $0x358] sm:$0xff]  ;;  %v17438_v56 = vcombine.low %v6240_v59, %v6244_v33 }
 0x630   : > { %v6108_v11 = vld [vmem:[%s26501_s3 + $0x378] sm:$0xff] }
 0x631   : > { %13180 = vmatpush1.bf16.msra.mxu0 %v17206_v6  ;;  %v6232_v26 = vld [vmem:[%s26501_s3 + $0x758] sm:$0xff]  ;;  %v17303_v52 = vcombine.high %v6104_v28, %v6108_v11  ;;  %v17302_v49 = vcombine.low %v6104_v28, %v6108_v11 }
 0x632   : > { %13221 = vmatpush1.bf16.msra.mxu1 %v17334_v42  ;;  %13181 = vmatprep.subr.bf16.mxu0 %v17199_v23  ;;  %v6236_v35 = vld [vmem:[%s26501_s3 + $0x778] sm:$0xff] }
 0x633   : > { %13222 = vmatprep.subr.bf16.mxu1 %v17327_v61  ;;  %v17431_v16 = vcombine.high %v6232_v26, %v6236_v35  ;;  %v6096_v44 = vld [vmem:[%s26501_s3 + $0x318] sm:$0xff]  ;;  %v17430_v5 = vcombine.low %v6232_v26, %v6236_v35 }
 0x634   : > { %v6100_v48 = vld [vmem:[%s26501_s3 + $0x338] sm:$0xff] }
 0x635   : > { %13182 = vmatpush1.bf16.msra.mxu0 %v17198_v7  ;;  %v6224_v41 = vld [vmem:[%s26501_s3 + $0x718] sm:$0xff]  ;;  %v17295_v58 = vcombine.high %v6096_v44, %v6100_v48  ;;  %v17294_v3 = vcombine.low %v6096_v44, %v6100_v48 }
 0x636   : > { %13223 = vmatpush1.bf16.msra.mxu1 %v17326_v60  ;;  %13183 = vmatprep.subr.bf16.mxu0 %v17319_v1  ;;  %v6228_v19 = vld [vmem:[%s26501_s3 + $0x738] sm:$0xff] }
 0x637   : > { %13224 = vmatprep.subr.bf16.mxu1 %v17447_v40  ;;  %v17423_v57 = vcombine.high %v6224_v41, %v6228_v19  ;;  %v6088_v6 = vld [vmem:[%s26501_s3 + $0x2d8] sm:$0xff]  ;;  %v17422_v4 = vcombine.low %v6224_v41, %v6228_v19 }
 0x638   : > { %v6092_v42 = vld [vmem:[%s26501_s3 + $0x2f8] sm:$0xff] }
 0x639   : > { %13184 = vmatpush2.bf16.msra.mxu0 %v17318_v39  ;;  %v6216_v23 = vld [vmem:[%s26501_s3 + $0x6d8] sm:$0xff]  ;;  %v17287_v37 = vcombine.high %v6088_v6, %v6092_v42  ;;  %v17286_v62 = vcombine.low %v6088_v6, %v6092_v42 }
 0x63a   : > { %13225 = vmatpush2.bf16.msra.mxu1 %v17446_v24  ;;  %13185 = vmatprep.subr.bf16.mxu0 %v17311_v21  ;;  %v6220_v61 = vld [vmem:[%s26501_s3 + $0x6f8] sm:$0xff] }
 0x63b   : > { %13226 = vmatprep.subr.bf16.mxu1 %v17439_v20  ;;  %v17415_v30 = vcombine.high %v6216_v23, %v6220_v61  ;;  %v6080_v7 = vld [vmem:[%s26501_s3 + $0x298] sm:$0xff]  ;;  %v17414_v55 = vcombine.low %v6216_v23, %v6220_v61 }
 0x63c   : > { %v6084_v60 = vld [vmem:[%s26501_s3 + $0x2b8] sm:$0xff] }
 0x63d   : > { %13186 = vmatpush2.bf16.msra.mxu0 %v17310_v38  ;;  %v6208_v1 = vld [vmem:[%s26501_s3 + $0x698] sm:$0xff]  ;;  %v17279_v59 = vcombine.high %v6080_v7, %v6084_v60  ;;  %v17278_v28 = vcombine.low %v6080_v7, %v6084_v60 }
 0x63e   : > { %13227 = vmatpush2.bf16.msra.mxu1 %v17438_v56  ;;  %13187 = vmatprep.subr.bf16.mxu0 %v17303_v52  ;;  %v6212_v40 = vld [vmem:[%s26501_s3 + $0x6b8] sm:$0xff] }
 0x63f   : > { %13228 = vmatprep.subr.bf16.mxu1 %v17431_v16  ;;  %v17407_v33 = vcombine.high %v6208_v1, %v6212_v40  ;;  %v6072_v39 = vld [vmem:[%s26501_s3 + $0x258] sm:$0xff]  ;;  %v17406_v11 = vcombine.low %v6208_v1, %v6212_v40 }
 0x640   : > { %v6076_v24 = vld [vmem:[%s26501_s3 + $0x278] sm:$0xff] }
 0x641   : > { %13188 = vmatpush2.bf16.msra.mxu0 %v17302_v49  ;;  %v6200_v21 = vld [vmem:[%s26501_s3 + $0x658] sm:$0xff]  ;;  %v17271_v26 = vcombine.high %v6072_v39, %v6076_v24  ;;  %v17270_v44 = vcombine.low %v6072_v39, %v6076_v24 }
 0x642   : > { %13229 = vmatpush2.bf16.msra.mxu1 %v17430_v5  ;;  %13189 = vmatprep.subr.bf16.mxu0 %v17295_v58  ;;  %v6204_v20 = vld [vmem:[%s26501_s3 + $0x678] sm:$0xff] }
 0x643   : > { %13230 = vmatprep.subr.bf16.mxu1 %v17423_v57  ;;  %v17399_v35 = vcombine.high %v6200_v21, %v6204_v20  ;;  %v6064_v38 = vld [vmem:[%s26501_s3 + $0x218] sm:$0xff]  ;;  %v17398_v48 = vcombine.low %v6200_v21, %v6204_v20 }
 0x644   : > { %v6068_v56 = vld [vmem:[%s26501_s3 + $0x238] sm:$0xff] }
 0x645   : > { %13190 = vmatpush2.bf16.msra.mxu0 %v17294_v3  ;;  %v6192_v52 = vld [vmem:[%s26501_s3 + $0x618] sm:$0xff]  ;;  %v17263_v41 = vcombine.high %v6064_v38, %v6068_v56  ;;  %v17262_v6 = vcombine.low %v6064_v38, %v6068_v56 }
 0x646   : > { %13231 = vmatpush2.bf16.msra.mxu1 %v17422_v4  ;;  %13191 = vmatprep.subr.bf16.mxu0 %v17287_v37  ;;  %v6196_v16 = vld [vmem:[%s26501_s3 + $0x638] sm:$0xff] }
 0x647   : > { %13232 = vmatprep.subr.bf16.mxu1 %v17415_v30  ;;  %v17391_v19 = vcombine.high %v6192_v52, %v6196_v16  ;;  %v6312_v49 = vld [vmem:[%s26501_s3 + $0x9d8] sm:$0xff]  ;;  %v17390_v42 = vcombine.low %v6192_v52, %v6196_v16 }
 0x648   : > { %v6316_v5 = vld [vmem:[%s26501_s3 + $0x9f8] sm:$0xff] }
 0x649   : > { %13192 = vmatpush2.bf16.msra.mxu0 %v17286_v62  ;;  %v6440_v58 = vld [vmem:[%s26501_s3 + $0xdd8] sm:$0xff]  ;;  %v17511_v23 = vcombine.high %v6312_v49, %v6316_v5  ;;  %v17510_v37 = vcombine.low %v6312_v49, %v6316_v5 }
 0x64a   : > { %13233 = vmatpush2.bf16.msra.mxu1 %v17414_v55  ;;  %13193 = vmatprep.subr.bf16.mxu0 %v17279_v59  ;;  %v6444_v57 = vld [vmem:[%s26501_s3 + $0xdf8] sm:$0xff] }
 0x64b   : > { %13234 = vmatprep.subr.bf16.mxu1 %v17407_v33  ;;  %v17639_v61 = vcombine.high %v6440_v58, %v6444_v57  ;;  %v6304_v3 = vld [vmem:[%s26501_s3 + $0x998] sm:$0xff]  ;;  %v17638_v60 = vcombine.low %v6440_v58, %v6444_v57 }
 0x64c   : > { %v6308_v4 = vld [vmem:[%s26501_s3 + $0x9b8] sm:$0xff] }
 0x64d   : > { %13194 = vmatpush2.bf16.msra.mxu0 %v17278_v28  ;;  %v6432_v30 = vld [vmem:[%s26501_s3 + $0xd98] sm:$0xff]  ;;  %v17503_v1 = vcombine.high %v6304_v3, %v6308_v4  ;;  %v17502_v20 = vcombine.low %v6304_v3, %v6308_v4 }
 0x64e   : > { %13235 = vmatpush2.bf16.msra.mxu1 %v17406_v11  ;;  %13195 = vmatprep.subr.bf16.mxu0 %v17271_v26  ;;  %v6436_v7 = vld [vmem:[%s26501_s3 + $0xdb8] sm:$0xff] }
 0x64f   : > { %13236 = vmatprep.subr.bf16.mxu1 %v17399_v35  ;;  %v6296_v40 = vld [vmem:[%s26501_s3 + $0x958] sm:$0xff]  ;;  %v17631_v59 = vcombine.high %v6432_v30, %v6436_v7  ;;  %v17630_v28 = vcombine.low %v6432_v30, %v6436_v7 }
 0x650   : > { %v6300_v62 = vld [vmem:[%s26501_s3 + $0x978] sm:$0xff] }
 0x651   : > { %13196 = vmatpush2.bf16.msra.mxu0 %v17270_v44  ;;  %v6424_v33 = vld [vmem:[%s26501_s3 + $0xd58] sm:$0xff]  ;;  %v17495_v11 = vcombine.high %v6296_v40, %v6300_v62  ;;  %v17494_v44 = vcombine.low %v6296_v40, %v6300_v62 }
 0x652   : > { %13237 = vmatpush2.bf16.msra.mxu1 %v17398_v48  ;;  %13197 = vmatprep.subr.bf16.mxu0 %v17263_v41  ;;  %v6428_v39 = vld [vmem:[%s26501_s3 + $0xd78] sm:$0xff] }
 0x653   : > { %13238 = vmatprep.subr.bf16.mxu1 %v17391_v19  ;;  %v6416_v52 = vld [vmem:[%s26501_s3 + $0xd18] sm:$0xff]  ;;  %v17622_v41 = vcombine.low %v6424_v33, %v6428_v39 }
 0x654   : > { %v6280_v58 = vld [vmem:[%s26501_s3 + $0x8d8] sm:$0xff] }
 0x655   : > { %13198 = vmatpush2.bf16.msra.mxu0 %v17262_v6  ;;  %v6284_v57 = vld [vmem:[%s26501_s3 + $0x8f8] sm:$0xff] }
 0x656   : > { %13239 = vmatpush2.bf16.msra.mxu1 %v17390_v42  ;;  %13249 = vmatprep.subr.bf16.mxu0 %v17511_v23  ;;  %v6408_v6 = vld [vmem:[%s26501_s3 + $0xcd8] sm:$0xff]  ;;  %v17479_v3 = vcombine.high %v6280_v58, %v6284_v57 }
 0x657   : > { %13290 = vmatprep.subr.bf16.mxu1 %v17639_v61  ;;  %v6412_v42 = vld [vmem:[%s26501_s3 + $0xcf8] sm:$0xff] }
 0x658   : > { %v12955_v55 = vpop.f32.mrf.mxu0  ;;  %13200 = vmatmul.mubr.bf16.vlgmr.msra.gmra.mxu0 %v22115_v51  ;;  %v17607_v4 = vcombine.high %v6408_v6, %v6412_v42  ;;  %v6276_v30 = vld [vmem:[%s26501_s3 + $0x8b8] sm:$0xff]  ;;  %v17606_v40 = vcombine.low %v6408_v6, %v6412_v42 }
 0x659   : > { %v12956_v24 = vadd.f32 %v12955_v55, %v24411_v32  ;;  %v12996_v21 = vpop.f32.mrf.mxu1  ;;  %13241 = vmatmul.mubr.bf16.vlgmr.msra.gmra.mxu1 %v22117_v17  ;;  %13250 = vmatpush1.bf16.msra.mxu0 %v17510_v37  ;;  %v17623_v32 = vcombine.high %v6424_v33, %v6428_v39  ;;  %v6288_v17 = vld [vmem:[%s26501_s3 + $0x918] sm:$0xff] }
 0x65a   : > { %13281 = vmatprep.mubr.bf16.mxu0 %v22127_v25  ;;  %13291 = vmatpush1.bf16.msra.mxu1 %v17638_v60  ;;  %v12957_v51 = vpop.f32.mrf.mxu0  ;;  %v6292_v25 = vld [vmem:[%s26501_s3 + $0x938] sm:$0xff] }
 0x65b   : > { %v24612_v26 = vadd.f32 %v12996_v21, %v12956_v24  ;;  %13322 = vmatprep.mubr.bf16.mxu1 %v22136_v31  ;;  %v12958_v35 = vadd.f32 %v12957_v51, %v24426_v34  ;;  %v12998_v38 = vpop.f32.mrf.mxu1  ;;  %13251 = vmatprep.subr.bf16.mxu0 %v17503_v1  ;;  %v6420_v31 = vld [vmem:[%s26501_s3 + $0xd38] sm:$0xff]  ;;  %v17487_v19 = vcombine.high %v6288_v17, %v6292_v25 }
 0x65c   : > { %v12959_v56 = vpop.f32.mrf.mxu0  ;;  %13292 = vmatprep.subr.bf16.mxu1 %v17631_v59  ;;  %v17615_v5 = vcombine.high %v6416_v52, %v6420_v31  ;;  %v17486_v23 = vcombine.low %v6288_v17, %v6292_v25  ;;  %v17614_v61 = vcombine.low %v6416_v52, %v6420_v31  ;;  %v6272_v37 = vld [vmem:[%s26501_s3 + $0x898] sm:$0xff]  ;;  %v17478_v1 = vcombine.low %v6280_v58, %v6284_v57 }
 0x65d   : > { %v24628_v34 = vadd.f32 %v12998_v38, %v12958_v35  ;;  %v13000_v16 = vpop.f32.mrf.mxu1  ;;  %13252 = vmatpush1.bf16.msra.mxu0 %v17502_v20  ;;  %v6400_v7 = vld [vmem:[%s26501_s3 + $0xc98] sm:$0xff]  ;;  %v17471_v62 = vcombine.high %v6272_v37, %v6276_v30  ;;  %v17470_v21 = vcombine.low %v6272_v37, %v6276_v30 }
 0x65e   : > { %13293 = vmatpush1.bf16.msra.mxu1 %v17630_v28  ;;  %v12960_v48 = vpop.f32.mrf.mxu0  ;;  %13253 = vmatprep.subr.bf16.mxu0 %v17495_v11  ;;  %v6404_v60 = vld [vmem:[%s26501_s3 + $0xcb8] sm:$0xff] }
 0x65f   : > { %v13001_v49 = vpop.f32.mrf.mxu1  ;;  %13294 = vmatprep.subr.bf16.mxu1 %v17623_v32  ;;  %v17599_v55 = vcombine.high %v6400_v7, %v6404_v60  ;;  %v6264_v59 = vld [vmem:[%s26501_s3 + $0x858] sm:$0xff]  ;;  %v17598_v20 = vcombine.low %v6400_v7, %v6404_v60 }
 0x660   : > { %v6268_v33 = vld [vmem:[%s26501_s3 + $0x878] sm:$0xff] }
 0x661   : > { %13254 = vmatpush1.bf16.msra.mxu0 %v17494_v44  ;;  %v6392_v39 = vld [vmem:[%s26501_s3 + $0xc58] sm:$0xff]  ;;  %v17463_v51 = vcombine.high %v6264_v59, %v6268_v33  ;;  %v17462_v17 = vcombine.low %v6264_v59, %v6268_v33 }
 0x662   : > { %13295 = vmatpush1.bf16.msra.mxu1 %v17622_v41  ;;  %13255 = vmatprep.subr.bf16.mxu0 %v17487_v19  ;;  %v6396_v24 = vld [vmem:[%s26501_s3 + $0xc78] sm:$0xff] }
 0x663   : > { %13296 = vmatprep.subr.bf16.mxu1 %v17615_v5  ;;  %v17591_v28 = vcombine.high %v6392_v39, %v6396_v24  ;;  %v6256_v11 = vld [vmem:[%s26501_s3 + $0x818] sm:$0xff]  ;;  %v17590_v25 = vcombine.low %v6392_v39, %v6396_v24 }
 0x664   : > { %v6260_v35 = vld [vmem:[%s26501_s3 + $0x838] sm:$0xff] }
 0x665   : > { %13256 = vmatpush1.bf16.msra.mxu0 %v17486_v23  ;;  %v6384_v38 = vld [vmem:[%s26501_s3 + $0xc18] sm:$0xff]  ;;  %v17455_v56 = vcombine.high %v6256_v11, %v6260_v35  ;;  %v17454_v41 = vcombine.low %v6256_v11, %v6260_v35 }
 0x666   : > { %13297 = vmatpush1.bf16.msra.mxu1 %v17614_v61  ;;  %13257 = vmatprep.subr.bf16.mxu0 %v17479_v3  ;;  %v6388_v32 = vld [vmem:[%s26501_s3 + $0xc38] sm:$0xff] }
 0x667   : > { %13298 = vmatprep.subr.bf16.mxu1 %v17607_v4  ;;  %v17583_v52 = vcombine.high %v6384_v38, %v6388_v32  ;;  %v6376_v31 = vld [vmem:[%s26501_s3 + $0xbd8] sm:$0xff]  ;;  %v17582_v19 = vcombine.low %v6384_v38, %v6388_v32 }
 0x668   : > { %v6380_v16 = vld [vmem:[%s26501_s3 + $0xbf8] sm:$0xff] }
 0x669   : > { %13258 = vmatpush1.bf16.msra.mxu0 %v17478_v1  ;;  %v6504_v44 = vld [vmem:[%s26501_s3 + $0xfd8] sm:$0xff]  ;;  %v17575_v49 = vcombine.high %v6376_v31, %v6380_v16  ;;  %v17574_v23 = vcombine.low %v6376_v31, %v6380_v16 }
 0x66a   : > { %13299 = vmatpush1.bf16.msra.mxu1 %v17606_v40  ;;  %13259 = vmatprep.subr.bf16.mxu0 %v17471_v62  ;;  %v6508_v48 = vld [vmem:[%s26501_s3 + $0xff8] sm:$0xff] }
 0x66b   : > { %13300 = vmatprep.subr.bf16.mxu1 %v17599_v55  ;;  %v17703_v5 = vcombine.high %v6504_v44, %v6508_v48  ;;  %v6368_v58 = vld [vmem:[%s26501_s3 + $0xb98] sm:$0xff]  ;;  %v17702_v61 = vcombine.low %v6504_v44, %v6508_v48 }
 0x66c   : > { %v6372_v57 = vld [vmem:[%s26501_s3 + $0xbb8] sm:$0xff] }
 0x66d   : > { %13260 = vmatpush1.bf16.msra.mxu0 %v17470_v21  ;;  %v6496_v6 = vld [vmem:[%s26501_s3 + $0xf98] sm:$0xff]  ;;  %v17567_v3 = vcombine.high %v6368_v58, %v6372_v57  ;;  %v17566_v1 = vcombine.low %v6368_v58, %v6372_v57 }
 0x66e   : > { %13301 = vmatpush1.bf16.msra.mxu1 %v17598_v20  ;;  %13261 = vmatprep.subr.bf16.mxu0 %v17463_v51  ;;  %v6500_v42 = vld [vmem:[%s26501_s3 + $0xfb8] sm:$0xff] }
 0x66f   : > { %13302 = vmatprep.subr.bf16.mxu1 %v17591_v28  ;;  %v17695_v4 = vcombine.high %v6496_v6, %v6500_v42  ;;  %v6360_v37 = vld [vmem:[%s26501_s3 + $0xb58] sm:$0xff]  ;;  %v17694_v40 = vcombine.low %v6496_v6, %v6500_v42 }
 0x670   : > { %v6364_v30 = vld [vmem:[%s26501_s3 + $0xb78] sm:$0xff] }
 0x671   : > { %13262 = vmatpush1.bf16.msra.mxu0 %v17462_v17  ;;  %v6488_v7 = vld [vmem:[%s26501_s3 + $0xf58] sm:$0xff]  ;;  %v17559_v62 = vcombine.high %v6360_v37, %v6364_v30  ;;  %v17558_v21 = vcombine.low %v6360_v37, %v6364_v30 }
 0x672   : > { %13303 = vmatpush1.bf16.msra.mxu1 %v17590_v25  ;;  %13263 = vmatprep.subr.bf16.mxu0 %v17455_v56  ;;  %v6492_v60 = vld [vmem:[%s26501_s3 + $0xf78] sm:$0xff] }
 0x673   : > { %13304 = vmatprep.subr.bf16.mxu1 %v17583_v52  ;;  %v17687_v55 = vcombine.high %v6488_v7, %v6492_v60  ;;  %v6352_v59 = vld [vmem:[%s26501_s3 + $0xb18] sm:$0xff]  ;;  %v17686_v20 = vcombine.low %v6488_v7, %v6492_v60 }
 0x674   : > { %v6356_v33 = vld [vmem:[%s26501_s3 + $0xb38] sm:$0xff] }
 0x675   : > { %13264 = vmatpush1.bf16.msra.mxu0 %v17454_v41  ;;  %v6480_v39 = vld [vmem:[%s26501_s3 + $0xf18] sm:$0xff]  ;;  %v17551_v51 = vcombine.high %v6352_v59, %v6356_v33  ;;  %v17550_v17 = vcombine.low %v6352_v59, %v6356_v33 }
 0x676   : > { %13305 = vmatpush1.bf16.msra.mxu1 %v17582_v19  ;;  %13265 = vmatprep.subr.bf16.mxu0 %v17575_v49  ;;  %v6484_v24 = vld [vmem:[%s26501_s3 + $0xf38] sm:$0xff] }
 0x677   : > { %13306 = vmatprep.subr.bf16.mxu1 %v17703_v5  ;;  %v17679_v28 = vcombine.high %v6480_v39, %v6484_v24  ;;  %v6344_v11 = vld [vmem:[%s26501_s3 + $0xad8] sm:$0xff]  ;;  %v17678_v25 = vcombine.low %v6480_v39, %v6484_v24 }
 0x678   : > { %v6348_v35 = vld [vmem:[%s26501_s3 + $0xaf8] sm:$0xff] }
 0x679   : > { %13266 = vmatpush2.bf16.msra.mxu0 %v17574_v23  ;;  %v6472_v38 = vld [vmem:[%s26501_s3 + $0xed8] sm:$0xff]  ;;  %v17543_v56 = vcombine.high %v6344_v11, %v6348_v35  ;;  %v17542_v41 = vcombine.low %v6344_v11, %v6348_v35 }
 0x67a   : > { %13307 = vmatpush2.bf16.msra.mxu1 %v17702_v61  ;;  %13267 = vmatprep.subr.bf16.mxu0 %v17567_v3  ;;  %v6476_v32 = vld [vmem:[%s26501_s3 + $0xef8] sm:$0xff] }
 0x67b   : > { %13308 = vmatprep.subr.bf16.mxu1 %v17695_v4  ;;  %v17671_v52 = vcombine.high %v6472_v38, %v6476_v32  ;;  %v6336_v31 = vld [vmem:[%s26501_s3 + $0xa98] sm:$0xff]  ;;  %v17670_v19 = vcombine.low %v6472_v38, %v6476_v32 }
 0x67c   : > { %v6340_v16 = vld [vmem:[%s26501_s3 + $0xab8] sm:$0xff] }
 0x67d   : > { %13268 = vmatpush2.bf16.msra.mxu0 %v17566_v1  ;;  %v6464_v44 = vld [vmem:[%s26501_s3 + $0xe98] sm:$0xff]  ;;  %v17535_v49 = vcombine.high %v6336_v31, %v6340_v16  ;;  %v17534_v23 = vcombine.low %v6336_v31, %v6340_v16 }
 0x67e   : > { %13309 = vmatpush2.bf16.msra.mxu1 %v17694_v40  ;;  %13269 = vmatprep.subr.bf16.mxu0 %v17559_v62  ;;  %v6468_v48 = vld [vmem:[%s26501_s3 + $0xeb8] sm:$0xff] }
 0x67f   : > { %13310 = vmatprep.subr.bf16.mxu1 %v17687_v55  ;;  %v17663_v5 = vcombine.high %v6464_v44, %v6468_v48  ;;  %v6328_v58 = vld [vmem:[%s26501_s3 + $0xa58] sm:$0xff]  ;;  %v17662_v61 = vcombine.low %v6464_v44, %v6468_v48 }
 0x680   : > { %v6332_v57 = vld [vmem:[%s26501_s3 + $0xa78] sm:$0xff] }
 0x681   : > { %13270 = vmatpush2.bf16.msra.mxu0 %v17558_v21  ;;  %v6456_v6 = vld [vmem:[%s26501_s3 + $0xe58] sm:$0xff]  ;;  %v17527_v3 = vcombine.high %v6328_v58, %v6332_v57  ;;  %v17526_v1 = vcombine.low %v6328_v58, %v6332_v57 }
 0x682   : > { %13311 = vmatpush2.bf16.msra.mxu1 %v17686_v20  ;;  %13271 = vmatprep.subr.bf16.mxu0 %v17551_v51  ;;  %v6460_v42 = vld [vmem:[%s26501_s3 + $0xe78] sm:$0xff] }
 0x683   : > { %13312 = vmatprep.subr.bf16.mxu1 %v17679_v28  ;;  %v17655_v4 = vcombine.high %v6456_v6, %v6460_v42  ;;  %v6320_v37 = vld [vmem:[%s26501_s3 + $0xa18] sm:$0xff]  ;;  %v17654_v40 = vcombine.low %v6456_v6, %v6460_v42 }
 0x684   : > { %v6324_v30 = vld [vmem:[%s26501_s3 + $0xa38] sm:$0xff] }
 0x685   : > { %13272 = vmatpush2.bf16.msra.mxu0 %v17550_v17  ;;  %v6448_v7 = vld [vmem:[%s26501_s3 + $0xe18] sm:$0xff]  ;;  %v17519_v62 = vcombine.high %v6320_v37, %v6324_v30  ;;  %v17518_v21 = vcombine.low %v6320_v37, %v6324_v30 }
 0x686   : > { %13313 = vmatpush2.bf16.msra.mxu1 %v17678_v25  ;;  %13273 = vmatprep.subr.bf16.mxu0 %v17543_v56  ;;  %v6452_v60 = vld [vmem:[%s26501_s3 + $0xe38] sm:$0xff] }
 0x687   : > { %13314 = vmatprep.subr.bf16.mxu1 %v17671_v52  ;;  %v17647_v55 = vcombine.high %v6448_v7, %v6452_v60  ;;  %v6568_v59 = vld [vmem:[%s26501_s3 + $0x11d8] sm:$0xff]  ;;  %v17646_v20 = vcombine.low %v6448_v7, %v6452_v60 }
 0x688   : > { %v6572_v33 = vld [vmem:[%s26501_s3 + $0x11f8] sm:$0xff] }
 0x689   : > { %13274 = vmatpush2.bf16.msra.mxu0 %v17542_v41  ;;  %v6696_v39 = vld [vmem:[%s26501_s3 + $0x15d8] sm:$0xff]  ;;  %v17767_v51 = vcombine.high %v6568_v59, %v6572_v33  ;;  %v17766_v38 = vcombine.low %v6568_v59, %v6572_v33 }
 0x68a   : > { %13315 = vmatpush2.bf16.msra.mxu1 %v17670_v19  ;;  %13275 = vmatprep.subr.bf16.mxu0 %v17535_v49  ;;  %v6700_v24 = vld [vmem:[%s26501_s3 + $0x15f8] sm:$0xff] }
 0x68b   : > { %13316 = vmatprep.subr.bf16.mxu1 %v17663_v5  ;;  %v17895_v28 = vcombine.high %v6696_v39, %v6700_v24  ;;  %v6560_v11 = vld [vmem:[%s26501_s3 + $0x1198] sm:$0xff]  ;;  %v17894_v25 = vcombine.low %v6696_v39, %v6700_v24 }
 0x68c   : > { %v6564_v35 = vld [vmem:[%s26501_s3 + $0x11b8] sm:$0xff] }
 0x68d   : > { %13276 = vmatpush2.bf16.msra.mxu0 %v17534_v23  ;;  %v6688_v32 = vld [vmem:[%s26501_s3 + $0x1598] sm:$0xff]  ;;  %v17759_v56 = vcombine.high %v6560_v11, %v6564_v35  ;;  %v17758_v5 = vcombine.low %v6560_v11, %v6564_v35 }
 0x68e   : > { %13317 = vmatpush2.bf16.msra.mxu1 %v17662_v61  ;;  %13277 = vmatprep.subr.bf16.mxu0 %v17527_v3  ;;  %v6692_v17 = vld [vmem:[%s26501_s3 + $0x15b8] sm:$0xff] }
 0x68f   : > { %13318 = vmatprep.subr.bf16.mxu1 %v17655_v4  ;;  %v6552_v52 = vld [vmem:[%s26501_s3 + $0x1158] sm:$0xff]  ;;  %v17887_v44 = vcombine.high %v6688_v32, %v6692_v17  ;;  %v17886_v58 = vcombine.low %v6688_v32, %v6692_v17 }
 0x690   : > { %v6556_v31 = vld [vmem:[%s26501_s3 + $0x1178] sm:$0xff] }
 0x691   : > { %13278 = vmatpush2.bf16.msra.mxu0 %v17526_v1  ;;  %v6680_v48 = vld [vmem:[%s26501_s3 + $0x1558] sm:$0xff]  ;;  %v17751_v57 = vcombine.high %v6552_v52, %v6556_v31  ;;  %v17750_v37 = vcombine.low %v6552_v52, %v6556_v31 }
 0x692   : > { %13319 = vmatpush2.bf16.msra.mxu1 %v17654_v40  ;;  %13279 = vmatprep.subr.bf16.mxu0 %v17519_v62  ;;  %v6684_v41 = vld [vmem:[%s26501_s3 + $0x1578] sm:$0xff] }
 0x693   : > { %13320 = vmatprep.subr.bf16.mxu1 %v17647_v55  ;;  %v6672_v3 = vld [vmem:[%s26501_s3 + $0x1518] sm:$0xff]  ;;  %v17878_v7 = vcombine.low %v6680_v48, %v6684_v41 }
 0x694   : > { %v6536_v62 = vld [vmem:[%s26501_s3 + $0x10d8] sm:$0xff] }
 0x695   : > { %13280 = vmatpush2.bf16.msra.mxu0 %v17518_v21  ;;  %v6540_v55 = vld [vmem:[%s26501_s3 + $0x10f8] sm:$0xff] }
 0x696   : > { %13321 = vmatpush2.bf16.msra.mxu1 %v17646_v20  ;;  %13331 = vmatprep.subr.bf16.mxu0 %v17767_v51  ;;  %v6664_v59 = vld [vmem:[%s26501_s3 + $0x14d8] sm:$0xff]  ;;  %v17735_v21 = vcombine.high %v6536_v62, %v6540_v55 }
 0x697   : > { %13372 = vmatprep.subr.bf16.mxu1 %v17895_v28  ;;  %v6668_v33 = vld [vmem:[%s26501_s3 + $0x14f8] sm:$0xff] }
 0x698   : > { %v13037_v16 = vpop.f32.mrf.mxu0  ;;  %13282 = vmatmul.mubr.bf16.vlgmr.msra.gmra.mxu0 %v22329_v46  ;;  %v17863_v20 = vcombine.high %v6664_v59, %v6668_v33  ;;  %v6528_v51 = vld [vmem:[%s26501_s3 + $0x1098] sm:$0xff]  ;;  %v17862_v32 = vcombine.low %v6664_v59, %v6668_v33 }
 0x699   : > { %v13038_v19 = vadd.f32 %v13037_v16, %v24612_v26  ;;  %v13078_v49 = vpop.f32.mrf.mxu1  ;;  %13323 = vmatmul.mubr.bf16.vlgmr.msra.gmra.mxu1 %v22331_v50  ;;  %13332 = vmatpush1.bf16.msra.mxu0 %v17766_v38  ;;  %v17879_v26 = vcombine.high %v6680_v48, %v6684_v41  ;;  %v6544_v50 = vld [vmem:[%s26501_s3 + $0x1118] sm:$0xff]  ;;  %v17734_v38 = vcombine.low %v6536_v62, %v6540_v55 }
 0x69a   : > { %13363 = vmatprep.mubr.bf16.mxu0 %v22339_v53  ;;  %13373 = vmatpush1.bf16.msra.mxu1 %v17894_v25  ;;  %v13039_v46 = vpop.f32.mrf.mxu0  ;;  %v6548_v53 = vld [vmem:[%s26501_s3 + $0x1138] sm:$0xff] }
 0x69b   : > { %v24814_v6 = vadd.f32 %v13078_v49, %v13038_v19  ;;  %13404 = vmatprep.mubr.bf16.mxu1 %v22348_v0  ;;  %v13040_v42 = vadd.f32 %v13039_v46, %v24628_v34  ;;  %v13080_v23 = vpop.f32.mrf.mxu1  ;;  %13333 = vmatprep.subr.bf16.mxu0 %v17759_v56  ;;  %v6676_v0 = vld [vmem:[%s26501_s3 + $0x1538] sm:$0xff]  ;;  %v17743_v60 = vcombine.high %v6544_v50, %v6548_v53 }
 0x69c   : > { %v13041_v61 = vpop.f32.mrf.mxu0  ;;  %13374 = vmatprep.subr.bf16.mxu1 %v17887_v44  ;;  %v17871_v40 = vcombine.high %v6672_v3, %v6676_v0  ;;  %v17742_v39 = vcombine.low %v6544_v50, %v6548_v53  ;;  %v17870_v24 = vcombine.low %v6672_v3, %v6676_v0  ;;  %v6532_v28 = vld [vmem:[%s26501_s3 + $0x10b8] sm:$0xff] }
 0x69d   : > { %v24830_v34 = vadd.f32 %v13080_v23, %v13040_v42  ;;  %v13082_v4 = vpop.f32.mrf.mxu1  ;;  %13334 = vmatpush1.bf16.msra.mxu0 %v17758_v5  ;;  %v6656_v11 = vld [vmem:[%s26501_s3 + $0x1498] sm:$0xff]  ;;  %v17727_v17 = vcombine.high %v6528_v51, %v6532_v28  ;;  %v17726_v44 = vcombine.low %v6528_v51, %v6532_v28 }
 0x69e   : > { %13375 = vmatpush1.bf16.msra.mxu1 %v17886_v58  ;;  %v13042_v30 = vpop.f32.mrf.mxu0  ;;  %13335 = vmatprep.subr.bf16.mxu0 %v17751_v57  ;;  %v6660_v35 = vld [vmem:[%s26501_s3 + $0x14b8] sm:$0xff] }
 0x69f   : > { %v13083_v1 = vpop.f32.mrf.mxu1  ;;  %13376 = vmatprep.subr.bf16.mxu1 %v17879_v26  ;;  %v17855_v25 = vcombine.high %v6656_v11, %v6660_v35  ;;  %v6520_v56 = vld [vmem:[%s26501_s3 + $0x1058] sm:$0xff]  ;;  %v17854_v48 = vcombine.low %v6656_v11, %v6660_v35 }
 0x6a0   : > { %v6524_v52 = vld [vmem:[%s26501_s3 + $0x1078] sm:$0xff] }
 0x6a1   : > { %13336 = vmatpush1.bf16.msra.mxu0 %v17750_v37  ;;  %v6648_v31 = vld [vmem:[%s26501_s3 + $0x1458] sm:$0xff]  ;;  %v17719_v41 = vcombine.high %v6520_v56, %v6524_v52  ;;  %v17718_v57 = vcombine.low %v6520_v56, %v6524_v52 }
 0x6a2   : > { %13377 = vmatpush1.bf16.msra.mxu1 %v17878_v7  ;;  %13337 = vmatprep.subr.bf16.mxu0 %v17743_v60  ;;  %v6652_v16 = vld [vmem:[%s26501_s3 + $0x1478] sm:$0xff] }
 0x6a3   : > { %13378 = vmatprep.subr.bf16.mxu1 %v17871_v40  ;;  %v17847_v19 = vcombine.high %v6648_v31, %v6652_v16  ;;  %v6512_v49 = vld [vmem:[%s26501_s3 + $0x1018] sm:$0xff]  ;;  %v17846_v42 = vcombine.low %v6648_v31, %v6652_v16 }
 0x6a4   : > { %v6516_v5 = vld [vmem:[%s26501_s3 + $0x1038] sm:$0xff] }
 0x6a5   : > { %13338 = vmatpush1.bf16.msra.mxu0 %v17742_v39  ;;  %v6640_v46 = vld [vmem:[%s26501_s3 + $0x1418] sm:$0xff]  ;;  %v17711_v23 = vcombine.high %v6512_v49, %v6516_v5  ;;  %v17710_v0 = vcombine.low %v6512_v49, %v6516_v5 }
 0x6a6   : > { %13379 = vmatpush1.bf16.msra.mxu1 %v17870_v24  ;;  %13339 = vmatprep.subr.bf16.mxu0 %v17735_v21  ;;  %v6644_v58 = vld [vmem:[%s26501_s3 + $0x1438] sm:$0xff] }
 0x6a7   : > { %13380 = vmatprep.subr.bf16.mxu1 %v17863_v20  ;;  %v17839_v26 = vcombine.high %v6640_v46, %v6644_v58  ;;  %v6632_v50 = vld [vmem:[%s26501_s3 + $0x13d8] sm:$0xff]  ;;  %v17838_v4 = vcombine.low %v6640_v46, %v6644_v58 }
 0x6a8   : > { %v6636_v53 = vld [vmem:[%s26501_s3 + $0x13f8] sm:$0xff] }
 0x6a9   : > { %13340 = vmatpush1.bf16.msra.mxu0 %v17734_v38  ;;  %v6760_v61 = vld [vmem:[%s26501_s3 + $0x17d8] sm:$0xff]  ;;  %v17831_v37 = vcombine.high %v6632_v50, %v6636_v53  ;;  %v17830_v62 = vcombine.low %v6632_v50, %v6636_v53 }
 0x6aa   : > { %13381 = vmatpush1.bf16.msra.mxu1 %v17862_v32  ;;  %13341 = vmatprep.subr.bf16.mxu0 %v17727_v17  ;;  %v6764_v3 = vld [vmem:[%s26501_s3 + $0x17f8] sm:$0xff] }
 0x6ab   : > { %13382 = vmatprep.subr.bf16.mxu1 %v17855_v25  ;;  %v17959_v30 = vcombine.high %v6760_v61, %v6764_v3  ;;  %v6624_v7 = vld [vmem:[%s26501_s3 + $0x1398] sm:$0xff]  ;;  %v17958_v55 = vcombine.low %v6760_v61, %v6764_v3 }
 0x6ac   : > { %v6628_v60 = vld [vmem:[%s26501_s3 + $0x13b8] sm:$0xff] }
 0x6ad   : > { %13342 = vmatpush1.bf16.msra.mxu0 %v17726_v44  ;;  %v6752_v1 = vld [vmem:[%s26501_s3 + $0x1798] sm:$0xff]  ;;  %v17823_v59 = vcombine.high %v6624_v7, %v6628_v60  ;;  %v17822_v51 = vcombine.low %v6624_v7, %v6628_v60 }
 0x6ae   : > { %13383 = vmatpush1.bf16.msra.mxu1 %v17854_v48  ;;  %13343 = vmatprep.subr.bf16.mxu0 %v17719_v41  ;;  %v6756_v40 = vld [vmem:[%s26501_s3 + $0x17b8] sm:$0xff] }
 0x6af   : > { %13384 = vmatprep.subr.bf16.mxu1 %v17847_v19  ;;  %v17951_v33 = vcombine.high %v6752_v1, %v6756_v40  ;;  %v6616_v39 = vld [vmem:[%s26501_s3 + $0x1358] sm:$0xff]  ;;  %v17950_v28 = vcombine.low %v6752_v1, %v6756_v40 }
 0x6b0   : > { %v6620_v24 = vld [vmem:[%s26501_s3 + $0x1378] sm:$0xff] }
 0x6b1   : > { %13344 = vmatpush1.bf16.msra.mxu0 %v17718_v57  ;;  %v6744_v21 = vld [vmem:[%s26501_s3 + $0x1758] sm:$0xff]  ;;  %v17815_v11 = vcombine.high %v6616_v39, %v6620_v24  ;;  %v17814_v56 = vcombine.low %v6616_v39, %v6620_v24 }
 0x6b2   : > { %13385 = vmatpush1.bf16.msra.mxu1 %v17846_v42  ;;  %13345 = vmatprep.subr.bf16.mxu0 %v17711_v23  ;;  %v6748_v20 = vld [vmem:[%s26501_s3 + $0x1778] sm:$0xff] }
 0x6b3   : > { %13386 = vmatprep.subr.bf16.mxu1 %v17839_v26  ;;  %v17943_v35 = vcombine.high %v6744_v21, %v6748_v20  ;;  %v6608_v38 = vld [vmem:[%s26501_s3 + $0x1318] sm:$0xff]  ;;  %v17942_v52 = vcombine.low %v6744_v21, %v6748_v20 }
 0x6b4   : > { %v6612_v32 = vld [vmem:[%s26501_s3 + $0x1338] sm:$0xff] }
 0x6b5   : > { %13346 = vmatpush1.bf16.msra.mxu0 %v17710_v0  ;;  %v6736_v17 = vld [vmem:[%s26501_s3 + $0x1718] sm:$0xff]  ;;  %v17807_v31 = vcombine.high %v6608_v38, %v6612_v32  ;;  %v17806_v49 = vcombine.low %v6608_v38, %v6612_v32 }
 0x6b6   : > { %13387 = vmatpush1.bf16.msra.mxu1 %v17838_v4  ;;  %13347 = vmatprep.subr.bf16.mxu0 %v17831_v37  ;;  %v6740_v25 = vld [vmem:[%s26501_s3 + $0x1738] sm:$0xff] }
 0x6b7   : > { %13388 = vmatprep.subr.bf16.mxu1 %v17959_v30  ;;  %v17935_v16 = vcombine.high %v6736_v17, %v6740_v25  ;;  %v6600_v44 = vld [vmem:[%s26501_s3 + $0x12d8] sm:$0xff]  ;;  %v17934_v5 = vcombine.low %v6736_v17, %v6740_v25 }
 0x6b8   : > { %v6604_v48 = vld [vmem:[%s26501_s3 + $0x12f8] sm:$0xff] }
 0x6b9   : > { %13348 = vmatpush2.bf16.msra.mxu0 %v17830_v62  ;;  %v6728_v41 = vld [vmem:[%s26501_s3 + $0x16d8] sm:$0xff]  ;;  %v17799_v46 = vcombine.high %v6600_v44, %v6604_v48  ;;  %v17798_v50 = vcombine.low %v6600_v44, %v6604_v48 }
 0x6ba   : > { %13389 = vmatpush2.bf16.msra.mxu1 %v17958_v55  ;;  %13349 = vmatprep.subr.bf16.mxu0 %v17823_v59  ;;  %v6732_v19 = vld [vmem:[%s26501_s3 + $0x16f8] sm:$0xff] }
 0x6bb   : > { %13390 = vmatprep.subr.bf16.mxu1 %v17951_v33  ;;  %v17927_v58 = vcombine.high %v6728_v41, %v6732_v19  ;;  %v6592_v57 = vld [vmem:[%s26501_s3 + $0x1298] sm:$0xff]  ;;  %v17926_v53 = vcombine.low %v6728_v41, %v6732_v19 }
 0x6bc   : > { %v6596_v42 = vld [vmem:[%s26501_s3 + $0x12b8] sm:$0xff] }
 0x6bd   : > { %13350 = vmatpush2.bf16.msra.mxu0 %v17822_v51  ;;  %v6720_v23 = vld [vmem:[%s26501_s3 + $0x1698] sm:$0xff]  ;;  %v17791_v61 = vcombine.high %v6592_v57, %v6596_v42  ;;  %v17790_v7 = vcombine.low %v6592_v57, %v6596_v42 }
 0x6be   : > { %13391 = vmatpush2.bf16.msra.mxu1 %v17950_v28  ;;  %13351 = vmatprep.subr.bf16.mxu0 %v17815_v11  ;;  %v6724_v26 = vld [vmem:[%s26501_s3 + $0x16b8] sm:$0xff] }
 0x6bf   : > { %13392 = vmatprep.subr.bf16.mxu1 %v17943_v35  ;;  %v17919_v3 = vcombine.high %v6720_v23, %v6724_v26  ;;  %v6584_v0 = vld [vmem:[%s26501_s3 + $0x1258] sm:$0xff]  ;;  %v17918_v60 = vcombine.low %v6720_v23, %v6724_v26 }
 0x6c0   : > { %v6588_v4 = vld [vmem:[%s26501_s3 + $0x1278] sm:$0xff] }
 0x6c1   : > { %13352 = vmatpush2.bf16.msra.mxu0 %v17814_v56  ;;  %v6712_v37 = vld [vmem:[%s26501_s3 + $0x1658] sm:$0xff]  ;;  %v17783_v1 = vcombine.high %v6584_v0, %v6588_v4  ;;  %v17782_v39 = vcombine.low %v6584_v0, %v6588_v4 }
 0x6c2   : > { %13393 = vmatpush2.bf16.msra.mxu1 %v17942_v52  ;;  %13353 = vmatprep.subr.bf16.mxu0 %v17807_v31  ;;  %v6716_v30 = vld [vmem:[%s26501_s3 + $0x1678] sm:$0xff] }
 0x6c3   : > { %13394 = vmatprep.subr.bf16.mxu1 %v17935_v16  ;;  %v17911_v40 = vcombine.high %v6712_v37, %v6716_v30  ;;  %v6576_v62 = vld [vmem:[%s26501_s3 + $0x1218] sm:$0xff]  ;;  %v17910_v24 = vcombine.low %v6712_v37, %v6716_v30 }
 0x6c4   : > { %v6580_v55 = vld [vmem:[%s26501_s3 + $0x1238] sm:$0xff] }
 0x6c5   : > { %13354 = vmatpush2.bf16.msra.mxu0 %v17806_v49  ;;  %v6704_v59 = vld [vmem:[%s26501_s3 + $0x1618] sm:$0xff]  ;;  %v17775_v21 = vcombine.high %v6576_v62, %v6580_v55  ;;  %v17774_v38 = vcombine.low %v6576_v62, %v6580_v55 }
 0x6c6   : > { %13395 = vmatpush2.bf16.msra.mxu1 %v17934_v5  ;;  %13355 = vmatprep.subr.bf16.mxu0 %v17799_v46  ;;  %v6708_v33 = vld [vmem:[%s26501_s3 + $0x1638] sm:$0xff] }
 0x6c7   : > { %13396 = vmatprep.subr.bf16.mxu1 %v17927_v58  ;;  %v17903_v20 = vcombine.high %v6704_v59, %v6708_v33  ;;  %v6824_v51 = vld [vmem:[%s26501_s3 + $0x19d8] sm:$0xff]  ;;  %v17902_v32 = vcombine.low %v6704_v59, %v6708_v33 }
 0x6c8   : > { %v6828_v28 = vld [vmem:[%s26501_s3 + $0x19f8] sm:$0xff] }
 0x6c9   : > { %13356 = vmatpush2.bf16.msra.mxu0 %v17798_v50  ;;  %v6952_v11 = vld [vmem:[%s26501_s3 + $0x1dd8] sm:$0xff]  ;;  %v18023_v17 = vcombine.high %v6824_v51, %v6828_v28  ;;  %v18022_v31 = vcombine.low %v6824_v51, %v6828_v28 }
 0x6ca   : > { %13397 = vmatpush2.bf16.msra.mxu1 %v17926_v53  ;;  %13357 = vmatprep.subr.bf16.mxu0 %v17791_v61  ;;  %v6956_v35 = vld [vmem:[%s26501_s3 + $0x1df8] sm:$0xff] }
 0x6cb   : > { %13398 = vmatprep.subr.bf16.mxu1 %v17919_v3  ;;  %v18151_v25 = vcombine.high %v6952_v11, %v6956_v35  ;;  %v6816_v56 = vld [vmem:[%s26501_s3 + $0x1998] sm:$0xff]  ;;  %v18150_v48 = vcombine.low %v6952_v11, %v6956_v35 }
 0x6cc   : > { %v6820_v52 = vld [vmem:[%s26501_s3 + $0x19b8] sm:$0xff] }
 0x6cd   : > { %13358 = vmatpush2.bf16.msra.mxu0 %v17790_v7  ;;  %v6944_v16 = vld [vmem:[%s26501_s3 + $0x1d98] sm:$0xff]  ;;  %v18015_v41 = vcombine.high %v6816_v56, %v6820_v52  ;;  %v18014_v26 = vcombine.low %v6816_v56, %v6820_v52 }
 0x6ce   : > { %13399 = vmatpush2.bf16.msra.mxu1 %v17918_v60  ;;  %13359 = vmatprep.subr.bf16.mxu0 %v17783_v1  ;;  %v6948_v44 = vld [vmem:[%s26501_s3 + $0x1db8] sm:$0xff] }
 0x6cf   : > { %13400 = vmatprep.subr.bf16.mxu1 %v17911_v40  ;;  %v6808_v19 = vld [vmem:[%s26501_s3 + $0x1958] sm:$0xff]  ;;  %v18143_v46 = vcombine.high %v6944_v16, %v6948_v44  ;;  %v18142_v50 = vcombine.low %v6944_v16, %v6948_v44 }
 0x6d0   : > { %v6812_v49 = vld [vmem:[%s26501_s3 + $0x1978] sm:$0xff] }
 0x6d1   : > { %13360 = vmatpush2.bf16.msra.mxu0 %v17782_v39  ;;  %v6936_v58 = vld [vmem:[%s26501_s3 + $0x1d58] sm:$0xff]  ;;  %v18007_v53 = vcombine.high %v6808_v19, %v6812_v49  ;;  %v18006_v7 = vcombine.low %v6808_v19, %v6812_v49 }
 0x6d2   : > { %13401 = vmatpush2.bf16.msra.mxu1 %v17910_v24  ;;  %13361 = vmatprep.subr.bf16.mxu0 %v17775_v21  ;;  %v6940_v57 = vld [vmem:[%s26501_s3 + $0x1d78] sm:$0xff] }
 0x6d3   : > { %13402 = vmatprep.subr.bf16.mxu1 %v17903_v20  ;;  %v6928_v37 = vld [vmem:[%s26501_s3 + $0x1d18] sm:$0xff]  ;;  %v18134_v1 = vcombine.low %v6936_v58, %v6940_v57 }
 0x6d4   : > { %v6792_v59 = vld [vmem:[%s26501_s3 + $0x18d8] sm:$0xff] }
 0x6d5   : > { %13362 = vmatpush2.bf16.msra.mxu0 %v17774_v38  ;;  %v6796_v33 = vld [vmem:[%s26501_s3 + $0x18f8] sm:$0xff] }
 0x6d6   : > { %13403 = vmatpush2.bf16.msra.mxu1 %v17902_v32  ;;  %13413 = vmatprep.subr.bf16.mxu0 %v18023_v17  ;;  %v6920_v39 = vld [vmem:[%s26501_s3 + $0x1cd8] sm:$0xff]  ;;  %v17991_v51 = vcombine.high %v6792_v59, %v6796_v33  ;;  %v17990_v17 = vcombine.low %v6792_v59, %v6796_v33 }
 0x6d7   : > { %13454 = vmatprep.subr.bf16.mxu1 %v18151_v25  ;;  %v6924_v24 = vld [vmem:[%s26501_s3 + $0x1cf8] sm:$0xff] }
 0x6d8   : > { %v13119_v5 = vpop.f32.mrf.mxu0  ;;  %13364 = vmatmul.mubr.bf16.vlgmr.msra.gmra.mxu0 %v22548_v18  ;;  %v18119_v28 = vcombine.high %v6920_v39, %v6924_v24  ;;  %v6784_v11 = vld [vmem:[%s26501_s3 + $0x1898] sm:$0xff]  ;;  %v18118_v25 = vcombine.low %v6920_v39, %v6924_v24 }
 0x6d9   : > { %v13120_v42 = vadd.f32 %v13119_v5, %v24814_v6  ;;  %v13160_v23 = vpop.f32.mrf.mxu1  ;;  %13405 = vmatmul.mubr.bf16.vlgmr.msra.gmra.mxu1 %v22550_v22  ;;  %13414 = vmatpush1.bf16.msra.mxu0 %v18022_v31  ;;  %v18135_v6 = vcombine.high %v6936_v58, %v6940_v57  ;;  %v6800_v22 = vld [vmem:[%s26501_s3 + $0x1918] sm:$0xff] }
 0x6da   : > { %13445 = vmatprep.mubr.bf16.mxu0 %v22558_v29  ;;  %13455 = vmatpush1.bf16.msra.mxu1 %v18150_v48  ;;  %v13121_v18 = vpop.f32.mrf.mxu0  ;;  %v6804_v29 = vld [vmem:[%s26501_s3 + $0x1938] sm:$0xff] }
 0x6db   : > { %v25016_v61 = vadd.f32 %v13160_v23, %v13120_v42  ;;  %13486 = vmatprep.mubr.bf16.mxu1 %v22598_v13  ;;  %v13122_v3 = vadd.f32 %v13121_v18, %v24830_v34  ;;  %v13162_v0 = vpop.f32.mrf.mxu1  ;;  %13415 = vmatprep.subr.bf16.mxu0 %v18015_v41  ;;  %v6932_v13 = vld [vmem:[%s26501_s3 + $0x1d38] sm:$0xff]  ;;  %v17999_v40 = vcombine.high %v6800_v22, %v6804_v29 }
 0x6dc   : > { %v13123_v4 = vpop.f32.mrf.mxu0  ;;  %13456 = vmatprep.subr.bf16.mxu1 %v18143_v46  ;;  %v18127_v55 = vcombine.high %v6928_v37, %v6932_v13  ;;  %v17998_v21 = vcombine.low %v6800_v22, %v6804_v29  ;;  %v18126_v20 = vcombine.low %v6928_v37, %v6932_v13  ;;  %v6788_v35 = vld [vmem:[%s26501_s3 + $0x18b8] sm:$0xff] }
 0x6dd   : > { %v25032_v34 = vadd.f32 %v13162_v0, %v13122_v3  ;;  %v13164_v30 = vpop.f32.mrf.mxu1  ;;  %13416 = vmatpush1.bf16.msra.mxu0 %v18014_v26  ;;  %v6912_v38 = vld [vmem:[%s26501_s3 + $0x1c98] sm:$0xff]  ;;  %v17983_v56 = vcombine.high %v6784_v11, %v6788_v35  ;;  %v17982_v41 = vcombine.low %v6784_v11, %v6788_v35 }
 0x6de   : > { %13457 = vmatpush1.bf16.msra.mxu1 %v18142_v50  ;;  %v13124_v60 = vpop.f32.mrf.mxu0  ;;  %13417 = vmatprep.subr.bf16.mxu0 %v18007_v53  ;;  %v6916_v32 = vld [vmem:[%s26501_s3 + $0x1cb8] sm:$0xff] }
 0x6df   : > { %v13165_v62 = vpop.f32.mrf.mxu1  ;;  %13458 = vmatprep.subr.bf16.mxu1 %v18135_v6  ;;  %v18111_v52 = vcombine.high %v6912_v38, %v6916_v32  ;;  %v6776_v31 = vld [vmem:[%s26501_s3 + $0x1858] sm:$0xff]  ;;  %v18110_v19 = vcombine.low %v6912_v38, %v6916_v32 }
 0x6e0   : > { %v6780_v16 = vld [vmem:[%s26501_s3 + $0x1878] sm:$0xff] }
 0x6e1   : > { %13418 = vmatpush1.bf16.msra.mxu0 %v18006_v7  ;;  %v6904_v44 = vld [vmem:[%s26501_s3 + $0x1c58] sm:$0xff]  ;;  %v17975_v49 = vcombine.high %v6776_v31, %v6780_v16  ;;  %v17974_v23 = vcombine.low %v6776_v31, %v6780_v16 }
 0x6e2   : > { %13459 = vmatpush1.bf16.msra.mxu1 %v18134_v1  ;;  %13419 = vmatprep.subr.bf16.mxu0 %v17999_v40  ;;  %v6908_v48 = vld [vmem:[%s26501_s3 + $0x1c78] sm:$0xff] }
 0x6e3   : > { %13460 = vmatprep.subr.bf16.mxu1 %v18127_v55  ;;  %v18103_v5 = vcombine.high %v6904_v44, %v6908_v48  ;;  %v6768_v46 = vld [vmem:[%s26501_s3 + $0x1818] sm:$0xff]  ;;  %v18102_v26 = vcombine.low %v6904_v44, %v6908_v48 }
 0x6e4   : > { %v6772_v58 = vld [vmem:[%s26501_s3 + $0x1838] sm:$0xff] }
 0x6e5   : > { %13420 = vmatpush1.bf16.msra.mxu0 %v17998_v21  ;;  %v6896_v57 = vld [vmem:[%s26501_s3 + $0x1c18] sm:$0xff]  ;;  %v17967_v18 = vcombine.high %v6768_v46, %v6772_v58  ;;  %v17966_v22 = vcombine.low %v6768_v46, %v6772_v58 }
 0x6e6   : > { %13461 = vmatpush1.bf16.msra.mxu1 %v18126_v20  ;;  %13421 = vmatprep.subr.bf16.mxu0 %v17991_v51  ;;  %v6900_v42 = vld [vmem:[%s26501_s3 + $0x1c38] sm:$0xff] }
 0x6e7   : > { %13462 = vmatprep.subr.bf16.mxu1 %v18119_v28  ;;  %v18095_v50 = vcombine.high %v6896_v57, %v6900_v42  ;;  %v6888_v53 = vld [vmem:[%s26501_s3 + $0x1bd8] sm:$0xff]  ;;  %v18094_v29 = vcombine.low %v6896_v57, %v6900_v42 }
 0x6e8   : > { %v6892_v3 = vld [vmem:[%s26501_s3 + $0x1bf8] sm:$0xff] }
 0x6e9   : > { %13422 = vmatpush1.bf16.msra.mxu0 %v17990_v17  ;;  %v7016_v0 = vld [vmem:[%s26501_s3 + $0x1fd8] sm:$0xff]  ;;  %v18087_v4 = vcombine.high %v6888_v53, %v6892_v3  ;;  %v18086_v1 = vcombine.low %v6888_v53, %v6892_v3 }
 0x6ea   : > { %13463 = vmatpush1.bf16.msra.mxu1 %v18118_v25  ;;  %13423 = vmatprep.subr.bf16.mxu0 %v17983_v56  ;;  %v7020_v6 = vld [vmem:[%s26501_s3 + $0x1ff8] sm:$0xff] }
 0x6eb   : > { %13464 = vmatprep.subr.bf16.mxu1 %v18111_v52  ;;  %v18215_v37 = vcombine.high %v7016_v0, %v7020_v6  ;;  %v6880_v13 = vld [vmem:[%s26501_s3 + $0x1b98] sm:$0xff]  ;;  %v18214_v40 = vcombine.low %v7016_v0, %v7020_v6 }
 0x6ec   : > { %v6884_v30 = vld [vmem:[%s26501_s3 + $0x1bb8] sm:$0xff] }
 0x6ed   : > { %13424 = vmatpush1.bf16.msra.mxu0 %v17982_v41  ;;  %v7008_v7 = vld [vmem:[%s26501_s3 + $0x1f98] sm:$0xff]  ;;  %v18079_v62 = vcombine.high %v6880_v13, %v6884_v30  ;;  %v18078_v21 = vcombine.low %v6880_v13, %v6884_v30 }
 0x6ee   : > { %13465 = vmatpush1.bf16.msra.mxu1 %v18110_v19  ;;  %13425 = vmatprep.subr.bf16.mxu0 %v17975_v49  ;;  %v7012_v60 = vld [vmem:[%s26501_s3 + $0x1fb8] sm:$0xff] }
 0x6ef   : > { %13466 = vmatprep.subr.bf16.mxu1 %v18103_v5  ;;  %v18207_v55 = vcombine.high %v7008_v7, %v7012_v60  ;;  %v6872_v59 = vld [vmem:[%s26501_s3 + $0x1b58] sm:$0xff]  ;;  %v18206_v20 = vcombine.low %v7008_v7, %v7012_v60 }
 0x6f0   : > { %v6876_v33 = vld [vmem:[%s26501_s3 + $0x1b78] sm:$0xff] }
 0x6f1   : > { %13426 = vmatpush1.bf16.msra.mxu0 %v17974_v23  ;;  %v7000_v39 = vld [vmem:[%s26501_s3 + $0x1f58] sm:$0xff]  ;;  %v18071_v51 = vcombine.high %v6872_v59, %v6876_v33  ;;  %v18070_v17 = vcombine.low %v6872_v59, %v6876_v33 }
 0x6f2   : > { %13467 = vmatpush1.bf16.msra.mxu1 %v18102_v26  ;;  %13427 = vmatprep.subr.bf16.mxu0 %v17967_v18  ;;  %v7004_v24 = vld [vmem:[%s26501_s3 + $0x1f78] sm:$0xff] }
 0x6f3   : > { %13468 = vmatprep.subr.bf16.mxu1 %v18095_v50  ;;  %v18199_v28 = vcombine.high %v7000_v39, %v7004_v24  ;;  %v6864_v11 = vld [vmem:[%s26501_s3 + $0x1b18] sm:$0xff]  ;;  %v18198_v25 = vcombine.low %v7000_v39, %v7004_v24  ;;  %v18647_v39 = vld [vmem:[%s26503_s5 + $0x154] ss:$24 sps:$4 sm:$0xff]  }
 0x6f4   : > { %v6868_v35 = vld [vmem:[%s26501_s3 + $0x1b38] sm:$0xff]  ;;  %v18650_v24 = vld [vmem:[%s26503_s5 + $0x454] ss:$24 sps:$4 sm:$0xff]  }
 0x6f5   : > { %13428 = vmatpush1.bf16.msra.mxu0 %v17966_v22  ;;  %v6992_v38 = vld [vmem:[%s26501_s3 + $0x1f18] sm:$0xff]  ;;  %v18063_v56 = vcombine.high %v6864_v11, %v6868_v35  ;;  %v18062_v41 = vcombine.low %v6864_v11, %v6868_v35  ;;  %v18645_v11 = vld [vmem:[%s26503_s5 + $0x150] ss:$24 sps:$4 sm:$0xff]  }
 0x6f6   : > { %13469 = vmatpush1.bf16.msra.mxu1 %v18094_v29  ;;  %13429 = vmatprep.subr.bf16.mxu0 %v18087_v4  ;;  %v6996_v32 = vld [vmem:[%s26501_s3 + $0x1f38] sm:$0xff]  ;;  %v18648_v35 = vld [vmem:[%s26503_s5 + $0x450] ss:$24 sps:$4 sm:$0xff]  }
 0x6f7   : > { %13470 = vmatprep.subr.bf16.mxu1 %v18215_v37  ;;  %v18191_v52 = vcombine.high %v6992_v38, %v6996_v32  ;;  %v6856_v31 = vld [vmem:[%s26501_s3 + $0x1ad8] sm:$0xff]  ;;  %v18190_v19 = vcombine.low %v6992_v38, %v6996_v32 }
 0x6f8   : > { %v6860_v16 = vld [vmem:[%s26501_s3 + $0x1af8] sm:$0xff] }
 0x6f9   : > { %13430 = vmatpush2.bf16.msra.mxu0 %v18086_v1  ;;  %v6984_v44 = vld [vmem:[%s26501_s3 + $0x1ed8] sm:$0xff]  ;;  %v18055_v49 = vcombine.high %v6856_v31, %v6860_v16  ;;  %v18054_v23 = vcombine.low %v6856_v31, %v6860_v16  ;;  %v18659_v31 = vld [vmem:[%s26503_s5 + $0xf4] ss:$24 sps:$4 sm:$0xff]  }
 0x6fa   : > { %13471 = vmatpush2.bf16.msra.mxu1 %v18214_v40  ;;  %13431 = vmatprep.subr.bf16.mxu0 %v18079_v62  ;;  %v6988_v48 = vld [vmem:[%s26501_s3 + $0x1ef8] sm:$0xff] }
 0x6fb   : > { %13472 = vmatprep.subr.bf16.mxu1 %v18207_v55  ;;  %v18183_v5 = vcombine.high %v6984_v44, %v6988_v48  ;;  %v6848_v46 = vld [vmem:[%s26501_s3 + $0x1a98] sm:$0xff]  ;;  %v18182_v26 = vcombine.low %v6984_v44, %v6988_v48  ;;  %v18662_v48 = vld [vmem:[%s26503_s5 + $0x3f4] ss:$24 sps:$4 sm:$0xff]  }
 0x6fc   : > { %v6852_v58 = vld [vmem:[%s26501_s3 + $0x1ab8] sm:$0xff] }
 0x6fd   : > { %13432 = vmatpush2.bf16.msra.mxu0 %v18078_v21  ;;  %v6976_v57 = vld [vmem:[%s26501_s3 + $0x1e98] sm:$0xff]  ;;  %v18047_v18 = vcombine.high %v6848_v46, %v6852_v58  ;;  %v18046_v22 = vcombine.low %v6848_v46, %v6852_v58  ;;  %v13496_v21 = vmax.f32 %v23410_v43, 0.0  ;;  %v18660_v58 = vld [vmem:[%s26503_s5 + $0x3f0] ss:$24 sps:$4 sm:$0xff]  }
 0x6fe   : > { %13473 = vmatpush2.bf16.msra.mxu1 %v18206_v20  ;;  %13433 = vmatprep.subr.bf16.mxu0 %v18071_v51  ;;  %v6980_v42 = vld [vmem:[%s26501_s3 + $0x1eb8] sm:$0xff]  ;;  %v13498_v20 = vmax.f32 %v24221_v45, 0.0  ;;  %v19226_v51 = vld [vmem:[%s26502_s4] sm:$0xff] }
 0x6ff   : > { %13474 = vmatprep.subr.bf16.mxu1 %v18199_v28  ;;  %v18175_v50 = vcombine.high %v6976_v57, %v6980_v42  ;;  %v6840_v53 = vld [vmem:[%s26501_s3 + $0x1a58] sm:$0xff]  ;;  %v18174_v29 = vcombine.low %v6976_v57, %v6980_v42  ;;  %v7050_v28 = vrot.slane %v19226_v51, %v21242_v27  ;;  %v7054_v43 = vrot.slane %v19226_v51, %v21257_v36 }
 0x700   : > { %v6844_v3 = vld [vmem:[%s26501_s3 + $0x1a78] sm:$0xff]  ;;  %v25200_v38 = vpack.c.bf16 %v13496_v21, %v13496_v21 }
 0x701   : > { %13434 = vmatpush2.bf16.msra.mxu0 %v18070_v17  ;;  %v6968_v0 = vld [vmem:[%s26501_s3 + $0x1e58] sm:$0xff]  ;;  %v18039_v4 = vcombine.high %v6840_v53, %v6844_v3  ;;  %v18038_v1 = vcombine.low %v6840_v53, %v6844_v3  ;;  %v25206_v17 = vpack.c.bf16 %v13498_v20, %v13498_v20  ;;  %v18674_v53 = vld [vmem:[%s26503_s5 + $0x394] ss:$24 sps:$4 sm:$0xff]   ;;  %v18669_v3 = vld [vmem:[%s26503_s5 + $0x90] ss:$24 sps:$4 sm:$0xff]  }
 0x702   : > { %13475 = vmatpush2.bf16.msra.mxu1 %v18198_v25  ;;  %13435 = vmatprep.subr.bf16.mxu0 %v18063_v56  ;;  %v6972_v6 = vld [vmem:[%s26501_s3 + $0x1e78] sm:$0xff] }
 0x703   : > { %13476 = vmatprep.subr.bf16.mxu1 %v18191_v52  ;;  %v18167_v37 = vcombine.high %v6968_v0, %v6972_v6  ;;  %v6832_v13 = vld [vmem:[%s26501_s3 + $0x1a18] sm:$0xff]  ;;  %v18166_v40 = vcombine.low %v6968_v0, %v6972_v6  ;;  %v18672_v0 = vld [vmem:[%s26503_s5 + $0x390] ss:$24 sps:$4 sm:$0xff]  }
 0x704   : > { %v6836_v30 = vld [vmem:[%s26501_s3 + $0x1a38] sm:$0xff] }
 0x705   : > { %13436 = vmatpush2.bf16.msra.mxu0 %v18062_v41  ;;  %v6960_v7 = vld [vmem:[%s26501_s3 + $0x1e18] sm:$0xff]  ;;  %v18031_v62 = vcombine.high %v6832_v13, %v6836_v30  ;;  %v18030_v59 = vcombine.low %v6832_v13, %v6836_v30  ;;  %v18686_v13 = vld [vmem:[%s26503_s5 + $0x334] ss:$24 sps:$4 sm:$0xff]   ;;  %v18681_v30 = vld [vmem:[%s26503_s5 + $0x30] ss:$24 sps:$4 sm:$0xff]  }
 0x706   : > { %13477 = vmatpush2.bf16.msra.mxu1 %v18190_v19  ;;  %13437 = vmatprep.subr.bf16.mxu0 %v18055_v49  ;;  %v6964_v60 = vld [vmem:[%s26501_s3 + $0x1e38] sm:$0xff] }
 0x707   : > { %13478 = vmatprep.subr.bf16.mxu1 %v18183_v5  ;;  %v18159_v55 = vcombine.high %v6960_v7, %v6964_v60  ;;  %v18158_v33 = vcombine.low %v6960_v7, %v6964_v60  ;;  %v18653_v45 = vld [vmem:[%s26503_s5 + $0x124] ss:$24 sps:$4 sm:$0xff]   ;;  %v18651_v36 = vld [vmem:[%s26503_s5 + $0x120] ss:$24 sps:$4 sm:$0xff]   ;;  %v18657_v5 = vld [vmem:[%s26503_s5 + $0xf0] ss:$24 sps:$4 sm:$0xff]  }
 0x708   : > { %v18656_v32 = vld [vmem:[%s26503_s5 + $0x424] ss:$24 sps:$4 sm:$0xff]   ;;  %v18684_v7 = vld [vmem:[%s26503_s5 + $0x330] ss:$24 sps:$4 sm:$0xff]   ;;  %v18699_v20 = vld [vmem:[%s26503_s5 + $0x2a0] ss:$24 sps:$4 sm:$0xff]  }
 0x709   : > { %13438 = vmatpush2.bf16.msra.mxu0 %v18054_v23  ;;  %v18665_v57 = vld [vmem:[%s26503_s5 + $0xc4] ss:$24 sps:$4 sm:$0xff]   ;;  %v18702_v51 = vld [vmem:[%s26503_s5 + $0x5a0] ss:$24 sps:$4 sm:$0xff]  }
 0x70a   : > { %13479 = vmatpush2.bf16.msra.mxu1 %v18182_v26  ;;  %13439 = vmatprep.subr.bf16.mxu0 %v18047_v18  ;;  %v18668_v23 = vld [vmem:[%s26503_s5 + $0x3c4] ss:$24 sps:$4 sm:$0xff]   ;;  %v18663_v26 = vld [vmem:[%s26503_s5 + $0xc0] ss:$24 sps:$4 sm:$0xff]  }
 0x70b   : > { %13480 = vmatprep.subr.bf16.mxu1 %v18175_v50  ;;  %v18666_v18 = vld [vmem:[%s26503_s5 + $0x3c0] ss:$24 sps:$4 sm:$0xff]   ;;  %v18671_v50 = vld [vmem:[%s26503_s5 + $0x94] ss:$24 sps:$4 sm:$0xff]   ;;  %v18677_v6 = vld [vmem:[%s26503_s5 + $0x64] ss:$24 sps:$4 sm:$0xff]  }
 0x70c   : > { %v18689_v60 = vld [vmem:[%s26503_s5 + $0x4] ss:$24 sps:$4 sm:$0xff]  }
 0x70d   : > { %13440 = vmatpush2.bf16.msra.mxu0 %v18046_v22  ;;  %v18680_v22 = vld [vmem:[%s26503_s5 + $0x364] ss:$24 sps:$4 sm:$0xff]  }
 0x70e   : > { %13481 = vmatpush2.bf16.msra.mxu1 %v18174_v29  ;;  %13441 = vmatprep.subr.bf16.mxu0 %v18039_v4  ;;  %v18675_v29 = vld [vmem:[%s26503_s5 + $0x60] ss:$24 sps:$4 sm:$0xff]   ;;  %v18704_v21 = vld [vmem:[%s26503_s5 + $0x5a4] ss:$24 sps:$4 sm:$0xff]  }
 0x70f   : > { %13482 = vmatprep.subr.bf16.mxu1 %v18167_v37  ;;  %v18678_v4 = vld [vmem:[%s26503_s5 + $0x360] ss:$24 sps:$4 sm:$0xff]   ;;  %v18683_v37 = vld [vmem:[%s26503_s5 + $0x34] ss:$24 sps:$4 sm:$0xff]  }
 0x711   : > { %13442 = vmatpush2.bf16.msra.mxu0 %v18038_v1  ;;  %v18692_v1 = vld [vmem:[%s26503_s5 + $0x304] ss:$24 sps:$4 sm:$0xff]  }
 0x712   : > { %13483 = vmatpush2.bf16.msra.mxu1 %v18166_v40  ;;  %13443 = vmatprep.subr.bf16.mxu0 %v18031_v62  ;;  %v18687_v40 = vld [vmem:[%s26503_s5] ss:$24 sps:$4 sm:$0xff]  }
 0x713   : > { %13484 = vmatprep.subr.bf16.mxu1 %v18159_v55  ;;  %v18690_v62 = vld [vmem:[%s26503_s5 + $0x300] ss:$24 sps:$4 sm:$0xff]   ;;  %v18695_v55 = vld [vmem:[%s26503_s5 + $0x2d4] ss:$24 sps:$4 sm:$0xff]  }
 0x715   : > { %13444 = vmatpush2.bf16.msra.mxu0 %v18030_v59  ;;  %v18698_v59 = vld [vmem:[%s26503_s5 + $0x5d4] ss:$24 sps:$4 sm:$0xff]  }
 0x716   : > { %13485 = vmatpush2.bf16.msra.mxu1 %v18158_v33  ;;  %15847 = vmatprep.subr.bf16.mxu0 %v18647_v39  ;;  %v18693_v33 = vld [vmem:[%s26503_s5 + $0x2d0] ss:$24 sps:$4 sm:$0xff]  }
 0x717   : > { %15888 = vmatprep.subr.bf16.mxu1 %v18650_v24  ;;  %v18696_v39 = vld [vmem:[%s26503_s5 + $0x5d0] ss:$24 sps:$4 sm:$0xff]   ;;  %v18701_v24 = vld [vmem:[%s26503_s5 + $0x2a4] ss:$24 sps:$4 sm:$0xff]  }
 0x718   : > { %v13201_v27 = vpop.f32.mrf.mxu0  ;;  %13446 = vmatmul.mubr.bf16.vlgmr.msra.gmra.mxu0 %v22769_v47  ;;  %v18654_v47 = vld [vmem:[%s26503_s5 + $0x420] ss:$24 sps:$4 sm:$0xff]  }
 0x719   : > { %v13202_v25 = vadd.f32 %v13201_v27, %v7050_v28  ;;  %v13242_v56 = vpop.f32.mrf.mxu1  ;;  %13487 = vmatmul.mubr.bf16.vlgmr.msra.gmra.mxu1 %v22771_v2  ;;  %15848 = vmatpush1.bf16.msra.mxu0 %v18645_v11  ;;  %v18707_v28 = vld [vmem:[%s26503_s5 + $0x274] ss:$24 sps:$4 sm:$0xff]   ;;  %v18716_v27 = vld [vmem:[%s26503_s5 + $0x544] ss:$24 sps:$4 sm:$0xff]  }
 0x71a   : > { %15879 = vmatprep.mubr.bf16.mxu0 %v25200_v38  ;;  %15889 = vmatpush1.bf16.msra.mxu1 %v18648_v35  ;;  %v13203_v52 = vpop.f32.mrf.mxu0  ;;  %v18710_v11 = vld [vmem:[%s26503_s5 + $0x574] ss:$24 sps:$4 sm:$0xff]   ;;  %v18705_v35 = vld [vmem:[%s26503_s5 + $0x270] ss:$24 sps:$4 sm:$0xff]  }
 0x71b   : > { %v25219_v16 = vadd.f32 %v13242_v56, %v13202_v25  ;;  %15920 = vmatprep.mubr.bf16.mxu1 %v25206_v17  ;;  %v13204_v2 = vadd.f32 %v13203_v52, %v7054_v43  ;;  %v13244_v44 = vpop.f32.mrf.mxu1  ;;  %15849 = vmatprep.subr.bf16.mxu0 %v18653_v45  ;;  %v18708_v43 = vld [vmem:[%s26503_s5 + $0x570] ss:$24 sps:$4 sm:$0xff]   ;;  %v18713_v45 = vld [vmem:[%s26503_s5 + $0x244] ss:$24 sps:$4 sm:$0xff]   ;;  %v18714_v25 = vld [vmem:[%s26503_s5 + $0x540] ss:$24 sps:$4 sm:$0xff]  }
 0x71c   : > { %v13205_v41 = vpop.f32.mrf.mxu0  ;;  %15890 = vmatprep.subr.bf16.mxu1 %v18656_v32  ;;  %v18711_v32 = vld [vmem:[%s26503_s5 + $0x240] ss:$24 sps:$4 sm:$0xff]   ;;  %v18719_v56 = vld [vmem:[%s26503_s5 + $0x214] ss:$24 sps:$4 sm:$0xff]   ;;  %v18717_v52 = vld [vmem:[%s26503_s5 + $0x210] ss:$24 sps:$4 sm:$0xff]  }
 0x71d   : > { %v25225_v19 = vadd.f32 %v13244_v44, %v13204_v2  ;;  %v13246_v49 = vpop.f32.mrf.mxu1  ;;  %15850 = vmatpush1.bf16.msra.mxu0 %v18651_v36  ;;  %v18722_v36 = vld [vmem:[%s26503_s5 + $0x514] ss:$24 sps:$4 sm:$0xff]   ;;  %v18728_v2 = vld [vmem:[%s26503_s5 + $0x4e4] ss:$24 sps:$4 sm:$0xff]   ;;  %v18723_v44 = vld [vmem:[%s26503_s5 + $0x1e0] ss:$24 sps:$4 sm:$0xff]  }
 0x71e   : > { %15891 = vmatpush1.bf16.msra.mxu1 %v18654_v47  ;;  %v13206_v46 = vpop.f32.mrf.mxu0  ;;  %15851 = vmatprep.subr.bf16.mxu0 %v18659_v31  ;;  %v18720_v47 = vld [vmem:[%s26503_s5 + $0x510] ss:$24 sps:$4 sm:$0xff]   ;;  %v18725_v31 = vld [vmem:[%s26503_s5 + $0x1e4] ss:$24 sps:$4 sm:$0xff]   ;;  %v18731_v41 = vld [vmem:[%s26503_s5 + $0x1b4] ss:$24 sps:$4 sm:$0xff]  }
 0x71f   : > { %v13247_v42 = vpop.f32.mrf.mxu1  ;;  %15892 = vmatprep.subr.bf16.mxu1 %v18662_v48  ;;  %v18726_v48 = vld [vmem:[%s26503_s5 + $0x4e0] ss:$24 sps:$4 sm:$0xff]   ;;  %v18734_v49 = vld [vmem:[%s26503_s5 + $0x4b4] ss:$24 sps:$4 sm:$0xff]   ;;  %v18732_v46 = vld [vmem:[%s26503_s5 + $0x4b0] ss:$24 sps:$4 sm:$0xff]  }
 0x720   : > { %v18735_v42 = vld [vmem:[%s26503_s5 + $0x180] ss:$24 sps:$4 sm:$0xff]  }
 0x721   : > { %15852 = vmatpush1.bf16.msra.mxu0 %v18657_v5  ;;  %v18729_v5 = vld [vmem:[%s26503_s5 + $0x1b0] ss:$24 sps:$4 sm:$0xff]  }
 0x722   : > { %15893 = vmatpush1.bf16.msra.mxu1 %v18660_v58  ;;  %15853 = vmatprep.subr.bf16.mxu0 %v18665_v57  ;;  %v18737_v58 = vld [vmem:[%s26503_s5 + $0x184] ss:$24 sps:$4 sm:$0xff]  }
 0x723   : > { %15894 = vmatprep.subr.bf16.mxu1 %v18668_v23  ;;  %v18740_v57 = vld [vmem:[%s26503_s5 + $0x484] ss:$24 sps:$4 sm:$0xff]   ;;  %v13495_v23 = vmax.f32 %v23394_v12, 0.0  ;;  %v18741_v12 = vld [vmem:[%s26503_s5 + $0x750] ss:$24 sps:$4 sm:$0xff]  }
 0x725   : > { %15854 = vmatpush1.bf16.msra.mxu0 %v18663_v26  ;;  %v18738_v26 = vld [vmem:[%s26503_s5 + $0x480] ss:$24 sps:$4 sm:$0xff]  }
 0x726   : > { %15895 = vmatpush1.bf16.msra.mxu1 %v18666_v18  ;;  %15855 = vmatprep.subr.bf16.mxu0 %v18671_v50  ;;  %v18743_v18 = vld [vmem:[%s26503_s5 + $0x754] ss:$24 sps:$4 sm:$0xff]   ;;  %v13497_v50 = vmax.f32 %v24205_v9, 0.0  ;;  %v18746_v9 = vld [vmem:[%s26503_s5 + $0x724] ss:$24 sps:$4 sm:$0xff]  }
 0x727   : > { %15896 = vmatprep.subr.bf16.mxu1 %v18674_v53  ;;  %v18800_v53 = vld [vmem:[%s26503_s5 + $0xa54] ss:$24 sps:$4 sm:$0xff]  }
 0x729   : > { %15856 = vmatpush1.bf16.msra.mxu0 %v18669_v3  ;;  %v13500_v3 = vmax.f32 %v25032_v34, 0.0 }
 0x72a   : > { %15897 = vmatpush1.bf16.msra.mxu1 %v18672_v0  ;;  %15857 = vmatprep.subr.bf16.mxu0 %v18677_v6  ;;  %v25401_v0 = vpack.c.bf16 %v13495_v23, %v13495_v23  ;;  %v25406_v6 = vpack.c.bf16 %v13497_v50, %v13497_v50  ;;  %v18846_v23 = vld [vmem:[%s26503_s5 + $0xbd0] ss:$24 sps:$4 sm:$0xff]   ;;  %v18773_v50 = vld [vmem:[%s26503_s5 + $0x874] ss:$24 sps:$4 sm:$0xff]  }
 0x72b   : > { %15898 = vmatprep.subr.bf16.mxu1 %v18680_v22  ;;  %v18798_v22 = vld [vmem:[%s26503_s5 + $0xa50] ss:$24 sps:$4 sm:$0xff]   ;;  %v25411_v34 = vpack.c.bf16 %v13500_v3, %v13500_v3  ;;  %v18860_v3 = vld [vmem:[%s26503_s5 + $0xb74] ss:$24 sps:$4 sm:$0xff]  }
 0x72d   : > { %15858 = vmatpush1.bf16.msra.mxu0 %v18675_v29 }
 0x72e   : > { %15899 = vmatpush1.bf16.msra.mxu1 %v18678_v4  ;;  %15859 = vmatprep.subr.bf16.mxu0 %v18683_v37  ;;  %v18806_v4 = vld [vmem:[%s26503_s5 + $0xa24] ss:$24 sps:$4 sm:$0xff]  }
 0x72f   : > { %15900 = vmatprep.subr.bf16.mxu1 %v18686_v13 }
 0x731   : > { %15860 = vmatpush1.bf16.msra.mxu0 %v18681_v30  ;;  %v18744_v30 = vld [vmem:[%s26503_s5 + $0x720] ss:$24 sps:$4 sm:$0xff]  }
 0x732   : > { %15901 = vmatpush1.bf16.msra.mxu1 %v18684_v7  ;;  %15861 = vmatprep.subr.bf16.mxu0 %v18689_v60  ;;  %v18749_v60 = vld [vmem:[%s26503_s5 + $0x6f4] ss:$24 sps:$4 sm:$0xff]  }
 0x733   : > { %15902 = vmatprep.subr.bf16.mxu1 %v18692_v1 }
 0x735   : > { %15862 = vmatpush1.bf16.msra.mxu0 %v18687_v40 }
 0x736   : > { %15903 = vmatpush1.bf16.msra.mxu1 %v18690_v62  ;;  %15863 = vmatprep.subr.bf16.mxu0 %v18695_v55  ;;  %v18804_v62 = vld [vmem:[%s26503_s5 + $0xa20] ss:$24 sps:$4 sm:$0xff]  }
 0x737   : > { %15904 = vmatprep.subr.bf16.mxu1 %v18698_v59  ;;  %v18812_v59 = vld [vmem:[%s26503_s5 + $0x9f4] ss:$24 sps:$4 sm:$0xff]  }
 0x739   : > { %15864 = vmatpush2.bf16.msra.mxu0 %v18693_v33 }
 0x73a   : > { %15905 = vmatpush2.bf16.msra.mxu1 %v18696_v39  ;;  %15865 = vmatprep.subr.bf16.mxu0 %v18701_v24 }
 0x73b   : > { %15906 = vmatprep.subr.bf16.mxu1 %v18704_v21  ;;  %v18752_v21 = vld [vmem:[%s26503_s5 + $0x6c4] ss:$24 sps:$4 sm:$0xff]  }
 0x73d   : > { %15866 = vmatpush2.bf16.msra.mxu0 %v18699_v20 }
 0x73e   : > { %15907 = vmatpush2.bf16.msra.mxu1 %v18702_v51  ;;  %15867 = vmatprep.subr.bf16.mxu0 %v18707_v28  ;;  %v18810_v51 = vld [vmem:[%s26503_s5 + $0x9f0] ss:$24 sps:$4 sm:$0xff]   ;;  %v18818_v28 = vld [vmem:[%s26503_s5 + $0x9c4] ss:$24 sps:$4 sm:$0xff]  }
 0x73f   : > { %15908 = vmatprep.subr.bf16.mxu1 %v18710_v11  ;;  %v18750_v11 = vld [vmem:[%s26503_s5 + $0x6c0] ss:$24 sps:$4 sm:$0xff]  }
 0x741   : > { %15868 = vmatpush2.bf16.msra.mxu0 %v18705_v35  ;;  %v18755_v35 = vld [vmem:[%s26503_s5 + $0x694] ss:$24 sps:$4 sm:$0xff]  }
 0x742   : > { %15909 = vmatpush2.bf16.msra.mxu1 %v18708_v43  ;;  %15869 = vmatprep.subr.bf16.mxu0 %v18713_v45  ;;  %v18816_v43 = vld [vmem:[%s26503_s5 + $0x9c0] ss:$24 sps:$4 sm:$0xff]   ;;  %v18824_v45 = vld [vmem:[%s26503_s5 + $0x994] ss:$24 sps:$4 sm:$0xff]  }
 0x743   : > { %15910 = vmatprep.subr.bf16.mxu1 %v18716_v27  ;;  %v18753_v27 = vld [vmem:[%s26503_s5 + $0x690] ss:$24 sps:$4 sm:$0xff]  }
 0x745   : > { %15870 = vmatpush2.bf16.msra.mxu0 %v18711_v32  ;;  %v18758_v32 = vld [vmem:[%s26503_s5 + $0x664] ss:$24 sps:$4 sm:$0xff]  }
 0x746   : > { %15911 = vmatpush2.bf16.msra.mxu1 %v18714_v25  ;;  %15871 = vmatprep.subr.bf16.mxu0 %v18719_v56  ;;  %v18822_v25 = vld [vmem:[%s26503_s5 + $0x990] ss:$24 sps:$4 sm:$0xff]   ;;  %v18830_v56 = vld [vmem:[%s26503_s5 + $0x964] ss:$24 sps:$4 sm:$0xff]  }
 0x747   : > { %15912 = vmatprep.subr.bf16.mxu1 %v18722_v36  ;;  %v18756_v36 = vld [vmem:[%s26503_s5 + $0x660] ss:$24 sps:$4 sm:$0xff]  }
 0x749   : > { %15872 = vmatpush2.bf16.msra.mxu0 %v18717_v52  ;;  %v18761_v52 = vld [vmem:[%s26503_s5 + $0x634] ss:$24 sps:$4 sm:$0xff]  }
 0x74a   : > { %15913 = vmatpush2.bf16.msra.mxu1 %v18720_v47  ;;  %15873 = vmatprep.subr.bf16.mxu0 %v18725_v31  ;;  %v18828_v47 = vld [vmem:[%s26503_s5 + $0x960] ss:$24 sps:$4 sm:$0xff]   ;;  %v18836_v31 = vld [vmem:[%s26503_s5 + $0x934] ss:$24 sps:$4 sm:$0xff]  }
 0x74b   : > { %15914 = vmatprep.subr.bf16.mxu1 %v18728_v2  ;;  %v18759_v2 = vld [vmem:[%s26503_s5 + $0x630] ss:$24 sps:$4 sm:$0xff]  }
 0x74d   : > { %15874 = vmatpush2.bf16.msra.mxu0 %v18723_v44  ;;  %v18764_v44 = vld [vmem:[%s26503_s5 + $0x604] ss:$24 sps:$4 sm:$0xff]  }
 0x74e   : > { %15915 = vmatpush2.bf16.msra.mxu1 %v18726_v48  ;;  %15875 = vmatprep.subr.bf16.mxu0 %v18731_v41  ;;  %v18834_v48 = vld [vmem:[%s26503_s5 + $0x930] ss:$24 sps:$4 sm:$0xff]   ;;  %v18842_v41 = vld [vmem:[%s26503_s5 + $0x904] ss:$24 sps:$4 sm:$0xff]  }
 0x74f   : > { %15916 = vmatprep.subr.bf16.mxu1 %v18734_v49  ;;  %v18762_v49 = vld [vmem:[%s26503_s5 + $0x600] ss:$24 sps:$4 sm:$0xff]  }
 0x751   : > { %15876 = vmatpush2.bf16.msra.mxu0 %v18729_v5  ;;  %v18767_v5 = vld [vmem:[%s26503_s5 + $0x8d4] ss:$24 sps:$4 sm:$0xff]  }
 0x752   : > { %15917 = vmatpush2.bf16.msra.mxu1 %v18732_v46  ;;  %15877 = vmatprep.subr.bf16.mxu0 %v18737_v58  ;;  %v18840_v46 = vld [vmem:[%s26503_s5 + $0x900] ss:$24 sps:$4 sm:$0xff]   ;;  %v18848_v58 = vld [vmem:[%s26503_s5 + $0xbd4] ss:$24 sps:$4 sm:$0xff]  }
 0x753   : > { %15918 = vmatprep.subr.bf16.mxu1 %v18740_v57  ;;  %v18765_v57 = vld [vmem:[%s26503_s5 + $0x8d0] ss:$24 sps:$4 sm:$0xff]  }
 0x755   : > { %15878 = vmatpush2.bf16.msra.mxu0 %v18735_v42  ;;  %v18770_v42 = vld [vmem:[%s26503_s5 + $0x8a4] ss:$24 sps:$4 sm:$0xff]  }
 0x756   : > { %15919 = vmatpush2.bf16.msra.mxu1 %v18738_v26  ;;  %15929 = vmatprep.subr.bf16.mxu0 %v18743_v18  ;;  %v18854_v26 = vld [vmem:[%s26503_s5 + $0xba4] ss:$24 sps:$4 sm:$0xff]   ;;  %v18768_v18 = vld [vmem:[%s26503_s5 + $0x8a0] ss:$24 sps:$4 sm:$0xff]  }
 0x757   : > { %15970 = vmatprep.subr.bf16.mxu1 %v18800_v53  ;;  %v18852_v53 = vld [vmem:[%s26503_s5 + $0xba0] ss:$24 sps:$4 sm:$0xff]  }
 0x758   : > { %v13283_v29 = vpop.f32.mrf.mxu0  ;;  %15880 = vmatmul.mubr.bf16.vlgmr.msra.gmra.mxu0 %v25401_v0 }
 0x759   : > { %v13284_v37 = vadd.f32 %v13283_v29, %v25219_v16  ;;  %v13324_v13 = vpop.f32.mrf.mxu1  ;;  %15921 = vmatmul.mubr.bf16.vlgmr.msra.gmra.mxu1 %v25406_v6  ;;  %15930 = vmatpush1.bf16.msra.mxu0 %v18741_v12  ;;  %v18771_v12 = vld [vmem:[%s26503_s5 + $0x870] ss:$24 sps:$4 sm:$0xff]   ;;  %v18866_v29 = vld [vmem:[%s26503_s5 + $0xb44] ss:$24 sps:$4 sm:$0xff]  }
 0x75a   : > { %15961 = vmatprep.mubr.bf16.mxu0 %v25411_v34  ;;  %v13285_v7 = vpop.f32.mrf.mxu0  ;;  %15931 = vmatprep.subr.bf16.mxu0 %v18746_v9  ;;  %v18776_v9 = vld [vmem:[%s26503_s5 + $0x844] ss:$24 sps:$4 sm:$0xff]  }
 0x75b   : > { %v25426_v1 = vadd.f32 %v13324_v13, %v13284_v37  ;;  %v13286_v16 = vadd.f32 %v13285_v7, %v25225_v19  ;;  %v13326_v40 = vpop.f32.mrf.mxu1  ;;  %15971 = vmatpush1.bf16.msra.mxu1 %v18798_v22  ;;  %v18747_v19 = vld [vmem:[%s26503_s5 + $0x6f0] ss:$24 sps:$4 sm:$0xff]   ;;  %v18779_v37 = vld [vmem:[%s26503_s5 + $0x814] ss:$24 sps:$4 sm:$0xff]   ;;  %v18864_v13 = vld [vmem:[%s26503_s5 + $0xb40] ss:$24 sps:$4 sm:$0xff]  }
 0x75c   : > { %v13287_v55 = vpop.f32.mrf.mxu0  ;;  %15972 = vmatprep.subr.bf16.mxu1 %v18806_v4  ;;  %v18858_v22 = vld [vmem:[%s26503_s5 + $0xb70] ss:$24 sps:$4 sm:$0xff]   ;;  %v18774_v4 = vld [vmem:[%s26503_s5 + $0x840] ss:$24 sps:$4 sm:$0xff]  }
 0x75d   : > { %v25435_v33 = vadd.f32 %v13326_v40, %v13286_v16  ;;  %v13328_v39 = vpop.f32.mrf.mxu1  ;;  %15932 = vmatpush1.bf16.msra.mxu0 %v18744_v30  ;;  %v18872_v30 = vld [vmem:[%s26503_s5 + $0xb14] ss:$24 sps:$4 sm:$0xff]   ;;  %v18777_v7 = vld [vmem:[%s26503_s5 + $0x810] ss:$24 sps:$4 sm:$0xff]   ;;  %v18878_v40 = vld [vmem:[%s26503_s5 + $0xae4] ss:$24 sps:$4 sm:$0xff]  }
 0x75e   : > { %v13288_v24 = vpop.f32.mrf.mxu0  ;;  %15933 = vmatprep.subr.bf16.mxu0 %v18749_v60  ;;  %v18782_v60 = vld [vmem:[%s26503_s5 + $0x7e4] ss:$24 sps:$4 sm:$0xff]   ;;  %v18870_v16 = vld [vmem:[%s26503_s5 + $0xb10] ss:$24 sps:$4 sm:$0xff]   ;;  %v18785_v55 = vld [vmem:[%s26503_s5 + $0x7b4] ss:$24 sps:$4 sm:$0xff]  }
 0x75f   : > { %v13329_v20 = vpop.f32.mrf.mxu1  ;;  %15973 = vmatpush1.bf16.msra.mxu1 %v18804_v62  ;;  %v18780_v62 = vld [vmem:[%s26503_s5 + $0x7e0] ss:$24 sps:$4 sm:$0xff]   ;;  %v18884_v39 = vld [vmem:[%s26503_s5 + $0xab4] ss:$24 sps:$4 sm:$0xff]   ;;  %v18788_v24 = vld [vmem:[%s26503_s5 + $0x784] ss:$24 sps:$4 sm:$0xff]  }
 0x760   : > { %15974 = vmatprep.subr.bf16.mxu1 %v18812_v59  ;;  %v18876_v59 = vld [vmem:[%s26503_s5 + $0xae0] ss:$24 sps:$4 sm:$0xff]   ;;  %v18890_v20 = vld [vmem:[%s26503_s5 + $0xa84] ss:$24 sps:$4 sm:$0xff]  }
 0x761   : > { %15934 = vmatpush1.bf16.msra.mxu0 %v18747_v19  ;;  %v18783_v19 = vld [vmem:[%s26503_s5 + $0x7b0] ss:$24 sps:$4 sm:$0xff]  }
 0x762   : > { %15935 = vmatprep.subr.bf16.mxu0 %v18752_v21  ;;  %v18882_v21 = vld [vmem:[%s26503_s5 + $0xab0] ss:$24 sps:$4 sm:$0xff]  }
 0x763   : > { %15975 = vmatpush1.bf16.msra.mxu1 %v18810_v51  ;;  %v18786_v51 = vld [vmem:[%s26503_s5 + $0x780] ss:$24 sps:$4 sm:$0xff]  }
 0x764   : > { %15976 = vmatprep.subr.bf16.mxu1 %v18818_v28  ;;  %v13499_v28 = vmax.f32 %v25016_v61, 0.0  ;;  %v18789_v61 = vld [vmem:[%s26503_s5 + $0x158] ss:$24 sps:$4 sm:$0xff]  }
 0x765   : > { %15936 = vmatpush1.bf16.msra.mxu0 %v18750_v11  ;;  %v18791_v11 = vld [vmem:[%s26503_s5 + $0x15c] ss:$24 sps:$4 sm:$0xff]  }
 0x766   : > { %15937 = vmatprep.subr.bf16.mxu0 %v18755_v35  ;;  %v18888_v35 = vld [vmem:[%s26503_s5 + $0xa80] ss:$24 sps:$4 sm:$0xff]  }
 0x767   : > { %15977 = vmatpush1.bf16.msra.mxu1 %v18816_v43  ;;  %v18896_v43 = vld [vmem:[%s26503_s5 + $0x45c] ss:$24 sps:$4 sm:$0xff]  }
 0x768   : > { %15978 = vmatprep.subr.bf16.mxu1 %v18824_v45  ;;  %v25609_v45 = vpack.c.bf16 %v13499_v28, %v13499_v28 }
 0x769   : > { %15938 = vmatpush1.bf16.msra.mxu0 %v18753_v27  ;;  %v18794_v27 = vld [vmem:[%s26503_s5 + $0x12c] ss:$24 sps:$4 sm:$0xff]  }
 0x76a   : > { %15939 = vmatprep.subr.bf16.mxu0 %v18758_v32 }
 0x76b   : > { %15979 = vmatpush1.bf16.msra.mxu1 %v18822_v25 }
 0x76c   : > { %15980 = vmatprep.subr.bf16.mxu1 %v18830_v56 }
 0x76d   : > { %15940 = vmatpush1.bf16.msra.mxu0 %v18756_v36  ;;  %v18792_v36 = vld [vmem:[%s26503_s5 + $0x128] ss:$24 sps:$4 sm:$0xff]  }
 0x76e   : > { %15941 = vmatprep.subr.bf16.mxu0 %v18761_v52 }
 0x76f   : > { %15981 = vmatpush1.bf16.msra.mxu1 %v18828_v47  ;;  %v18797_v47 = vld [vmem:[%s26503_s5 + $0xfc] ss:$24 sps:$4 sm:$0xff]  }
 0x770   : > { %15982 = vmatprep.subr.bf16.mxu1 %v18836_v31 }
 0x771   : > { %15942 = vmatpush1.bf16.msra.mxu0 %v18759_v2 }
 0x772   : > { %15943 = vmatprep.subr.bf16.mxu0 %v18764_v44 }
 0x773   : > { %15983 = vmatpush1.bf16.msra.mxu1 %v18834_v48  ;;  %v18795_v48 = vld [vmem:[%s26503_s5 + $0xf8] ss:$24 sps:$4 sm:$0xff]  }
 0x774   : > { %15984 = vmatprep.subr.bf16.mxu1 %v18842_v41 }
 0x775   : > { %15944 = vmatpush1.bf16.msra.mxu0 %v18762_v49  ;;  %v18803_v49 = vld [vmem:[%s26503_s5 + $0xcc] ss:$24 sps:$4 sm:$0xff]  }
 0x776   : > { %15945 = vmatprep.subr.bf16.mxu0 %v18767_v5 }
 0x777   : > { %15985 = vmatpush1.bf16.msra.mxu1 %v18840_v46  ;;  %v18801_v46 = vld [vmem:[%s26503_s5 + $0xc8] ss:$24 sps:$4 sm:$0xff]  }
 0x778   : > { %15986 = vmatprep.subr.bf16.mxu1 %v18848_v58  ;;  %v18809_v58 = vld [vmem:[%s26503_s5 + $0x9c] ss:$24 sps:$4 sm:$0xff]  }
 0x779   : > { %15946 = vmatpush2.bf16.msra.mxu0 %v18765_v57  ;;  %v18807_v57 = vld [vmem:[%s26503_s5 + $0x98] ss:$24 sps:$4 sm:$0xff]  }
 0x77a   : > { %15947 = vmatprep.subr.bf16.mxu0 %v18770_v42  ;;  %v18815_v42 = vld [vmem:[%s26503_s5 + $0x6c] ss:$24 sps:$4 sm:$0xff]  }
 0x77b   : > { %15987 = vmatpush2.bf16.msra.mxu1 %v18846_v23  ;;  %v18813_v23 = vld [vmem:[%s26503_s5 + $0x68] ss:$24 sps:$4 sm:$0xff]  }
 0x77c   : > { %15988 = vmatprep.subr.bf16.mxu1 %v18854_v26  ;;  %v18821_v26 = vld [vmem:[%s26503_s5 + $0x3c] ss:$24 sps:$4 sm:$0xff]  }
 0x77d   : > { %15948 = vmatpush2.bf16.msra.mxu0 %v18768_v18  ;;  %v18819_v18 = vld [vmem:[%s26503_s5 + $0x38] ss:$24 sps:$4 sm:$0xff]  }
 0x77e   : > { %15949 = vmatprep.subr.bf16.mxu0 %v18773_v50  ;;  %v18827_v50 = vld [vmem:[%s26503_s5 + $0xc] ss:$24 sps:$4 sm:$0xff]  }
 0x77f   : > { %15989 = vmatpush2.bf16.msra.mxu1 %v18852_v53  ;;  %v18825_v53 = vld [vmem:[%s26503_s5 + $0x8] ss:$24 sps:$4 sm:$0xff]  }
 0x780   : > { %15990 = vmatprep.subr.bf16.mxu1 %v18860_v3  ;;  %v18833_v3 = vld [vmem:[%s26503_s5 + $0x2dc] ss:$24 sps:$4 sm:$0xff]  }
 0x781   : > { %15950 = vmatpush2.bf16.msra.mxu0 %v18771_v12  ;;  %v18831_v12 = vld [vmem:[%s26503_s5 + $0x2d8] ss:$24 sps:$4 sm:$0xff]  }
 0x782   : > { %15951 = vmatprep.subr.bf16.mxu0 %v18776_v9  ;;  %v18839_v9 = vld [vmem:[%s26503_s5 + $0x2ac] ss:$24 sps:$4 sm:$0xff]  }
 0x783   : > { %15991 = vmatpush2.bf16.msra.mxu1 %v18858_v22  ;;  %v18837_v22 = vld [vmem:[%s26503_s5 + $0x2a8] ss:$24 sps:$4 sm:$0xff]  }
 0x784   : > { %15992 = vmatprep.subr.bf16.mxu1 %v18866_v29  ;;  %v18845_v29 = vld [vmem:[%s26503_s5 + $0x27c] ss:$24 sps:$4 sm:$0xff]  }
 0x785   : > { %15952 = vmatpush2.bf16.msra.mxu0 %v18774_v4  ;;  %v18843_v4 = vld [vmem:[%s26503_s5 + $0x278] ss:$24 sps:$4 sm:$0xff]  }
 0x786   : > { %15953 = vmatprep.subr.bf16.mxu0 %v18779_v37  ;;  %v18851_v37 = vld [vmem:[%s26503_s5 + $0x24c] ss:$24 sps:$4 sm:$0xff]  }
 0x787   : > { %15993 = vmatpush2.bf16.msra.mxu1 %v18864_v13  ;;  %v18849_v13 = vld [vmem:[%s26503_s5 + $0x248] ss:$24 sps:$4 sm:$0xff]  }
 0x788   : > { %15994 = vmatprep.subr.bf16.mxu1 %v18872_v30  ;;  %v18857_v30 = vld [vmem:[%s26503_s5 + $0x21c] ss:$24 sps:$4 sm:$0xff]  }
 0x789   : > { %15954 = vmatpush2.bf16.msra.mxu0 %v18777_v7  ;;  %v18855_v7 = vld [vmem:[%s26503_s5 + $0x218] ss:$24 sps:$4 sm:$0xff]  }
 0x78a   : > { %15955 = vmatprep.subr.bf16.mxu0 %v18782_v60  ;;  %v18863_v60 = vld [vmem:[%s26503_s5 + $0x1ec] ss:$24 sps:$4 sm:$0xff]  }
 0x78b   : > { %15995 = vmatpush2.bf16.msra.mxu1 %v18870_v16  ;;  %v18861_v16 = vld [vmem:[%s26503_s5 + $0x1e8] ss:$24 sps:$4 sm:$0xff]  }
 0x78c   : > { %15996 = vmatprep.subr.bf16.mxu1 %v18878_v40  ;;  %v18869_v40 = vld [vmem:[%s26503_s5 + $0x1bc] ss:$24 sps:$4 sm:$0xff]  }
 0x78d   : > { %15956 = vmatpush2.bf16.msra.mxu0 %v18780_v62  ;;  %v18867_v62 = vld [vmem:[%s26503_s5 + $0x1b8] ss:$24 sps:$4 sm:$0xff]  }
 0x78e   : > { %15957 = vmatprep.subr.bf16.mxu0 %v18785_v55  ;;  %v18875_v55 = vld [vmem:[%s26503_s5 + $0x18c] ss:$24 sps:$4 sm:$0xff]  }
 0x78f   : > { %15997 = vmatpush2.bf16.msra.mxu1 %v18876_v59  ;;  %v18873_v59 = vld [vmem:[%s26503_s5 + $0x188] ss:$24 sps:$4 sm:$0xff]  }
 0x790   : > { %15998 = vmatprep.subr.bf16.mxu1 %v18884_v39  ;;  %v18881_v39 = vld [vmem:[%s26503_s5 + $0x75c] ss:$24 sps:$4 sm:$0xff]  }
 0x791   : > { %15958 = vmatpush2.bf16.msra.mxu0 %v18783_v19 }
 0x792   : > { %15959 = vmatprep.subr.bf16.mxu0 %v18788_v24  ;;  %v18879_v24 = vld [vmem:[%s26503_s5 + $0x758] ss:$24 sps:$4 sm:$0xff]  }
 0x793   : > { %15999 = vmatpush2.bf16.msra.mxu1 %v18882_v21  ;;  %v18887_v21 = vld [vmem:[%s26503_s5 + $0x72c] ss:$24 sps:$4 sm:$0xff]  }
 0x794   : > { %16000 = vmatprep.subr.bf16.mxu1 %v18890_v20 }
 0x795   : > { %15960 = vmatpush2.bf16.msra.mxu0 %v18786_v51 }
 0x796   : > { %16011 = vmatprep.subr.bf16.mxu0 %v18791_v11 }
 0x797   : > { %16001 = vmatpush2.bf16.msra.mxu1 %v18888_v35 }
 0x798   : > { %v13365_v32 = vpop.f32.mrf.mxu0  ;;  %15962 = vmatmul.mubr.bf16.vlgmr.msra.gmra.mxu0 %v25609_v45  ;;  %16052 = vmatprep.subr.bf16.mxu1 %v18896_v43  ;;  %v18893_v43 = vld [vmem:[%s26503_s5 + $0x6fc] ss:$24 sps:$4 sm:$0xff]  }
 0x799   : > { %v13366_v25 = vadd.f32 %v13365_v32, %v25426_v1  ;;  %v13406_v56 = vpop.f32.mrf.mxu1  ;;  %16012 = vmatpush1.bf16.msra.mxu0 %v18789_v61  ;;  %16043 = vmatprep.mubr.bf16.mxu0 %v25200_v38 }
 0x79a   : > { %v25620_v52 = vpop.f32.mrf.mxu0  ;;  %16013 = vmatprep.subr.bf16.mxu0 %v18794_v27 }
 0x79b   : > { %v25625_v31 = vadd.f32 %v13406_v56, %v13366_v25  ;;  %v25627_v2 = vpop.f32.mrf.mxu1  ;;  %v13368_v19 = vadd.f32 %v25620_v52, %v25435_v33  ;;  %v18885_v33 = vld [vmem:[%s26503_s5 + $0x728] ss:$24 sps:$4 sm:$0xff]   ;;  %v18891_v52 = vld [vmem:[%s26503_s5 + $0x6f8] ss:$24 sps:$4 sm:$0xff]  }
 0x79c   : > { %v13369_v1 = vpop.f32.mrf.mxu0 }
 0x79d   : > { %v13410_v44 = vpop.f32.mrf.mxu1  ;;  %16014 = vmatpush1.bf16.msra.mxu0 %v18792_v36  ;;  %v13409_v51 = vadd.f32 %v25627_v2, %v13368_v19  ;;  %v18899_v2 = vld [vmem:[%s26503_s5 + $0x6cc] ss:$24 sps:$4 sm:$0xff]   ;;  %v18936_v19 = vld [vmem:[%s26503_s5 + $0x308] ss:$24 sps:$4 sm:$0xff]  }
 0x79e   : > { %v13370_v41 = vpop.f32.mrf.mxu0  ;;  %16015 = vmatprep.subr.bf16.mxu0 %v18797_v47 }
 0x79f   : > { %v13411_v5 = vpop.f32.mrf.mxu1  ;;  %v18894_v41 = vld [vmem:[%s26503_s5 + $0x458] ss:$24 sps:$4 sm:$0xff]  }
 0x7a0   : > { %v18897_v5 = vld [vmem:[%s26503_s5 + $0x6c8] ss:$24 sps:$4 sm:$0xff]  }
 0x7a1   : > { %16016 = vmatpush1.bf16.msra.mxu0 %v18795_v48 }
 0x7a2   : > { %16017 = vmatprep.subr.bf16.mxu0 %v18803_v49 }
 0x7a5   : > { %16018 = vmatpush1.bf16.msra.mxu0 %v18801_v46  ;;  %v18902_v46 = vld [vmem:[%s26503_s5 + $0x42c] ss:$24 sps:$4 sm:$0xff]  }
 0x7a6   : > { %16019 = vmatprep.subr.bf16.mxu0 %v18809_v58  ;;  %v18905_v58 = vld [vmem:[%s26503_s5 + $0x69c] ss:$24 sps:$4 sm:$0xff]  }
 0x7a9   : > { %16020 = vmatpush1.bf16.msra.mxu0 %v18807_v57  ;;  %v18900_v57 = vld [vmem:[%s26503_s5 + $0x428] ss:$24 sps:$4 sm:$0xff]  }
 0x7aa   : > { %16021 = vmatprep.subr.bf16.mxu0 %v18815_v42  ;;  %v18903_v42 = vld [vmem:[%s26503_s5 + $0x698] ss:$24 sps:$4 sm:$0xff]  }
 0x7ad   : > { %16022 = vmatpush1.bf16.msra.mxu0 %v18813_v23  ;;  %v18908_v23 = vld [vmem:[%s26503_s5 + $0x3fc] ss:$24 sps:$4 sm:$0xff]  }
 0x7ae   : > { %16023 = vmatprep.subr.bf16.mxu0 %v18821_v26  ;;  %v18911_v26 = vld [vmem:[%s26503_s5 + $0x66c] ss:$24 sps:$4 sm:$0xff]  }
 0x7b1   : > { %16024 = vmatpush1.bf16.msra.mxu0 %v18819_v18  ;;  %v18906_v18 = vld [vmem:[%s26503_s5 + $0x3f8] ss:$24 sps:$4 sm:$0xff]  }
 0x7b2   : > { %16025 = vmatprep.subr.bf16.mxu0 %v18827_v50  ;;  %v18909_v50 = vld [vmem:[%s26503_s5 + $0x668] ss:$24 sps:$4 sm:$0xff]  }
 0x7b5   : > { %16026 = vmatpush1.bf16.msra.mxu0 %v18825_v53  ;;  %v18914_v53 = vld [vmem:[%s26503_s5 + $0x3cc] ss:$24 sps:$4 sm:$0xff]  }
 0x7b6   : > { %16027 = vmatprep.subr.bf16.mxu0 %v18833_v3  ;;  %v18917_v3 = vld [vmem:[%s26503_s5 + $0x63c] ss:$24 sps:$4 sm:$0xff]  }
 0x7b9   : > { %16028 = vmatpush2.bf16.msra.mxu0 %v18831_v12  ;;  %v18912_v12 = vld [vmem:[%s26503_s5 + $0x3c8] ss:$24 sps:$4 sm:$0xff]  }
 0x7ba   : > { %16029 = vmatprep.subr.bf16.mxu0 %v18839_v9  ;;  %v18915_v9 = vld [vmem:[%s26503_s5 + $0x638] ss:$24 sps:$4 sm:$0xff]  }
 0x7bd   : > { %16030 = vmatpush2.bf16.msra.mxu0 %v18837_v22  ;;  %v18920_v22 = vld [vmem:[%s26503_s5 + $0x39c] ss:$24 sps:$4 sm:$0xff]  }
 0x7be   : > { %16031 = vmatprep.subr.bf16.mxu0 %v18845_v29  ;;  %v18923_v29 = vld [vmem:[%s26503_s5 + $0x60c] ss:$24 sps:$4 sm:$0xff]  }
 0x7c1   : > { %16032 = vmatpush2.bf16.msra.mxu0 %v18843_v4  ;;  %v18918_v4 = vld [vmem:[%s26503_s5 + $0x398] ss:$24 sps:$4 sm:$0xff]  }
 0x7c2   : > { %16033 = vmatprep.subr.bf16.mxu0 %v18851_v37  ;;  %v18921_v37 = vld [vmem:[%s26503_s5 + $0x608] ss:$24 sps:$4 sm:$0xff]  }
 0x7c5   : > { %16034 = vmatpush2.bf16.msra.mxu0 %v18849_v13  ;;  %v18926_v13 = vld [vmem:[%s26503_s5 + $0x36c] ss:$24 sps:$4 sm:$0xff]  }
 0x7c6   : > { %16035 = vmatprep.subr.bf16.mxu0 %v18857_v30  ;;  %v18929_v30 = vld [vmem:[%s26503_s5 + $0x8dc] ss:$24 sps:$4 sm:$0xff]  }
 0x7c9   : > { %16036 = vmatpush2.bf16.msra.mxu0 %v18855_v7  ;;  %v18924_v7 = vld [vmem:[%s26503_s5 + $0x368] ss:$24 sps:$4 sm:$0xff]  }
 0x7ca   : > { %16037 = vmatprep.subr.bf16.mxu0 %v18863_v60  ;;  %v18927_v60 = vld [vmem:[%s26503_s5 + $0x8d8] ss:$24 sps:$4 sm:$0xff]  }
 0x7cd   : > { %16038 = vmatpush2.bf16.msra.mxu0 %v18861_v16  ;;  %v18932_v16 = vld [vmem:[%s26503_s5 + $0x33c] ss:$24 sps:$4 sm:$0xff]  }
 0x7ce   : > { %16039 = vmatprep.subr.bf16.mxu0 %v18869_v40  ;;  %v18935_v40 = vld [vmem:[%s26503_s5 + $0x8ac] ss:$24 sps:$4 sm:$0xff]  }
 0x7d1   : > { %16040 = vmatpush2.bf16.msra.mxu0 %v18867_v62  ;;  %v18930_v62 = vld [vmem:[%s26503_s5 + $0x338] ss:$24 sps:$4 sm:$0xff]  }
 0x7d2   : > { %16041 = vmatprep.subr.bf16.mxu0 %v18875_v55  ;;  %v18933_v55 = vld [vmem:[%s26503_s5 + $0x8a8] ss:$24 sps:$4 sm:$0xff]  }
 0x7d5   : > { %16042 = vmatpush2.bf16.msra.mxu0 %v18873_v59  ;;  %v18938_v59 = vld [vmem:[%s26503_s5 + $0x30c] ss:$24 sps:$4 sm:$0xff]  }
 0x7d6   : > { %16093 = vmatprep.subr.bf16.mxu0 %v18881_v39  ;;  %v18941_v39 = vld [vmem:[%s26503_s5 + $0x87c] ss:$24 sps:$4 sm:$0xff]  }
 0x7d8   : > { %v13447_v20 = vpop.f32.mrf.mxu0  ;;  %16044 = vmatmul.mubr.bf16.vlgmr.msra.gmra.mxu0 %v25401_v0 }
 0x7d9   : > { %v13448_v28 = vadd.f32 %v13447_v20, %v25625_v31  ;;  %v13488_v11 = vpop.f32.mrf.mxu1  ;;  %16094 = vmatpush1.bf16.msra.mxu0 %v18879_v24  ;;  %16125 = vmatprep.mubr.bf16.mxu0 %v25411_v34  ;;  %v18939_v24 = vld [vmem:[%s26503_s5 + $0x878] ss:$24 sps:$4 sm:$0xff]   ;;  %v18947_v20 = vld [vmem:[%s26503_s5 + $0x84c] ss:$24 sps:$4 sm:$0xff]  }
 0x7da   : > { %v13449_v35 = vpop.f32.mrf.mxu0  ;;  %16095 = vmatprep.subr.bf16.mxu0 %v18887_v21  ;;  %v18944_v21 = vld [vmem:[%s26503_s5 + $0x5dc] ss:$24 sps:$4 sm:$0xff]  }
 0x7db   : > { %v13489_v61 = vadd.f32 %v13488_v11, %v13448_v28  ;;  %v13450_v27 = vadd.f32 %v13449_v35, %v13409_v51  ;;  %v13490_v32 = vpop.f32.mrf.mxu1  ;;  %v18942_v51 = vld [vmem:[%s26503_s5 + $0x5d8] ss:$24 sps:$4 sm:$0xff]   ;;  %v18945_v28 = vld [vmem:[%s26503_s5 + $0x848] ss:$24 sps:$4 sm:$0xff]   ;;  %v18950_v11 = vld [vmem:[%s26503_s5 + $0x5ac] ss:$24 sps:$4 sm:$0xff]  }
 0x7dc   : > { %v13451_v25 = vpop.f32.mrf.mxu0  ;;  %v18948_v35 = vld [vmem:[%s26503_s5 + $0x5a8] ss:$24 sps:$4 sm:$0xff]  }
 0x7dd   : > { %v13491_v56 = vadd.f32 %v13490_v32, %v13450_v27  ;;  %v13492_v36 = vpop.f32.mrf.mxu1  ;;  %16096 = vmatpush1.bf16.msra.mxu0 %v18885_v33  ;;  %v13501_v47 = vmax.f32 %v13489_v61, 0.0  ;;  %v18953_v33 = vld [vmem:[%s26503_s5 + $0x81c] ss:$24 sps:$4 sm:$0xff]   ;;  %v18959_v27 = vld [vmem:[%s26503_s5 + $0x7ec] ss:$24 sps:$4 sm:$0xff]  }
 0x7de   : > { %v13452_v31 = vpop.f32.mrf.mxu0  ;;  %16097 = vmatprep.subr.bf16.mxu0 %v18893_v43  ;;  %v18951_v43 = vld [vmem:[%s26503_s5 + $0x818] ss:$24 sps:$4 sm:$0xff]   ;;  %v18956_v61 = vld [vmem:[%s26503_s5 + $0x57c] ss:$24 sps:$4 sm:$0xff]   ;;  %v18957_v25 = vld [vmem:[%s26503_s5 + $0x7e8] ss:$24 sps:$4 sm:$0xff]  }
 0x7df   : > { %v13502_v1 = vmax.f32 %v13491_v56, 0.0  ;;  %v13493_v44 = vpop.f32.mrf.mxu1  ;;  %v25742_v49 = vpack.c.bf16 %v13501_v47, %v13501_v47  ;;  %v18954_v32 = vld [vmem:[%s26503_s5 + $0x578] ss:$24 sps:$4 sm:$0xff]   ;;  %v18962_v56 = vld [vmem:[%s26503_s5 + $0x54c] ss:$24 sps:$4 sm:$0xff]  }
 0x7e0   : > { %v18965_v36 = vld [vmem:[%s26503_s5 + $0x7bc] ss:$24 sps:$4 sm:$0xff]   ;;  %v18963_v47 = vld [vmem:[%s26503_s5 + $0x7b8] ss:$24 sps:$4 sm:$0xff]   ;;  %v18969_v44 = vld [vmem:[%s26503_s5 + $0x788] ss:$24 sps:$4 sm:$0xff]  }
 0x7e1   : > { %v25737_v48 = vpack.c.bf16 %v13502_v1, %v13502_v1  ;;  %16098 = vmatpush1.bf16.msra.mxu0 %v18891_v52  ;;  %v18960_v52 = vld [vmem:[%s26503_s5 + $0x548] ss:$24 sps:$4 sm:$0xff]   ;;  %v18968_v31 = vld [vmem:[%s26503_s5 + $0x51c] ss:$24 sps:$4 sm:$0xff]   ;;  %v18966_v1 = vld [vmem:[%s26503_s5 + $0x518] ss:$24 sps:$4 sm:$0xff]  }
 0x7e2   : > { %16099 = vmatprep.subr.bf16.mxu0 %v18899_v2  ;;  %v18971_v2 = vld [vmem:[%s26503_s5 + $0x78c] ss:$24 sps:$4 sm:$0xff]  }
 0x7e3   : > { %16002 = vmatprep.mubr.bf16.mxu1 %v25737_v48 }
 0x7e4   : > { %16003 = vmatmul.mubr.bf16.vlgmr.msra.gmra.mxu1 %v25742_v49 }
 0x7e5   : > { %16053 = vmatpush1.bf16.msra.mxu1 %v18894_v41  ;;  %16084 = vmatprep.mubr.bf16.mxu1 %v25206_v17  ;;  %v18974_v41 = vld [vmem:[%s26503_s5 + $0x4ec] ss:$24 sps:$4 sm:$0xff]  }
 0x7e6   : > { %16100 = vmatpush1.bf16.msra.mxu0 %v18897_v5  ;;  %16054 = vmatprep.subr.bf16.mxu1 %v18902_v46  ;;  %v25900_v5 = vld [vmem:[%s26504_s6] sm:$0x3f] }
 0x7e7   : > { %16101 = vmatprep.subr.bf16.mxu0 %v18905_v58  ;;  %v18977_v46 = vld [vmem:[%s26503_s5 + $0x164] ss:$24 sps:$4 sm:$0xff]   ;;  %v18972_v58 = vld [vmem:[%s26503_s5 + $0x4e8] ss:$24 sps:$4 sm:$0xff]  }
 0x7e9   : > { %16055 = vmatpush1.bf16.msra.mxu1 %v18900_v57  ;;  %v13900_v57 = vrot.slane %v25900_v5, %v20205_v54 }
 0x7ea   : > { %16102 = vmatpush1.bf16.msra.mxu0 %v18903_v42  ;;  %16056 = vmatprep.subr.bf16.mxu1 %v18908_v23  ;;  %v18975_v42 = vld [vmem:[%s26503_s5 + $0x160] ss:$24 sps:$4 sm:$0xff]   ;;  %v13904_v23 = vrot.slane %v25900_v5, %v20217_v63 }
 0x7eb   : > { %16103 = vmatprep.subr.bf16.mxu0 %v18911_v26  ;;  %v18980_v26 = vld [vmem:[%s26503_s5 + $0x4bc] ss:$24 sps:$4 sm:$0xff]  }
 0x7ed   : > { %16057 = vmatpush1.bf16.msra.mxu1 %v18906_v18  ;;  %v18983_v18 = vld [vmem:[%s26503_s5 + $0x134] ss:$24 sps:$4 sm:$0xff]  }
 0x7ee   : > { %16104 = vmatpush1.bf16.msra.mxu0 %v18909_v50  ;;  %16058 = vmatprep.subr.bf16.mxu1 %v18914_v53 }
 0x7ef   : > { %16105 = vmatprep.subr.bf16.mxu0 %v18917_v3  ;;  %v18978_v3 = vld [vmem:[%s26503_s5 + $0x4b8] ss:$24 sps:$4 sm:$0xff]  }
 0x7f1   : > { %16059 = vmatpush1.bf16.msra.mxu1 %v18912_v12  ;;  %v18981_v12 = vld [vmem:[%s26503_s5 + $0x130] ss:$24 sps:$4 sm:$0xff]  }
 0x7f2   : > { %16106 = vmatpush1.bf16.msra.mxu0 %v18915_v9  ;;  %16060 = vmatprep.subr.bf16.mxu1 %v18920_v22  ;;  %v18986_v9 = vld [vmem:[%s26503_s5 + $0x48c] ss:$24 sps:$4 sm:$0xff]  }
 0x7f3   : > { %16107 = vmatprep.subr.bf16.mxu0 %v18923_v29 }
 0x7f5   : > { %16061 = vmatpush1.bf16.msra.mxu1 %v18918_v4 }
 0x7f6   : > { %16108 = vmatpush1.bf16.msra.mxu0 %v18921_v37  ;;  %16062 = vmatprep.subr.bf16.mxu1 %v18926_v13  ;;  %v18989_v37 = vld [vmem:[%s26503_s5 + $0x104] ss:$24 sps:$4 sm:$0xff]  }
 0x7f7   : > { %16109 = vmatprep.subr.bf16.mxu0 %v18929_v30 }
 0x7f9   : > { %16063 = vmatpush1.bf16.msra.mxu1 %v18924_v7  ;;  %v18984_v7 = vld [vmem:[%s26503_s5 + $0x488] ss:$24 sps:$4 sm:$0xff]  }
 0x7fa   : > { %16110 = vmatpush2.bf16.msra.mxu0 %v18927_v60  ;;  %16064 = vmatprep.subr.bf16.mxu1 %v18932_v16  ;;  %v18987_v16 = vld [vmem:[%s26503_s5 + $0x100] ss:$24 sps:$4 sm:$0xff]  }
 0x7fb   : > { %16111 = vmatprep.subr.bf16.mxu0 %v18935_v40  ;;  %v18992_v40 = vld [vmem:[%s26503_s5 + $0xa5c] ss:$24 sps:$4 sm:$0xff]  }
 0x7fd   : > { %16065 = vmatpush1.bf16.msra.mxu1 %v18930_v62 }
 0x7fe   : > { %16112 = vmatpush2.bf16.msra.mxu0 %v18933_v55  ;;  %16066 = vmatprep.subr.bf16.mxu1 %v18938_v59  ;;  %v18995_v55 = vld [vmem:[%s26503_s5 + $0xd4] ss:$24 sps:$4 sm:$0xff]   ;;  %v18990_v59 = vld [vmem:[%s26503_s5 + $0xa58] ss:$24 sps:$4 sm:$0xff]  }
 0x7ff   : > { %16113 = vmatprep.subr.bf16.mxu0 %v18941_v39  ;;  %v18993_v39 = vld [vmem:[%s26503_s5 + $0xd0] ss:$24 sps:$4 sm:$0xff]  }
 0x801   : > { %16067 = vmatpush1.bf16.msra.mxu1 %v18936_v19  ;;  %v18998_v19 = vld [vmem:[%s26503_s5 + $0xa2c] ss:$24 sps:$4 sm:$0xff]  }
 0x802   : > { %16114 = vmatpush2.bf16.msra.mxu0 %v18939_v24  ;;  %16068 = vmatprep.subr.bf16.mxu1 %v18944_v21  ;;  %v19001_v24 = vld [vmem:[%s26503_s5 + $0xa4] ss:$24 sps:$4 sm:$0xff]   ;;  %v18996_v21 = vld [vmem:[%s26503_s5 + $0xa28] ss:$24 sps:$4 sm:$0xff]  }
 0x803   : > { %16115 = vmatprep.subr.bf16.mxu0 %v18947_v20  ;;  %v18999_v20 = vld [vmem:[%s26503_s5 + $0xa0] ss:$24 sps:$4 sm:$0xff]  }
 0x805   : > { %16069 = vmatpush2.bf16.msra.mxu1 %v18942_v51  ;;  %v19004_v51 = vld [vmem:[%s26503_s5 + $0x9fc] ss:$24 sps:$4 sm:$0xff]  }
 0x806   : > { %16116 = vmatpush2.bf16.msra.mxu0 %v18945_v28  ;;  %16070 = vmatprep.subr.bf16.mxu1 %v18950_v11  ;;  %v19007_v28 = vld [vmem:[%s26503_s5 + $0x74] ss:$24 sps:$4 sm:$0xff]   ;;  %v19002_v11 = vld [vmem:[%s26503_s5 + $0x9f8] ss:$24 sps:$4 sm:$0xff]  }
 0x807   : > { %16117 = vmatprep.subr.bf16.mxu0 %v18953_v33  ;;  %v19005_v33 = vld [vmem:[%s26503_s5 + $0x70] ss:$24 sps:$4 sm:$0xff]  }
 0x809   : > { %16071 = vmatpush2.bf16.msra.mxu1 %v18948_v35  ;;  %v19010_v35 = vld [vmem:[%s26503_s5 + $0x9cc] ss:$24 sps:$4 sm:$0xff]  }
 0x80a   : > { %16118 = vmatpush2.bf16.msra.mxu0 %v18951_v43  ;;  %16072 = vmatprep.subr.bf16.mxu1 %v18956_v61  ;;  %v19013_v43 = vld [vmem:[%s26503_s5 + $0x44] ss:$24 sps:$4 sm:$0xff]   ;;  %v19008_v61 = vld [vmem:[%s26503_s5 + $0x9c8] ss:$24 sps:$4 sm:$0xff]  }
 0x80b   : > { %16119 = vmatprep.subr.bf16.mxu0 %v18959_v27  ;;  %v19011_v27 = vld [vmem:[%s26503_s5 + $0x40] ss:$24 sps:$4 sm:$0xff]  }
 0x80d   : > { %16073 = vmatpush2.bf16.msra.mxu1 %v18954_v32  ;;  %v19016_v32 = vld [vmem:[%s26503_s5 + $0x99c] ss:$24 sps:$4 sm:$0xff]  }
 0x80e   : > { %16120 = vmatpush2.bf16.msra.mxu0 %v18957_v25  ;;  %16074 = vmatprep.subr.bf16.mxu1 %v18962_v56  ;;  %v19019_v25 = vld [vmem:[%s26503_s5 + $0x14] ss:$24 sps:$4 sm:$0xff]   ;;  %v19014_v56 = vld [vmem:[%s26503_s5 + $0x998] ss:$24 sps:$4 sm:$0xff]  }
 0x80f   : > { %16121 = vmatprep.subr.bf16.mxu0 %v18965_v36  ;;  %v19017_v36 = vld [vmem:[%s26503_s5 + $0x10] ss:$24 sps:$4 sm:$0xff]  }
 0x811   : > { %16075 = vmatpush2.bf16.msra.mxu1 %v18960_v52  ;;  %v19022_v52 = vld [vmem:[%s26503_s5 + $0x96c] ss:$24 sps:$4 sm:$0xff]  }
 0x812   : > { %16122 = vmatpush2.bf16.msra.mxu0 %v18963_v47  ;;  %16076 = vmatprep.subr.bf16.mxu1 %v18968_v31  ;;  %v19025_v47 = vld [vmem:[%s26503_s5 + $0x2e4] ss:$24 sps:$4 sm:$0xff]   ;;  %v19020_v31 = vld [vmem:[%s26503_s5 + $0x968] ss:$24 sps:$4 sm:$0xff]  }
 0x813   : > { %16123 = vmatprep.subr.bf16.mxu0 %v18971_v2  ;;  %v19023_v2 = vld [vmem:[%s26503_s5 + $0x2e0] ss:$24 sps:$4 sm:$0xff]  }
 0x815   : > { %16077 = vmatpush2.bf16.msra.mxu1 %v18966_v1  ;;  %v19028_v1 = vld [vmem:[%s26503_s5 + $0x93c] ss:$24 sps:$4 sm:$0xff]  }
 0x816   : > { %16124 = vmatpush2.bf16.msra.mxu0 %v18969_v44  ;;  %16078 = vmatprep.subr.bf16.mxu1 %v18974_v41  ;;  %v19031_v44 = vld [vmem:[%s26503_s5 + $0x2b4] ss:$24 sps:$4 sm:$0xff]   ;;  %v19026_v41 = vld [vmem:[%s26503_s5 + $0x938] ss:$24 sps:$4 sm:$0xff]  }
 0x817   : > { %16175 = vmatprep.subr.bf16.mxu0 %v18977_v46  ;;  %v19029_v46 = vld [vmem:[%s26503_s5 + $0x2b0] ss:$24 sps:$4 sm:$0xff]  }
 0x818   : > { %v15881_v50 = vpop.f32.mrf.mxu0 }
 0x819   : > { %v15882_v54 = vadd.f32 %v15881_v50, %v13900_v57  ;;  %v15922_v53 = vpop.f32.mrf.mxu1  ;;  %16079 = vmatpush2.bf16.msra.mxu1 %v18972_v58  ;;  %16126 = vmatmul.mubr.bf16.vlgmr.msra.gmra.mxu0 %v25609_v45  ;;  %v19034_v58 = vld [vmem:[%s26503_s5 + $0x90c] ss:$24 sps:$4 sm:$0xff]   ;;  %v19038_v50 = vld [vmem:[%s26503_s5 + $0xbd8] ss:$24 sps:$4 sm:$0xff]  }
 0x81a   : > { %16176 = vmatpush1.bf16.msra.mxu0 %v18975_v42  ;;  %16207 = vmatprep.mubr.bf16.mxu0 %v25200_v38  ;;  %v15883_v63 = vpop.f32.mrf.mxu0  ;;  %v19037_v57 = vld [vmem:[%s26503_s5 + $0x284] ss:$24 sps:$4 sm:$0xff]   ;;  %v19032_v42 = vld [vmem:[%s26503_s5 + $0x908] ss:$24 sps:$4 sm:$0xff]  }
 0x81b   : > { %v25932_v22 = vadd.f32 %v15922_v53, %v15882_v54  ;;  %v15884_v29 = vadd.f32 %v15883_v63, %v13904_v23  ;;  %v15924_v4 = vpop.f32.mrf.mxu1  ;;  %16080 = vmatprep.subr.bf16.mxu1 %v18980_v26  ;;  %16177 = vmatprep.subr.bf16.mxu0 %v18983_v18  ;;  %v19035_v23 = vld [vmem:[%s26503_s5 + $0x280] ss:$24 sps:$4 sm:$0xff]   ;;  %v19040_v26 = vld [vmem:[%s26503_s5 + $0xbdc] ss:$24 sps:$4 sm:$0xff]   ;;  %v19041_v54 = vld [vmem:[%s26503_s5 + $0x250] ss:$24 sps:$4 sm:$0xff]  }
 0x81c   : > { %v15885_v38 = vpop.f32.mrf.mxu0  ;;  %v19043_v18 = vld [vmem:[%s26503_s5 + $0x254] ss:$24 sps:$4 sm:$0xff]   ;;  %v19044_v63 = vld [vmem:[%s26503_s5 + $0xba8] ss:$24 sps:$4 sm:$0xff]  }
 0x81d   : > { %v25937_v13 = vadd.f32 %v15924_v4, %v15884_v29  ;;  %v15926_v30 = vpop.f32.mrf.mxu1  ;;  %16081 = vmatpush2.bf16.msra.mxu1 %v18978_v3  ;;  %v19046_v53 = vld [vmem:[%s26503_s5 + $0xbac] ss:$24 sps:$4 sm:$0xff]   ;;  %v19050_v4 = vld [vmem:[%s26503_s5 + $0xb78] ss:$24 sps:$4 sm:$0xff]  }
 0x81e   : > { %16178 = vmatpush1.bf16.msra.mxu0 %v18981_v12  ;;  %v15886_v60 = vpop.f32.mrf.mxu0  ;;  %16082 = vmatprep.subr.bf16.mxu1 %v18986_v9  ;;  %v19049_v3 = vld [vmem:[%s26503_s5 + $0x224] ss:$24 sps:$4 sm:$0xff]   ;;  %v19047_v12 = vld [vmem:[%s26503_s5 + $0x220] ss:$24 sps:$4 sm:$0xff]   ;;  %v19055_v29 = vld [vmem:[%s26503_s5 + $0x1f4] ss:$24 sps:$4 sm:$0xff]  }
 0x81f   : > { %v15927_v62 = vpop.f32.mrf.mxu1  ;;  %16179 = vmatprep.subr.bf16.mxu0 %v18989_v37  ;;  %v19052_v9 = vld [vmem:[%s26503_s5 + $0xb7c] ss:$24 sps:$4 sm:$0xff]   ;;  %v19053_v37 = vld [vmem:[%s26503_s5 + $0x1f0] ss:$24 sps:$4 sm:$0xff]   ;;  %v19058_v38 = vld [vmem:[%s26503_s5 + $0xb4c] ss:$24 sps:$4 sm:$0xff]  }
 0x820   : > { %v19061_v30 = vld [vmem:[%s26503_s5 + $0x1c4] ss:$24 sps:$4 sm:$0xff]   ;;  %v19059_v60 = vld [vmem:[%s26503_s5 + $0x1c0] ss:$24 sps:$4 sm:$0xff]  }
 0x821   : > { %16083 = vmatpush2.bf16.msra.mxu1 %v18984_v7  ;;  %v19056_v7 = vld [vmem:[%s26503_s5 + $0xb48] ss:$24 sps:$4 sm:$0xff]   ;;  %v19062_v62 = vld [vmem:[%s26503_s5 + $0xb18] ss:$24 sps:$4 sm:$0xff]  }
 0x822   : > { %16180 = vmatpush1.bf16.msra.mxu0 %v18987_v16  ;;  %16134 = vmatprep.subr.bf16.mxu1 %v18992_v40  ;;  %v19064_v16 = vld [vmem:[%s26503_s5 + $0xb1c] ss:$24 sps:$4 sm:$0xff]  }
 0x823   : > { %16181 = vmatprep.subr.bf16.mxu0 %v18995_v55  ;;  %v19067_v40 = vld [vmem:[%s26503_s5 + $0x194] ss:$24 sps:$4 sm:$0xff]   ;;  %v19065_v55 = vld [vmem:[%s26503_s5 + $0x190] ss:$24 sps:$4 sm:$0xff]  }
 0x824   : > { %16085 = vmatmul.mubr.bf16.vlgmr.msra.gmra.mxu1 %v25406_v6 }
 0x825   : > { %16135 = vmatpush1.bf16.msra.mxu1 %v18990_v59  ;;  %16166 = vmatprep.mubr.bf16.mxu1 %v25737_v48  ;;  %v19070_v59 = vld [vmem:[%s26503_s5 + $0xaec] ss:$24 sps:$4 sm:$0xff]  }
 0x826   : > { %16182 = vmatpush1.bf16.msra.mxu0 %v18993_v39  ;;  %16136 = vmatprep.subr.bf16.mxu1 %v18998_v19  ;;  %v19073_v39 = vld [vmem:[%s26503_s5 + $0x764] ss:$24 sps:$4 sm:$0xff]   ;;  %v19068_v19 = vld [vmem:[%s26503_s5 + $0xae8] ss:$24 sps:$4 sm:$0xff]  }
 0x827   : > { %16183 = vmatprep.subr.bf16.mxu0 %v19001_v24  ;;  %v19071_v24 = vld [vmem:[%s26503_s5 + $0x760] ss:$24 sps:$4 sm:$0xff]  }
 0x829   : > { %16137 = vmatpush1.bf16.msra.mxu1 %v18996_v21  ;;  %v19076_v21 = vld [vmem:[%s26503_s5 + $0xabc] ss:$24 sps:$4 sm:$0xff]  }
 0x82a   : > { %16184 = vmatpush1.bf16.msra.mxu0 %v18999_v20  ;;  %16138 = vmatprep.subr.bf16.mxu1 %v19004_v51  ;;  %v19079_v20 = vld [vmem:[%s26503_s5 + $0x734] ss:$24 sps:$4 sm:$0xff]  }
 0x82b   : > { %16185 = vmatprep.subr.bf16.mxu0 %v19007_v28 }
 0x82d   : > { %16139 = vmatpush1.bf16.msra.mxu1 %v19002_v11  ;;  %v19074_v11 = vld [vmem:[%s26503_s5 + $0xab8] ss:$24 sps:$4 sm:$0xff]  }
 0x82e   : > { %16186 = vmatpush1.bf16.msra.mxu0 %v19005_v33  ;;  %16140 = vmatprep.subr.bf16.mxu1 %v19010_v35  ;;  %v19077_v35 = vld [vmem:[%s26503_s5 + $0x730] ss:$24 sps:$4 sm:$0xff]  }
 0x82f   : > { %16187 = vmatprep.subr.bf16.mxu0 %v19013_v43 }
 0x831   : > { %16141 = vmatpush1.bf16.msra.mxu1 %v19008_v61 }
 0x832   : > { %16188 = vmatpush1.bf16.msra.mxu0 %v19011_v27  ;;  %16142 = vmatprep.subr.bf16.mxu1 %v19016_v32  ;;  %v19088_v32 = vld [vmem:[%s26503_s5 + $0x464] ss:$24 sps:$4 sm:$0xff]  }
 0x833   : > { %16189 = vmatprep.subr.bf16.mxu0 %v19019_v25  ;;  %v19091_v25 = vld [vmem:[%s26503_s5 + $0x6d4] ss:$24 sps:$4 sm:$0xff]  }
 0x835   : > { %16143 = vmatpush1.bf16.msra.mxu1 %v19014_v56  ;;  %v19086_v56 = vld [vmem:[%s26503_s5 + $0x460] ss:$24 sps:$4 sm:$0xff]  }
 0x836   : > { %16190 = vmatpush1.bf16.msra.mxu0 %v19017_v36  ;;  %16144 = vmatprep.subr.bf16.mxu1 %v19022_v52  ;;  %v19089_v36 = vld [vmem:[%s26503_s5 + $0x6d0] ss:$24 sps:$4 sm:$0xff]   ;;  %v19094_v52 = vld [vmem:[%s26503_s5 + $0x434] ss:$24 sps:$4 sm:$0xff]  }
 0x837   : > { %16191 = vmatprep.subr.bf16.mxu0 %v19025_v47  ;;  %v19097_v47 = vld [vmem:[%s26503_s5 + $0x6a4] ss:$24 sps:$4 sm:$0xff]  }
 0x839   : > { %16145 = vmatpush1.bf16.msra.mxu1 %v19020_v31  ;;  %v19092_v31 = vld [vmem:[%s26503_s5 + $0x430] ss:$24 sps:$4 sm:$0xff]  }
 0x83a   : > { %16192 = vmatpush2.bf16.msra.mxu0 %v19023_v2  ;;  %16146 = vmatprep.subr.bf16.mxu1 %v19028_v1  ;;  %v19095_v2 = vld [vmem:[%s26503_s5 + $0x6a0] ss:$24 sps:$4 sm:$0xff]   ;;  %v19100_v1 = vld [vmem:[%s26503_s5 + $0x404] ss:$24 sps:$4 sm:$0xff]  }
 0x83b   : > { %16193 = vmatprep.subr.bf16.mxu0 %v19031_v44  ;;  %v19103_v44 = vld [vmem:[%s26503_s5 + $0x674] ss:$24 sps:$4 sm:$0xff]  }
 0x83d   : > { %16147 = vmatpush1.bf16.msra.mxu1 %v19026_v41  ;;  %v19101_v41 = vld [vmem:[%s26503_s5 + $0x670] ss:$24 sps:$4 sm:$0xff]  }
 0x83e   : > { %16194 = vmatpush2.bf16.msra.mxu0 %v19029_v46  ;;  %16148 = vmatprep.subr.bf16.mxu1 %v19034_v58  ;;  %v19106_v46 = vld [vmem:[%s26503_s5 + $0x3d4] ss:$24 sps:$4 sm:$0xff]   ;;  %v19109_v58 = vld [vmem:[%s26503_s5 + $0x644] ss:$24 sps:$4 sm:$0xff]  }
 0x83f   : > { %16195 = vmatprep.subr.bf16.mxu0 %v19037_v57  ;;  %v19104_v57 = vld [vmem:[%s26503_s5 + $0x3d0] ss:$24 sps:$4 sm:$0xff]  }
 0x841   : > { %16149 = vmatpush1.bf16.msra.mxu1 %v19032_v42  ;;  %v19107_v42 = vld [vmem:[%s26503_s5 + $0x640] ss:$24 sps:$4 sm:$0xff]  }
 0x842   : > { %16196 = vmatpush2.bf16.msra.mxu0 %v19035_v23  ;;  %16150 = vmatprep.subr.bf16.mxu1 %v19040_v26  ;;  %v19112_v23 = vld [vmem:[%s26503_s5 + $0x3a4] ss:$24 sps:$4 sm:$0xff]   ;;  %v19115_v26 = vld [vmem:[%s26503_s5 + $0x614] ss:$24 sps:$4 sm:$0xff]  }
 0x843   : > { %16197 = vmatprep.subr.bf16.mxu0 %v19043_v18  ;;  %v19110_v18 = vld [vmem:[%s26503_s5 + $0x3a0] ss:$24 sps:$4 sm:$0xff]  }
 0x845   : > { %16151 = vmatpush2.bf16.msra.mxu1 %v19038_v50  ;;  %v19113_v50 = vld [vmem:[%s26503_s5 + $0x610] ss:$24 sps:$4 sm:$0xff]  }
 0x846   : > { %16198 = vmatpush2.bf16.msra.mxu0 %v19041_v54  ;;  %16152 = vmatprep.subr.bf16.mxu1 %v19046_v53  ;;  %v19118_v54 = vld [vmem:[%s26503_s5 + $0x374] ss:$24 sps:$4 sm:$0xff]   ;;  %v19121_v53 = vld [vmem:[%s26503_s5 + $0x8e4] ss:$24 sps:$4 sm:$0xff]  }
 0x847   : > { %16199 = vmatprep.subr.bf16.mxu0 %v19049_v3  ;;  %v19116_v3 = vld [vmem:[%s26503_s5 + $0x370] ss:$24 sps:$4 sm:$0xff]  }
 0x849   : > { %16153 = vmatpush2.bf16.msra.mxu1 %v19044_v63  ;;  %v19119_v63 = vld [vmem:[%s26503_s5 + $0x8e0] ss:$24 sps:$4 sm:$0xff]  }
 0x84a   : > { %16200 = vmatpush2.bf16.msra.mxu0 %v19047_v12  ;;  %16154 = vmatprep.subr.bf16.mxu1 %v19052_v9  ;;  %v19124_v12 = vld [vmem:[%s26503_s5 + $0x344] ss:$24 sps:$4 sm:$0xff]   ;;  %v19127_v9 = vld [vmem:[%s26503_s5 + $0x8b4] ss:$24 sps:$4 sm:$0xff]  }
 0x84b   : > { %16201 = vmatprep.subr.bf16.mxu0 %v19055_v29  ;;  %v19122_v29 = vld [vmem:[%s26503_s5 + $0x340] ss:$24 sps:$4 sm:$0xff]  }
 0x84d   : > { %16155 = vmatpush2.bf16.msra.mxu1 %v19050_v4  ;;  %v19125_v4 = vld [vmem:[%s26503_s5 + $0x8b0] ss:$24 sps:$4 sm:$0xff]  }
 0x84e   : > { %16202 = vmatpush2.bf16.msra.mxu0 %v19053_v37  ;;  %16156 = vmatprep.subr.bf16.mxu1 %v19058_v38  ;;  %v19130_v37 = vld [vmem:[%s26503_s5 + $0x314] ss:$24 sps:$4 sm:$0xff]   ;;  %v19133_v38 = vld [vmem:[%s26503_s5 + $0x884] ss:$24 sps:$4 sm:$0xff]  }
 0x84f   : > { %16203 = vmatprep.subr.bf16.mxu0 %v19061_v30  ;;  %v19128_v30 = vld [vmem:[%s26503_s5 + $0x310] ss:$24 sps:$4 sm:$0xff]  }
 0x851   : > { %16157 = vmatpush2.bf16.msra.mxu1 %v19056_v7  ;;  %v19131_v7 = vld [vmem:[%s26503_s5 + $0x880] ss:$24 sps:$4 sm:$0xff]  }
 0x852   : > { %16204 = vmatpush2.bf16.msra.mxu0 %v19059_v60  ;;  %16158 = vmatprep.subr.bf16.mxu1 %v19064_v16  ;;  %v19136_v60 = vld [vmem:[%s26503_s5 + $0x5e4] ss:$24 sps:$4 sm:$0xff]   ;;  %v19139_v16 = vld [vmem:[%s26503_s5 + $0x854] ss:$24 sps:$4 sm:$0xff]  }
 0x853   : > { %16205 = vmatprep.subr.bf16.mxu0 %v19067_v40  ;;  %v19134_v40 = vld [vmem:[%s26503_s5 + $0x5e0] ss:$24 sps:$4 sm:$0xff]  }
 0x855   : > { %16159 = vmatpush2.bf16.msra.mxu1 %v19062_v62  ;;  %v19137_v62 = vld [vmem:[%s26503_s5 + $0x850] ss:$24 sps:$4 sm:$0xff]  }
 0x856   : > { %16206 = vmatpush2.bf16.msra.mxu0 %v19065_v55  ;;  %16160 = vmatprep.subr.bf16.mxu1 %v19070_v59  ;;  %v19142_v55 = vld [vmem:[%s26503_s5 + $0x5b4] ss:$24 sps:$4 sm:$0xff]   ;;  %v19145_v59 = vld [vmem:[%s26503_s5 + $0x824] ss:$24 sps:$4 sm:$0xff]  }
 0x857   : > { %16257 = vmatprep.subr.bf16.mxu0 %v19073_v39  ;;  %v19140_v39 = vld [vmem:[%s26503_s5 + $0x5b0] ss:$24 sps:$4 sm:$0xff]  }
 0x858   : > { %v15963_v51 = vpop.f32.mrf.mxu0 }
 0x859   : > { %v26122_v28 = vadd.f32 %v15963_v51, %v25932_v22  ;;  %16161 = vmatpush2.bf16.msra.mxu1 %v19068_v19  ;;  %16208 = vmatmul.mubr.bf16.vlgmr.msra.gmra.mxu0 %v25401_v0  ;;  %v19082_v22 = vld [vmem:[%s26503_s5 + $0xa8c] ss:$24 sps:$4 sm:$0xff]   ;;  %v19143_v19 = vld [vmem:[%s26503_s5 + $0x820] ss:$24 sps:$4 sm:$0xff]   ;;  %v19149_v51 = vld [vmem:[%s26503_s5 + $0x7f0] ss:$24 sps:$4 sm:$0xff]  }
 0x85a   : > { %16258 = vmatpush1.bf16.msra.mxu0 %v19071_v24  ;;  %16289 = vmatprep.mubr.bf16.mxu0 %v25411_v34  ;;  %v15965_v33 = vpop.f32.mrf.mxu0  ;;  %v19085_v0 = vld [vmem:[%s26503_s5 + $0x704] ss:$24 sps:$4 sm:$0xff]   ;;  %v19080_v34 = vld [vmem:[%s26503_s5 + $0xa88] ss:$24 sps:$4 sm:$0xff]  }
 0x85b   : > { %v26136_v43 = vadd.f32 %v15965_v33, %v25937_v13  ;;  %16162 = vmatprep.subr.bf16.mxu1 %v19076_v21  ;;  %16259 = vmatprep.subr.bf16.mxu0 %v19079_v20  ;;  %v19083_v13 = vld [vmem:[%s26503_s5 + $0x700] ss:$24 sps:$4 sm:$0xff]   ;;  %v19148_v24 = vld [vmem:[%s26503_s5 + $0x584] ss:$24 sps:$4 sm:$0xff]   ;;  %v19151_v21 = vld [vmem:[%s26503_s5 + $0x7f4] ss:$24 sps:$4 sm:$0xff]  }
 0x85c   : > { %v15967_v61 = vpop.f32.mrf.mxu0  ;;  %v19146_v20 = vld [vmem:[%s26503_s5 + $0x580] ss:$24 sps:$4 sm:$0xff]   ;;  %v19157_v33 = vld [vmem:[%s26503_s5 + $0x7c4] ss:$24 sps:$4 sm:$0xff]  }
 0x85d   : > { %16163 = vmatpush2.bf16.msra.mxu1 %v19074_v11  ;;  %v19154_v11 = vld [vmem:[%s26503_s5 + $0x554] ss:$24 sps:$4 sm:$0xff]  }
 0x85e   : > { %16260 = vmatpush1.bf16.msra.mxu0 %v19077_v35  ;;  %v15968_v27 = vpop.f32.mrf.mxu0  ;;  %16164 = vmatprep.subr.bf16.mxu1 %v19082_v22  ;;  %v19152_v35 = vld [vmem:[%s26503_s5 + $0x550] ss:$24 sps:$4 sm:$0xff]   ;;  %v19155_v22 = vld [vmem:[%s26503_s5 + $0x7c0] ss:$24 sps:$4 sm:$0xff]   ;;  %v19163_v61 = vld [vmem:[%s26503_s5 + $0x794] ss:$24 sps:$4 sm:$0xff]  }
 0x85f   : > { %16261 = vmatprep.subr.bf16.mxu0 %v19085_v0  ;;  %v19160_v0 = vld [vmem:[%s26503_s5 + $0x524] ss:$24 sps:$4 sm:$0xff]   ;;  %v19161_v27 = vld [vmem:[%s26503_s5 + $0x790] ss:$24 sps:$4 sm:$0xff]  }
 0x861   : > { %16165 = vmatpush2.bf16.msra.mxu1 %v19080_v34  ;;  %v19158_v34 = vld [vmem:[%s26503_s5 + $0x520] ss:$24 sps:$4 sm:$0xff]  }
 0x862   : > { %16262 = vmatpush1.bf16.msra.mxu0 %v19083_v13  ;;  %16216 = vmatprep.subr.bf16.mxu1 %v19088_v32  ;;  %v19166_v13 = vld [vmem:[%s26503_s5 + $0x4f4] ss:$24 sps:$4 sm:$0xff]   ;;  %v19164_v32 = vld [vmem:[%s26503_s5 + $0x4f0] ss:$24 sps:$4 sm:$0xff]  }
 0x863   : > { %16263 = vmatprep.subr.bf16.mxu0 %v19091_v25  ;;  %v19169_v25 = vld [vmem:[%s26503_s5 + $0x4c4] ss:$24 sps:$4 sm:$0xff]  }
 0x864   : > { %16167 = vmatmul.mubr.bf16.vlgmr.msra.gmra.mxu1 %v25742_v49 }
 0x865   : > { %16217 = vmatpush1.bf16.msra.mxu1 %v19086_v56  ;;  %16248 = vmatprep.mubr.bf16.mxu1 %v25206_v17  ;;  %v19098_v17 = vld [vmem:[%s26503_s5 + $0x400] ss:$24 sps:$4 sm:$0xff]  }
 0x866   : > { %16264 = vmatpush1.bf16.msra.mxu0 %v19089_v36  ;;  %16218 = vmatprep.subr.bf16.mxu1 %v19094_v52  ;;  %v19167_v36 = vld [vmem:[%s26503_s5 + $0x4c0] ss:$24 sps:$4 sm:$0xff]  }
 0x867   : > { %16265 = vmatprep.subr.bf16.mxu0 %v19097_v47  ;;  %v19172_v47 = vld [vmem:[%s26503_s5 + $0x494] ss:$24 sps:$4 sm:$0xff]  }
 0x869   : > { %16219 = vmatpush1.bf16.msra.mxu1 %v19092_v31 }
 0x86a   : > { %16266 = vmatpush1.bf16.msra.mxu0 %v19095_v2  ;;  %16220 = vmatprep.subr.bf16.mxu1 %v19100_v1  ;;  %v19170_v2 = vld [vmem:[%s26503_s5 + $0x490] ss:$24 sps:$4 sm:$0xff]  }
 0x86b   : > { %16267 = vmatprep.subr.bf16.mxu0 %v19103_v44  ;;  %v19173_v44 = vld [vmem:[%s26503_s5 + $0xa60] ss:$24 sps:$4 sm:$0xff]  }
 0x86d   : > { %16221 = vmatpush1.bf16.msra.mxu1 %v19098_v17  ;;  %v19178_v17 = vld [vmem:[%s26503_s5 + $0xa34] ss:$24 sps:$4 sm:$0xff]  }
 0x86e   : > { %16268 = vmatpush1.bf16.msra.mxu0 %v19101_v41  ;;  %16222 = vmatprep.subr.bf16.mxu1 %v19106_v46 }
 0x86f   : > { %16269 = vmatprep.subr.bf16.mxu0 %v19109_v58  ;;  %v19176_v58 = vld [vmem:[%s26503_s5 + $0xa30] ss:$24 sps:$4 sm:$0xff]  }
 0x871   : > { %16223 = vmatpush1.bf16.msra.mxu1 %v19104_v57 }
 0x872   : > { %16270 = vmatpush1.bf16.msra.mxu0 %v19107_v42  ;;  %16224 = vmatprep.subr.bf16.mxu1 %v19112_v23  ;;  %v19181_v42 = vld [vmem:[%s26503_s5 + $0xa04] ss:$24 sps:$4 sm:$0xff]  }
 0x873   : > { %16271 = vmatprep.subr.bf16.mxu0 %v19115_v26  ;;  %v19184_v26 = vld [vmem:[%s26503_s5 + $0x9d4] ss:$24 sps:$4 sm:$0xff]  }
 0x875   : > { %16225 = vmatpush1.bf16.msra.mxu1 %v19110_v18  ;;  %v19182_v18 = vld [vmem:[%s26503_s5 + $0x9d0] ss:$24 sps:$4 sm:$0xff]  }
 0x876   : > { %16272 = vmatpush1.bf16.msra.mxu0 %v19113_v50  ;;  %16226 = vmatprep.subr.bf16.mxu1 %v19118_v54  ;;  %v19185_v50 = vld [vmem:[%s26503_s5 + $0x9a0] ss:$24 sps:$4 sm:$0xff]   ;;  %v19190_v54 = vld [vmem:[%s26503_s5 + $0x974] ss:$24 sps:$4 sm:$0xff]  }
 0x877   : > { %16273 = vmatprep.subr.bf16.mxu0 %v19121_v53  ;;  %v19188_v53 = vld [vmem:[%s26503_s5 + $0x970] ss:$24 sps:$4 sm:$0xff]  }
 0x879   : > { %16227 = vmatpush1.bf16.msra.mxu1 %v19116_v3  ;;  %v19193_v3 = vld [vmem:[%s26503_s5 + $0x944] ss:$24 sps:$4 sm:$0xff]  }
 0x87a   : > { %16274 = vmatpush2.bf16.msra.mxu0 %v19119_v63  ;;  %16228 = vmatprep.subr.bf16.mxu1 %v19124_v12  ;;  %v19191_v63 = vld [vmem:[%s26503_s5 + $0x940] ss:$24 sps:$4 sm:$0xff]   ;;  %v19196_v12 = vld [vmem:[%s26503_s5 + $0x914] ss:$24 sps:$4 sm:$0xff]  }
 0x87b   : > { %16275 = vmatprep.subr.bf16.mxu0 %v19127_v9  ;;  %v19194_v9 = vld [vmem:[%s26503_s5 + $0x910] ss:$24 sps:$4 sm:$0xff]  }
 0x87d   : > { %16229 = vmatpush1.bf16.msra.mxu1 %v19122_v29  ;;  %v19199_v29 = vld [vmem:[%s26503_s5 + $0xbe4] ss:$24 sps:$4 sm:$0xff]  }
 0x87e   : > { %16276 = vmatpush2.bf16.msra.mxu0 %v19125_v4  ;;  %16230 = vmatprep.subr.bf16.mxu1 %v19130_v37  ;;  %v19197_v4 = vld [vmem:[%s26503_s5 + $0xbe0] ss:$24 sps:$4 sm:$0xff]   ;;  %v19202_v37 = vld [vmem:[%s26503_s5 + $0xbb4] ss:$24 sps:$4 sm:$0xff]  }
 0x87f   : > { %16277 = vmatprep.subr.bf16.mxu0 %v19133_v38  ;;  %v19200_v38 = vld [vmem:[%s26503_s5 + $0xbb0] ss:$24 sps:$4 sm:$0xff]  }
 0x881   : > { %16231 = vmatpush1.bf16.msra.mxu1 %v19128_v30  ;;  %v19205_v30 = vld [vmem:[%s26503_s5 + $0xb84] ss:$24 sps:$4 sm:$0xff]  }
 0x882   : > { %16278 = vmatpush2.bf16.msra.mxu0 %v19131_v7  ;;  %16232 = vmatprep.subr.bf16.mxu1 %v19136_v60  ;;  %v19203_v7 = vld [vmem:[%s26503_s5 + $0xb80] ss:$24 sps:$4 sm:$0xff]   ;;  %v19208_v60 = vld [vmem:[%s26503_s5 + $0xb54] ss:$24 sps:$4 sm:$0xff]  }
 0x883   : > { %16279 = vmatprep.subr.bf16.mxu0 %v19139_v16  ;;  %v19206_v16 = vld [vmem:[%s26503_s5 + $0xb50] ss:$24 sps:$4 sm:$0xff]  }
 0x885   : > { %16233 = vmatpush2.bf16.msra.mxu1 %v19134_v40  ;;  %v19211_v40 = vld [vmem:[%s26503_s5 + $0xb24] ss:$24 sps:$4 sm:$0xff]  }
 0x886   : > { %16280 = vmatpush2.bf16.msra.mxu0 %v19137_v62  ;;  %16234 = vmatprep.subr.bf16.mxu1 %v19142_v55  ;;  %v19209_v62 = vld [vmem:[%s26503_s5 + $0xb20] ss:$24 sps:$4 sm:$0xff]   ;;  %v19214_v55 = vld [vmem:[%s26503_s5 + $0xaf4] ss:$24 sps:$4 sm:$0xff]  }
 0x887   : > { %16281 = vmatprep.subr.bf16.mxu0 %v19145_v59  ;;  %v19212_v59 = vld [vmem:[%s26503_s5 + $0xaf0] ss:$24 sps:$4 sm:$0xff]  }
 0x889   : > { %16235 = vmatpush2.bf16.msra.mxu1 %v19140_v39  ;;  %v19217_v39 = vld [vmem:[%s26503_s5 + $0xac4] ss:$24 sps:$4 sm:$0xff]  }
 0x88a   : > { %16282 = vmatpush2.bf16.msra.mxu0 %v19143_v19  ;;  %16236 = vmatprep.subr.bf16.mxu1 %v19148_v24  ;;  %v19215_v24 = vld [vmem:[%s26503_s5 + $0xac0] ss:$24 sps:$4 sm:$0xff]  }
 0x88b   : > { %16283 = vmatprep.subr.bf16.mxu0 %v19151_v21  ;;  %v19220_v21 = vld [vmem:[%s26503_s5 + $0xa94] ss:$24 sps:$4 sm:$0xff]  }
 0x88d   : > { %16237 = vmatpush2.bf16.msra.mxu1 %v19146_v20 }
 0x88e   : > { %16284 = vmatpush2.bf16.msra.mxu0 %v19149_v51  ;;  %16238 = vmatprep.subr.bf16.mxu1 %v19154_v11  ;;  %v19218_v11 = vld [vmem:[%s26503_s5 + $0xa90] ss:$24 sps:$4 sm:$0xff]  }
 0x88f   : > { %16285 = vmatprep.subr.bf16.mxu0 %v19157_v33  ;;  %v13908_v33 = vrot.slane %v25900_v5, %v20609_v8 }
 0x891   : > { %16239 = vmatpush2.bf16.msra.mxu1 %v19152_v35 }
 0x892   : > { %16286 = vmatpush2.bf16.msra.mxu0 %v19155_v22  ;;  %16240 = vmatprep.subr.bf16.mxu1 %v19160_v0  ;;  %v13912_v22 = vrot.slane %v25900_v5, %v20624_v14 }
 0x893   : > { %16287 = vmatprep.subr.bf16.mxu0 %v19163_v61 }
 0x895   : > { %16241 = vmatpush2.bf16.msra.mxu1 %v19158_v34 }
 0x896   : > { %16288 = vmatpush2.bf16.msra.mxu0 %v19161_v27  ;;  %16242 = vmatprep.subr.bf16.mxu1 %v19166_v13 }
 0x898   : > { %v26314_v56 = vpop.f32.mrf.mxu0 }
 0x899   : > { %16243 = vmatpush2.bf16.msra.mxu1 %v19164_v32  ;;  %16290 = vmatmul.mubr.bf16.vlgmr.msra.gmra.mxu0 %v25609_v45  ;;  %v19175_v45 = vld [vmem:[%s26503_s5 + $0xa64] ss:$24 sps:$4 sm:$0xff]   ;;  %v16046_v0 = vadd.f32 %v26314_v56, %v13908_v33 }
 0x89a   : > { %v26320_v52 = vpop.f32.mrf.mxu0  ;;  %16244 = vmatprep.subr.bf16.mxu1 %v19169_v25 }
 0x89b   : > { %v16048_v34 = vadd.f32 %v26320_v52, %v13912_v22 }
 0x89c   : > { %v16049_v31 = vpop.f32.mrf.mxu0 }
 0x89d   : > { %16245 = vmatpush2.bf16.msra.mxu1 %v19167_v36 }
 0x89e   : > { %v16050_v1 = vpop.f32.mrf.mxu0  ;;  %16246 = vmatprep.subr.bf16.mxu1 %v19172_v47 }
 0x8a1   : > { %16247 = vmatpush2.bf16.msra.mxu1 %v19170_v2 }
 0x8a2   : > { %16298 = vmatprep.subr.bf16.mxu1 %v19175_v45 }
 0x8a4   : > { %16249 = vmatmul.mubr.bf16.vlgmr.msra.gmra.mxu1 %v25406_v6  ;;  %v16004_v41 = vpop.f32.mrf.mxu1 }
 0x8a5   : > { %v16005_v46 = vadd.f32 %v16004_v41, %v26122_v28  ;;  %16299 = vmatpush1.bf16.msra.mxu1 %v19173_v44  ;;  %16330 = vmatprep.mubr.bf16.mxu1 %v25737_v48  ;;  %v19179_v48 = vld [vmem:[%s26503_s5 + $0xa00] ss:$24 sps:$4 sm:$0xff]  }
 0x8a6   : > { %v16006_v57 = vpop.f32.mrf.mxu1  ;;  %16300 = vmatprep.subr.bf16.mxu1 %v19178_v17 }
 0x8a7   : > { %16339 = vst [vmem:[%s26349_s14] sm:$0xff] %v16005_v46  ;;  %v16007_v6 = vadd.f32 %v16006_v57, %v26136_v43  ;;  %v19187_v43 = vld [vmem:[%s26503_s5 + $0x9a4] ss:$24 sps:$4 sm:$0xff]   ;;  %v13916_v57 = vrot.slane %v25900_v5, %v20833_v10 }
 0x8a8   : > { %v16008_v28 = vpop.f32.mrf.mxu1 }
 0x8a9   : > { %16340 = vst [vmem:[%s26349_s14 + $0x8] sm:$0xff] %v16007_v6  ;;  %16301 = vmatpush1.bf16.msra.mxu1 %v19176_v58  ;;  %v13920_v6 = vrot.slane %v25900_v5, %v20836_v15 }
 0x8aa   : > { %v16009_v23 = vpop.f32.mrf.mxu1  ;;  %16302 = vmatprep.subr.bf16.mxu1 %v19181_v42 }
 0x8ad   : > { %16303 = vmatpush1.bf16.msra.mxu1 %v19179_v48 }
 0x8ae   : > { %16304 = vmatprep.subr.bf16.mxu1 %v19184_v26 }
 0x8b1   : > { %16305 = vmatpush1.bf16.msra.mxu1 %v19182_v18 }
 0x8b2   : > { %16306 = vmatprep.subr.bf16.mxu1 %v19187_v43 }
 0x8b5   : > { %16307 = vmatpush1.bf16.msra.mxu1 %v19185_v50 }
 0x8b6   : > { %16308 = vmatprep.subr.bf16.mxu1 %v19190_v54 }
 0x8b9   : > { %16309 = vmatpush1.bf16.msra.mxu1 %v19188_v53 }
 0x8ba   : > { %16310 = vmatprep.subr.bf16.mxu1 %v19193_v3 }
 0x8bd   : > { %16311 = vmatpush1.bf16.msra.mxu1 %v19191_v63 }
 0x8be   : > { %16312 = vmatprep.subr.bf16.mxu1 %v19196_v12 }
 0x8c1   : > { %16313 = vmatpush1.bf16.msra.mxu1 %v19194_v9 }
 0x8c2   : > { %16314 = vmatprep.subr.bf16.mxu1 %v19199_v29 }
 0x8c5   : > { %16315 = vmatpush2.bf16.msra.mxu1 %v19197_v4 }
 0x8c6   : > { %16316 = vmatprep.subr.bf16.mxu1 %v19202_v37 }
 0x8c9   : > { %16317 = vmatpush2.bf16.msra.mxu1 %v19200_v38 }
 0x8ca   : > { %16318 = vmatprep.subr.bf16.mxu1 %v19205_v30 }
 0x8cd   : > { %16319 = vmatpush2.bf16.msra.mxu1 %v19203_v7 }
 0x8ce   : > { %16320 = vmatprep.subr.bf16.mxu1 %v19208_v60 }
 0x8d1   : > { %16321 = vmatpush2.bf16.msra.mxu1 %v19206_v16 }
 0x8d2   : > { %16322 = vmatprep.subr.bf16.mxu1 %v19211_v40 }
 0x8d5   : > { %16323 = vmatpush2.bf16.msra.mxu1 %v19209_v62 }
 0x8d6   : > { %16324 = vmatprep.subr.bf16.mxu1 %v19214_v55 }
 0x8d9   : > { %v16127_v19 = vpop.f32.mrf.mxu0  ;;  %16325 = vmatpush2.bf16.msra.mxu1 %v19212_v59 }
 0x8da   : > { %16326 = vmatprep.subr.bf16.mxu1 %v19217_v39 }
 0x8db   : > { %v16129_v20 = vpop.f32.mrf.mxu0 }
 0x8dd   : > { %v16131_v51 = vpop.f32.mrf.mxu0  ;;  %16327 = vmatpush2.bf16.msra.mxu1 %v19215_v24 }
 0x8de   : > { %16328 = vmatprep.subr.bf16.mxu1 %v19220_v21 }
 0x8df   : > { %v16132_v35 = vpop.f32.mrf.mxu0 }
 0x8e1   : > { %16329 = vmatpush2.bf16.msra.mxu1 %v19218_v11 }
 0x8e4   : > { %v16086_v61 = vpop.f32.mrf.mxu1  ;;  %16331 = vmatmul.mubr.bf16.vlgmr.msra.gmra.mxu1 %v25742_v49 }
 0x8e5   : > { %v16087_v27 = vadd.f32 %v16086_v61, %v16046_v0 }
 0x8e6   : > { %v16088_v13 = vpop.f32.mrf.mxu1 }
 0x8e7   : > { %v16089_v32 = vadd.f32 %v16088_v13, %v16048_v34  ;;  %v16128_v25 = vadd.f32 %v16127_v19, %v16087_v27 }
 0x8e8   : > { %v16090_v36 = vpop.f32.mrf.mxu1 }
 0x8e9   : > { %v16130_v8 = vadd.f32 %v16129_v20, %v16089_v32 }
 0x8ea   : > { %v16091_v47 = vpop.f32.mrf.mxu1 }
 0x919   : > { %v16209_v31 = vpop.f32.mrf.mxu0 }
 0x91a   : > { %v16210_v28 = vadd.f32 %v16209_v31, %v13916_v57 }
 0x91b   : > { %v16211_v2 = vpop.f32.mrf.mxu0 }
 0x91c   : > { %v16212_v23 = vadd.f32 %v16211_v2, %v13920_v6 }
 0x91d   : > { %v16213_v14 = vpop.f32.mrf.mxu0 }
 0x91f   : > { %v16214_v1 = vpop.f32.mrf.mxu0 }
 0x924   : > { %v16168_v45 = vpop.f32.mrf.mxu1 }
 0x925   : > { %v16169_v56 = vadd.f32 %v16168_v45, %v16128_v25 }
 0x926   : > { %v16170_v44 = vpop.f32.mrf.mxu1 }
 0x927   : > { %16341 = vst [vmem:[%s26349_s14 + $0x10] sm:$0xff] %v16169_v56  ;;  %v16171_v49 = vadd.f32 %v16170_v44, %v16130_v8 }
 0x928   : > { %v16172_v17 = vpop.f32.mrf.mxu1 }
 0x929   : > { %16342 = vst [vmem:[%s26349_s14 + $0x18] sm:$0xff] %v16171_v49 }
 0x92a   : > { %v16173_v52 = vpop.f32.mrf.mxu1 }
 0x959   : > { %v16291_v41 = vpop.f32.mrf.mxu0 }
 0x95b   : > { %v16293_v46 = vpop.f32.mrf.mxu0 }
 0x95d   : > { %v16295_v58 = vpop.f32.mrf.mxu0 }
 0x95f   : > { %v16296_v42 = vpop.f32.mrf.mxu0 }
 0x964   : > { %v16250_v48 = vpop.f32.mrf.mxu1 }
 0x965   : > { %v16251_v26 = vadd.f32 %v16250_v48, %v16210_v28 }
 0x966   : > { %v16252_v18 = vpop.f32.mrf.mxu1 }
 0x967   : > { %v16253_v43 = vadd.f32 %v16252_v18, %v16212_v23  ;;  %v16292_v50 = vadd.f32 %v16291_v41, %v16251_v26 }
 0x968   : > { %v16254_v54 = vpop.f32.mrf.mxu1 }
 0x969   : > { %v16294_v53 = vadd.f32 %v16293_v46, %v16253_v43 }
 0x96a   : > { %v16255_v3 = vpop.f32.mrf.mxu1 }
 0x9a4   : > { %v16332_v10 = vpop.f32.mrf.mxu1 }
 0x9a5   : > { %v16333_v63 = vadd.f32 %v16332_v10, %v16292_v50 }
 0x9a6   : > { %v16334_v12 = vpop.f32.mrf.mxu1 }
 0x9a7   : > { %16343 = vst [vmem:[%s26349_s14 + $0x20] sm:$0xff] %v16333_v63  ;;  %v16335_v15 = vadd.f32 %v16334_v12, %v16294_v53 }
 0x9a8   : > { %v16336_v5 = vpop.f32.mrf.mxu1 }
 0x9a9   : > { %16344 = vst [vmem:[%s26349_s14 + $0x28] sm:$0xff] %v16335_v15 }
 0x9aa   : > { %v16337_v9 = vpop.f32.mrf.mxu1 }
 0x9ab   : > { %19240 = shalt.err (!%p19237_p3)
}
 0x9ac   : > { %s19241_s14 = scalar_lea.hbm %s26454_s8, 768  ;;  %s19245_s19 = scalar_lea.hbm %s26505_s7, 1536 }
 0x9ad   : > { %p19242_p4 = scmp.ne.s32.totalorder %s26454_s8, %s19241_s14  ;;  %p19246_p9 = scmp.lt.s32.totalorder %s26454_s8, %s26505_s7 }
 0x9ae   : > { %p19247_p10 = scmp.lt.s32.totalorder %s19245_s19, %s19241_s14 }
 0x9af   : > { %p19243_p7 = pnand %p19242_p4, %p19368_p5 }
 0x9b0   : > { %p19248_p11 = por %p19247_p10, %p19246_p9 }
 0x9b1   : > { %p19244_p8 = pneg %p19243_p7 }
 0x9b3   : > { %p19249_p12 = pnand %p19248_p11, %p19244_p8 }
 0x9b5   : > { %19252 = shalt.err (!%p19249_p12)
}
 0x9b6   : > { %18606 = dma.vmem_to_hbm [thread:$0]  (%p19368_p5), %s26456_s13, 768, %s26454_s8, %s16346_s28  }
 0x9b7 PF: > { %p18612_p13 = scmp.ge.s32.totalorder %s19287_s27, 2  ;;  %s16372_s21 = sand.u32 1, %s19275_s24  }
 0x9b8   : > { %s16373_s29 = scalar_lea.sflag [#allocation3], %s16372_s21 }
 0x9b9   : > { %p18609_p0 = pnand %p18612_p13, %p19372_p6 }
 0x9bb   : > { %p18610_p1 = pneg %p18609_p0 }
 0x9bd   : > { %19270 = dma.done.wait (%p18610_p1), %s16373_s29, 768  }
 0x9be   : > { %19272 = vsyncadd (%p18610_p1), %s16373_s29, 4294966528  ;;  %p17_p2 = scmp.ge.s32.totalorder %s19355_s30, 4   ;;  %s26508_s24 = smov %s19279_s25 }
 0x9bf   : > { %s26509_s25 = smov %s19283_s26  ;;  %s26510_s26 = smov %s19366_s10 }
 0x9c0   : > { %s26511_s27 = smov %s19355_s30  ;;  %19 = sbr.rel (!%p17_p2) target bundleno = 3 (0x3), region = 83 }
 0x9c5   :  { %16378 = vsyncpa [#allocation3], 1 }
 0x9c6   :  { %16380 = vsyncpa [#allocation3 + $0x1], 1 }

</bundles_post_ra>
